<compile_context>
chip_gen: v7x
topology: tpu7x:2x2x1
jax: 0.10.0
libtpu: 0.0.40
codegen_flags: <defaults>
</compile_context>

<pallas_src>
import functools
import math

import numpy as np
import jax
import jax.numpy as jnp
from jax.experimental import pallas as pl
from jax.experimental.pallas import tpu as pltpu  # noqa: F401  (TPU backend; kept for tuning hooks)

PAD = 0
LN_EPS = 1e-6
NEG_INF = -1e9

_LAYER_KEYS = (
    "slf_w_a", "slf_w_s", "slf_fc", "slf_g", "slf_b",
    "enc_wq", "enc_wkv", "enc_fc", "enc_g", "enc_b",
    "ffn_w1", "ffn_b1", "ffn_w2", "ffn_b2", "ffn_g", "ffn_b",
)


# ---------------------------------------------------------------------------
# In-kernel helpers (pure tracing helpers operating on loaded arrays)
# ---------------------------------------------------------------------------

def _layer_norm(x, g, b, eps):
    mu = jnp.mean(x, axis=-1, keepdims=True)
    xc = x - mu
    var = jnp.mean(xc * xc, axis=-1, keepdims=True)
    return xc * jax.lax.rsqrt(var + eps) * g + b


def _attn_heads(q, k, v, bias, fc, inv_temp, n_head, d_k, d_v):
    """Multi-head attention with the output projection folded into the head loop.

    q: (Lq, n_head*d_k), k: (Lk, n_head*d_k), v: (Lk, n_head*d_v),
    bias: (Lq, Lk) additive mask or None, fc: (n_head*d_v, H).
    Returns sum_h softmax(q_h k_h^T / temp + bias) v_h @ fc_h  : (Lq, H).
    """
    out = None
    for h in range(n_head):
        qh = q[:, h * d_k:(h + 1) * d_k]
        kh = k[:, h * d_k:(h + 1) * d_k]
        vh = v[:, h * d_v:(h + 1) * d_v]
        logits = jax.lax.dot_general(
            qh, kh, (((1,), (1,)), ((), ())),
            preferred_element_type=jnp.float32) * inv_temp
        if bias is not None:
            logits = logits + bias
        mx = jnp.max(logits, axis=-1, keepdims=True)
        e = jnp.exp(logits - mx)
        p = e * pl.reciprocal(jnp.sum(e, axis=-1, keepdims=True), approx=True)
        oh = jnp.dot(p, vh, preferred_element_type=jnp.float32)
        contrib = jnp.dot(oh, fc[h * d_v:(h + 1) * d_v, :],
                          preferred_element_type=jnp.float32)
        out = contrib if out is None else out + contrib
    return out


def _decoder_block_b(darea, dshot, enc, bias, w, *, n_head, d_k, d_v, temp, eps):
    """One DecoderLayer for a single batch element.  All inputs are 2D:
    darea/dshot (Lq, H), enc (Lk, H), bias (Lq, Lq)."""
    f32 = jnp.float32
    inv_temp = 1.0 / temp
    nk = n_head * d_k

    # --- disentangled type-area self attention -----------------------------
    residual = darea + dshot
    qkv = (jnp.dot(darea, w["slf_w_a"], preferred_element_type=f32)
           + jnp.dot(dshot, w["slf_w_s"], preferred_element_type=f32))      # (Lq, 2nk+nv)
    q, k, v = qkv[:, :nk], qkv[:, nk:2 * nk], qkv[:, 2 * nk:]
    attn = _attn_heads(q, k, v, bias, w["slf_fc"], inv_temp, n_head, d_k, d_v)
    out1 = _layer_norm(attn + residual, w["slf_g"], w["slf_b"], eps)

    # --- encoder-decoder attention (no mask) --------------------------------
    q2 = jnp.dot(out1, w["enc_wq"], preferred_element_type=f32)
    kv = jnp.dot(enc, w["enc_wkv"], preferred_element_type=f32)             # (Lk, nk+nv)
    k2, v2 = kv[:, :nk], kv[:, nk:]
    attn2 = _attn_heads(q2, k2, v2, None, w["enc_fc"], inv_temp, n_head, d_k, d_v)
    out2 = _layer_norm(attn2 + out1, w["enc_g"], w["enc_b"], eps)

    # --- position-wise FFN ---------------------------------------------------
    hmid = jnp.maximum(jnp.dot(out2, w["ffn_w1"], preferred_element_type=f32) + w["ffn_b1"], 0.0)
    y = jnp.dot(hmid, w["ffn_w2"], preferred_element_type=f32) + w["ffn_b2"] + out2
    return _layer_norm(y, w["ffn_g"], w["ffn_b"], eps)


# ---------------------------------------------------------------------------
# Pallas kernels
# ---------------------------------------------------------------------------

def _frontend_kernel(xyA_ref, xyB_ref, embA_ref, embB_ref, typeg_ref, pemb_ref,
                     wsc_ref, bsc_ref, wlp_loc_ref, wlp_emb_ref, blp_ref,
                     wctA_ref, wctB_ref, bct_ref, wtpt_ref, wtpp_ref, btp_ref,
                     o_ref):
    """coord branch (both players) + coordination_transform + type_player, fused."""
    f32 = jnp.float32
    hA = jnp.maximum(jnp.dot(xyA_ref[...], wsc_ref[...], preferred_element_type=f32) + bsc_ref[...], 0.0)
    hB = jnp.maximum(jnp.dot(xyB_ref[...], wsc_ref[...], preferred_element_type=f32) + bsc_ref[...], 0.0)
    Ah = (jnp.dot(hA, wlp_loc_ref[...], preferred_element_type=f32)
          + jnp.dot(embA_ref[...], wlp_emb_ref[...], preferred_element_type=f32) + blp_ref[...])
    Bh = (jnp.dot(hB, wlp_loc_ref[...], preferred_element_type=f32)
          + jnp.dot(embB_ref[...], wlp_emb_ref[...], preferred_element_type=f32) + blp_ref[...])
    coord = (jnp.dot(Ah, wctA_ref[...], preferred_element_type=f32)
             + jnp.dot(Bh, wctB_ref[...], preferred_element_type=f32) + bct_ref[...])
    typ = (jnp.dot(typeg_ref[...], wtpt_ref[...], preferred_element_type=f32)
           + jnp.dot(pemb_ref[...], wtpp_ref[...], preferred_element_type=f32) + btp_ref[...])
    o_ref[...] = jnp.concatenate([coord, typ], axis=-1)     # single 2H-wide slab store


def _dual_decoder_kernel(*refs, n_head, d_k, d_v, temp, eps):
    """Both DecoderLayers (global on stacked A/B batch, local) in one launch.

    refs layout: [g_darea, g_dshot, g_enc, g_bias] + 16 global weights +
                 [l_darea, l_dshot, l_enc, l_bias] + 16 local weights +
                 [out_global, out_local]
    """
    n_w = len(_LAYER_KEYS)
    g_act, g_w = refs[0:4], refs[4:4 + n_w]
    l_act, l_w = refs[4 + n_w:8 + n_w], refs[8 + n_w:8 + 2 * n_w]
    og_ref, ol_ref = refs[8 + 2 * n_w], refs[9 + 2 * n_w]

    def run(act_refs, w_refs, o_ref):
        darea_ref, dshot_ref, enc_ref, bias_ref = act_refs
        w = {name: r[...] for name, r in zip(_LAYER_KEYS, w_refs)}  # load weights once
        n_batch = darea_ref.shape[0]
        for b in range(n_batch):   # static unroll; all intermediates stay in VMEM/vregs
            o_ref[b, :, :] = _decoder_block_b(
                darea_ref[b], dshot_ref[b], enc_ref[b], bias_ref[b], w,
                n_head=n_head, d_k=d_k, d_v=d_v, temp=temp, eps=eps)

    run(g_act, g_w, og_ref)
    run(l_act, l_w, ol_ref)


def _fusion_head_kernel(xA_ref, xB_ref, xL_ref, wh_ref, wg_ref, wabl_ref, whead_ref, o_ref):
    """GatedFusionLayer + both output heads fused; lane-dense (H,128) output matmul."""
    f32 = jnp.float32
    n_batch, _, H = xA_ref.shape
    wh = wh_ref[...]       # (3, H, H)    hidden1..3
    wg = wg_ref[...]       # (3, 3H, H)   gated1..3 (rows split per input stream)
    wabl = wabl_ref[...]   # (3, L, H)    w_A / w_B / w_L (broadcast over batch in-kernel)
    whead = whead_ref[...]  # (H, 128)    [area_w | shot_w | zero pad]
    for b in range(n_batch):
        xs = (xA_ref[b], xB_ref[b], xL_ref[b])     # (L, H) each
        z = None
        for i in range(3):
            h_i = jnp.tanh(jnp.dot(xs[i], wh[i], preferred_element_type=f32))
            g_i = (jnp.dot(xs[0], wg[i, 0:H, :], preferred_element_type=f32)
                   + jnp.dot(xs[1], wg[i, H:2 * H, :], preferred_element_type=f32)
                   + jnp.dot(xs[2], wg[i, 2 * H:3 * H, :], preferred_element_type=f32))
            zi = wabl[i] * jax.nn.sigmoid(g_i) * h_i
            z = zi if z is None else z + zi
        o_ref[b, :, :] = jnp.dot(jax.nn.sigmoid(z), whead, preferred_element_type=f32)


# ---------------------------------------------------------------------------
# pallas_call wrappers (no grid -> single invocation, whole arrays in VMEM)
# ---------------------------------------------------------------------------

def pallas_frontend(p, xyA, xyB, embA, embB, type_g, pemb):
    M = xyA.shape[0]
    H = p["location_player_w_loc"].shape[1]
    LD = p["coord_transform_w_A"].shape[1]
    return pl.pallas_call(
        _frontend_kernel,
        out_shape=jax.ShapeDtypeStruct((M, LD + H), jnp.float32),
    )(xyA, xyB, embA, embB, type_g, pemb,
      p["self_coord_w"], p["self_coord_b"],
      p["location_player_w_loc"], p["location_player_w_emb"], p["location_player_b"],
      p["coord_transform_w_A"], p["coord_transform_w_B"], p["coord_transform_b"],
      p["type_player_w_t"], p["type_player_w_p"], p["type_player_b"])


def pallas_dual_decoder(glob_p, glob_in, loc_p, loc_in, n_head, d_k, d_v):
    g_darea, g_dshot, g_enc, g_bias = glob_in
    l_darea, l_dshot, l_enc, l_bias = loc_in
    Bg, Lg, H = g_darea.shape
    Bl, Ll, _ = l_darea.shape
    gw = [glob_p[k] for k in _LAYER_KEYS]
    lw = [loc_p[k] for k in _LAYER_KEYS]
    kern = functools.partial(_dual_decoder_kernel, n_head=n_head, d_k=d_k, d_v=d_v,
                             temp=math.sqrt(d_k), eps=LN_EPS)
    out_g, out_l = pl.pallas_call(
        kern,
        out_shape=(jax.ShapeDtypeStruct((Bg, Lg, H), jnp.float32),
                   jax.ShapeDtypeStruct((Bl, Ll, H), jnp.float32)),
    )(g_darea, g_dshot, g_enc, g_bias, *gw,
      l_darea, l_dshot, l_enc, l_bias, *lw)
    return out_g, out_l


def pallas_fusion_head(gp, head_w, x_A, x_B, x_L):
    B, L, H = x_A.shape
    wabl = jnp.stack([gp["w_A"][:L], gp["w_B"][:L], gp["w_L"][:L]], axis=0)  # (3, L, H)
    return pl.pallas_call(
        _fusion_head_kernel,
        out_shape=jax.ShapeDtypeStruct((B, L, head_w.shape[1]), jnp.float32),
    )(x_A, x_B, x_L, gp["w_hidden"], gp["w_gated"], wabl, head_w)


# ---------------------------------------------------------------------------
# Model glue (plain JAX: gathers, PE, masks, A/B stacking, alternatemerge)
# ---------------------------------------------------------------------------

def shotgen_decoder_forward(p, cfg, player, pAx, pAy, pBx, pBy, shot_type,
                            enc_local, enc_gA, enc_gB, two_player):
    B, L = player.shape
    H = cfg["hidden_size"]
    n_head, d_k, d_v = 2, H, H
    assert L % 2 == 0  # TODO(synk): odd-length alternatemerge branches (seq*2 == merge_len±1) not implemented.
    LA = L // 2
    M = B * L

    player_emb = p["player_embedding"][player]                  # (B, L, PD)
    two_emb = p["player_embedding"][two_player]                  # (B, 2, PD)
    type_g = p["type_embedding"][shot_type]                      # (B, L, TD)
    PD = player_emb.shape[-1]
    TD = type_g.shape[-1]

    # ---- fused front end -----------------------------------------------------
    xyA = jnp.stack([pAx, pAy], axis=-1).astype(jnp.float32).reshape(M, 2)
    xyB = jnp.stack([pBx, pBy], axis=-1).astype(jnp.float32).reshape(M, 2)
    embA = jnp.broadcast_to(two_emb[:, 0:1, :], (B, L, PD)).reshape(M, PD)
    embB = jnp.broadcast_to(two_emb[:, 1:2, :], (B, L, PD)).reshape(M, PD)
    slab = pallas_frontend(p, xyA, xyB, embA, embB,
                           type_g.reshape(M, TD), player_emb.reshape(M, PD))
    slab = slab.reshape(B, L, 2 * H)
    coord, type_emb = slab[..., :H], slab[..., H:]

    # ---- positional encoding (decode mode; dropout = identity in eval) -------
    pos = p["pos_table"]
    E = cfg["encode_length"]
    pe_full = pos[E:E + L][None]
    pe_half = pos[E:E + LA][None]
    dec_area = coord + pe_full
    dec_shot = type_emb + pe_full
    dec_area_g = jnp.concatenate([coord[:, 0::2], coord[:, 1::2]], axis=0) + pe_half     # (2B, LA, H)
    dec_shot_g = jnp.concatenate([type_emb[:, 0::2], type_emb[:, 1::2]], axis=0) + pe_half
    enc_g = jnp.concatenate([enc_gA, enc_gB], axis=0)

    # ---- masks as additive f32 bias (0 keep / -1e9 drop), shared by all heads -
    tril_L = jnp.tril(jnp.ones((1, L, L), bool))
    tril_A = jnp.tril(jnp.ones((1, LA, LA), bool))
    local_bias = jnp.where((shot_type != PAD)[:, None, :] & tril_L, 0.0, NEG_INF).astype(jnp.float32)
    gA_bias = jnp.where((shot_type[:, 0::2] != PAD)[:, None, :] & tril_A, 0.0, NEG_INF).astype(jnp.float32)
    gB_bias = jnp.where((shot_type[:, 1::2] != PAD)[:, None, :] & tril_A, 0.0, NEG_INF).astype(jnp.float32)
    g_bias = jnp.concatenate([gA_bias, gB_bias], axis=0)

    # ---- both DecoderLayers in ONE pallas_call -------------------------------
    dec_g, dec_local = pallas_dual_decoder(
        p["global_layer"], (dec_area_g, dec_shot_g, enc_g, g_bias),
        p["local_layer"], (dec_area, dec_shot, enc_local, local_bias),
        n_head, d_k, d_v)
    dec_gA, dec_gB = dec_g[:B], dec_g[B:]

    # ---- alternatemerge (seq_len*2 == merge_len): interleave by stack+reshape -
    dec_out_A = jnp.stack([dec_gA, dec_gA], axis=2).reshape(B, L, H)
    rep_B = jnp.stack([dec_gB, dec_gB], axis=2).reshape(B, L, H)
    dec_out_B = jnp.concatenate([jnp.zeros((B, 1, H), jnp.float32), rep_B[:, :L - 1]], axis=1)

    return dec_out_A, dec_out_B, dec_local


def shotgen_predictor_forward(params, cfg, player, pAx, pAy, pBx, pBy, shot_type,
                              enc_local, enc_gA, enc_gB, two_player):
    dp = params["decoder"]
    dec_out_A, dec_out_B, dec_local = shotgen_decoder_forward(
        dp, cfg, player, pAx, pAy, pBx, pBy, shot_type, enc_local, enc_gA, enc_gB, two_player)
    logits = pallas_fusion_head(dp["gated_fusion"], params["head_w"],
                                dec_out_A, dec_out_B, dec_local)       # (B, L, 128)
    area_logits = logits[..., :10]
    shot_logits = logits[..., 10:10 + cfg["type_num"]]
    return area_logits, shot_logits


# ---------------------------------------------------------------------------
# Deterministic parameter initialization (fused / split weight layouts built here)
# ---------------------------------------------------------------------------

def sinusoid_table(n_position, d_hid):
    pos = np.arange(n_position)[:, None].astype(np.float64)
    hid = np.arange(d_hid)[None, :]
    angle = pos / np.power(10000.0, 2 * (hid // 2) / d_hid)
    table = np.zeros((n_position, d_hid))
    table[:, 0::2] = np.sin(angle[:, 0::2])
    table[:, 1::2] = np.cos(angle[:, 1::2])
    return jnp.asarray(table, jnp.float32)


def init_params(key, cfg):
    H, PD, TD, LD = cfg["hidden_size"], cfg["player_dim"], cfg["type_dim"], cfg["location_dim"]
    # The reference implicitly requires type_dim == location_dim == hidden_size
    # (PE of width type_dim is added to hidden_size-wide streams; coordination_transform
    # output of width location_dim is used as d_model).
    assert TD == H and LD == H
    n_head = 2
    d_k = d_v = H
    nk, nv = n_head * d_k, n_head * d_v
    d_inner = 2 * H
    keys = iter(jax.random.split(key, 64))

    def w(shape, scale=0.1):
        return jax.random.normal(next(keys), shape, jnp.float32) * scale

    def zeros(shape):
        return jnp.zeros(shape, jnp.float32)

    def ones(shape):
        return jnp.ones(shape, jnp.float32)

    def dec_layer():
        # TypeArea attention: the six projections fold into two (H, 2nk+nv) blocks
        # producing the area / shot contributions to the q,k,v SUMS directly.
        return {
            "slf_w_a": w((H, 2 * nk + nv)), "slf_w_s": w((H, 2 * nk + nv)),
            "slf_fc": w((nv, H)), "slf_g": ones((1, H)), "slf_b": zeros((1, H)),
            "enc_wq": w((H, nk)), "enc_wkv": w((H, nk + nv)),
            "enc_fc": w((nv, H)), "enc_g": ones((1, H)), "enc_b": zeros((1, H)),
            "ffn_w1": w((H, d_inner)), "ffn_b1": zeros((1, d_inner)),
            "ffn_w2": w((d_inner, H)), "ffn_b2": zeros((1, H)),
            "ffn_g": ones((1, H)), "ffn_b": zeros((1, H)),
        }

    decode_len = cfg["max_length"] - cfg["encode_length"]
    gated = {
        "w_hidden": w((3, H, H)),        # hidden1..3
        "w_gated": w((3, 3 * H, H)),     # gated1..3 (rows [xA | xB | xL])
        "w_A": w((decode_len, H)), "w_B": w((decode_len, H)), "w_L": w((decode_len, H)),
    }

    # Fused, lane-dense output heads (both bias-free, as in the reference).
    head_w = zeros((H, 128))
    head_w = head_w.at[:, :10].set(w((H, 10)))
    head_w = head_w.at[:, 10:10 + cfg["type_num"]].set(w((H, cfg["type_num"])))

    decoder = {
        "player_embedding": w((cfg["player_num"], PD), 1.0),
        "type_embedding": w((cfg["type_num"], TD), 1.0),
        "self_coord_w": w((2, LD)), "self_coord_b": zeros((1, LD)),
        "location_player_w_loc": w((LD, H)), "location_player_w_emb": w((PD, H)),
        "location_player_b": zeros((1, H)),
        "coord_transform_w_A": w((H, LD)), "coord_transform_w_B": w((H, LD)),
        "coord_transform_b": zeros((1, LD)),
        "type_player_w_t": w((TD, H)), "type_player_w_p": w((PD, H)),
        "type_player_b": zeros((1, H)),
        "pos_table": sinusoid_table(cfg["max_length"], TD),
        "global_layer": dec_layer(),
        "local_layer": dec_layer(),
        "gated_fusion": gated,
    }
    return {"decoder": decoder, "head_w": head_w}


# ---------------------------------------------------------------------------
# Main
# ---------------------------------------------------------------------------

if __name__ == "__main__":
    cfg = dict(player_num=4, player_dim=32, type_num=12, type_dim=32,
               location_dim=32, hidden_size=32, encode_length=4, max_length=32)

    key = jax.random.PRNGKey(0)
    pkey, ikey = jax.random.split(key)
    params = init_params(pkey, cfg)

    B, L = 2, 8
    ks = jax.random.split(ikey, 10)
    player = jax.random.randint(ks[0], (B, L), 1, cfg["player_num"])
    shot_type = jax.random.randint(ks[1], (B, L), 1, cfg["type_num"])
    pAx = jax.random.uniform(ks[2], (B, L), jnp.float32)
    pAy = jax.random.uniform(ks[3], (B, L), jnp.float32)
    pBx = jax.random.uniform(ks[4], (B, L), jnp.float32)
    pBy = jax.random.uniform(ks[5], (B, L), jnp.float32)
    enc_local = jax.random.normal(ks[6], (B, cfg["encode_length"], cfg["hidden_size"]), jnp.float32)
    enc_gA = jax.random.normal(ks[7], (B, cfg["encode_length"] // 2, cfg["hidden_size"]), jnp.float32)
    enc_gB = jax.random.normal(ks[8], (B, cfg["encode_length"] // 2, cfg["hidden_size"]), jnp.float32)
    two_player = jnp.tile(jnp.array([[1, 2]], jnp.int32), (B, 1))

    fwd = jax.jit(lambda prm, *args: shotgen_predictor_forward(prm, cfg, *args))
    area_logits, shot_logits = fwd(params, player, pAx, pAy, pBx, pBy, shot_type,
                                   enc_local, enc_gA, enc_gB, two_player)
    jax.block_until_ready((area_logits, shot_logits))

    assert area_logits.shape == (B, L, 10)
    assert shot_logits.shape == (B, L, cfg["type_num"])
    assert bool(jnp.all(jnp.isfinite(area_logits))) and bool(jnp.all(jnp.isfinite(shot_logits)))
    print("KERNEL_OK")
</pallas_src>

<mosaic_0001>
module attributes {stable_mosaic.version = 11 : i64} {
  func.func @_frontend_kernel(%arg0: memref<16x2xf32, #tpu.memory_space<vmem>>, %arg1: memref<16x2xf32, #tpu.memory_space<vmem>>, %arg2: memref<16x32xf32, #tpu.memory_space<vmem>>, %arg3: memref<16x32xf32, #tpu.memory_space<vmem>>, %arg4: memref<16x32xf32, #tpu.memory_space<vmem>>, %arg5: memref<16x32xf32, #tpu.memory_space<vmem>>, %arg6: memref<2x32xf32, #tpu.memory_space<vmem>>, %arg7: memref<1x32xf32, #tpu.memory_space<vmem>>, %arg8: memref<32x32xf32, #tpu.memory_space<vmem>>, %arg9: memref<32x32xf32, #tpu.memory_space<vmem>>, %arg10: memref<1x32xf32, #tpu.memory_space<vmem>>, %arg11: memref<32x32xf32, #tpu.memory_space<vmem>>, %arg12: memref<32x32xf32, #tpu.memory_space<vmem>>, %arg13: memref<1x32xf32, #tpu.memory_space<vmem>>, %arg14: memref<32x32xf32, #tpu.memory_space<vmem>>, %arg15: memref<32x32xf32, #tpu.memory_space<vmem>>, %arg16: memref<1x32xf32, #tpu.memory_space<vmem>>, %arg17: memref<16x64xf32, #tpu.memory_space<vmem>>) attributes {dimension_semantics = [], scalar_prefetch = 0 : i64, scratch_operands = 0 : i64, tpu.core_type = #tpu.core_type<tc>} {
    %c0 = arith.constant 0 : index
    %c0_0 = arith.constant 0 : index
    %0 = vector.load %arg0[%c0, %c0_0] : memref<16x2xf32, #tpu.memory_space<vmem>>, vector<16x2xf32>
    %c0_1 = arith.constant 0 : index
    %c0_2 = arith.constant 0 : index
    %1 = vector.load %arg6[%c0_1, %c0_2] : memref<2x32xf32, #tpu.memory_space<vmem>>, vector<2x32xf32>
    %cst = arith.constant dense<0.000000e+00> : vector<16x32xf32>
    %2 = tpu.matmul %0, %1, %cst {dimension_numbers = #tpu.dot_dimension_numbers<[1], [0], [0], [1], [0, 0, 1, 1], [], []>} : vector<16x2xf32>, vector<2x32xf32>, vector<16x32xf32> -> vector<16x32xf32>
    %c0_3 = arith.constant 0 : index
    %c0_4 = arith.constant 0 : index
    %3 = vector.load %arg7[%c0_3, %c0_4] : memref<1x32xf32, #tpu.memory_space<vmem>>, vector<1x32xf32>
    %4 = vector.broadcast %3 : vector<1x32xf32> to vector<16x32xf32>
    %5 = arith.addf %2, %4 : vector<16x32xf32>
    %cst_5 = arith.constant 0.000000e+00 : f32
    %6 = vector.broadcast %cst_5 : f32 to vector<16x32xf32>
    %7 = arith.maximumf %5, %6 : vector<16x32xf32>
    %c0_6 = arith.constant 0 : index
    %c0_7 = arith.constant 0 : index
    %8 = vector.load %arg1[%c0_6, %c0_7] : memref<16x2xf32, #tpu.memory_space<vmem>>, vector<16x2xf32>
    %c0_8 = arith.constant 0 : index
    %c0_9 = arith.constant 0 : index
    %9 = vector.load %arg6[%c0_8, %c0_9] : memref<2x32xf32, #tpu.memory_space<vmem>>, vector<2x32xf32>
    %cst_10 = arith.constant dense<0.000000e+00> : vector<16x32xf32>
    %10 = tpu.matmul %8, %9, %cst_10 {dimension_numbers = #tpu.dot_dimension_numbers<[1], [0], [0], [1], [0, 0, 1, 1], [], []>} : vector<16x2xf32>, vector<2x32xf32>, vector<16x32xf32> -> vector<16x32xf32>
    %c0_11 = arith.constant 0 : index
    %c0_12 = arith.constant 0 : index
    %11 = vector.load %arg7[%c0_11, %c0_12] : memref<1x32xf32, #tpu.memory_space<vmem>>, vector<1x32xf32>
    %12 = vector.broadcast %11 : vector<1x32xf32> to vector<16x32xf32>
    %13 = arith.addf %10, %12 : vector<16x32xf32>
    %cst_13 = arith.constant 0.000000e+00 : f32
    %14 = vector.broadcast %cst_13 : f32 to vector<16x32xf32>
    %15 = arith.maximumf %13, %14 : vector<16x32xf32>
    %c0_14 = arith.constant 0 : index
    %c0_15 = arith.constant 0 : index
    %16 = vector.load %arg8[%c0_14, %c0_15] : memref<32x32xf32, #tpu.memory_space<vmem>>, vector<32x32xf32>
    %cst_16 = arith.constant dense<0.000000e+00> : vector<16x32xf32>
    %17 = tpu.matmul %7, %16, %cst_16 {dimension_numbers = #tpu.dot_dimension_numbers<[1], [0], [0], [1], [0, 0, 1, 1], [], []>} : vector<16x32xf32>, vector<32x32xf32>, vector<16x32xf32> -> vector<16x32xf32>
    %c0_17 = arith.constant 0 : index
    %c0_18 = arith.constant 0 : index
    %18 = vector.load %arg2[%c0_17, %c0_18] : memref<16x32xf32, #tpu.memory_space<vmem>>, vector<16x32xf32>
    %c0_19 = arith.constant 0 : index
    %c0_20 = arith.constant 0 : index
    %19 = vector.load %arg9[%c0_19, %c0_20] : memref<32x32xf32, #tpu.memory_space<vmem>>, vector<32x32xf32>
    %cst_21 = arith.constant dense<0.000000e+00> : vector<16x32xf32>
    %20 = tpu.matmul %18, %19, %cst_21 {dimension_numbers = #tpu.dot_dimension_numbers<[1], [0], [0], [1], [0, 0, 1, 1], [], []>} : vector<16x32xf32>, vector<32x32xf32>, vector<16x32xf32> -> vector<16x32xf32>
    %21 = arith.addf %17, %20 : vector<16x32xf32>
    %c0_22 = arith.constant 0 : index
    %c0_23 = arith.constant 0 : index
    %22 = vector.load %arg10[%c0_22, %c0_23] : memref<1x32xf32, #tpu.memory_space<vmem>>, vector<1x32xf32>
    %23 = vector.broadcast %22 : vector<1x32xf32> to vector<16x32xf32>
    %24 = arith.addf %21, %23 : vector<16x32xf32>
    %c0_24 = arith.constant 0 : index
    %c0_25 = arith.constant 0 : index
    %25 = vector.load %arg8[%c0_24, %c0_25] : memref<32x32xf32, #tpu.memory_space<vmem>>, vector<32x32xf32>
    %cst_26 = arith.constant dense<0.000000e+00> : vector<16x32xf32>
    %26 = tpu.matmul %15, %25, %cst_26 {dimension_numbers = #tpu.dot_dimension_numbers<[1], [0], [0], [1], [0, 0, 1, 1], [], []>} : vector<16x32xf32>, vector<32x32xf32>, vector<16x32xf32> -> vector<16x32xf32>
    %c0_27 = arith.constant 0 : index
    %c0_28 = arith.constant 0 : index
    %27 = vector.load %arg3[%c0_27, %c0_28] : memref<16x32xf32, #tpu.memory_space<vmem>>, vector<16x32xf32>
    %c0_29 = arith.constant 0 : index
    %c0_30 = arith.constant 0 : index
    %28 = vector.load %arg9[%c0_29, %c0_30] : memref<32x32xf32, #tpu.memory_space<vmem>>, vector<32x32xf32>
    %cst_31 = arith.constant dense<0.000000e+00> : vector<16x32xf32>
    %29 = tpu.matmul %27, %28, %cst_31 {dimension_numbers = #tpu.dot_dimension_numbers<[1], [0], [0], [1], [0, 0, 1, 1], [], []>} : vector<16x32xf32>, vector<32x32xf32>, vector<16x32xf32> -> vector<16x32xf32>
    %30 = arith.addf %26, %29 : vector<16x32xf32>
    %c0_32 = arith.constant 0 : index
    %c0_33 = arith.constant 0 : index
    %31 = vector.load %arg10[%c0_32, %c0_33] : memref<1x32xf32, #tpu.memory_space<vmem>>, vector<1x32xf32>
    %32 = vector.broadcast %31 : vector<1x32xf32> to vector<16x32xf32>
    %33 = arith.addf %30, %32 : vector<16x32xf32>
    %c0_34 = arith.constant 0 : index
    %c0_35 = arith.constant 0 : index
    %34 = vector.load %arg11[%c0_34, %c0_35] : memref<32x32xf32, #tpu.memory_space<vmem>>, vector<32x32xf32>
    %cst_36 = arith.constant dense<0.000000e+00> : vector<16x32xf32>
    %35 = tpu.matmul %24, %34, %cst_36 {dimension_numbers = #tpu.dot_dimension_numbers<[1], [0], [0], [1], [0, 0, 1, 1], [], []>} : vector<16x32xf32>, vector<32x32xf32>, vector<16x32xf32> -> vector<16x32xf32>
    %c0_37 = arith.constant 0 : index
    %c0_38 = arith.constant 0 : index
    %36 = vector.load %arg12[%c0_37, %c0_38] : memref<32x32xf32, #tpu.memory_space<vmem>>, vector<32x32xf32>
    %cst_39 = arith.constant dense<0.000000e+00> : vector<16x32xf32>
    %37 = tpu.matmul %33, %36, %cst_39 {dimension_numbers = #tpu.dot_dimension_numbers<[1], [0], [0], [1], [0, 0, 1, 1], [], []>} : vector<16x32xf32>, vector<32x32xf32>, vector<16x32xf32> -> vector<16x32xf32>
    %38 = arith.addf %35, %37 : vector<16x32xf32>
    %c0_40 = arith.constant 0 : index
    %c0_41 = arith.constant 0 : index
    %39 = vector.load %arg13[%c0_40, %c0_41] : memref<1x32xf32, #tpu.memory_space<vmem>>, vector<1x32xf32>
    %40 = vector.broadcast %39 : vector<1x32xf32> to vector<16x32xf32>
    %41 = arith.addf %38, %40 : vector<16x32xf32>
    %c0_42 = arith.constant 0 : index
    %c0_43 = arith.constant 0 : index
    %42 = vector.load %arg4[%c0_42, %c0_43] : memref<16x32xf32, #tpu.memory_space<vmem>>, vector<16x32xf32>
    %c0_44 = arith.constant 0 : index
    %c0_45 = arith.constant 0 : index
    %43 = vector.load %arg14[%c0_44, %c0_45] : memref<32x32xf32, #tpu.memory_space<vmem>>, vector<32x32xf32>
    %cst_46 = arith.constant dense<0.000000e+00> : vector<16x32xf32>
    %44 = tpu.matmul %42, %43, %cst_46 {dimension_numbers = #tpu.dot_dimension_numbers<[1], [0], [0], [1], [0, 0, 1, 1], [], []>} : vector<16x32xf32>, vector<32x32xf32>, vector<16x32xf32> -> vector<16x32xf32>
    %c0_47 = arith.constant 0 : index
    %c0_48 = arith.constant 0 : index
    %45 = vector.load %arg5[%c0_47, %c0_48] : memref<16x32xf32, #tpu.memory_space<vmem>>, vector<16x32xf32>
    %c0_49 = arith.constant 0 : index
    %c0_50 = arith.constant 0 : index
    %46 = vector.load %arg15[%c0_49, %c0_50] : memref<32x32xf32, #tpu.memory_space<vmem>>, vector<32x32xf32>
    %cst_51 = arith.constant dense<0.000000e+00> : vector<16x32xf32>
    %47 = tpu.matmul %45, %46, %cst_51 {dimension_numbers = #tpu.dot_dimension_numbers<[1], [0], [0], [1], [0, 0, 1, 1], [], []>} : vector<16x32xf32>, vector<32x32xf32>, vector<16x32xf32> -> vector<16x32xf32>
    %48 = arith.addf %44, %47 : vector<16x32xf32>
    %c0_52 = arith.constant 0 : index
    %c0_53 = arith.constant 0 : index
    %49 = vector.load %arg16[%c0_52, %c0_53] : memref<1x32xf32, #tpu.memory_space<vmem>>, vector<1x32xf32>
    %50 = vector.broadcast %49 : vector<1x32xf32> to vector<16x32xf32>
    %51 = arith.addf %48, %50 : vector<16x32xf32>
    %52 = tpu.concatenate %41, %51 in 1 : vector<16x32xf32>, vector<16x32xf32> -> vector<16x64xf32>
    %c0_54 = arith.constant 0 : index
    %c0_55 = arith.constant 0 : index
    %53 = vector.load %arg17[%c0_54, %c0_55] : memref<16x64xf32, #tpu.memory_space<vmem>>, vector<16x64xf32>
    tpu.vector_store %arg17[%c0_54, %c0_55], %52 {strides = array<i32>} : memref<16x64xf32, #tpu.memory_space<vmem>>, vector<16x64xf32>,
    return
  }
}

module attributes {stable_mosaic.version = 11 : i64} {
  func.func @_fusion_head_kernel(%arg0: memref<2x8x32xf32, #tpu.memory_space<vmem>>, %arg1: memref<2x8x32xf32, #tpu.memory_space<vmem>>, %arg2: memref<2x8x32xf32, #tpu.memory_space<vmem>>, %arg3: memref<3x32x32xf32, #tpu.memory_space<vmem>>, %arg4: memref<3x96x32xf32, #tpu.memory_space<vmem>>, %arg5: memref<3x8x32xf32, #tpu.memory_space<vmem>>, %arg6: memref<32x128xf32, #tpu.memory_space<vmem>>, %arg7: memref<2x8x128xf32, #tpu.memory_space<vmem>>) attributes {dimension_semantics = [], scalar_prefetch = 0 : i64, scratch_operands = 0 : i64, tpu.core_type = #tpu.core_type<tc>} {
    %c0 = arith.constant 0 : index
    %c0_0 = arith.constant 0 : index
    %c0_1 = arith.constant 0 : index
    %0 = vector.load %arg3[%c0, %c0_0, %c0_1] : memref<3x32x32xf32, #tpu.memory_space<vmem>>, vector<3x32x32xf32>
    %c0_2 = arith.constant 0 : index
    %c0_3 = arith.constant 0 : index
    %c0_4 = arith.constant 0 : index
    %1 = vector.load %arg4[%c0_2, %c0_3, %c0_4] : memref<3x96x32xf32, #tpu.memory_space<vmem>>, vector<3x96x32xf32>
    %c0_5 = arith.constant 0 : index
    %c0_6 = arith.constant 0 : index
    %c0_7 = arith.constant 0 : index
    %2 = vector.load %arg5[%c0_5, %c0_6, %c0_7] : memref<3x8x32xf32, #tpu.memory_space<vmem>>, vector<3x8x32xf32>
    %c0_8 = arith.constant 0 : index
    %c0_9 = arith.constant 0 : index
    %3 = vector.load %arg6[%c0_8, %c0_9] : memref<32x128xf32, #tpu.memory_space<vmem>>, vector<32x128xf32>
    %c0_10 = arith.constant 0 : index
    %c0_11 = arith.constant 0 : index
    %c0_12 = arith.constant 0 : index
    %4 = vector.load %arg0[%c0_10, %c0_11, %c0_12] : memref<2x8x32xf32, #tpu.memory_space<vmem>>, vector<1x8x32xf32>
    %5 = vector.shape_cast %4 : vector<1x8x32xf32> to vector<8x32xf32>
    %c0_13 = arith.constant 0 : index
    %c0_14 = arith.constant 0 : index
    %c0_15 = arith.constant 0 : index
    %6 = vector.load %arg1[%c0_13, %c0_14, %c0_15] : memref<2x8x32xf32, #tpu.memory_space<vmem>>, vector<1x8x32xf32>
    %7 = vector.shape_cast %6 : vector<1x8x32xf32> to vector<8x32xf32>
    %c0_16 = arith.constant 0 : index
    %c0_17 = arith.constant 0 : index
    %c0_18 = arith.constant 0 : index
    %8 = vector.load %arg2[%c0_16, %c0_17, %c0_18] : memref<2x8x32xf32, #tpu.memory_space<vmem>>, vector<1x8x32xf32>
    %9 = vector.shape_cast %8 : vector<1x8x32xf32> to vector<8x32xf32>
    %10 = vector.extract_strided_slice %0 {offsets = [0, 0, 0], sizes = [1, 32, 32], strides = [1, 1, 1]} : vector<3x32x32xf32> to vector<1x32x32xf32>
    %11 = vector.shape_cast %10 : vector<1x32x32xf32> to vector<32x32xf32>
    %cst = arith.constant dense<0.000000e+00> : vector<8x32xf32>
    %12 = tpu.matmul %5, %11, %cst {dimension_numbers = #tpu.dot_dimension_numbers<[1], [0], [0], [1], [0, 0, 1, 1], [], []>} : vector<8x32xf32>, vector<32x32xf32>, vector<8x32xf32> -> vector<8x32xf32>
    %13 = math.tanh %12 : vector<8x32xf32>
    %14 = vector.extract_strided_slice %1 {offsets = [0, 0, 0], sizes = [1, 32, 32], strides = [1, 1, 1]} : vector<3x96x32xf32> to vector<1x32x32xf32>
    %15 = vector.shape_cast %14 : vector<1x32x32xf32> to vector<32x32xf32>
    %cst_19 = arith.constant dense<0.000000e+00> : vector<8x32xf32>
    %16 = tpu.matmul %5, %15, %cst_19 {dimension_numbers = #tpu.dot_dimension_numbers<[1], [0], [0], [1], [0, 0, 1, 1], [], []>} : vector<8x32xf32>, vector<32x32xf32>, vector<8x32xf32> -> vector<8x32xf32>
    %17 = vector.extract_strided_slice %1 {offsets = [0, 32, 0], sizes = [1, 32, 32], strides = [1, 1, 1]} : vector<3x96x32xf32> to vector<1x32x32xf32>
    %18 = vector.shape_cast %17 : vector<1x32x32xf32> to vector<32x32xf32>
    %cst_20 = arith.constant dense<0.000000e+00> : vector<8x32xf32>
    %19 = tpu.matmul %7, %18, %cst_20 {dimension_numbers = #tpu.dot_dimension_numbers<[1], [0], [0], [1], [0, 0, 1, 1], [], []>} : vector<8x32xf32>, vector<32x32xf32>, vector<8x32xf32> -> vector<8x32xf32>
    %20 = arith.addf %16, %19 : vector<8x32xf32>
    %21 = vector.extract_strided_slice %1 {offsets = [0, 64, 0], sizes = [1, 32, 32], strides = [1, 1, 1]} : vector<3x96x32xf32> to vector<1x32x32xf32>
    %22 = vector.shape_cast %21 : vector<1x32x32xf32> to vector<32x32xf32>
    %cst_21 = arith.constant dense<0.000000e+00> : vector<8x32xf32>
    %23 = tpu.matmul %9, %22, %cst_21 {dimension_numbers = #tpu.dot_dimension_numbers<[1], [0], [0], [1], [0, 0, 1, 1], [], []>} : vector<8x32xf32>, vector<32x32xf32>, vector<8x32xf32> -> vector<8x32xf32>
    %24 = arith.addf %20, %23 : vector<8x32xf32>
    %25 = vector.extract_strided_slice %2 {offsets = [0, 0, 0], sizes = [1, 8, 32], strides = [1, 1, 1]} : vector<3x8x32xf32> to vector<1x8x32xf32>
    %26 = vector.shape_cast %25 : vector<1x8x32xf32> to vector<8x32xf32>
    %27 = arith.negf %24 : vector<8x32xf32>
    %28 = math.exp %27 : vector<8x32xf32>
    %cst_22 = arith.constant 1.000000e+00 : f32
    %29 = vector.broadcast %cst_22 : f32 to vector<8x32xf32>
    %30 = arith.addf %29, %28 : vector<8x32xf32>
    %31 = arith.divf %29, %30 : vector<8x32xf32>
    %32 = arith.mulf %26, %31 : vector<8x32xf32>
    %33 = arith.mulf %32, %13 : vector<8x32xf32>
    %34 = vector.extract_strided_slice %0 {offsets = [1, 0, 0], sizes = [1, 32, 32], strides = [1, 1, 1]} : vector<3x32x32xf32> to vector<1x32x32xf32>
    %35 = vector.shape_cast %34 : vector<1x32x32xf32> to vector<32x32xf32>
    %cst_23 = arith.constant dense<0.000000e+00> : vector<8x32xf32>
    %36 = tpu.matmul %7, %35, %cst_23 {dimension_numbers = #tpu.dot_dimension_numbers<[1], [0], [0], [1], [0, 0, 1, 1], [], []>} : vector<8x32xf32>, vector<32x32xf32>, vector<8x32xf32> -> vector<8x32xf32>
    %37 = math.tanh %36 : vector<8x32xf32>
    %38 = vector.extract_strided_slice %1 {offsets = [1, 0, 0], sizes = [1, 32, 32], strides = [1, 1, 1]} : vector<3x96x32xf32> to vector<1x32x32xf32>
    %39 = vector.shape_cast %38 : vector<1x32x32xf32> to vector<32x32xf32>
    %cst_24 = arith.constant dense<0.000000e+00> : vector<8x32xf32>
    %40 = tpu.matmul %5, %39, %cst_24 {dimension_numbers = #tpu.dot_dimension_numbers<[1], [0], [0], [1], [0, 0, 1, 1], [], []>} : vector<8x32xf32>, vector<32x32xf32>, vector<8x32xf32> -> vector<8x32xf32>
    %41 = vector.extract_strided_slice %1 {offsets = [1, 32, 0], sizes = [1, 32, 32], strides = [1, 1, 1]} : vector<3x96x32xf32> to vector<1x32x32xf32>
    %42 = vector.shape_cast %41 : vector<1x32x32xf32> to vector<32x32xf32>
    %cst_25 = arith.constant dense<0.000000e+00> : vector<8x32xf32>
    %43 = tpu.matmul %7, %42, %cst_25 {dimension_numbers = #tpu.dot_dimension_numbers<[1], [0], [0], [1], [0, 0, 1, 1], [], []>} : vector<8x32xf32>, vector<32x32xf32>, vector<8x32xf32> -> vector<8x32xf32>
    %44 = arith.addf %40, %43 : vector<8x32xf32>
    %45 = vector.extract_strided_slice %1 {offsets = [1, 64, 0], sizes = [1, 32, 32], strides = [1, 1, 1]} : vector<3x96x32xf32> to vector<1x32x32xf32>
    %46 = vector.shape_cast %45 : vector<1x32x32xf32> to vector<32x32xf32>
    %cst_26 = arith.constant dense<0.000000e+00> : vector<8x32xf32>
    %47 = tpu.matmul %9, %46, %cst_26 {dimension_numbers = #tpu.dot_dimension_numbers<[1], [0], [0], [1], [0, 0, 1, 1], [], []>} : vector<8x32xf32>, vector<32x32xf32>, vector<8x32xf32> -> vector<8x32xf32>
    %48 = arith.addf %44, %47 : vector<8x32xf32>
    %49 = vector.extract_strided_slice %2 {offsets = [1, 0, 0], sizes = [1, 8, 32], strides = [1, 1, 1]} : vector<3x8x32xf32> to vector<1x8x32xf32>
    %50 = vector.shape_cast %49 : vector<1x8x32xf32> to vector<8x32xf32>
    %51 = arith.negf %48 : vector<8x32xf32>
    %52 = math.exp %51 : vector<8x32xf32>
    %cst_27 = arith.constant 1.000000e+00 : f32
    %53 = vector.broadcast %cst_27 : f32 to vector<8x32xf32>
    %54 = arith.addf %53, %52 : vector<8x32xf32>
    %55 = arith.divf %53, %54 : vector<8x32xf32>
    %56 = arith.mulf %50, %55 : vector<8x32xf32>
    %57 = arith.mulf %56, %37 : vector<8x32xf32>
    %58 = arith.addf %33, %57 : vector<8x32xf32>
    %59 = vector.extract_strided_slice %0 {offsets = [2, 0, 0], sizes = [1, 32, 32], strides = [1, 1, 1]} : vector<3x32x32xf32> to vector<1x32x32xf32>
    %60 = vector.shape_cast %59 : vector<1x32x32xf32> to vector<32x32xf32>
    %cst_28 = arith.constant dense<0.000000e+00> : vector<8x32xf32>
    %61 = tpu.matmul %9, %60, %cst_28 {dimension_numbers = #tpu.dot_dimension_numbers<[1], [0], [0], [1], [0, 0, 1, 1], [], []>} : vector<8x32xf32>, vector<32x32xf32>, vector<8x32xf32> -> vector<8x32xf32>
    %62 = math.tanh %61 : vector<8x32xf32>
    %63 = vector.extract_strided_slice %1 {offsets = [2, 0, 0], sizes = [1, 32, 32], strides = [1, 1, 1]} : vector<3x96x32xf32> to vector<1x32x32xf32>
    %64 = vector.shape_cast %63 : vector<1x32x32xf32> to vector<32x32xf32>
    %cst_29 = arith.constant dense<0.000000e+00> : vector<8x32xf32>
    %65 = tpu.matmul %5, %64, %cst_29 {dimension_numbers = #tpu.dot_dimension_numbers<[1], [0], [0], [1], [0, 0, 1, 1], [], []>} : vector<8x32xf32>, vector<32x32xf32>, vector<8x32xf32> -> vector<8x32xf32>
    %66 = vector.extract_strided_slice %1 {offsets = [2, 32, 0], sizes = [1, 32, 32], strides = [1, 1, 1]} : vector<3x96x32xf32> to vector<1x32x32xf32>
    %67 = vector.shape_cast %66 : vector<1x32x32xf32> to vector<32x32xf32>
    %cst_30 = arith.constant dense<0.000000e+00> : vector<8x32xf32>
    %68 = tpu.matmul %7, %67, %cst_30 {dimension_numbers = #tpu.dot_dimension_numbers<[1], [0], [0], [1], [0, 0, 1, 1], [], []>} : vector<8x32xf32>, vector<32x32xf32>, vector<8x32xf32> -> vector<8x32xf32>
    %69 = arith.addf %65, %68 : vector<8x32xf32>
    %70 = vector.extract_strided_slice %1 {offsets = [2, 64, 0], sizes = [1, 32, 32], strides = [1, 1, 1]} : vector<3x96x32xf32> to vector<1x32x32xf32>
    %71 = vector.shape_cast %70 : vector<1x32x32xf32> to vector<32x32xf32>
    %cst_31 = arith.constant dense<0.000000e+00> : vector<8x32xf32>
    %72 = tpu.matmul %9, %71, %cst_31 {dimension_numbers = #tpu.dot_dimension_numbers<[1], [0], [0], [1], [0, 0, 1, 1], [], []>} : vector<8x32xf32>, vector<32x32xf32>, vector<8x32xf32> -> vector<8x32xf32>
    %73 = arith.addf %69, %72 : vector<8x32xf32>
    %74 = vector.extract_strided_slice %2 {offsets = [2, 0, 0], sizes = [1, 8, 32], strides = [1, 1, 1]} : vector<3x8x32xf32> to vector<1x8x32xf32>
    %75 = vector.shape_cast %74 : vector<1x8x32xf32> to vector<8x32xf32>
    %76 = arith.negf %73 : vector<8x32xf32>
    %77 = math.exp %76 : vector<8x32xf32>
    %cst_32 = arith.constant 1.000000e+00 : f32
    %78 = vector.broadcast %cst_32 : f32 to vector<8x32xf32>
    %79 = arith.addf %78, %77 : vector<8x32xf32>
    %80 = arith.divf %78, %79 : vector<8x32xf32>
    %81 = arith.mulf %75, %80 : vector<8x32xf32>
    %82 = arith.mulf %81, %62 : vector<8x32xf32>
    %83 = arith.addf %58, %82 : vector<8x32xf32>
    %84 = arith.negf %83 : vector<8x32xf32>
    %85 = math.exp %84 : vector<8x32xf32>
    %cst_33 = arith.constant 1.000000e+00 : f32
    %86 = vector.broadcast %cst_33 : f32 to vector<8x32xf32>
    %87 = arith.addf %86, %85 : vector<8x32xf32>
    %88 = arith.divf %86, %87 : vector<8x32xf32>
    %cst_34 = arith.constant dense<0.000000e+00> : vector<8x128xf32>
    %89 = tpu.matmul %88, %3, %cst_34 {dimension_numbers = #tpu.dot_dimension_numbers<[1], [0], [0], [1], [0, 0, 1, 1], [], []>} : vector<8x32xf32>, vector<32x128xf32>, vector<8x128xf32> -> vector<8x128xf32>
    %c0_35 = arith.constant 0 : index
    %c0_36 = arith.constant 0 : index
    %c0_37 = arith.constant 0 : index
    %90 = vector.load %arg7[%c0_35, %c0_36, %c0_37] : memref<2x8x128xf32, #tpu.memory_space<vmem>>, vector<1x8x128xf32>
    %91 = vector.shape_cast %90 : vector<1x8x128xf32> to vector<8x128xf32>
    %92 = vector.shape_cast %89 : vector<8x128xf32> to vector<1x8x128xf32>
    tpu.vector_store %arg7[%c0_35, %c0_36, %c0_37], %92 {strides = array<i32>} : memref<2x8x128xf32, #tpu.memory_space<vmem>>, vector<1x8x128xf32>,
    %c1 = arith.constant 1 : index
    %c0_38 = arith.constant 0 : index
    %c0_39 = arith.constant 0 : index
    %93 = vector.load %arg0[%c1, %c0_38, %c0_39] : memref<2x8x32xf32, #tpu.memory_space<vmem>>, vector<1x8x32xf32>
    %94 = vector.shape_cast %93 : vector<1x8x32xf32> to vector<8x32xf32>
    %c1_40 = arith.constant 1 : index
    %c0_41 = arith.constant 0 : index
    %c0_42 = arith.constant 0 : index
    %95 = vector.load %arg1[%c1_40, %c0_41, %c0_42] : memref<2x8x32xf32, #tpu.memory_space<vmem>>, vector<1x8x32xf32>
    %96 = vector.shape_cast %95 : vector<1x8x32xf32> to vector<8x32xf32>
    %c1_43 = arith.constant 1 : index
    %c0_44 = arith.constant 0 : index
    %c0_45 = arith.constant 0 : index
    %97 = vector.load %arg2[%c1_43, %c0_44, %c0_45] : memref<2x8x32xf32, #tpu.memory_space<vmem>>, vector<1x8x32xf32>
    %98 = vector.shape_cast %97 : vector<1x8x32xf32> to vector<8x32xf32>
    %99 = vector.extract_strided_slice %0 {offsets = [0, 0, 0], sizes = [1, 32, 32], strides = [1, 1, 1]} : vector<3x32x32xf32> to vector<1x32x32xf32>
    %100 = vector.shape_cast %99 : vector<1x32x32xf32> to vector<32x32xf32>
    %cst_46 = arith.constant dense<0.000000e+00> : vector<8x32xf32>
    %101 = tpu.matmul %94, %100, %cst_46 {dimension_numbers = #tpu.dot_dimension_numbers<[1], [0], [0], [1], [0, 0, 1, 1], [], []>} : vector<8x32xf32>, vector<32x32xf32>, vector<8x32xf32> -> vector<8x32xf32>
    %102 = math.tanh %101 : vector<8x32xf32>
    %103 = vector.extract_strided_slice %1 {offsets = [0, 0, 0], sizes = [1, 32, 32], strides = [1, 1, 1]} : vector<3x96x32xf32> to vector<1x32x32xf32>
    %104 = vector.shape_cast %103 : vector<1x32x32xf32> to vector<32x32xf32>
    %cst_47 = arith.constant dense<0.000000e+00> : vector<8x32xf32>
    %105 = tpu.matmul %94, %104, %cst_47 {dimension_numbers = #tpu.dot_dimension_numbers<[1], [0], [0], [1], [0, 0, 1, 1], [], []>} : vector<8x32xf32>, vector<32x32xf32>, vector<8x32xf32> -> vector<8x32xf32>
    %106 = vector.extract_strided_slice %1 {offsets = [0, 32, 0], sizes = [1, 32, 32], strides = [1, 1, 1]} : vector<3x96x32xf32> to vector<1x32x32xf32>
    %107 = vector.shape_cast %106 : vector<1x32x32xf32> to vector<32x32xf32>
    %cst_48 = arith.constant dense<0.000000e+00> : vector<8x32xf32>
    %108 = tpu.matmul %96, %107, %cst_48 {dimension_numbers = #tpu.dot_dimension_numbers<[1], [0], [0], [1], [0, 0, 1, 1], [], []>} : vector<8x32xf32>, vector<32x32xf32>, vector<8x32xf32> -> vector<8x32xf32>
    %109 = arith.addf %105, %108 : vector<8x32xf32>
    %110 = vector.extract_strided_slice %1 {offsets = [0, 64, 0], sizes = [1, 32, 32], strides = [1, 1, 1]} : vector<3x96x32xf32> to vector<1x32x32xf32>
    %111 = vector.shape_cast %110 : vector<1x32x32xf32> to vector<32x32xf32>
    %cst_49 = arith.constant dense<0.000000e+00> : vector<8x32xf32>
    %112 = tpu.matmul %98, %111, %cst_49 {dimension_numbers = #tpu.dot_dimension_numbers<[1], [0], [0], [1], [0, 0, 1, 1], [], []>} : vector<8x32xf32>, vector<32x32xf32>, vector<8x32xf32> -> vector<8x32xf32>
    %113 = arith.addf %109, %112 : vector<8x32xf32>
    %114 = vector.extract_strided_slice %2 {offsets = [0, 0, 0], sizes = [1, 8, 32], strides = [1, 1, 1]} : vector<3x8x32xf32> to vector<1x8x32xf32>
    %115 = vector.shape_cast %114 : vector<1x8x32xf32> to vector<8x32xf32>
    %116 = arith.negf %113 : vector<8x32xf32>
    %117 = math.exp %116 : vector<8x32xf32>
    %cst_50 = arith.constant 1.000000e+00 : f32
    %118 = vector.broadcast %cst_50 : f32 to vector<8x32xf32>
    %119 = arith.addf %118, %117 : vector<8x32xf32>
    %120 = arith.divf %118, %119 : vector<8x32xf32>
    %121 = arith.mulf %115, %120 : vector<8x32xf32>
    %122 = arith.mulf %121, %102 : vector<8x32xf32>
    %123 = vector.extract_strided_slice %0 {offsets = [1, 0, 0], sizes = [1, 32, 32], strides = [1, 1, 1]} : vector<3x32x32xf32> to vector<1x32x32xf32>
    %124 = vector.shape_cast %123 : vector<1x32x32xf32> to vector<32x32xf32>
    %cst_51 = arith.constant dense<0.000000e+00> : vector<8x32xf32>
    %125 = tpu.matmul %96, %124, %cst_51 {dimension_numbers = #tpu.dot_dimension_numbers<[1], [0], [0], [1], [0, 0, 1, 1], [], []>} : vector<8x32xf32>, vector<32x32xf32>, vector<8x32xf32> -> vector<8x32xf32>
    %126 = math.tanh %125 : vector<8x32xf32>
    %127 = vector.extract_strided_slice %1 {offsets = [1, 0, 0], sizes = [1, 32, 32], strides = [1, 1, 1]} : vector<3x96x32xf32> to vector<1x32x32xf32>
    %128 = vector.shape_cast %127 : vector<1x32x32xf32> to vector<32x32xf32>
    %cst_52 = arith.constant dense<0.000000e+00> : vector<8x32xf32>
    %129 = tpu.matmul %94, %128, %cst_52 {dimension_numbers = #tpu.dot_dimension_numbers<[1], [0], [0], [1], [0, 0, 1, 1], [], []>} : vector<8x32xf32>, vector<32x32xf32>, vector<8x32xf32> -> vector<8x32xf32>
    %130 = vector.extract_strided_slice %1 {offsets = [1, 32, 0], sizes = [1, 32, 32], strides = [1, 1, 1]} : vector<3x96x32xf32> to vector<1x32x32xf32>
    %131 = vector.shape_cast %130 : vector<1x32x32xf32> to vector<32x32xf32>
    %cst_53 = arith.constant dense<0.000000e+00> : vector<8x32xf32>
    %132 = tpu.matmul %96, %131, %cst_53 {dimension_numbers = #tpu.dot_dimension_numbers<[1], [0], [0], [1], [0, 0, 1, 1], [], []>} : vector<8x32xf32>, vector<32x32xf32>, vector<8x32xf32> -> vector<8x32xf32>
    %133 = arith.addf %129, %132 : vector<8x32xf32>
    %134 = vector.extract_strided_slice %1 {offsets = [1, 64, 0], sizes = [1, 32, 32], strides = [1, 1, 1]} : vector<3x96x32xf32> to vector<1x32x32xf32>
    %135 = vector.shape_cast %134 : vector<1x32x32xf32> to vector<32x32xf32>
    %cst_54 = arith.constant dense<0.000000e+00> : vector<8x32xf32>
    %136 = tpu.matmul %98, %135, %cst_54 {dimension_numbers = #tpu.dot_dimension_numbers<[1], [0], [0], [1], [0, 0, 1, 1], [], []>} : vector<8x32xf32>, vector<32x32xf32>, vector<8x32xf32> -> vector<8x32xf32>
    %137 = arith.addf %133, %136 : vector<8x32xf32>
    %138 = vector.extract_strided_slice %2 {offsets = [1, 0, 0], sizes = [1, 8, 32], strides = [1, 1, 1]} : vector<3x8x32xf32> to vector<1x8x32xf32>
    %139 = vector.shape_cast %138 : vector<1x8x32xf32> to vector<8x32xf32>
    %140 = arith.negf %137 : vector<8x32xf32>
    %141 = math.exp %140 : vector<8x32xf32>
    %cst_55 = arith.constant 1.000000e+00 : f32
    %142 = vector.broadcast %cst_55 : f32 to vector<8x32xf32>
    %143 = arith.addf %142, %141 : vector<8x32xf32>
    %144 = arith.divf %142, %143 : vector<8x32xf32>
    %145 = arith.mulf %139, %144 : vector<8x32xf32>
    %146 = arith.mulf %145, %126 : vector<8x32xf32>
    %147 = arith.addf %122, %146 : vector<8x32xf32>
    %148 = vector.extract_strided_slice %0 {offsets = [2, 0, 0], sizes = [1, 32, 32], strides = [1, 1, 1]} : vector<3x32x32xf32> to vector<1x32x32xf32>
    %149 = vector.shape_cast %148 : vector<1x32x32xf32> to vector<32x32xf32>
    %cst_56 = arith.constant dense<0.000000e+00> : vector<8x32xf32>
    %150 = tpu.matmul %98, %149, %cst_56 {dimension_numbers = #tpu.dot_dimension_numbers<[1], [0], [0], [1], [0, 0, 1, 1], [], []>} : vector<8x32xf32>, vector<32x32xf32>, vector<8x32xf32> -> vector<8x32xf32>
    %151 = math.tanh %150 : vector<8x32xf32>
    %152 = vector.extract_strided_slice %1 {offsets = [2, 0, 0], sizes = [1, 32, 32], strides = [1, 1, 1]} : vector<3x96x32xf32> to vector<1x32x32xf32>
    %153 = vector.shape_cast %152 : vector<1x32x32xf32> to vector<32x32xf32>
    %cst_57 = arith.constant dense<0.000000e+00> : vector<8x32xf32>
    %154 = tpu.matmul %94, %153, %cst_57 {dimension_numbers = #tpu.dot_dimension_numbers<[1], [0], [0], [1], [0, 0, 1, 1], [], []>} : vector<8x32xf32>, vector<32x32xf32>, vector<8x32xf32> -> vector<8x32xf32>
    %155 = vector.extract_strided_slice %1 {offsets = [2, 32, 0], sizes = [1, 32, 32], strides = [1, 1, 1]} : vector<3x96x32xf32> to vector<1x32x32xf32>
    %156 = vector.shape_cast %155 : vector<1x32x32xf32> to vector<32x32xf32>
    %cst_58 = arith.constant dense<0.000000e+00> : vector<8x32xf32>
    %157 = tpu.matmul %96, %156, %cst_58 {dimension_numbers = #tpu.dot_dimension_numbers<[1], [0], [0], [1], [0, 0, 1, 1], [], []>} : vector<8x32xf32>, vector<32x32xf32>, vector<8x32xf32> -> vector<8x32xf32>
    %158 = arith.addf %154, %157 : vector<8x32xf32>
    %159 = vector.extract_strided_slice %1 {offsets = [2, 64, 0], sizes = [1, 32, 32], strides = [1, 1, 1]} : vector<3x96x32xf32> to vector<1x32x32xf32>
    %160 = vector.shape_cast %159 : vector<1x32x32xf32> to vector<32x32xf32>
    %cst_59 = arith.constant dense<0.000000e+00> : vector<8x32xf32>
    %161 = tpu.matmul %98, %160, %cst_59 {dimension_numbers = #tpu.dot_dimension_numbers<[1], [0], [0], [1], [0, 0, 1, 1], [], []>} : vector<8x32xf32>, vector<32x32xf32>, vector<8x32xf32> -> vector<8x32xf32>
    %162 = arith.addf %158, %161 : vector<8x32xf32>
    %163 = vector.extract_strided_slice %2 {offsets = [2, 0, 0], sizes = [1, 8, 32], strides = [1, 1, 1]} : vector<3x8x32xf32> to vector<1x8x32xf32>
    %164 = vector.shape_cast %163 : vector<1x8x32xf32> to vector<8x32xf32>
    %165 = arith.negf %162 : vector<8x32xf32>
    %166 = math.exp %165 : vector<8x32xf32>
    %cst_60 = arith.constant 1.000000e+00 : f32
    %167 = vector.broadcast %cst_60 : f32 to vector<8x32xf32>
    %168 = arith.addf %167, %166 : vector<8x32xf32>
    %169 = arith.divf %167, %168 : vector<8x32xf32>
    %170 = arith.mulf %164, %169 : vector<8x32xf32>
    %171 = arith.mulf %170, %151 : vector<8x32xf32>
    %172 = arith.addf %147, %171 : vector<8x32xf32>
    %173 = arith.negf %172 : vector<8x32xf32>
    %174 = math.exp %173 : vector<8x32xf32>
    %cst_61 = arith.constant 1.000000e+00 : f32
    %175 = vector.broadcast %cst_61 : f32 to vector<8x32xf32>
    %176 = arith.addf %175, %174 : vector<8x32xf32>
    %177 = arith.divf %175, %176 : vector<8x32xf32>
    %cst_62 = arith.constant dense<0.000000e+00> : vector<8x128xf32>
    %178 = tpu.matmul %177, %3, %cst_62 {dimension_numbers = #tpu.dot_dimension_numbers<[1], [0], [0], [1], [0, 0, 1, 1], [], []>} : vector<8x32xf32>, vector<32x128xf32>, vector<8x128xf32> -> vector<8x128xf32>
    %c1_63 = arith.constant 1 : index
    %c0_64 = arith.constant 0 : index
    %c0_65 = arith.constant 0 : index
    %179 = vector.load %arg7[%c1_63, %c0_64, %c0_65] : memref<2x8x128xf32, #tpu.memory_space<vmem>>, vector<1x8x128xf32>
    %180 = vector.shape_cast %179 : vector<1x8x128xf32> to vector<8x128xf32>
    %181 = vector.shape_cast %178 : vector<8x128xf32> to vector<1x8x128xf32>
    tpu.vector_store %arg7[%c1_63, %c0_64, %c0_65], %181 {strides = array<i32>} : memref<2x8x128xf32, #tpu.memory_space<vmem>>, vector<1x8x128xf32>,
    return
  }
}

module attributes {stable_mosaic.version = 11 : i64} {
  func.func @_dual_decoder_kernel(%arg0: memref<4x4x32xf32, #tpu.memory_space<vmem>>, %arg1: memref<4x4x32xf32, #tpu.memory_space<vmem>>, %arg2: memref<4x2x32xf32, #tpu.memory_space<vmem>>, %arg3: memref<4x4x4xf32, #tpu.memory_space<vmem>>, %arg4: memref<32x192xf32, #tpu.memory_space<vmem>>, %arg5: memref<32x192xf32, #tpu.memory_space<vmem>>, %arg6: memref<64x32xf32, #tpu.memory_space<vmem>>, %arg7: memref<1x32xf32, #tpu.memory_space<vmem>>, %arg8: memref<1x32xf32, #tpu.memory_space<vmem>>, %arg9: memref<32x64xf32, #tpu.memory_space<vmem>>, %arg10: memref<32x128xf32, #tpu.memory_space<vmem>>, %arg11: memref<64x32xf32, #tpu.memory_space<vmem>>, %arg12: memref<1x32xf32, #tpu.memory_space<vmem>>, %arg13: memref<1x32xf32, #tpu.memory_space<vmem>>, %arg14: memref<32x64xf32, #tpu.memory_space<vmem>>, %arg15: memref<1x64xf32, #tpu.memory_space<vmem>>, %arg16: memref<64x32xf32, #tpu.memory_space<vmem>>, %arg17: memref<1x32xf32, #tpu.memory_space<vmem>>, %arg18: memref<1x32xf32, #tpu.memory_space<vmem>>, %arg19: memref<1x32xf32, #tpu.memory_space<vmem>>, %arg20: memref<2x8x32xf32, #tpu.memory_space<vmem>>, %arg21: memref<2x8x32xf32, #tpu.memory_space<vmem>>, %arg22: memref<2x4x32xf32, #tpu.memory_space<vmem>>, %arg23: memref<2x8x8xf32, #tpu.memory_space<vmem>>, %arg24: memref<32x192xf32, #tpu.memory_space<vmem>>, %arg25: memref<32x192xf32, #tpu.memory_space<vmem>>, %arg26: memref<64x32xf32, #tpu.memory_space<vmem>>, %arg27: memref<1x32xf32, #tpu.memory_space<vmem>>, %arg28: memref<1x32xf32, #tpu.memory_space<vmem>>, %arg29: memref<32x64xf32, #tpu.memory_space<vmem>>, %arg30: memref<32x128xf32, #tpu.memory_space<vmem>>, %arg31: memref<64x32xf32, #tpu.memory_space<vmem>>, %arg32: memref<1x32xf32, #tpu.memory_space<vmem>>, %arg33: memref<1x32xf32, #tpu.memory_space<vmem>>, %arg34: memref<32x64xf32, #tpu.memory_space<vmem>>, %arg35: memref<1x64xf32, #tpu.memory_space<vmem>>, %arg36: memref<64x32xf32, #tpu.memory_space<vmem>>, %arg37: memref<1x32xf32, #tpu.memory_space<vmem>>, %arg38: memref<1x32xf32, #tpu.memory_space<vmem>>, %arg39: memref<1x32xf32, #tpu.memory_space<vmem>>, %arg40: memref<4x4x32xf32, #tpu.memory_space<vmem>>, %arg41: memref<2x8x32xf32, #tpu.memory_space<vmem>>) attributes {dimension_semantics = [], scalar_prefetch = 0 : i64, scratch_operands = 0 : i64, tpu.core_type = #tpu.core_type<tc>} {
    %c0 = arith.constant 0 : index
    %c0_0 = arith.constant 0 : index
    %0 = vector.load %arg4[%c0, %c0_0] : memref<32x192xf32, #tpu.memory_space<vmem>>, vector<32x192xf32>
    %c0_1 = arith.constant 0 : index
    %c0_2 = arith.constant 0 : index
    %1 = vector.load %arg5[%c0_1, %c0_2] : memref<32x192xf32, #tpu.memory_space<vmem>>, vector<32x192xf32>
    %c0_3 = arith.constant 0 : index
    %c0_4 = arith.constant 0 : index
    %2 = vector.load %arg6[%c0_3, %c0_4] : memref<64x32xf32, #tpu.memory_space<vmem>>, vector<64x32xf32>
    %c0_5 = arith.constant 0 : index
    %c0_6 = arith.constant 0 : index
    %3 = vector.load %arg7[%c0_5, %c0_6] : memref<1x32xf32, #tpu.memory_space<vmem>>, vector<1x32xf32>
    %c0_7 = arith.constant 0 : index
    %c0_8 = arith.constant 0 : index
    %4 = vector.load %arg8[%c0_7, %c0_8] : memref<1x32xf32, #tpu.memory_space<vmem>>, vector<1x32xf32>
    %c0_9 = arith.constant 0 : index
    %c0_10 = arith.constant 0 : index
    %5 = vector.load %arg9[%c0_9, %c0_10] : memref<32x64xf32, #tpu.memory_space<vmem>>, vector<32x64xf32>
    %c0_11 = arith.constant 0 : index
    %c0_12 = arith.constant 0 : index
    %6 = vector.load %arg10[%c0_11, %c0_12] : memref<32x128xf32, #tpu.memory_space<vmem>>, vector<32x128xf32>
    %c0_13 = arith.constant 0 : index
    %c0_14 = arith.constant 0 : index
    %7 = vector.load %arg11[%c0_13, %c0_14] : memref<64x32xf32, #tpu.memory_space<vmem>>, vector<64x32xf32>
    %c0_15 = arith.constant 0 : index
    %c0_16 = arith.constant 0 : index
    %8 = vector.load %arg12[%c0_15, %c0_16] : memref<1x32xf32, #tpu.memory_space<vmem>>, vector<1x32xf32>
    %c0_17 = arith.constant 0 : index
    %c0_18 = arith.constant 0 : index
    %9 = vector.load %arg13[%c0_17, %c0_18] : memref<1x32xf32, #tpu.memory_space<vmem>>, vector<1x32xf32>
    %c0_19 = arith.constant 0 : index
    %c0_20 = arith.constant 0 : index
    %10 = vector.load %arg14[%c0_19, %c0_20] : memref<32x64xf32, #tpu.memory_space<vmem>>, vector<32x64xf32>
    %c0_21 = arith.constant 0 : index
    %c0_22 = arith.constant 0 : index
    %11 = vector.load %arg15[%c0_21, %c0_22] : memref<1x64xf32, #tpu.memory_space<vmem>>, vector<1x64xf32>
    %c0_23 = arith.constant 0 : index
    %c0_24 = arith.constant 0 : index
    %12 = vector.load %arg16[%c0_23, %c0_24] : memref<64x32xf32, #tpu.memory_space<vmem>>, vector<64x32xf32>
    %c0_25 = arith.constant 0 : index
    %c0_26 = arith.constant 0 : index
    %13 = vector.load %arg17[%c0_25, %c0_26] : memref<1x32xf32, #tpu.memory_space<vmem>>, vector<1x32xf32>
    %c0_27 = arith.constant 0 : index
    %c0_28 = arith.constant 0 : index
    %14 = vector.load %arg18[%c0_27, %c0_28] : memref<1x32xf32, #tpu.memory_space<vmem>>, vector<1x32xf32>
    %c0_29 = arith.constant 0 : index
    %c0_30 = arith.constant 0 : index
    %15 = vector.load %arg19[%c0_29, %c0_30] : memref<1x32xf32, #tpu.memory_space<vmem>>, vector<1x32xf32>
    %c0_31 = arith.constant 0 : index
    %c0_32 = arith.constant 0 : index
    %c0_33 = arith.constant 0 : index
    %16 = vector.load %arg0[%c0_31, %c0_32, %c0_33] : memref<4x4x32xf32, #tpu.memory_space<vmem>>, vector<1x4x32xf32>
    %17 = vector.shape_cast %16 : vector<1x4x32xf32> to vector<4x32xf32>
    %c0_34 = arith.constant 0 : index
    %c0_35 = arith.constant 0 : index
    %c0_36 = arith.constant 0 : index
    %18 = vector.load %arg1[%c0_34, %c0_35, %c0_36] : memref<4x4x32xf32, #tpu.memory_space<vmem>>, vector<1x4x32xf32>
    %19 = vector.shape_cast %18 : vector<1x4x32xf32> to vector<4x32xf32>
    %c0_37 = arith.constant 0 : index
    %c0_38 = arith.constant 0 : index
    %c0_39 = arith.constant 0 : index
    %20 = vector.load %arg2[%c0_37, %c0_38, %c0_39] : memref<4x2x32xf32, #tpu.memory_space<vmem>>, vector<1x2x32xf32>
    %21 = vector.shape_cast %20 : vector<1x2x32xf32> to vector<2x32xf32>
    %c0_40 = arith.constant 0 : index
    %c0_41 = arith.constant 0 : index
    %c0_42 = arith.constant 0 : index
    %22 = vector.load %arg3[%c0_40, %c0_41, %c0_42] : memref<4x4x4xf32, #tpu.memory_space<vmem>>, vector<1x4x4xf32>
    %23 = vector.shape_cast %22 : vector<1x4x4xf32> to vector<4x4xf32>
    %24 = arith.addf %17, %19 : vector<4x32xf32>
    %cst = arith.constant dense<0.000000e+00> : vector<4x192xf32>
    %25 = tpu.matmul %17, %0, %cst {dimension_numbers = #tpu.dot_dimension_numbers<[1], [0], [0], [1], [0, 0, 1, 1], [], []>} : vector<4x32xf32>, vector<32x192xf32>, vector<4x192xf32> -> vector<4x192xf32>
    %cst_43 = arith.constant dense<0.000000e+00> : vector<4x192xf32>
    %26 = tpu.matmul %19, %1, %cst_43 {dimension_numbers = #tpu.dot_dimension_numbers<[1], [0], [0], [1], [0, 0, 1, 1], [], []>} : vector<4x32xf32>, vector<32x192xf32>, vector<4x192xf32> -> vector<4x192xf32>
    %27 = arith.addf %25, %26 : vector<4x192xf32>
    %28 = vector.extract_strided_slice %27 {offsets = [0, 0], sizes = [4, 64], strides = [1, 1]} : vector<4x192xf32> to vector<4x64xf32>
    %29 = vector.extract_strided_slice %27 {offsets = [0, 64], sizes = [4, 64], strides = [1, 1]} : vector<4x192xf32> to vector<4x64xf32>
    %30 = vector.extract_strided_slice %27 {offsets = [0, 128], sizes = [4, 64], strides = [1, 1]} : vector<4x192xf32> to vector<4x64xf32>
    %31 = vector.extract_strided_slice %28 {offsets = [0, 0], sizes = [4, 32], strides = [1, 1]} : vector<4x64xf32> to vector<4x32xf32>
    %32 = vector.extract_strided_slice %29 {offsets = [0, 0], sizes = [4, 32], strides = [1, 1]} : vector<4x64xf32> to vector<4x32xf32>
    %33 = vector.extract_strided_slice %30 {offsets = [0, 0], sizes = [4, 32], strides = [1, 1]} : vector<4x64xf32> to vector<4x32xf32>
    %cst_44 = arith.constant dense<0.000000e+00> : vector<4x4xf32>
    %34 = tpu.matmul %31, %32, %cst_44 {dimension_numbers = #tpu.dot_dimension_numbers<[1], [1], [0], [0], [0, 0, 1, 0], [], []>} : vector<4x32xf32>, vector<4x32xf32>, vector<4x4xf32> -> vector<4x4xf32>
    %cst_45 = arith.constant 0.176776692 : f32
    %35 = vector.broadcast %cst_45 : f32 to vector<4x4xf32>
    %36 = arith.mulf %34, %35 : vector<4x4xf32>
    %37 = arith.addf %36, %23 : vector<4x4xf32>
    %cst_46 = arith.constant dense<0xFF800000> : vector<4xf32>
    %38 = vector.multi_reduction <maximumf>, %37, %cst_46 [1] : vector<4x4xf32> to vector<4xf32>
    %39 = vector.shape_cast %38 : vector<4xf32> to vector<4x1xf32>
    %40 = vector.broadcast %39 : vector<4x1xf32> to vector<4x4xf32>
    %41 = arith.subf %37, %40 : vector<4x4xf32>
    %42 = math.exp %41 : vector<4x4xf32>
    %cst_47 = arith.constant dense<0.000000e+00> : vector<4xf32>
    %43 = vector.multi_reduction <add>, %42, %cst_47 [1] : vector<4x4xf32> to vector<4xf32>
    %44 = vector.shape_cast %43 : vector<4xf32> to vector<4x1xf32>
    %45 = tpu.reciprocal %44 {approx = true} : vector<4x1xf32> -> vector<4x1xf32>
    %46 = vector.broadcast %45 : vector<4x1xf32> to vector<4x4xf32>
    %47 = arith.mulf %42, %46 : vector<4x4xf32>
    %cst_48 = arith.constant dense<0.000000e+00> : vector<4x32xf32>
    %48 = tpu.matmul %47, %33, %cst_48 {dimension_numbers = #tpu.dot_dimension_numbers<[1], [0], [0], [1], [0, 0, 1, 1], [], []>} : vector<4x4xf32>, vector<4x32xf32>, vector<4x32xf32> -> vector<4x32xf32>
    %49 = vector.extract_strided_slice %2 {offsets = [0, 0], sizes = [32, 32], strides = [1, 1]} : vector<64x32xf32> to vector<32x32xf32>
    %cst_49 = arith.constant dense<0.000000e+00> : vector<4x32xf32>
    %50 = tpu.matmul %48, %49, %cst_49 {dimension_numbers = #tpu.dot_dimension_numbers<[1], [0], [0], [1], [0, 0, 1, 1], [], []>} : vector<4x32xf32>, vector<32x32xf32>, vector<4x32xf32> -> vector<4x32xf32>
    %51 = vector.extract_strided_slice %28 {offsets = [0, 32], sizes = [4, 32], strides = [1, 1]} : vector<4x64xf32> to vector<4x32xf32>
    %52 = vector.extract_strided_slice %29 {offsets = [0, 32], sizes = [4, 32], strides = [1, 1]} : vector<4x64xf32> to vector<4x32xf32>
    %53 = vector.extract_strided_slice %30 {offsets = [0, 32], sizes = [4, 32], strides = [1, 1]} : vector<4x64xf32> to vector<4x32xf32>
    %cst_50 = arith.constant dense<0.000000e+00> : vector<4x4xf32>
    %54 = tpu.matmul %51, %52, %cst_50 {dimension_numbers = #tpu.dot_dimension_numbers<[1], [1], [0], [0], [0, 0, 1, 0], [], []>} : vector<4x32xf32>, vector<4x32xf32>, vector<4x4xf32> -> vector<4x4xf32>
    %cst_51 = arith.constant 0.176776692 : f32
    %55 = vector.broadcast %cst_51 : f32 to vector<4x4xf32>
    %56 = arith.mulf %54, %55 : vector<4x4xf32>
    %57 = arith.addf %56, %23 : vector<4x4xf32>
    %cst_52 = arith.constant dense<0xFF800000> : vector<4xf32>
    %58 = vector.multi_reduction <maximumf>, %57, %cst_52 [1] : vector<4x4xf32> to vector<4xf32>
    %59 = vector.shape_cast %58 : vector<4xf32> to vector<4x1xf32>
    %60 = vector.broadcast %59 : vector<4x1xf32> to vector<4x4xf32>
    %61 = arith.subf %57, %60 : vector<4x4xf32>
    %62 = math.exp %61 : vector<4x4xf32>
    %cst_53 = arith.constant dense<0.000000e+00> : vector<4xf32>
    %63 = vector.multi_reduction <add>, %62, %cst_53 [1] : vector<4x4xf32> to vector<4xf32>
    %64 = vector.shape_cast %63 : vector<4xf32> to vector<4x1xf32>
    %65 = tpu.reciprocal %64 {approx = true} : vector<4x1xf32> -> vector<4x1xf32>
    %66 = vector.broadcast %65 : vector<4x1xf32> to vector<4x4xf32>
    %67 = arith.mulf %62, %66 : vector<4x4xf32>
    %cst_54 = arith.constant dense<0.000000e+00> : vector<4x32xf32>
    %68 = tpu.matmul %67, %53, %cst_54 {dimension_numbers = #tpu.dot_dimension_numbers<[1], [0], [0], [1], [0, 0, 1, 1], [], []>} : vector<4x4xf32>, vector<4x32xf32>, vector<4x32xf32> -> vector<4x32xf32>
    %69 = vector.extract_strided_slice %2 {offsets = [32, 0], sizes = [32, 32], strides = [1, 1]} : vector<64x32xf32> to vector<32x32xf32>
    %cst_55 = arith.constant dense<0.000000e+00> : vector<4x32xf32>
    %70 = tpu.matmul %68, %69, %cst_55 {dimension_numbers = #tpu.dot_dimension_numbers<[1], [0], [0], [1], [0, 0, 1, 1], [], []>} : vector<4x32xf32>, vector<32x32xf32>, vector<4x32xf32> -> vector<4x32xf32>
    %71 = arith.addf %50, %70 : vector<4x32xf32>
    %72 = arith.addf %71, %24 : vector<4x32xf32>
    %cst_56 = arith.constant dense<0.000000e+00> : vector<4xf32>
    %73 = vector.multi_reduction <add>, %72, %cst_56 [1] : vector<4x32xf32> to vector<4xf32>
    %74 = vector.shape_cast %73 : vector<4xf32> to vector<4x1xf32>
    %cst_57 = arith.constant 3.200000e+01 : f32
    %75 = vector.broadcast %cst_57 : f32 to vector<4x1xf32>
    %76 = arith.divf %74, %75 : vector<4x1xf32>
    %77 = vector.broadcast %76 : vector<4x1xf32> to vector<4x32xf32>
    %78 = arith.subf %72, %77 : vector<4x32xf32>
    %79 = arith.mulf %78, %78 : vector<4x32xf32>
    %cst_58 = arith.constant dense<0.000000e+00> : vector<4xf32>
    %80 = vector.multi_reduction <add>, %79, %cst_58 [1] : vector<4x32xf32> to vector<4xf32>
    %81 = vector.shape_cast %80 : vector<4xf32> to vector<4x1xf32>
    %cst_59 = arith.constant 3.200000e+01 : f32
    %82 = vector.broadcast %cst_59 : f32 to vector<4x1xf32>
    %83 = arith.divf %81, %82 : vector<4x1xf32>
    %cst_60 = arith.constant 9.99999997E-7 : f32
    %84 = vector.broadcast %cst_60 : f32 to vector<4x1xf32>
    %85 = arith.addf %83, %84 : vector<4x1xf32>
    %86 = math.rsqrt %85 : vector<4x1xf32>
    %87 = vector.broadcast %86 : vector<4x1xf32> to vector<4x32xf32>
    %88 = arith.mulf %78, %87 : vector<4x32xf32>
    %89 = vector.broadcast %3 : vector<1x32xf32> to vector<4x32xf32>
    %90 = arith.mulf %88, %89 : vector<4x32xf32>
    %91 = vector.broadcast %4 : vector<1x32xf32> to vector<4x32xf32>
    %92 = arith.addf %90, %91 : vector<4x32xf32>
    %cst_61 = arith.constant dense<0.000000e+00> : vector<4x64xf32>
    %93 = tpu.matmul %92, %5, %cst_61 {dimension_numbers = #tpu.dot_dimension_numbers<[1], [0], [0], [1], [0, 0, 1, 1], [], []>} : vector<4x32xf32>, vector<32x64xf32>, vector<4x64xf32> -> vector<4x64xf32>
    %cst_62 = arith.constant dense<0.000000e+00> : vector<2x128xf32>
    %94 = tpu.matmul %21, %6, %cst_62 {dimension_numbers = #tpu.dot_dimension_numbers<[1], [0], [0], [1], [0, 0, 1, 1], [], []>} : vector<2x32xf32>, vector<32x128xf32>, vector<2x128xf32> -> vector<2x128xf32>
    %95 = vector.extract_strided_slice %94 {offsets = [0, 0], sizes = [2, 64], strides = [1, 1]} : vector<2x128xf32> to vector<2x64xf32>
    %96 = vector.extract_strided_slice %94 {offsets = [0, 64], sizes = [2, 64], strides = [1, 1]} : vector<2x128xf32> to vector<2x64xf32>
    %97 = vector.extract_strided_slice %93 {offsets = [0, 0], sizes = [4, 32], strides = [1, 1]} : vector<4x64xf32> to vector<4x32xf32>
    %98 = vector.extract_strided_slice %95 {offsets = [0, 0], sizes = [2, 32], strides = [1, 1]} : vector<2x64xf32> to vector<2x32xf32>
    %99 = vector.extract_strided_slice %96 {offsets = [0, 0], sizes = [2, 32], strides = [1, 1]} : vector<2x64xf32> to vector<2x32xf32>
    %cst_63 = arith.constant dense<0.000000e+00> : vector<4x2xf32>
    %100 = tpu.matmul %97, %98, %cst_63 {dimension_numbers = #tpu.dot_dimension_numbers<[1], [1], [0], [0], [0, 0, 1, 0], [], []>} : vector<4x32xf32>, vector<2x32xf32>, vector<4x2xf32> -> vector<4x2xf32>
    %cst_64 = arith.constant 0.176776692 : f32
    %101 = vector.broadcast %cst_64 : f32 to vector<4x2xf32>
    %102 = arith.mulf %100, %101 : vector<4x2xf32>
    %cst_65 = arith.constant dense<0xFF800000> : vector<4xf32>
    %103 = vector.multi_reduction <maximumf>, %102, %cst_65 [1] : vector<4x2xf32> to vector<4xf32>
    %104 = vector.shape_cast %103 : vector<4xf32> to vector<4x1xf32>
    %105 = vector.broadcast %104 : vector<4x1xf32> to vector<4x2xf32>
    %106 = arith.subf %102, %105 : vector<4x2xf32>
    %107 = math.exp %106 : vector<4x2xf32>
    %cst_66 = arith.constant dense<0.000000e+00> : vector<4xf32>
    %108 = vector.multi_reduction <add>, %107, %cst_66 [1] : vector<4x2xf32> to vector<4xf32>
    %109 = vector.shape_cast %108 : vector<4xf32> to vector<4x1xf32>
    %110 = tpu.reciprocal %109 {approx = true} : vector<4x1xf32> -> vector<4x1xf32>
    %111 = vector.broadcast %110 : vector<4x1xf32> to vector<4x2xf32>
    %112 = arith.mulf %107, %111 : vector<4x2xf32>
    %cst_67 = arith.constant dense<0.000000e+00> : vector<4x32xf32>
    %113 = tpu.matmul %112, %99, %cst_67 {dimension_numbers = #tpu.dot_dimension_numbers<[1], [0], [0], [1], [0, 0, 1, 1], [], []>} : vector<4x2xf32>, vector<2x32xf32>, vector<4x32xf32> -> vector<4x32xf32>
    %114 = vector.extract_strided_slice %7 {offsets = [0, 0], sizes = [32, 32], strides = [1, 1]} : vector<64x32xf32> to vector<32x32xf32>
    %cst_68 = arith.constant dense<0.000000e+00> : vector<4x32xf32>
    %115 = tpu.matmul %113, %114, %cst_68 {dimension_numbers = #tpu.dot_dimension_numbers<[1], [0], [0], [1], [0, 0, 1, 1], [], []>} : vector<4x32xf32>, vector<32x32xf32>, vector<4x32xf32> -> vector<4x32xf32>
    %116 = vector.extract_strided_slice %93 {offsets = [0, 32], sizes = [4, 32], strides = [1, 1]} : vector<4x64xf32> to vector<4x32xf32>
    %117 = vector.extract_strided_slice %95 {offsets = [0, 32], sizes = [2, 32], strides = [1, 1]} : vector<2x64xf32> to vector<2x32xf32>
    %118 = vector.extract_strided_slice %96 {offsets = [0, 32], sizes = [2, 32], strides = [1, 1]} : vector<2x64xf32> to vector<2x32xf32>
    %cst_69 = arith.constant dense<0.000000e+00> : vector<4x2xf32>
    %119 = tpu.matmul %116, %117, %cst_69 {dimension_numbers = #tpu.dot_dimension_numbers<[1], [1], [0], [0], [0, 0, 1, 0], [], []>} : vector<4x32xf32>, vector<2x32xf32>, vector<4x2xf32> -> vector<4x2xf32>
    %cst_70 = arith.constant 0.176776692 : f32
    %120 = vector.broadcast %cst_70 : f32 to vector<4x2xf32>
    %121 = arith.mulf %119, %120 : vector<4x2xf32>
    %cst_71 = arith.constant dense<0xFF800000> : vector<4xf32>
    %122 = vector.multi_reduction <maximumf>, %121, %cst_71 [1] : vector<4x2xf32> to vector<4xf32>
    %123 = vector.shape_cast %122 : vector<4xf32> to vector<4x1xf32>
    %124 = vector.broadcast %123 : vector<4x1xf32> to vector<4x2xf32>
    %125 = arith.subf %121, %124 : vector<4x2xf32>
    %126 = math.exp %125 : vector<4x2xf32>
    %cst_72 = arith.constant dense<0.000000e+00> : vector<4xf32>
    %127 = vector.multi_reduction <add>, %126, %cst_72 [1] : vector<4x2xf32> to vector<4xf32>
    %128 = vector.shape_cast %127 : vector<4xf32> to vector<4x1xf32>
    %129 = tpu.reciprocal %128 {approx = true} : vector<4x1xf32> -> vector<4x1xf32>
    %130 = vector.broadcast %129 : vector<4x1xf32> to vector<4x2xf32>
    %131 = arith.mulf %126, %130 : vector<4x2xf32>
    %cst_73 = arith.constant dense<0.000000e+00> : vector<4x32xf32>
    %132 = tpu.matmul %131, %118, %cst_73 {dimension_numbers = #tpu.dot_dimension_numbers<[1], [0], [0], [1], [0, 0, 1, 1], [], []>} : vector<4x2xf32>, vector<2x32xf32>, vector<4x32xf32> -> vector<4x32xf32>
    %133 = vector.extract_strided_slice %7 {offsets = [32, 0], sizes = [32, 32], strides = [1, 1]} : vector<64x32xf32> to vector<32x32xf32>
    %cst_74 = arith.constant dense<0.000000e+00> : vector<4x32xf32>
    %134 = tpu.matmul %132, %133, %cst_74 {dimension_numbers = #tpu.dot_dimension_numbers<[1], [0], [0], [1], [0, 0, 1, 1], [], []>} : vector<4x32xf32>, vector<32x32xf32>, vector<4x32xf32> -> vector<4x32xf32>
    %135 = arith.addf %115, %134 : vector<4x32xf32>
    %136 = arith.addf %135, %92 : vector<4x32xf32>
    %cst_75 = arith.constant dense<0.000000e+00> : vector<4xf32>
    %137 = vector.multi_reduction <add>, %136, %cst_75 [1] : vector<4x32xf32> to vector<4xf32>
    %138 = vector.shape_cast %137 : vector<4xf32> to vector<4x1xf32>
    %cst_76 = arith.constant 3.200000e+01 : f32
    %139 = vector.broadcast %cst_76 : f32 to vector<4x1xf32>
    %140 = arith.divf %138, %139 : vector<4x1xf32>
    %141 = vector.broadcast %140 : vector<4x1xf32> to vector<4x32xf32>
    %142 = arith.subf %136, %141 : vector<4x32xf32>
    %143 = arith.mulf %142, %142 : vector<4x32xf32>
    %cst_77 = arith.constant dense<0.000000e+00> : vector<4xf32>
    %144 = vector.multi_reduction <add>, %143, %cst_77 [1] : vector<4x32xf32> to vector<4xf32>
    %145 = vector.shape_cast %144 : vector<4xf32> to vector<4x1xf32>
    %cst_78 = arith.constant 3.200000e+01 : f32
    %146 = vector.broadcast %cst_78 : f32 to vector<4x1xf32>
    %147 = arith.divf %145, %146 : vector<4x1xf32>
    %cst_79 = arith.constant 9.99999997E-7 : f32
    %148 = vector.broadcast %cst_79 : f32 to vector<4x1xf32>
    %149 = arith.addf %147, %148 : vector<4x1xf32>
    %150 = math.rsqrt %149 : vector<4x1xf32>
    %151 = vector.broadcast %150 : vector<4x1xf32> to vector<4x32xf32>
    %152 = arith.mulf %142, %151 : vector<4x32xf32>
    %153 = vector.broadcast %8 : vector<1x32xf32> to vector<4x32xf32>
    %154 = arith.mulf %152, %153 : vector<4x32xf32>
    %155 = vector.broadcast %9 : vector<1x32xf32> to vector<4x32xf32>
    %156 = arith.addf %154, %155 : vector<4x32xf32>
    %cst_80 = arith.constant dense<0.000000e+00> : vector<4x64xf32>
    %157 = tpu.matmul %156, %10, %cst_80 {dimension_numbers = #tpu.dot_dimension_numbers<[1], [0], [0], [1], [0, 0, 1, 1], [], []>} : vector<4x32xf32>, vector<32x64xf32>, vector<4x64xf32> -> vector<4x64xf32>
    %158 = vector.broadcast %11 : vector<1x64xf32> to vector<4x64xf32>
    %159 = arith.addf %157, %158 : vector<4x64xf32>
    %cst_81 = arith.constant 0.000000e+00 : f32
    %160 = vector.broadcast %cst_81 : f32 to vector<4x64xf32>
    %161 = arith.maximumf %159, %160 : vector<4x64xf32>
    %cst_82 = arith.constant dense<0.000000e+00> : vector<4x32xf32>
    %162 = tpu.matmul %161, %12, %cst_82 {dimension_numbers = #tpu.dot_dimension_numbers<[1], [0], [0], [1], [0, 0, 1, 1], [], []>} : vector<4x64xf32>, vector<64x32xf32>, vector<4x32xf32> -> vector<4x32xf32>
    %163 = vector.broadcast %13 : vector<1x32xf32> to vector<4x32xf32>
    %164 = arith.addf %162, %163 : vector<4x32xf32>
    %165 = arith.addf %164, %156 : vector<4x32xf32>
    %cst_83 = arith.constant dense<0.000000e+00> : vector<4xf32>
    %166 = vector.multi_reduction <add>, %165, %cst_83 [1] : vector<4x32xf32> to vector<4xf32>
    %167 = vector.shape_cast %166 : vector<4xf32> to vector<4x1xf32>
    %cst_84 = arith.constant 3.200000e+01 : f32
    %168 = vector.broadcast %cst_84 : f32 to vector<4x1xf32>
    %169 = arith.divf %167, %168 : vector<4x1xf32>
    %170 = vector.broadcast %169 : vector<4x1xf32> to vector<4x32xf32>
    %171 = arith.subf %165, %170 : vector<4x32xf32>
    %172 = arith.mulf %171, %171 : vector<4x32xf32>
    %cst_85 = arith.constant dense<0.000000e+00> : vector<4xf32>
    %173 = vector.multi_reduction <add>, %172, %cst_85 [1] : vector<4x32xf32> to vector<4xf32>
    %174 = vector.shape_cast %173 : vector<4xf32> to vector<4x1xf32>
    %cst_86 = arith.constant 3.200000e+01 : f32
    %175 = vector.broadcast %cst_86 : f32 to vector<4x1xf32>
    %176 = arith.divf %174, %175 : vector<4x1xf32>
    %cst_87 = arith.constant 9.99999997E-7 : f32
    %177 = vector.broadcast %cst_87 : f32 to vector<4x1xf32>
    %178 = arith.addf %176, %177 : vector<4x1xf32>
    %179 = math.rsqrt %178 : vector<4x1xf32>
    %180 = vector.broadcast %179 : vector<4x1xf32> to vector<4x32xf32>
    %181 = arith.mulf %171, %180 : vector<4x32xf32>
    %182 = vector.broadcast %14 : vector<1x32xf32> to vector<4x32xf32>
    %183 = arith.mulf %181, %182 : vector<4x32xf32>
    %184 = vector.broadcast %15 : vector<1x32xf32> to vector<4x32xf32>
    %185 = arith.addf %183, %184 : vector<4x32xf32>
    %c0_88 = arith.constant 0 : index
    %c0_89 = arith.constant 0 : index
    %c0_90 = arith.constant 0 : index
    %186 = vector.load %arg40[%c0_88, %c0_89, %c0_90] : memref<4x4x32xf32, #tpu.memory_space<vmem>>, vector<1x4x32xf32>
    %187 = vector.shape_cast %186 : vector<1x4x32xf32> to vector<4x32xf32>
    %188 = vector.shape_cast %185 : vector<4x32xf32> to vector<1x4x32xf32>
    tpu.vector_store %arg40[%c0_88, %c0_89, %c0_90], %188 {strides = array<i32>} : memref<4x4x32xf32, #tpu.memory_space<vmem>>, vector<1x4x32xf32>,
    %c1 = arith.constant 1 : index
    %c0_91 = arith.constant 0 : index
    %c0_92 = arith.constant 0 : index
    %189 = vector.load %arg0[%c1, %c0_91, %c0_92] : memref<4x4x32xf32, #tpu.memory_space<vmem>>, vector<1x4x32xf32>
    %190 = vector.shape_cast %189 : vector<1x4x32xf32> to vector<4x32xf32>
    %c1_93 = arith.constant 1 : index
    %c0_94 = arith.constant 0 : index
    %c0_95 = arith.constant 0 : index
    %191 = vector.load %arg1[%c1_93, %c0_94, %c0_95] : memref<4x4x32xf32, #tpu.memory_space<vmem>>, vector<1x4x32xf32>
    %192 = vector.shape_cast %191 : vector<1x4x32xf32> to vector<4x32xf32>
    %c1_96 = arith.constant 1 : index
    %c0_97 = arith.constant 0 : index
    %c0_98 = arith.constant 0 : index
    %193 = vector.load %arg2[%c1_96, %c0_97, %c0_98] : memref<4x2x32xf32, #tpu.memory_space<vmem>>, vector<1x2x32xf32>
    %194 = vector.shape_cast %193 : vector<1x2x32xf32> to vector<2x32xf32>
    %c1_99 = arith.constant 1 : index
    %c0_100 = arith.constant 0 : index
    %c0_101 = arith.constant 0 : index
    %195 = vector.load %arg3[%c1_99, %c0_100, %c0_101] : memref<4x4x4xf32, #tpu.memory_space<vmem>>, vector<1x4x4xf32>
    %196 = vector.shape_cast %195 : vector<1x4x4xf32> to vector<4x4xf32>
    %197 = arith.addf %190, %192 : vector<4x32xf32>
    %cst_102 = arith.constant dense<0.000000e+00> : vector<4x192xf32>
    %198 = tpu.matmul %190, %0, %cst_102 {dimension_numbers = #tpu.dot_dimension_numbers<[1], [0], [0], [1], [0, 0, 1, 1], [], []>} : vector<4x32xf32>, vector<32x192xf32>, vector<4x192xf32> -> vector<4x192xf32>
    %cst_103 = arith.constant dense<0.000000e+00> : vector<4x192xf32>
    %199 = tpu.matmul %192, %1, %cst_103 {dimension_numbers = #tpu.dot_dimension_numbers<[1], [0], [0], [1], [0, 0, 1, 1], [], []>} : vector<4x32xf32>, vector<32x192xf32>, vector<4x192xf32> -> vector<4x192xf32>
    %200 = arith.addf %198, %199 : vector<4x192xf32>
    %201 = vector.extract_strided_slice %200 {offsets = [0, 0], sizes = [4, 64], strides = [1, 1]} : vector<4x192xf32> to vector<4x64xf32>
    %202 = vector.extract_strided_slice %200 {offsets = [0, 64], sizes = [4, 64], strides = [1, 1]} : vector<4x192xf32> to vector<4x64xf32>
    %203 = vector.extract_strided_slice %200 {offsets = [0, 128], sizes = [4, 64], strides = [1, 1]} : vector<4x192xf32> to vector<4x64xf32>
    %204 = vector.extract_strided_slice %201 {offsets = [0, 0], sizes = [4, 32], strides = [1, 1]} : vector<4x64xf32> to vector<4x32xf32>
    %205 = vector.extract_strided_slice %202 {offsets = [0, 0], sizes = [4, 32], strides = [1, 1]} : vector<4x64xf32> to vector<4x32xf32>
    %206 = vector.extract_strided_slice %203 {offsets = [0, 0], sizes = [4, 32], strides = [1, 1]} : vector<4x64xf32> to vector<4x32xf32>
    %cst_104 = arith.constant dense<0.000000e+00> : vector<4x4xf32>
    %207 = tpu.matmul %204, %205, %cst_104 {dimension_numbers = #tpu.dot_dimension_numbers<[1], [1], [0], [0], [0, 0, 1, 0], [], []>} : vector<4x32xf32>, vector<4x32xf32>, vector<4x4xf32> -> vector<4x4xf32>
    %cst_105 = arith.constant 0.176776692 : f32
    %208 = vector.broadcast %cst_105 : f32 to vector<4x4xf32>
    %209 = arith.mulf %207, %208 : vector<4x4xf32>
    %210 = arith.addf %209, %196 : vector<4x4xf32>
    %cst_106 = arith.constant dense<0xFF800000> : vector<4xf32>
    %211 = vector.multi_reduction <maximumf>, %210, %cst_106 [1] : vector<4x4xf32> to vector<4xf32>
    %212 = vector.shape_cast %211 : vector<4xf32> to vector<4x1xf32>
    %213 = vector.broadcast %212 : vector<4x1xf32> to vector<4x4xf32>
    %214 = arith.subf %210, %213 : vector<4x4xf32>
    %215 = math.exp %214 : vector<4x4xf32>
    %cst_107 = arith.constant dense<0.000000e+00> : vector<4xf32>
    %216 = vector.multi_reduction <add>, %215, %cst_107 [1] : vector<4x4xf32> to vector<4xf32>
    %217 = vector.shape_cast %216 : vector<4xf32> to vector<4x1xf32>
    %218 = tpu.reciprocal %217 {approx = true} : vector<4x1xf32> -> vector<4x1xf32>
    %219 = vector.broadcast %218 : vector<4x1xf32> to vector<4x4xf32>
    %220 = arith.mulf %215, %219 : vector<4x4xf32>
    %cst_108 = arith.constant dense<0.000000e+00> : vector<4x32xf32>
    %221 = tpu.matmul %220, %206, %cst_108 {dimension_numbers = #tpu.dot_dimension_numbers<[1], [0], [0], [1], [0, 0, 1, 1], [], []>} : vector<4x4xf32>, vector<4x32xf32>, vector<4x32xf32> -> vector<4x32xf32>
    %222 = vector.extract_strided_slice %2 {offsets = [0, 0], sizes = [32, 32], strides = [1, 1]} : vector<64x32xf32> to vector<32x32xf32>
    %cst_109 = arith.constant dense<0.000000e+00> : vector<4x32xf32>
    %223 = tpu.matmul %221, %222, %cst_109 {dimension_numbers = #tpu.dot_dimension_numbers<[1], [0], [0], [1], [0, 0, 1, 1], [], []>} : vector<4x32xf32>, vector<32x32xf32>, vector<4x32xf32> -> vector<4x32xf32>
    %224 = vector.extract_strided_slice %201 {offsets = [0, 32], sizes = [4, 32], strides = [1, 1]} : vector<4x64xf32> to vector<4x32xf32>
    %225 = vector.extract_strided_slice %202 {offsets = [0, 32], sizes = [4, 32], strides = [1, 1]} : vector<4x64xf32> to vector<4x32xf32>
    %226 = vector.extract_strided_slice %203 {offsets = [0, 32], sizes = [4, 32], strides = [1, 1]} : vector<4x64xf32> to vector<4x32xf32>
    %cst_110 = arith.constant dense<0.000000e+00> : vector<4x4xf32>
    %227 = tpu.matmul %224, %225, %cst_110 {dimension_numbers = #tpu.dot_dimension_numbers<[1], [1], [0], [0], [0, 0, 1, 0], [], []>} : vector<4x32xf32>, vector<4x32xf32>, vector<4x4xf32> -> vector<4x4xf32>
    %cst_111 = arith.constant 0.176776692 : f32
    %228 = vector.broadcast %cst_111 : f32 to vector<4x4xf32>
    %229 = arith.mulf %227, %228 : vector<4x4xf32>
    %230 = arith.addf %229, %196 : vector<4x4xf32>
    %cst_112 = arith.constant dense<0xFF800000> : vector<4xf32>
    %231 = vector.multi_reduction <maximumf>, %230, %cst_112 [1] : vector<4x4xf32> to vector<4xf32>
    %232 = vector.shape_cast %231 : vector<4xf32> to vector<4x1xf32>
    %233 = vector.broadcast %232 : vector<4x1xf32> to vector<4x4xf32>
    %234 = arith.subf %230, %233 : vector<4x4xf32>
    %235 = math.exp %234 : vector<4x4xf32>
    %cst_113 = arith.constant dense<0.000000e+00> : vector<4xf32>
    %236 = vector.multi_reduction <add>, %235, %cst_113 [1] : vector<4x4xf32> to vector<4xf32>
    %237 = vector.shape_cast %236 : vector<4xf32> to vector<4x1xf32>
    %238 = tpu.reciprocal %237 {approx = true} : vector<4x1xf32> -> vector<4x1xf32>
    %239 = vector.broadcast %238 : vector<4x1xf32> to vector<4x4xf32>
    %240 = arith.mulf %235, %239 : vector<4x4xf32>
    %cst_114 = arith.constant dense<0.000000e+00> : vector<4x32xf32>
    %241 = tpu.matmul %240, %226, %cst_114 {dimension_numbers = #tpu.dot_dimension_numbers<[1], [0], [0], [1], [0, 0, 1, 1], [], []>} : vector<4x4xf32>, vector<4x32xf32>, vector<4x32xf32> -> vector<4x32xf32>
    %242 = vector.extract_strided_slice %2 {offsets = [32, 0], sizes = [32, 32], strides = [1, 1]} : vector<64x32xf32> to vector<32x32xf32>
    %cst_115 = arith.constant dense<0.000000e+00> : vector<4x32xf32>
    %243 = tpu.matmul %241, %242, %cst_115 {dimension_numbers = #tpu.dot_dimension_numbers<[1], [0], [0], [1], [0, 0, 1, 1], [], []>} : vector<4x32xf32>, vector<32x32xf32>, vector<4x32xf32> -> vector<4x32xf32>
    %244 = arith.addf %223, %243 : vector<4x32xf32>
    %245 = arith.addf %244, %197 : vector<4x32xf32>
    %cst_116 = arith.constant dense<0.000000e+00> : vector<4xf32>
    %246 = vector.multi_reduction <add>, %245, %cst_116 [1] : vector<4x32xf32> to vector<4xf32>
    %247 = vector.shape_cast %246 : vector<4xf32> to vector<4x1xf32>
    %cst_117 = arith.constant 3.200000e+01 : f32
    %248 = vector.broadcast %cst_117 : f32 to vector<4x1xf32>
    %249 = arith.divf %247, %248 : vector<4x1xf32>
    %250 = vector.broadcast %249 : vector<4x1xf32> to vector<4x32xf32>
    %251 = arith.subf %245, %250 : vector<4x32xf32>
    %252 = arith.mulf %251, %251 : vector<4x32xf32>
    %cst_118 = arith.constant dense<0.000000e+00> : vector<4xf32>
    %253 = vector.multi_reduction <add>, %252, %cst_118 [1] : vector<4x32xf32> to vector<4xf32>
    %254 = vector.shape_cast %253 : vector<4xf32> to vector<4x1xf32>
    %cst_119 = arith.constant 3.200000e+01 : f32
    %255 = vector.broadcast %cst_119 : f32 to vector<4x1xf32>
    %256 = arith.divf %254, %255 : vector<4x1xf32>
    %cst_120 = arith.constant 9.99999997E-7 : f32
    %257 = vector.broadcast %cst_120 : f32 to vector<4x1xf32>
    %258 = arith.addf %256, %257 : vector<4x1xf32>
    %259 = math.rsqrt %258 : vector<4x1xf32>
    %260 = vector.broadcast %259 : vector<4x1xf32> to vector<4x32xf32>
    %261 = arith.mulf %251, %260 : vector<4x32xf32>
    %262 = vector.broadcast %3 : vector<1x32xf32> to vector<4x32xf32>
    %263 = arith.mulf %261, %262 : vector<4x32xf32>
    %264 = vector.broadcast %4 : vector<1x32xf32> to vector<4x32xf32>
    %265 = arith.addf %263, %264 : vector<4x32xf32>
    %cst_121 = arith.constant dense<0.000000e+00> : vector<4x64xf32>
    %266 = tpu.matmul %265, %5, %cst_121 {dimension_numbers = #tpu.dot_dimension_numbers<[1], [0], [0], [1], [0, 0, 1, 1], [], []>} : vector<4x32xf32>, vector<32x64xf32>, vector<4x64xf32> -> vector<4x64xf32>
    %cst_122 = arith.constant dense<0.000000e+00> : vector<2x128xf32>
    %267 = tpu.matmul %194, %6, %cst_122 {dimension_numbers = #tpu.dot_dimension_numbers<[1], [0], [0], [1], [0, 0, 1, 1], [], []>} : vector<2x32xf32>, vector<32x128xf32>, vector<2x128xf32> -> vector<2x128xf32>
    %268 = vector.extract_strided_slice %267 {offsets = [0, 0], sizes = [2, 64], strides = [1, 1]} : vector<2x128xf32> to vector<2x64xf32>
    %269 = vector.extract_strided_slice %267 {offsets = [0, 64], sizes = [2, 64], strides = [1, 1]} : vector<2x128xf32> to vector<2x64xf32>
    %270 = vector.extract_strided_slice %266 {offsets = [0, 0], sizes = [4, 32], strides = [1, 1]} : vector<4x64xf32> to vector<4x32xf32>
    %271 = vector.extract_strided_slice %268 {offsets = [0, 0], sizes = [2, 32], strides = [1, 1]} : vector<2x64xf32> to vector<2x32xf32>
    %272 = vector.extract_strided_slice %269 {offsets = [0, 0], sizes = [2, 32], strides = [1, 1]} : vector<2x64xf32> to vector<2x32xf32>
    %cst_123 = arith.constant dense<0.000000e+00> : vector<4x2xf32>
    %273 = tpu.matmul %270, %271, %cst_123 {dimension_numbers = #tpu.dot_dimension_numbers<[1], [1], [0], [0], [0, 0, 1, 0], [], []>} : vector<4x32xf32>, vector<2x32xf32>, vector<4x2xf32> -> vector<4x2xf32>
    %cst_124 = arith.constant 0.176776692 : f32
    %274 = vector.broadcast %cst_124 : f32 to vector<4x2xf32>
    %275 = arith.mulf %273, %274 : vector<4x2xf32>
    %cst_125 = arith.constant dense<0xFF800000> : vector<4xf32>
    %276 = vector.multi_reduction <maximumf>, %275, %cst_125 [1] : vector<4x2xf32> to vector<4xf32>
    %277 = vector.shape_cast %276 : vector<4xf32> to vector<4x1xf32>
    %278 = vector.broadcast %277 : vector<4x1xf32> to vector<4x2xf32>
    %279 = arith.subf %275, %278 : vector<4x2xf32>
    %280 = math.exp %279 : vector<4x2xf32>
    %cst_126 = arith.constant dense<0.000000e+00> : vector<4xf32>
    %281 = vector.multi_reduction <add>, %280, %cst_126 [1] : vector<4x2xf32> to vector<4xf32>
    %282 = vector.shape_cast %281 : vector<4xf32> to vector<4x1xf32>
    %283 = tpu.reciprocal %282 {approx = true} : vector<4x1xf32> -> vector<4x1xf32>
    %284 = vector.broadcast %283 : vector<4x1xf32> to vector<4x2xf32>
    %285 = arith.mulf %280, %284 : vector<4x2xf32>
    %cst_127 = arith.constant dense<0.000000e+00> : vector<4x32xf32>
    %286 = tpu.matmul %285, %272, %cst_127 {dimension_numbers = #tpu.dot_dimension_numbers<[1], [0], [0], [1], [0, 0, 1, 1], [], []>} : vector<4x2xf32>, vector<2x32xf32>, vector<4x32xf32> -> vector<4x32xf32>
    %287 = vector.extract_strided_slice %7 {offsets = [0, 0], sizes = [32, 32], strides = [1, 1]} : vector<64x32xf32> to vector<32x32xf32>
    %cst_128 = arith.constant dense<0.000000e+00> : vector<4x32xf32>
    %288 = tpu.matmul %286, %287, %cst_128 {dimension_numbers = #tpu.dot_dimension_numbers<[1], [0], [0], [1], [0, 0, 1, 1], [], []>} : vector<4x32xf32>, vector<32x32xf32>, vector<4x32xf32> -> vector<4x32xf32>
    %289 = vector.extract_strided_slice %266 {offsets = [0, 32], sizes = [4, 32], strides = [1, 1]} : vector<4x64xf32> to vector<4x32xf32>
    %290 = vector.extract_strided_slice %268 {offsets = [0, 32], sizes = [2, 32], strides = [1, 1]} : vector<2x64xf32> to vector<2x32xf32>
    %291 = vector.extract_strided_slice %269 {offsets = [0, 32], sizes = [2, 32], strides = [1, 1]} : vector<2x64xf32> to vector<2x32xf32>
    %cst_129 = arith.constant dense<0.000000e+00> : vector<4x2xf32>
    %292 = tpu.matmul %289, %290, %cst_129 {dimension_numbers = #tpu.dot_dimension_numbers<[1], [1], [0], [0], [0, 0, 1, 0], [], []>} : vector<4x32xf32>, vector<2x32xf32>, vector<4x2xf32> -> vector<4x2xf32>
    %cst_130 = arith.constant 0.176776692 : f32
    %293 = vector.broadcast %cst_130 : f32 to vector<4x2xf32>
    %294 = arith.mulf %292, %293 : vector<4x2xf32>
    %cst_131 = arith.constant dense<0xFF800000> : vector<4xf32>
    %295 = vector.multi_reduction <maximumf>, %294, %cst_131 [1] : vector<4x2xf32> to vector<4xf32>
    %296 = vector.shape_cast %295 : vector<4xf32> to vector<4x1xf32>
    %297 = vector.broadcast %296 : vector<4x1xf32> to vector<4x2xf32>
    %298 = arith.subf %294, %297 : vector<4x2xf32>
    %299 = math.exp %298 : vector<4x2xf32>
    %cst_132 = arith.constant dense<0.000000e+00> : vector<4xf32>
    %300 = vector.multi_reduction <add>, %299, %cst_132 [1] : vector<4x2xf32> to vector<4xf32>
    %301 = vector.shape_cast %300 : vector<4xf32> to vector<4x1xf32>
    %302 = tpu.reciprocal %301 {approx = true} : vector<4x1xf32> -> vector<4x1xf32>
    %303 = vector.broadcast %302 : vector<4x1xf32> to vector<4x2xf32>
    %304 = arith.mulf %299, %303 : vector<4x2xf32>
    %cst_133 = arith.constant dense<0.000000e+00> : vector<4x32xf32>
    %305 = tpu.matmul %304, %291, %cst_133 {dimension_numbers = #tpu.dot_dimension_numbers<[1], [0], [0], [1], [0, 0, 1, 1], [], []>} : vector<4x2xf32>, vector<2x32xf32>, vector<4x32xf32> -> vector<4x32xf32>
    %306 = vector.extract_strided_slice %7 {offsets = [32, 0], sizes = [32, 32], strides = [1, 1]} : vector<64x32xf32> to vector<32x32xf32>
    %cst_134 = arith.constant dense<0.000000e+00> : vector<4x32xf32>
    %307 = tpu.matmul %305, %306, %cst_134 {dimension_numbers = #tpu.dot_dimension_numbers<[1], [0], [0], [1], [0, 0, 1, 1], [], []>} : vector<4x32xf32>, vector<32x32xf32>, vector<4x32xf32> -> vector<4x32xf32>
    %308 = arith.addf %288, %307 : vector<4x32xf32>
    %309 = arith.addf %308, %265 : vector<4x32xf32>
    %cst_135 = arith.constant dense<0.000000e+00> : vector<4xf32>
    %310 = vector.multi_reduction <add>, %309, %cst_135 [1] : vector<4x32xf32> to vector<4xf32>
    %311 = vector.shape_cast %310 : vector<4xf32> to vector<4x1xf32>
    %cst_136 = arith.constant 3.200000e+01 : f32
    %312 = vector.broadcast %cst_136 : f32 to vector<4x1xf32>
    %313 = arith.divf %311, %312 : vector<4x1xf32>
    %314 = vector.broadcast %313 : vector<4x1xf32> to vector<4x32xf32>
    %315 = arith.subf %309, %314 : vector<4x32xf32>
    %316 = arith.mulf %315, %315 : vector<4x32xf32>
    %cst_137 = arith.constant dense<0.000000e+00> : vector<4xf32>
    %317 = vector.multi_reduction <add>, %316, %cst_137 [1] : vector<4x32xf32> to vector<4xf32>
    %318 = vector.shape_cast %317 : vector<4xf32> to vector<4x1xf32>
    %cst_138 = arith.constant 3.200000e+01 : f32
    %319 = vector.broadcast %cst_138 : f32 to vector<4x1xf32>
    %320 = arith.divf %318, %319 : vector<4x1xf32>
    %cst_139 = arith.constant 9.99999997E-7 : f32
    %321 = vector.broadcast %cst_139 : f32 to vector<4x1xf32>
    %322 = arith.addf %320, %321 : vector<4x1xf32>
    %323 = math.rsqrt %322 : vector<4x1xf32>
    %324 = vector.broadcast %323 : vector<4x1xf32> to vector<4x32xf32>
    %325 = arith.mulf %315, %324 : vector<4x32xf32>
    %326 = vector.broadcast %8 : vector<1x32xf32> to vector<4x32xf32>
    %327 = arith.mulf %325, %326 : vector<4x32xf32>
    %328 = vector.broadcast %9 : vector<1x32xf32> to vector<4x32xf32>
    %329 = arith.addf %327, %328 : vector<4x32xf32>
    %cst_140 = arith.constant dense<0.000000e+00> : vector<4x64xf32>
    %330 = tpu.matmul %329, %10, %cst_140 {dimension_numbers = #tpu.dot_dimension_numbers<[1], [0], [0], [1], [0, 0, 1, 1], [], []>} : vector<4x32xf32>, vector<32x64xf32>, vector<4x64xf32> -> vector<4x64xf32>
    %331 = vector.broadcast %11 : vector<1x64xf32> to vector<4x64xf32>
    %332 = arith.addf %330, %331 : vector<4x64xf32>
    %cst_141 = arith.constant 0.000000e+00 : f32
    %333 = vector.broadcast %cst_141 : f32 to vector<4x64xf32>
    %334 = arith.maximumf %332, %333 : vector<4x64xf32>
    %cst_142 = arith.constant dense<0.000000e+00> : vector<4x32xf32>
    %335 = tpu.matmul %334, %12, %cst_142 {dimension_numbers = #tpu.dot_dimension_numbers<[1], [0], [0], [1], [0, 0, 1, 1], [], []>} : vector<4x64xf32>, vector<64x32xf32>, vector<4x32xf32> -> vector<4x32xf32>
    %336 = vector.broadcast %13 : vector<1x32xf32> to vector<4x32xf32>
    %337 = arith.addf %335, %336 : vector<4x32xf32>
    %338 = arith.addf %337, %329 : vector<4x32xf32>
    %cst_143 = arith.constant dense<0.000000e+00> : vector<4xf32>
    %339 = vector.multi_reduction <add>, %338, %cst_143 [1] : vector<4x32xf32> to vector<4xf32>
    %340 = vector.shape_cast %339 : vector<4xf32> to vector<4x1xf32>
    %cst_144 = arith.constant 3.200000e+01 : f32
    %341 = vector.broadcast %cst_144 : f32 to vector<4x1xf32>
    %342 = arith.divf %340, %341 : vector<4x1xf32>
    %343 = vector.broadcast %342 : vector<4x1xf32> to vector<4x32xf32>
    %344 = arith.subf %338, %343 : vector<4x32xf32>
    %345 = arith.mulf %344, %344 : vector<4x32xf32>
    %cst_145 = arith.constant dense<0.000000e+00> : vector<4xf32>
    %346 = vector.multi_reduction <add>, %345, %cst_145 [1] : vector<4x32xf32> to vector<4xf32>
    %347 = vector.shape_cast %346 : vector<4xf32> to vector<4x1xf32>
    %cst_146 = arith.constant 3.200000e+01 : f32
    %348 = vector.broadcast %cst_146 : f32 to vector<4x1xf32>
    %349 = arith.divf %347, %348 : vector<4x1xf32>
    %cst_147 = arith.constant 9.99999997E-7 : f32
    %350 = vector.broadcast %cst_147 : f32 to vector<4x1xf32>
    %351 = arith.addf %349, %350 : vector<4x1xf32>
    %352 = math.rsqrt %351 : vector<4x1xf32>
    %353 = vector.broadcast %352 : vector<4x1xf32> to vector<4x32xf32>
    %354 = arith.mulf %344, %353 : vector<4x32xf32>
    %355 = vector.broadcast %14 : vector<1x32xf32> to vector<4x32xf32>
    %356 = arith.mulf %354, %355 : vector<4x32xf32>
    %357 = vector.broadcast %15 : vector<1x32xf32> to vector<4x32xf32>
    %358 = arith.addf %356, %357 : vector<4x32xf32>
    %c1_148 = arith.constant 1 : index
    %c0_149 = arith.constant 0 : index
    %c0_150 = arith.constant 0 : index
    %359 = vector.load %arg40[%c1_148, %c0_149, %c0_150] : memref<4x4x32xf32, #tpu.memory_space<vmem>>, vector<1x4x32xf32>
    %360 = vector.shape_cast %359 : vector<1x4x32xf32> to vector<4x32xf32>
    %361 = vector.shape_cast %358 : vector<4x32xf32> to vector<1x4x32xf32>
    tpu.vector_store %arg40[%c1_148, %c0_149, %c0_150], %361 {strides = array<i32>} : memref<4x4x32xf32, #tpu.memory_space<vmem>>, vector<1x4x32xf32>,
    %c2 = arith.constant 2 : index
    %c0_151 = arith.constant 0 : index
    %c0_152 = arith.constant 0 : index
    %362 = vector.load %arg0[%c2, %c0_151, %c0_152] : memref<4x4x32xf32, #tpu.memory_space<vmem>>, vector<1x4x32xf32>
    %363 = vector.shape_cast %362 : vector<1x4x32xf32> to vector<4x32xf32>
    %c2_153 = arith.constant 2 : index
    %c0_154 = arith.constant 0 : index
    %c0_155 = arith.constant 0 : index
    %364 = vector.load %arg1[%c2_153, %c0_154, %c0_155] : memref<4x4x32xf32, #tpu.memory_space<vmem>>, vector<1x4x32xf32>
    %365 = vector.shape_cast %364 : vector<1x4x32xf32> to vector<4x32xf32>
    %c2_156 = arith.constant 2 : index
    %c0_157 = arith.constant 0 : index
    %c0_158 = arith.constant 0 : index
    %366 = vector.load %arg2[%c2_156, %c0_157, %c0_158] : memref<4x2x32xf32, #tpu.memory_space<vmem>>, vector<1x2x32xf32>
    %367 = vector.shape_cast %366 : vector<1x2x32xf32> to vector<2x32xf32>
    %c2_159 = arith.constant 2 : index
    %c0_160 = arith.constant 0 : index
    %c0_161 = arith.constant 0 : index
    %368 = vector.load %arg3[%c2_159, %c0_160, %c0_161] : memref<4x4x4xf32, #tpu.memory_space<vmem>>, vector<1x4x4xf32>
    %369 = vector.shape_cast %368 : vector<1x4x4xf32> to vector<4x4xf32>
    %370 = arith.addf %363, %365 : vector<4x32xf32>
    %cst_162 = arith.constant dense<0.000000e+00> : vector<4x192xf32>
    %371 = tpu.matmul %363, %0, %cst_162 {dimension_numbers = #tpu.dot_dimension_numbers<[1], [0], [0], [1], [0, 0, 1, 1], [], []>} : vector<4x32xf32>, vector<32x192xf32>, vector<4x192xf32> -> vector<4x192xf32>
    %cst_163 = arith.constant dense<0.000000e+00> : vector<4x192xf32>
    %372 = tpu.matmul %365, %1, %cst_163 {dimension_numbers = #tpu.dot_dimension_numbers<[1], [0], [0], [1], [0, 0, 1, 1], [], []>} : vector<4x32xf32>, vector<32x192xf32>, vector<4x192xf32> -> vector<4x192xf32>
    %373 = arith.addf %371, %372 : vector<4x192xf32>
    %374 = vector.extract_strided_slice %373 {offsets = [0, 0], sizes = [4, 64], strides = [1, 1]} : vector<4x192xf32> to vector<4x64xf32>
    %375 = vector.extract_strided_slice %373 {offsets = [0, 64], sizes = [4, 64], strides = [1, 1]} : vector<4x192xf32> to vector<4x64xf32>
    %376 = vector.extract_strided_slice %373 {offsets = [0, 128], sizes = [4, 64], strides = [1, 1]} : vector<4x192xf32> to vector<4x64xf32>
    %377 = vector.extract_strided_slice %374 {offsets = [0, 0], sizes = [4, 32], strides = [1, 1]} : vector<4x64xf32> to vector<4x32xf32>
    %378 = vector.extract_strided_slice %375 {offsets = [0, 0], sizes = [4, 32], strides = [1, 1]} : vector<4x64xf32> to vector<4x32xf32>
    %379 = vector.extract_strided_slice %376 {offsets = [0, 0], sizes = [4, 32], strides = [1, 1]} : vector<4x64xf32> to vector<4x32xf32>
    %cst_164 = arith.constant dense<0.000000e+00> : vector<4x4xf32>
    %380 = tpu.matmul %377, %378, %cst_164 {dimension_numbers = #tpu.dot_dimension_numbers<[1], [1], [0], [0], [0, 0, 1, 0], [], []>} : vector<4x32xf32>, vector<4x32xf32>, vector<4x4xf32> -> vector<4x4xf32>
    %cst_165 = arith.constant 0.176776692 : f32
    %381 = vector.broadcast %cst_165 : f32 to vector<4x4xf32>
    %382 = arith.mulf %380, %381 : vector<4x4xf32>
    %383 = arith.addf %382, %369 : vector<4x4xf32>
    %cst_166 = arith.constant dense<0xFF800000> : vector<4xf32>
    %384 = vector.multi_reduction <maximumf>, %383, %cst_166 [1] : vector<4x4xf32> to vector<4xf32>
    %385 = vector.shape_cast %384 : vector<4xf32> to vector<4x1xf32>
    %386 = vector.broadcast %385 : vector<4x1xf32> to vector<4x4xf32>
    %387 = arith.subf %383, %386 : vector<4x4xf32>
    %388 = math.exp %387 : vector<4x4xf32>
    %cst_167 = arith.constant dense<0.000000e+00> : vector<4xf32>
    %389 = vector.multi_reduction <add>, %388, %cst_167 [1] : vector<4x4xf32> to vector<4xf32>
    %390 = vector.shape_cast %389 : vector<4xf32> to vector<4x1xf32>
    %391 = tpu.reciprocal %390 {approx = true} : vector<4x1xf32> -> vector<4x1xf32>
    %392 = vector.broadcast %391 : vector<4x1xf32> to vector<4x4xf32>
    %393 = arith.mulf %388, %392 : vector<4x4xf32>
    %cst_168 = arith.constant dense<0.000000e+00> : vector<4x32xf32>
    %394 = tpu.matmul %393, %379, %cst_168 {dimension_numbers = #tpu.dot_dimension_numbers<[1], [0], [0], [1], [0, 0, 1, 1], [], []>} : vector<4x4xf32>, vector<4x32xf32>, vector<4x32xf32> -> vector<4x32xf32>
    %395 = vector.extract_strided_slice %2 {offsets = [0, 0], sizes = [32, 32], strides = [1, 1]} : vector<64x32xf32> to vector<32x32xf32>
    %cst_169 = arith.constant dense<0.000000e+00> : vector<4x32xf32>
    %396 = tpu.matmul %394, %395, %cst_169 {dimension_numbers = #tpu.dot_dimension_numbers<[1], [0], [0], [1], [0, 0, 1, 1], [], []>} : vector<4x32xf32>, vector<32x32xf32>, vector<4x32xf32> -> vector<4x32xf32>
    %397 = vector.extract_strided_slice %374 {offsets = [0, 32], sizes = [4, 32], strides = [1, 1]} : vector<4x64xf32> to vector<4x32xf32>
    %398 = vector.extract_strided_slice %375 {offsets = [0, 32], sizes = [4, 32], strides = [1, 1]} : vector<4x64xf32> to vector<4x32xf32>
    %399 = vector.extract_strided_slice %376 {offsets = [0, 32], sizes = [4, 32], strides = [1, 1]} : vector<4x64xf32> to vector<4x32xf32>
    %cst_170 = arith.constant dense<0.000000e+00> : vector<4x4xf32>
    %400 = tpu.matmul %397, %398, %cst_170 {dimension_numbers = #tpu.dot_dimension_numbers<[1], [1], [0], [0], [0, 0, 1, 0], [], []>} : vector<4x32xf32>, vector<4x32xf32>, vector<4x4xf32> -> vector<4x4xf32>
    %cst_171 = arith.constant 0.176776692 : f32
    %401 = vector.broadcast %cst_171 : f32 to vector<4x4xf32>
    %402 = arith.mulf %400, %401 : vector<4x4xf32>
    %403 = arith.addf %402, %369 : vector<4x4xf32>
    %cst_172 = arith.constant dense<0xFF800000> : vector<4xf32>
    %404 = vector.multi_reduction <maximumf>, %403, %cst_172 [1] : vector<4x4xf32> to vector<4xf32>
    %405 = vector.shape_cast %404 : vector<4xf32> to vector<4x1xf32>
    %406 = vector.broadcast %405 : vector<4x1xf32> to vector<4x4xf32>
    %407 = arith.subf %403, %406 : vector<4x4xf32>
    %408 = math.exp %407 : vector<4x4xf32>
    %cst_173 = arith.constant dense<0.000000e+00> : vector<4xf32>
    %409 = vector.multi_reduction <add>, %408, %cst_173 [1] : vector<4x4xf32> to vector<4xf32>
    %410 = vector.shape_cast %409 : vector<4xf32> to vector<4x1xf32>
    %411 = tpu.reciprocal %410 {approx = true} : vector<4x1xf32> -> vector<4x1xf32>
    %412 = vector.broadcast %411 : vector<4x1xf32> to vector<4x4xf32>
    %413 = arith.mulf %408, %412 : vector<4x4xf32>
    %cst_174 = arith.constant dense<0.000000e+00> : vector<4x32xf32>
    %414 = tpu.matmul %413, %399, %cst_174 {dimension_numbers = #tpu.dot_dimension_numbers<[1], [0], [0], [1], [0, 0, 1, 1], [], []>} : vector<4x4xf32>, vector<4x32xf32>, vector<4x32xf32> -> vector<4x32xf32>
    %415 = vector.extract_strided_slice %2 {offsets = [32, 0], sizes = [32, 32], strides = [1, 1]} : vector<64x32xf32> to vector<32x32xf32>
    %cst_175 = arith.constant dense<0.000000e+00> : vector<4x32xf32>
    %416 = tpu.matmul %414, %415, %cst_175 {dimension_numbers = #tpu.dot_dimension_numbers<[1], [0], [0], [1], [0, 0, 1, 1], [], []>} : vector<4x32xf32>, vector<32x32xf32>, vector<4x32xf32> -> vector<4x32xf32>
    %417 = arith.addf %396, %416 : vector<4x32xf32>
    %418 = arith.addf %417, %370 : vector<4x32xf32>
    %cst_176 = arith.constant dense<0.000000e+00> : vector<4xf32>
    %419 = vector.multi_reduction <add>, %418, %cst_176 [1] : vector<4x32xf32> to vector<4xf32>
    %420 = vector.shape_cast %419 : vector<4xf32> to vector<4x1xf32>
    %cst_177 = arith.constant 3.200000e+01 : f32
    %421 = vector.broadcast %cst_177 : f32 to vector<4x1xf32>
    %422 = arith.divf %420, %421 : vector<4x1xf32>
    %423 = vector.broadcast %422 : vector<4x1xf32> to vector<4x32xf32>
    %424 = arith.subf %418, %423 : vector<4x32xf32>
    %425 = arith.mulf %424, %424 : vector<4x32xf32>
    %cst_178 = arith.constant dense<0.000000e+00> : vector<4xf32>
    %426 = vector.multi_reduction <add>, %425, %cst_178 [1] : vector<4x32xf32> to vector<4xf32>
    %427 = vector.shape_cast %426 : vector<4xf32> to vector<4x1xf32>
    %cst_179 = arith.constant 3.200000e+01 : f32
    %428 = vector.broadcast %cst_179 : f32 to vector<4x1xf32>
    %429 = arith.divf %427, %428 : vector<4x1xf32>
    %cst_180 = arith.constant 9.99999997E-7 : f32
    %430 = vector.broadcast %cst_180 : f32 to vector<4x1xf32>
    %431 = arith.addf %429, %430 : vector<4x1xf32>
    %432 = math.rsqrt %431 : vector<4x1xf32>
    %433 = vector.broadcast %432 : vector<4x1xf32> to vector<4x32xf32>
    %434 = arith.mulf %424, %433 : vector<4x32xf32>
    %435 = vector.broadcast %3 : vector<1x32xf32> to vector<4x32xf32>
    %436 = arith.mulf %434, %435 : vector<4x32xf32>
    %437 = vector.broadcast %4 : vector<1x32xf32> to vector<4x32xf32>
    %438 = arith.addf %436, %437 : vector<4x32xf32>
    %cst_181 = arith.constant dense<0.000000e+00> : vector<4x64xf32>
    %439 = tpu.matmul %438, %5, %cst_181 {dimension_numbers = #tpu.dot_dimension_numbers<[1], [0], [0], [1], [0, 0, 1, 1], [], []>} : vector<4x32xf32>, vector<32x64xf32>, vector<4x64xf32> -> vector<4x64xf32>
    %cst_182 = arith.constant dense<0.000000e+00> : vector<2x128xf32>
    %440 = tpu.matmul %367, %6, %cst_182 {dimension_numbers = #tpu.dot_dimension_numbers<[1], [0], [0], [1], [0, 0, 1, 1], [], []>} : vector<2x32xf32>, vector<32x128xf32>, vector<2x128xf32> -> vector<2x128xf32>
    %441 = vector.extract_strided_slice %440 {offsets = [0, 0], sizes = [2, 64], strides = [1, 1]} : vector<2x128xf32> to vector<2x64xf32>
    %442 = vector.extract_strided_slice %440 {offsets = [0, 64], sizes = [2, 64], strides = [1, 1]} : vector<2x128xf32> to vector<2x64xf32>
    %443 = vector.extract_strided_slice %439 {offsets = [0, 0], sizes = [4, 32], strides = [1, 1]} : vector<4x64xf32> to vector<4x32xf32>
    %444 = vector.extract_strided_slice %441 {offsets = [0, 0], sizes = [2, 32], strides = [1, 1]} : vector<2x64xf32> to vector<2x32xf32>
    %445 = vector.extract_strided_slice %442 {offsets = [0, 0], sizes = [2, 32], strides = [1, 1]} : vector<2x64xf32> to vector<2x32xf32>
    %cst_183 = arith.constant dense<0.000000e+00> : vector<4x2xf32>
    %446 = tpu.matmul %443, %444, %cst_183 {dimension_numbers = #tpu.dot_dimension_numbers<[1], [1], [0], [0], [0, 0, 1, 0], [], []>} : vector<4x32xf32>, vector<2x32xf32>, vector<4x2xf32> -> vector<4x2xf32>
    %cst_184 = arith.constant 0.176776692 : f32
    %447 = vector.broadcast %cst_184 : f32 to vector<4x2xf32>
    %448 = arith.mulf %446, %447 : vector<4x2xf32>
    %cst_185 = arith.constant dense<0xFF800000> : vector<4xf32>
    %449 = vector.multi_reduction <maximumf>, %448, %cst_185 [1] : vector<4x2xf32> to vector<4xf32>
    %450 = vector.shape_cast %449 : vector<4xf32> to vector<4x1xf32>
    %451 = vector.broadcast %450 : vector<4x1xf32> to vector<4x2xf32>
    %452 = arith.subf %448, %451 : vector<4x2xf32>
    %453 = math.exp %452 : vector<4x2xf32>
    %cst_186 = arith.constant dense<0.000000e+00> : vector<4xf32>
    %454 = vector.multi_reduction <add>, %453, %cst_186 [1] : vector<4x2xf32> to vector<4xf32>
    %455 = vector.shape_cast %454 : vector<4xf32> to vector<4x1xf32>
    %456 = tpu.reciprocal %455 {approx = true} : vector<4x1xf32> -> vector<4x1xf32>
    %457 = vector.broadcast %456 : vector<4x1xf32> to vector<4x2xf32>
    %458 = arith.mulf %453, %457 : vector<4x2xf32>
    %cst_187 = arith.constant dense<0.000000e+00> : vector<4x32xf32>
    %459 = tpu.matmul %458, %445, %cst_187 {dimension_numbers = #tpu.dot_dimension_numbers<[1], [0], [0], [1], [0, 0, 1, 1], [], []>} : vector<4x2xf32>, vector<2x32xf32>, vector<4x32xf32> -> vector<4x32xf32>
    %460 = vector.extract_strided_slice %7 {offsets = [0, 0], sizes = [32, 32], strides = [1, 1]} : vector<64x32xf32> to vector<32x32xf32>
    %cst_188 = arith.constant dense<0.000000e+00> : vector<4x32xf32>
    %461 = tpu.matmul %459, %460, %cst_188 {dimension_numbers = #tpu.dot_dimension_numbers<[1], [0], [0], [1], [0, 0, 1, 1], [], []>} : vector<4x32xf32>, vector<32x32xf32>, vector<4x32xf32> -> vector<4x32xf32>
    %462 = vector.extract_strided_slice %439 {offsets = [0, 32], sizes = [4, 32], strides = [1, 1]} : vector<4x64xf32> to vector<4x32xf32>
    %463 = vector.extract_strided_slice %441 {offsets = [0, 32], sizes = [2, 32], strides = [1, 1]} : vector<2x64xf32> to vector<2x32xf32>
    %464 = vector.extract_strided_slice %442 {offsets = [0, 32], sizes = [2, 32], strides = [1, 1]} : vector<2x64xf32> to vector<2x32xf32>
    %cst_189 = arith.constant dense<0.000000e+00> : vector<4x2xf32>
    %465 = tpu.matmul %462, %463, %cst_189 {dimension_numbers = #tpu.dot_dimension_numbers<[1], [1], [0], [0], [0, 0, 1, 0], [], []>} : vector<4x32xf32>, vector<2x32xf32>, vector<4x2xf32> -> vector<4x2xf32>
    %cst_190 = arith.constant 0.176776692 : f32
    %466 = vector.broadcast %cst_190 : f32 to vector<4x2xf32>
    %467 = arith.mulf %465, %466 : vector<4x2xf32>
    %cst_191 = arith.constant dense<0xFF800000> : vector<4xf32>
    %468 = vector.multi_reduction <maximumf>, %467, %cst_191 [1] : vector<4x2xf32> to vector<4xf32>
    %469 = vector.shape_cast %468 : vector<4xf32> to vector<4x1xf32>
    %470 = vector.broadcast %469 : vector<4x1xf32> to vector<4x2xf32>
    %471 = arith.subf %467, %470 : vector<4x2xf32>
    %472 = math.exp %471 : vector<4x2xf32>
    %cst_192 = arith.constant dense<0.000000e+00> : vector<4xf32>
    %473 = vector.multi_reduction <add>, %472, %cst_192 [1] : vector<4x2xf32> to vector<4xf32>
    %474 = vector.shape_cast %473 : vector<4xf32> to vector<4x1xf32>
    %475 = tpu.reciprocal %474 {approx = true} : vector<4x1xf32> -> vector<4x1xf32>
    %476 = vector.broadcast %475 : vector<4x1xf32> to vector<4x2xf32>
    %477 = arith.mulf %472, %476 : vector<4x2xf32>
    %cst_193 = arith.constant dense<0.000000e+00> : vector<4x32xf32>
    %478 = tpu.matmul %477, %464, %cst_193 {dimension_numbers = #tpu.dot_dimension_numbers<[1], [0], [0], [1], [0, 0, 1, 1], [], []>} : vector<4x2xf32>, vector<2x32xf32>, vector<4x32xf32> -> vector<4x32xf32>
    %479 = vector.extract_strided_slice %7 {offsets = [32, 0], sizes = [32, 32], strides = [1, 1]} : vector<64x32xf32> to vector<32x32xf32>
    %cst_194 = arith.constant dense<0.000000e+00> : vector<4x32xf32>
    %480 = tpu.matmul %478, %479, %cst_194 {dimension_numbers = #tpu.dot_dimension_numbers<[1], [0], [0], [1], [0, 0, 1, 1], [], []>} : vector<4x32xf32>, vector<32x32xf32>, vector<4x32xf32> -> vector<4x32xf32>
    %481 = arith.addf %461, %480 : vector<4x32xf32>
    %482 = arith.addf %481, %438 : vector<4x32xf32>
    %cst_195 = arith.constant dense<0.000000e+00> : vector<4xf32>
    %483 = vector.multi_reduction <add>, %482, %cst_195 [1] : vector<4x32xf32> to vector<4xf32>
    %484 = vector.shape_cast %483 : vector<4xf32> to vector<4x1xf32>
    %cst_196 = arith.constant 3.200000e+01 : f32
    %485 = vector.broadcast %cst_196 : f32 to vector<4x1xf32>
    %486 = arith.divf %484, %485 : vector<4x1xf32>
    %487 = vector.broadcast %486 : vector<4x1xf32> to vector<4x32xf32>
    %488 = arith.subf %482, %487 : vector<4x32xf32>
    %489 = arith.mulf %488, %488 : vector<4x32xf32>
    %cst_197 = arith.constant dense<0.000000e+00> : vector<4xf32>
    %490 = vector.multi_reduction <add>, %489, %cst_197 [1] : vector<4x32xf32> to vector<4xf32>
    %491 = vector.shape_cast %490 : vector<4xf32> to vector<4x1xf32>
    %cst_198 = arith.constant 3.200000e+01 : f32
    %492 = vector.broadcast %cst_198 : f32 to vector<4x1xf32>
    %493 = arith.divf %491, %492 : vector<4x1xf32>
    %cst_199 = arith.constant 9.99999997E-7 : f32
    %494 = vector.broadcast %cst_199 : f32 to vector<4x1xf32>
    %495 = arith.addf %493, %494 : vector<4x1xf32>
    %496 = math.rsqrt %495 : vector<4x1xf32>
    %497 = vector.broadcast %496 : vector<4x1xf32> to vector<4x32xf32>
    %498 = arith.mulf %488, %497 : vector<4x32xf32>
    %499 = vector.broadcast %8 : vector<1x32xf32> to vector<4x32xf32>
    %500 = arith.mulf %498, %499 : vector<4x32xf32>
    %501 = vector.broadcast %9 : vector<1x32xf32> to vector<4x32xf32>
    %502 = arith.addf %500, %501 : vector<4x32xf32>
    %cst_200 = arith.constant dense<0.000000e+00> : vector<4x64xf32>
    %503 = tpu.matmul %502, %10, %cst_200 {dimension_numbers = #tpu.dot_dimension_numbers<[1], [0], [0], [1], [0, 0, 1, 1], [], []>} : vector<4x32xf32>, vector<32x64xf32>, vector<4x64xf32> -> vector<4x64xf32>
    %504 = vector.broadcast %11 : vector<1x64xf32> to vector<4x64xf32>
    %505 = arith.addf %503, %504 : vector<4x64xf32>
    %cst_201 = arith.constant 0.000000e+00 : f32
    %506 = vector.broadcast %cst_201 : f32 to vector<4x64xf32>
    %507 = arith.maximumf %505, %506 : vector<4x64xf32>
    %cst_202 = arith.constant dense<0.000000e+00> : vector<4x32xf32>
    %508 = tpu.matmul %507, %12, %cst_202 {dimension_numbers = #tpu.dot_dimension_numbers<[1], [0], [0], [1], [0, 0, 1, 1], [], []>} : vector<4x64xf32>, vector<64x32xf32>, vector<4x32xf32> -> vector<4x32xf32>
    %509 = vector.broadcast %13 : vector<1x32xf32> to vector<4x32xf32>
    %510 = arith.addf %508, %509 : vector<4x32xf32>
    %511 = arith.addf %510, %502 : vector<4x32xf32>
    %cst_203 = arith.constant dense<0.000000e+00> : vector<4xf32>
    %512 = vector.multi_reduction <add>, %511, %cst_203 [1] : vector<4x32xf32> to vector<4xf32>
    %513 = vector.shape_cast %512 : vector<4xf32> to vector<4x1xf32>
    %cst_204 = arith.constant 3.200000e+01 : f32
    %514 = vector.broadcast %cst_204 : f32 to vector<4x1xf32>
    %515 = arith.divf %513, %514 : vector<4x1xf32>
    %516 = vector.broadcast %515 : vector<4x1xf32> to vector<4x32xf32>
    %517 = arith.subf %511, %516 : vector<4x32xf32>
    %518 = arith.mulf %517, %517 : vector<4x32xf32>
    %cst_205 = arith.constant dense<0.000000e+00> : vector<4xf32>
    %519 = vector.multi_reduction <add>, %518, %cst_205 [1] : vector<4x32xf32> to vector<4xf32>
    %520 = vector.shape_cast %519 : vector<4xf32> to vector<4x1xf32>
    %cst_206 = arith.constant 3.200000e+01 : f32
    %521 = vector.broadcast %cst_206 : f32 to vector<4x1xf32>
    %522 = arith.divf %520, %521 : vector<4x1xf32>
    %cst_207 = arith.constant 9.99999997E-7 : f32
    %523 = vector.broadcast %cst_207 : f32 to vector<4x1xf32>
    %524 = arith.addf %522, %523 : vector<4x1xf32>
    %525 = math.rsqrt %524 : vector<4x1xf32>
    %526 = vector.broadcast %525 : vector<4x1xf32> to vector<4x32xf32>
    %527 = arith.mulf %517, %526 : vector<4x32xf32>
    %528 = vector.broadcast %14 : vector<1x32xf32> to vector<4x32xf32>
    %529 = arith.mulf %527, %528 : vector<4x32xf32>
    %530 = vector.broadcast %15 : vector<1x32xf32> to vector<4x32xf32>
    %531 = arith.addf %529, %530 : vector<4x32xf32>
    %c2_208 = arith.constant 2 : index
    %c0_209 = arith.constant 0 : index
    %c0_210 = arith.constant 0 : index
    %532 = vector.load %arg40[%c2_208, %c0_209, %c0_210] : memref<4x4x32xf32, #tpu.memory_space<vmem>>, vector<1x4x32xf32>
    %533 = vector.shape_cast %532 : vector<1x4x32xf32> to vector<4x32xf32>
    %534 = vector.shape_cast %531 : vector<4x32xf32> to vector<1x4x32xf32>
    tpu.vector_store %arg40[%c2_208, %c0_209, %c0_210], %534 {strides = array<i32>} : memref<4x4x32xf32, #tpu.memory_space<vmem>>, vector<1x4x32xf32>,
    %c3 = arith.constant 3 : index
    %c0_211 = arith.constant 0 : index
    %c0_212 = arith.constant 0 : index
    %535 = vector.load %arg0[%c3, %c0_211, %c0_212] : memref<4x4x32xf32, #tpu.memory_space<vmem>>, vector<1x4x32xf32>
    %536 = vector.shape_cast %535 : vector<1x4x32xf32> to vector<4x32xf32>
    %c3_213 = arith.constant 3 : index
    %c0_214 = arith.constant 0 : index
    %c0_215 = arith.constant 0 : index
    %537 = vector.load %arg1[%c3_213, %c0_214, %c0_215] : memref<4x4x32xf32, #tpu.memory_space<vmem>>, vector<1x4x32xf32>
    %538 = vector.shape_cast %537 : vector<1x4x32xf32> to vector<4x32xf32>
    %c3_216 = arith.constant 3 : index
    %c0_217 = arith.constant 0 : index
    %c0_218 = arith.constant 0 : index
    %539 = vector.load %arg2[%c3_216, %c0_217, %c0_218] : memref<4x2x32xf32, #tpu.memory_space<vmem>>, vector<1x2x32xf32>
    %540 = vector.shape_cast %539 : vector<1x2x32xf32> to vector<2x32xf32>
    %c3_219 = arith.constant 3 : index
    %c0_220 = arith.constant 0 : index
    %c0_221 = arith.constant 0 : index
    %541 = vector.load %arg3[%c3_219, %c0_220, %c0_221] : memref<4x4x4xf32, #tpu.memory_space<vmem>>, vector<1x4x4xf32>
    %542 = vector.shape_cast %541 : vector<1x4x4xf32> to vector<4x4xf32>
    %543 = arith.addf %536, %538 : vector<4x32xf32>
    %cst_222 = arith.constant dense<0.000000e+00> : vector<4x192xf32>
    %544 = tpu.matmul %536, %0, %cst_222 {dimension_numbers = #tpu.dot_dimension_numbers<[1], [0], [0], [1], [0, 0, 1, 1], [], []>} : vector<4x32xf32>, vector<32x192xf32>, vector<4x192xf32> -> vector<4x192xf32>
    %cst_223 = arith.constant dense<0.000000e+00> : vector<4x192xf32>
    %545 = tpu.matmul %538, %1, %cst_223 {dimension_numbers = #tpu.dot_dimension_numbers<[1], [0], [0], [1], [0, 0, 1, 1], [], []>} : vector<4x32xf32>, vector<32x192xf32>, vector<4x192xf32> -> vector<4x192xf32>
    %546 = arith.addf %544, %545 : vector<4x192xf32>
    %547 = vector.extract_strided_slice %546 {offsets = [0, 0], sizes = [4, 64], strides = [1, 1]} : vector<4x192xf32> to vector<4x64xf32>
    %548 = vector.extract_strided_slice %546 {offsets = [0, 64], sizes = [4, 64], strides = [1, 1]} : vector<4x192xf32> to vector<4x64xf32>
    %549 = vector.extract_strided_slice %546 {offsets = [0, 128], sizes = [4, 64], strides = [1, 1]} : vector<4x192xf32> to vector<4x64xf32>
    %550 = vector.extract_strided_slice %547 {offsets = [0, 0], sizes = [4, 32], strides = [1, 1]} : vector<4x64xf32> to vector<4x32xf32>
    %551 = vector.extract_strided_slice %548 {offsets = [0, 0], sizes = [4, 32], strides = [1, 1]} : vector<4x64xf32> to vector<4x32xf32>
    %552 = vector.extract_strided_slice %549 {offsets = [0, 0], sizes = [4, 32], strides = [1, 1]} : vector<4x64xf32> to vector<4x32xf32>
    %cst_224 = arith.constant dense<0.000000e+00> : vector<4x4xf32>
    %553 = tpu.matmul %550, %551, %cst_224 {dimension_numbers = #tpu.dot_dimension_numbers<[1], [1], [0], [0], [0, 0, 1, 0], [], []>} : vector<4x32xf32>, vector<4x32xf32>, vector<4x4xf32> -> vector<4x4xf32>
    %cst_225 = arith.constant 0.176776692 : f32
    %554 = vector.broadcast %cst_225 : f32 to vector<4x4xf32>
    %555 = arith.mulf %553, %554 : vector<4x4xf32>
    %556 = arith.addf %555, %542 : vector<4x4xf32>
    %cst_226 = arith.constant dense<0xFF800000> : vector<4xf32>
    %557 = vector.multi_reduction <maximumf>, %556, %cst_226 [1] : vector<4x4xf32> to vector<4xf32>
    %558 = vector.shape_cast %557 : vector<4xf32> to vector<4x1xf32>
    %559 = vector.broadcast %558 : vector<4x1xf32> to vector<4x4xf32>
    %560 = arith.subf %556, %559 : vector<4x4xf32>
    %561 = math.exp %560 : vector<4x4xf32>
    %cst_227 = arith.constant dense<0.000000e+00> : vector<4xf32>
    %562 = vector.multi_reduction <add>, %561, %cst_227 [1] : vector<4x4xf32> to vector<4xf32>
    %563 = vector.shape_cast %562 : vector<4xf32> to vector<4x1xf32>
    %564 = tpu.reciprocal %563 {approx = true} : vector<4x1xf32> -> vector<4x1xf32>
    %565 = vector.broadcast %564 : vector<4x1xf32> to vector<4x4xf32>
    %566 = arith.mulf %561, %565 : vector<4x4xf32>
    %cst_228 = arith.constant dense<0.000000e+00> : vector<4x32xf32>
    %567 = tpu.matmul %566, %552, %cst_228 {dimension_numbers = #tpu.dot_dimension_numbers<[1], [0], [0], [1], [0, 0, 1, 1], [], []>} : vector<4x4xf32>, vector<4x32xf32>, vector<4x32xf32> -> vector<4x32xf32>
    %568 = vector.extract_strided_slice %2 {offsets = [0, 0], sizes = [32, 32], strides = [1, 1]} : vector<64x32xf32> to vector<32x32xf32>
    %cst_229 = arith.constant dense<0.000000e+00> : vector<4x32xf32>
    %569 = tpu.matmul %567, %568, %cst_229 {dimension_numbers = #tpu.dot_dimension_numbers<[1], [0], [0], [1], [0, 0, 1, 1], [], []>} : vector<4x32xf32>, vector<32x32xf32>, vector<4x32xf32> -> vector<4x32xf32>
    %570 = vector.extract_strided_slice %547 {offsets = [0, 32], sizes = [4, 32], strides = [1, 1]} : vector<4x64xf32> to vector<4x32xf32>
    %571 = vector.extract_strided_slice %548 {offsets = [0, 32], sizes = [4, 32], strides = [1, 1]} : vector<4x64xf32> to vector<4x32xf32>
    %572 = vector.extract_strided_slice %549 {offsets = [0, 32], sizes = [4, 32], strides = [1, 1]} : vector<4x64xf32> to vector<4x32xf32>
    %cst_230 = arith.constant dense<0.000000e+00> : vector<4x4xf32>
    %573 = tpu.matmul %570, %571, %cst_230 {dimension_numbers = #tpu.dot_dimension_numbers<[1], [1], [0], [0], [0, 0, 1, 0], [], []>} : vector<4x32xf32>, vector<4x32xf32>, vector<4x4xf32> -> vector<4x4xf32>
    %cst_231 = arith.constant 0.176776692 : f32
    %574 = vector.broadcast %cst_231 : f32 to vector<4x4xf32>
    %575 = arith.mulf %573, %574 : vector<4x4xf32>
    %576 = arith.addf %575, %542 : vector<4x4xf32>
    %cst_232 = arith.constant dense<0xFF800000> : vector<4xf32>
    %577 = vector.multi_reduction <maximumf>, %576, %cst_232 [1] : vector<4x4xf32> to vector<4xf32>
    %578 = vector.shape_cast %577 : vector<4xf32> to vector<4x1xf32>
    %579 = vector.broadcast %578 : vector<4x1xf32> to vector<4x4xf32>
    %580 = arith.subf %576, %579 : vector<4x4xf32>
    %581 = math.exp %580 : vector<4x4xf32>
    %cst_233 = arith.constant dense<0.000000e+00> : vector<4xf32>
    %582 = vector.multi_reduction <add>, %581, %cst_233 [1] : vector<4x4xf32> to vector<4xf32>
    %583 = vector.shape_cast %582 : vector<4xf32> to vector<4x1xf32>
    %584 = tpu.reciprocal %583 {approx = true} : vector<4x1xf32> -> vector<4x1xf32>
    %585 = vector.broadcast %584 : vector<4x1xf32> to vector<4x4xf32>
    %586 = arith.mulf %581, %585 : vector<4x4xf32>
    %cst_234 = arith.constant dense<0.000000e+00> : vector<4x32xf32>
    %587 = tpu.matmul %586, %572, %cst_234 {dimension_numbers = #tpu.dot_dimension_numbers<[1], [0], [0], [1], [0, 0, 1, 1], [], []>} : vector<4x4xf32>, vector<4x32xf32>, vector<4x32xf32> -> vector<4x32xf32>
    %588 = vector.extract_strided_slice %2 {offsets = [32, 0], sizes = [32, 32], strides = [1, 1]} : vector<64x32xf32> to vector<32x32xf32>
    %cst_235 = arith.constant dense<0.000000e+00> : vector<4x32xf32>
    %589 = tpu.matmul %587, %588, %cst_235 {dimension_numbers = #tpu.dot_dimension_numbers<[1], [0], [0], [1], [0, 0, 1, 1], [], []>} : vector<4x32xf32>, vector<32x32xf32>, vector<4x32xf32> -> vector<4x32xf32>
    %590 = arith.addf %569, %589 : vector<4x32xf32>
    %591 = arith.addf %590, %543 : vector<4x32xf32>
    %cst_236 = arith.constant dense<0.000000e+00> : vector<4xf32>
    %592 = vector.multi_reduction <add>, %591, %cst_236 [1] : vector<4x32xf32> to vector<4xf32>
    %593 = vector.shape_cast %592 : vector<4xf32> to vector<4x1xf32>
    %cst_237 = arith.constant 3.200000e+01 : f32
    %594 = vector.broadcast %cst_237 : f32 to vector<4x1xf32>
    %595 = arith.divf %593, %594 : vector<4x1xf32>
    %596 = vector.broadcast %595 : vector<4x1xf32> to vector<4x32xf32>
    %597 = arith.subf %591, %596 : vector<4x32xf32>
    %598 = arith.mulf %597, %597 : vector<4x32xf32>
    %cst_238 = arith.constant dense<0.000000e+00> : vector<4xf32>
    %599 = vector.multi_reduction <add>, %598, %cst_238 [1] : vector<4x32xf32> to vector<4xf32>
    %600 = vector.shape_cast %599 : vector<4xf32> to vector<4x1xf32>
    %cst_239 = arith.constant 3.200000e+01 : f32
    %601 = vector.broadcast %cst_239 : f32 to vector<4x1xf32>
    %602 = arith.divf %600, %601 : vector<4x1xf32>
    %cst_240 = arith.constant 9.99999997E-7 : f32
    %603 = vector.broadcast %cst_240 : f32 to vector<4x1xf32>
    %604 = arith.addf %602, %603 : vector<4x1xf32>
    %605 = math.rsqrt %604 : vector<4x1xf32>
    %606 = vector.broadcast %605 : vector<4x1xf32> to vector<4x32xf32>
    %607 = arith.mulf %597, %606 : vector<4x32xf32>
    %608 = vector.broadcast %3 : vector<1x32xf32> to vector<4x32xf32>
    %609 = arith.mulf %607, %608 : vector<4x32xf32>
    %610 = vector.broadcast %4 : vector<1x32xf32> to vector<4x32xf32>
    %611 = arith.addf %609, %610 : vector<4x32xf32>
    %cst_241 = arith.constant dense<0.000000e+00> : vector<4x64xf32>
    %612 = tpu.matmul %611, %5, %cst_241 {dimension_numbers = #tpu.dot_dimension_numbers<[1], [0], [0], [1], [0, 0, 1, 1], [], []>} : vector<4x32xf32>, vector<32x64xf32>, vector<4x64xf32> -> vector<4x64xf32>
    %cst_242 = arith.constant dense<0.000000e+00> : vector<2x128xf32>
    %613 = tpu.matmul %540, %6, %cst_242 {dimension_numbers = #tpu.dot_dimension_numbers<[1], [0], [0], [1], [0, 0, 1, 1], [], []>} : vector<2x32xf32>, vector<32x128xf32>, vector<2x128xf32> -> vector<2x128xf32>
    %614 = vector.extract_strided_slice %613 {offsets = [0, 0], sizes = [2, 64], strides = [1, 1]} : vector<2x128xf32> to vector<2x64xf32>
    %615 = vector.extract_strided_slice %613 {offsets = [0, 64], sizes = [2, 64], strides = [1, 1]} : vector<2x128xf32> to vector<2x64xf32>
    %616 = vector.extract_strided_slice %612 {offsets = [0, 0], sizes = [4, 32], strides = [1, 1]} : vector<4x64xf32> to vector<4x32xf32>
    %617 = vector.extract_strided_slice %614 {offsets = [0, 0], sizes = [2, 32], strides = [1, 1]} : vector<2x64xf32> to vector<2x32xf32>
    %618 = vector.extract_strided_slice %615 {offsets = [0, 0], sizes = [2, 32], strides = [1, 1]} : vector<2x64xf32> to vector<2x32xf32>
    %cst_243 = arith.constant dense<0.000000e+00> : vector<4x2xf32>
    %619 = tpu.matmul %616, %617, %cst_243 {dimension_numbers = #tpu.dot_dimension_numbers<[1], [1], [0], [0], [0, 0, 1, 0], [], []>} : vector<4x32xf32>, vector<2x32xf32>, vector<4x2xf32> -> vector<4x2xf32>
    %cst_244 = arith.constant 0.176776692 : f32
    %620 = vector.broadcast %cst_244 : f32 to vector<4x2xf32>
    %621 = arith.mulf %619, %620 : vector<4x2xf32>
    %cst_245 = arith.constant dense<0xFF800000> : vector<4xf32>
    %622 = vector.multi_reduction <maximumf>, %621, %cst_245 [1] : vector<4x2xf32> to vector<4xf32>
    %623 = vector.shape_cast %622 : vector<4xf32> to vector<4x1xf32>
    %624 = vector.broadcast %623 : vector<4x1xf32> to vector<4x2xf32>
    %625 = arith.subf %621, %624 : vector<4x2xf32>
    %626 = math.exp %625 : vector<4x2xf32>
    %cst_246 = arith.constant dense<0.000000e+00> : vector<4xf32>
    %627 = vector.multi_reduction <add>, %626, %cst_246 [1] : vector<4x2xf32> to vector<4xf32>
    %628 = vector.shape_cast %627 : vector<4xf32> to vector<4x1xf32>
    %629 = tpu.reciprocal %628 {approx = true} : vector<4x1xf32> -> vector<4x1xf32>
    %630 = vector.broadcast %629 : vector<4x1xf32> to vector<4x2xf32>
    %631 = arith.mulf %626, %630 : vector<4x2xf32>
    %cst_247 = arith.constant dense<0.000000e+00> : vector<4x32xf32>
    %632 = tpu.matmul %631, %618, %cst_247 {dimension_numbers = #tpu.dot_dimension_numbers<[1], [0], [0], [1], [0, 0, 1, 1], [], []>} : vector<4x2xf32>, vector<2x32xf32>, vector<4x32xf32> -> vector<4x32xf32>
    %633 = vector.extract_strided_slice %7 {offsets = [0, 0], sizes = [32, 32], strides = [1, 1]} : vector<64x32xf32> to vector<32x32xf32>
    %cst_248 = arith.constant dense<0.000000e+00> : vector<4x32xf32>
    %634 = tpu.matmul %632, %633, %cst_248 {dimension_numbers = #tpu.dot_dimension_numbers<[1], [0], [0], [1], [0, 0, 1, 1], [], []>} : vector<4x32xf32>, vector<32x32xf32>, vector<4x32xf32> -> vector<4x32xf32>
    %635 = vector.extract_strided_slice %612 {offsets = [0, 32], sizes = [4, 32], strides = [1, 1]} : vector<4x64xf32> to vector<4x32xf32>
    %636 = vector.extract_strided_slice %614 {offsets = [0, 32], sizes = [2, 32], strides = [1, 1]} : vector<2x64xf32> to vector<2x32xf32>
    %637 = vector.extract_strided_slice %615 {offsets = [0, 32], sizes = [2, 32], strides = [1, 1]} : vector<2x64xf32> to vector<2x32xf32>
    %cst_249 = arith.constant dense<0.000000e+00> : vector<4x2xf32>
    %638 = tpu.matmul %635, %636, %cst_249 {dimension_numbers = #tpu.dot_dimension_numbers<[1], [1], [0], [0], [0, 0, 1, 0], [], []>} : vector<4x32xf32>, vector<2x32xf32>, vector<4x2xf32> -> vector<4x2xf32>
    %cst_250 = arith.constant 0.176776692 : f32
    %639 = vector.broadcast %cst_250 : f32 to vector<4x2xf32>
    %640 = arith.mulf %638, %639 : vector<4x2xf32>
    %cst_251 = arith.constant dense<0xFF800000> : vector<4xf32>
    %641 = vector.multi_reduction <maximumf>, %640, %cst_251 [1] : vector<4x2xf32> to vector<4xf32>
    %642 = vector.shape_cast %641 : vector<4xf32> to vector<4x1xf32>
    %643 = vector.broadcast %642 : vector<4x1xf32> to vector<4x2xf32>
    %644 = arith.subf %640, %643 : vector<4x2xf32>
    %645 = math.exp %644 : vector<4x2xf32>
    %cst_252 = arith.constant dense<0.000000e+00> : vector<4xf32>
    %646 = vector.multi_reduction <add>, %645, %cst_252 [1] : vector<4x2xf32> to vector<4xf32>
    %647 = vector.shape_cast %646 : vector<4xf32> to vector<4x1xf32>
    %648 = tpu.reciprocal %647 {approx = true} : vector<4x1xf32> -> vector<4x1xf32>
    %649 = vector.broadcast %648 : vector<4x1xf32> to vector<4x2xf32>
    %650 = arith.mulf %645, %649 : vector<4x2xf32>
    %cst_253 = arith.constant dense<0.000000e+00> : vector<4x32xf32>
    %651 = tpu.matmul %650, %637, %cst_253 {dimension_numbers = #tpu.dot_dimension_numbers<[1], [0], [0], [1], [0, 0, 1, 1], [], []>} : vector<4x2xf32>, vector<2x32xf32>, vector<4x32xf32> -> vector<4x32xf32>
    %652 = vector.extract_strided_slice %7 {offsets = [32, 0], sizes = [32, 32], strides = [1, 1]} : vector<64x32xf32> to vector<32x32xf32>
    %cst_254 = arith.constant dense<0.000000e+00> : vector<4x32xf32>
    %653 = tpu.matmul %651, %652, %cst_254 {dimension_numbers = #tpu.dot_dimension_numbers<[1], [0], [0], [1], [0, 0, 1, 1], [], []>} : vector<4x32xf32>, vector<32x32xf32>, vector<4x32xf32> -> vector<4x32xf32>
    %654 = arith.addf %634, %653 : vector<4x32xf32>
    %655 = arith.addf %654, %611 : vector<4x32xf32>
    %cst_255 = arith.constant dense<0.000000e+00> : vector<4xf32>
    %656 = vector.multi_reduction <add>, %655, %cst_255 [1] : vector<4x32xf32> to vector<4xf32>
    %657 = vector.shape_cast %656 : vector<4xf32> to vector<4x1xf32>
    %cst_256 = arith.constant 3.200000e+01 : f32
    %658 = vector.broadcast %cst_256 : f32 to vector<4x1xf32>
    %659 = arith.divf %657, %658 : vector<4x1xf32>
    %660 = vector.broadcast %659 : vector<4x1xf32> to vector<4x32xf32>
    %661 = arith.subf %655, %660 : vector<4x32xf32>
    %662 = arith.mulf %661, %661 : vector<4x32xf32>
    %cst_257 = arith.constant dense<0.000000e+00> : vector<4xf32>
    %663 = vector.multi_reduction <add>, %662, %cst_257 [1] : vector<4x32xf32> to vector<4xf32>
    %664 = vector.shape_cast %663 : vector<4xf32> to vector<4x1xf32>
    %cst_258 = arith.constant 3.200000e+01 : f32
    %665 = vector.broadcast %cst_258 : f32 to vector<4x1xf32>
    %666 = arith.divf %664, %665 : vector<4x1xf32>
    %cst_259 = arith.constant 9.99999997E-7 : f32
    %667 = vector.broadcast %cst_259 : f32 to vector<4x1xf32>
    %668 = arith.addf %666, %667 : vector<4x1xf32>
    %669 = math.rsqrt %668 : vector<4x1xf32>
    %670 = vector.broadcast %669 : vector<4x1xf32> to vector<4x32xf32>
    %671 = arith.mulf %661, %670 : vector<4x32xf32>
    %672 = vector.broadcast %8 : vector<1x32xf32> to vector<4x32xf32>
    %673 = arith.mulf %671, %672 : vector<4x32xf32>
    %674 = vector.broadcast %9 : vector<1x32xf32> to vector<4x32xf32>
    %675 = arith.addf %673, %674 : vector<4x32xf32>
    %cst_260 = arith.constant dense<0.000000e+00> : vector<4x64xf32>
    %676 = tpu.matmul %675, %10, %cst_260 {dimension_numbers = #tpu.dot_dimension_numbers<[1], [0], [0], [1], [0, 0, 1, 1], [], []>} : vector<4x32xf32>, vector<32x64xf32>, vector<4x64xf32> -> vector<4x64xf32>
    %677 = vector.broadcast %11 : vector<1x64xf32> to vector<4x64xf32>
    %678 = arith.addf %676, %677 : vector<4x64xf32>
    %cst_261 = arith.constant 0.000000e+00 : f32
    %679 = vector.broadcast %cst_261 : f32 to vector<4x64xf32>
    %680 = arith.maximumf %678, %679 : vector<4x64xf32>
    %cst_262 = arith.constant dense<0.000000e+00> : vector<4x32xf32>
    %681 = tpu.matmul %680, %12, %cst_262 {dimension_numbers = #tpu.dot_dimension_numbers<[1], [0], [0], [1], [0, 0, 1, 1], [], []>} : vector<4x64xf32>, vector<64x32xf32>, vector<4x32xf32> -> vector<4x32xf32>
    %682 = vector.broadcast %13 : vector<1x32xf32> to vector<4x32xf32>
    %683 = arith.addf %681, %682 : vector<4x32xf32>
    %684 = arith.addf %683, %675 : vector<4x32xf32>
    %cst_263 = arith.constant dense<0.000000e+00> : vector<4xf32>
    %685 = vector.multi_reduction <add>, %684, %cst_263 [1] : vector<4x32xf32> to vector<4xf32>
    %686 = vector.shape_cast %685 : vector<4xf32> to vector<4x1xf32>
    %cst_264 = arith.constant 3.200000e+01 : f32
    %687 = vector.broadcast %cst_264 : f32 to vector<4x1xf32>
    %688 = arith.divf %686, %687 : vector<4x1xf32>
    %689 = vector.broadcast %688 : vector<4x1xf32> to vector<4x32xf32>
    %690 = arith.subf %684, %689 : vector<4x32xf32>
    %691 = arith.mulf %690, %690 : vector<4x32xf32>
    %cst_265 = arith.constant dense<0.000000e+00> : vector<4xf32>
    %692 = vector.multi_reduction <add>, %691, %cst_265 [1] : vector<4x32xf32> to vector<4xf32>
    %693 = vector.shape_cast %692 : vector<4xf32> to vector<4x1xf32>
    %cst_266 = arith.constant 3.200000e+01 : f32
    %694 = vector.broadcast %cst_266 : f32 to vector<4x1xf32>
    %695 = arith.divf %693, %694 : vector<4x1xf32>
    %cst_267 = arith.constant 9.99999997E-7 : f32
    %696 = vector.broadcast %cst_267 : f32 to vector<4x1xf32>
    %697 = arith.addf %695, %696 : vector<4x1xf32>
    %698 = math.rsqrt %697 : vector<4x1xf32>
    %699 = vector.broadcast %698 : vector<4x1xf32> to vector<4x32xf32>
    %700 = arith.mulf %690, %699 : vector<4x32xf32>
    %701 = vector.broadcast %14 : vector<1x32xf32> to vector<4x32xf32>
    %702 = arith.mulf %700, %701 : vector<4x32xf32>
    %703 = vector.broadcast %15 : vector<1x32xf32> to vector<4x32xf32>
    %704 = arith.addf %702, %703 : vector<4x32xf32>
    %c3_268 = arith.constant 3 : index
    %c0_269 = arith.constant 0 : index
    %c0_270 = arith.constant 0 : index
    %705 = vector.load %arg40[%c3_268, %c0_269, %c0_270] : memref<4x4x32xf32, #tpu.memory_space<vmem>>, vector<1x4x32xf32>
    %706 = vector.shape_cast %705 : vector<1x4x32xf32> to vector<4x32xf32>
    %707 = vector.shape_cast %704 : vector<4x32xf32> to vector<1x4x32xf32>
    tpu.vector_store %arg40[%c3_268, %c0_269, %c0_270], %707 {strides = array<i32>} : memref<4x4x32xf32, #tpu.memory_space<vmem>>, vector<1x4x32xf32>,
    %c0_271 = arith.constant 0 : index
    %c0_272 = arith.constant 0 : index
    %708 = vector.load %arg24[%c0_271, %c0_272] : memref<32x192xf32, #tpu.memory_space<vmem>>, vector<32x192xf32>
    %c0_273 = arith.constant 0 : index
    %c0_274 = arith.constant 0 : index
    %709 = vector.load %arg25[%c0_273, %c0_274] : memref<32x192xf32, #tpu.memory_space<vmem>>, vector<32x192xf32>
    %c0_275 = arith.constant 0 : index
    %c0_276 = arith.constant 0 : index
    %710 = vector.load %arg26[%c0_275, %c0_276] : memref<64x32xf32, #tpu.memory_space<vmem>>, vector<64x32xf32>
    %c0_277 = arith.constant 0 : index
    %c0_278 = arith.constant 0 : index
    %711 = vector.load %arg27[%c0_277, %c0_278] : memref<1x32xf32, #tpu.memory_space<vmem>>, vector<1x32xf32>
    %c0_279 = arith.constant 0 : index
    %c0_280 = arith.constant 0 : index
    %712 = vector.load %arg28[%c0_279, %c0_280] : memref<1x32xf32, #tpu.memory_space<vmem>>, vector<1x32xf32>
    %c0_281 = arith.constant 0 : index
    %c0_282 = arith.constant 0 : index
    %713 = vector.load %arg29[%c0_281, %c0_282] : memref<32x64xf32, #tpu.memory_space<vmem>>, vector<32x64xf32>
    %c0_283 = arith.constant 0 : index
    %c0_284 = arith.constant 0 : index
    %714 = vector.load %arg30[%c0_283, %c0_284] : memref<32x128xf32, #tpu.memory_space<vmem>>, vector<32x128xf32>
    %c0_285 = arith.constant 0 : index
    %c0_286 = arith.constant 0 : index
    %715 = vector.load %arg31[%c0_285, %c0_286] : memref<64x32xf32, #tpu.memory_space<vmem>>, vector<64x32xf32>
    %c0_287 = arith.constant 0 : index
    %c0_288 = arith.constant 0 : index
    %716 = vector.load %arg32[%c0_287, %c0_288] : memref<1x32xf32, #tpu.memory_space<vmem>>, vector<1x32xf32>
    %c0_289 = arith.constant 0 : index
    %c0_290 = arith.constant 0 : index
    %717 = vector.load %arg33[%c0_289, %c0_290] : memref<1x32xf32, #tpu.memory_space<vmem>>, vector<1x32xf32>
    %c0_291 = arith.constant 0 : index
    %c0_292 = arith.constant 0 : index
    %718 = vector.load %arg34[%c0_291, %c0_292] : memref<32x64xf32, #tpu.memory_space<vmem>>, vector<32x64xf32>
    %c0_293 = arith.constant 0 : index
    %c0_294 = arith.constant 0 : index
    %719 = vector.load %arg35[%c0_293, %c0_294] : memref<1x64xf32, #tpu.memory_space<vmem>>, vector<1x64xf32>
    %c0_295 = arith.constant 0 : index
    %c0_296 = arith.constant 0 : index
    %720 = vector.load %arg36[%c0_295, %c0_296] : memref<64x32xf32, #tpu.memory_space<vmem>>, vector<64x32xf32>
    %c0_297 = arith.constant 0 : index
    %c0_298 = arith.constant 0 : index
    %721 = vector.load %arg37[%c0_297, %c0_298] : memref<1x32xf32, #tpu.memory_space<vmem>>, vector<1x32xf32>
    %c0_299 = arith.constant 0 : index
    %c0_300 = arith.constant 0 : index
    %722 = vector.load %arg38[%c0_299, %c0_300] : memref<1x32xf32, #tpu.memory_space<vmem>>, vector<1x32xf32>
    %c0_301 = arith.constant 0 : index
    %c0_302 = arith.constant 0 : index
    %723 = vector.load %arg39[%c0_301, %c0_302] : memref<1x32xf32, #tpu.memory_space<vmem>>, vector<1x32xf32>
    %c0_303 = arith.constant 0 : index
    %c0_304 = arith.constant 0 : index
    %c0_305 = arith.constant 0 : index
    %724 = vector.load %arg20[%c0_303, %c0_304, %c0_305] : memref<2x8x32xf32, #tpu.memory_space<vmem>>, vector<1x8x32xf32>
    %725 = vector.shape_cast %724 : vector<1x8x32xf32> to vector<8x32xf32>
    %c0_306 = arith.constant 0 : index
    %c0_307 = arith.constant 0 : index
    %c0_308 = arith.constant 0 : index
    %726 = vector.load %arg21[%c0_306, %c0_307, %c0_308] : memref<2x8x32xf32, #tpu.memory_space<vmem>>, vector<1x8x32xf32>
    %727 = vector.shape_cast %726 : vector<1x8x32xf32> to vector<8x32xf32>
    %c0_309 = arith.constant 0 : index
    %c0_310 = arith.constant 0 : index
    %c0_311 = arith.constant 0 : index
    %728 = vector.load %arg22[%c0_309, %c0_310, %c0_311] : memref<2x4x32xf32, #tpu.memory_space<vmem>>, vector<1x4x32xf32>
    %729 = vector.shape_cast %728 : vector<1x4x32xf32> to vector<4x32xf32>
    %c0_312 = arith.constant 0 : index
    %c0_313 = arith.constant 0 : index
    %c0_314 = arith.constant 0 : index
    %730 = vector.load %arg23[%c0_312, %c0_313, %c0_314] : memref<2x8x8xf32, #tpu.memory_space<vmem>>, vector<1x8x8xf32>
    %731 = vector.shape_cast %730 : vector<1x8x8xf32> to vector<8x8xf32>
    %732 = arith.addf %725, %727 : vector<8x32xf32>
    %cst_315 = arith.constant dense<0.000000e+00> : vector<8x192xf32>
    %733 = tpu.matmul %725, %708, %cst_315 {dimension_numbers = #tpu.dot_dimension_numbers<[1], [0], [0], [1], [0, 0, 1, 1], [], []>} : vector<8x32xf32>, vector<32x192xf32>, vector<8x192xf32> -> vector<8x192xf32>
    %cst_316 = arith.constant dense<0.000000e+00> : vector<8x192xf32>
    %734 = tpu.matmul %727, %709, %cst_316 {dimension_numbers = #tpu.dot_dimension_numbers<[1], [0], [0], [1], [0, 0, 1, 1], [], []>} : vector<8x32xf32>, vector<32x192xf32>, vector<8x192xf32> -> vector<8x192xf32>
    %735 = arith.addf %733, %734 : vector<8x192xf32>
    %736 = vector.extract_strided_slice %735 {offsets = [0, 0], sizes = [8, 64], strides = [1, 1]} : vector<8x192xf32> to vector<8x64xf32>
    %737 = vector.extract_strided_slice %735 {offsets = [0, 64], sizes = [8, 64], strides = [1, 1]} : vector<8x192xf32> to vector<8x64xf32>
    %738 = vector.extract_strided_slice %735 {offsets = [0, 128], sizes = [8, 64], strides = [1, 1]} : vector<8x192xf32> to vector<8x64xf32>
    %739 = vector.extract_strided_slice %736 {offsets = [0, 0], sizes = [8, 32], strides = [1, 1]} : vector<8x64xf32> to vector<8x32xf32>
    %740 = vector.extract_strided_slice %737 {offsets = [0, 0], sizes = [8, 32], strides = [1, 1]} : vector<8x64xf32> to vector<8x32xf32>
    %741 = vector.extract_strided_slice %738 {offsets = [0, 0], sizes = [8, 32], strides = [1, 1]} : vector<8x64xf32> to vector<8x32xf32>
    %cst_317 = arith.constant dense<0.000000e+00> : vector<8x8xf32>
    %742 = tpu.matmul %739, %740, %cst_317 {dimension_numbers = #tpu.dot_dimension_numbers<[1], [1], [0], [0], [0, 0, 1, 0], [], []>} : vector<8x32xf32>, vector<8x32xf32>, vector<8x8xf32> -> vector<8x8xf32>
    %cst_318 = arith.constant 0.176776692 : f32
    %743 = vector.broadcast %cst_318 : f32 to vector<8x8xf32>
    %744 = arith.mulf %742, %743 : vector<8x8xf32>
    %745 = arith.addf %744, %731 : vector<8x8xf32>
    %cst_319 = arith.constant dense<0xFF800000> : vector<8xf32>
    %746 = vector.multi_reduction <maximumf>, %745, %cst_319 [1] : vector<8x8xf32> to vector<8xf32>
    %747 = vector.shape_cast %746 : vector<8xf32> to vector<8x1xf32>
    %748 = vector.broadcast %747 : vector<8x1xf32> to vector<8x8xf32>
    %749 = arith.subf %745, %748 : vector<8x8xf32>
    %750 = math.exp %749 : vector<8x8xf32>
    %cst_320 = arith.constant dense<0.000000e+00> : vector<8xf32>
    %751 = vector.multi_reduction <add>, %750, %cst_320 [1] : vector<8x8xf32> to vector<8xf32>
    %752 = vector.shape_cast %751 : vector<8xf32> to vector<8x1xf32>
    %753 = tpu.reciprocal %752 {approx = true} : vector<8x1xf32> -> vector<8x1xf32>
    %754 = vector.broadcast %753 : vector<8x1xf32> to vector<8x8xf32>
    %755 = arith.mulf %750, %754 : vector<8x8xf32>
    %cst_321 = arith.constant dense<0.000000e+00> : vector<8x32xf32>
    %756 = tpu.matmul %755, %741, %cst_321 {dimension_numbers = #tpu.dot_dimension_numbers<[1], [0], [0], [1], [0, 0, 1, 1], [], []>} : vector<8x8xf32>, vector<8x32xf32>, vector<8x32xf32> -> vector<8x32xf32>
    %757 = vector.extract_strided_slice %710 {offsets = [0, 0], sizes = [32, 32], strides = [1, 1]} : vector<64x32xf32> to vector<32x32xf32>
    %cst_322 = arith.constant dense<0.000000e+00> : vector<8x32xf32>
    %758 = tpu.matmul %756, %757, %cst_322 {dimension_numbers = #tpu.dot_dimension_numbers<[1], [0], [0], [1], [0, 0, 1, 1], [], []>} : vector<8x32xf32>, vector<32x32xf32>, vector<8x32xf32> -> vector<8x32xf32>
    %759 = vector.extract_strided_slice %736 {offsets = [0, 32], sizes = [8, 32], strides = [1, 1]} : vector<8x64xf32> to vector<8x32xf32>
    %760 = vector.extract_strided_slice %737 {offsets = [0, 32], sizes = [8, 32], strides = [1, 1]} : vector<8x64xf32> to vector<8x32xf32>
    %761 = vector.extract_strided_slice %738 {offsets = [0, 32], sizes = [8, 32], strides = [1, 1]} : vector<8x64xf32> to vector<8x32xf32>
    %cst_323 = arith.constant dense<0.000000e+00> : vector<8x8xf32>
    %762 = tpu.matmul %759, %760, %cst_323 {dimension_numbers = #tpu.dot_dimension_numbers<[1], [1], [0], [0], [0, 0, 1, 0], [], []>} : vector<8x32xf32>, vector<8x32xf32>, vector<8x8xf32> -> vector<8x8xf32>
    %cst_324 = arith.constant 0.176776692 : f32
    %763 = vector.broadcast %cst_324 : f32 to vector<8x8xf32>
    %764 = arith.mulf %762, %763 : vector<8x8xf32>
    %765 = arith.addf %764, %731 : vector<8x8xf32>
    %cst_325 = arith.constant dense<0xFF800000> : vector<8xf32>
    %766 = vector.multi_reduction <maximumf>, %765, %cst_325 [1] : vector<8x8xf32> to vector<8xf32>
    %767 = vector.shape_cast %766 : vector<8xf32> to vector<8x1xf32>
    %768 = vector.broadcast %767 : vector<8x1xf32> to vector<8x8xf32>
    %769 = arith.subf %765, %768 : vector<8x8xf32>
    %770 = math.exp %769 : vector<8x8xf32>
    %cst_326 = arith.constant dense<0.000000e+00> : vector<8xf32>
    %771 = vector.multi_reduction <add>, %770, %cst_326 [1] : vector<8x8xf32> to vector<8xf32>
    %772 = vector.shape_cast %771 : vector<8xf32> to vector<8x1xf32>
    %773 = tpu.reciprocal %772 {approx = true} : vector<8x1xf32> -> vector<8x1xf32>
    %774 = vector.broadcast %773 : vector<8x1xf32> to vector<8x8xf32>
    %775 = arith.mulf %770, %774 : vector<8x8xf32>
    %cst_327 = arith.constant dense<0.000000e+00> : vector<8x32xf32>
    %776 = tpu.matmul %775, %761, %cst_327 {dimension_numbers = #tpu.dot_dimension_numbers<[1], [0], [0], [1], [0, 0, 1, 1], [], []>} : vector<8x8xf32>, vector<8x32xf32>, vector<8x32xf32> -> vector<8x32xf32>
    %777 = vector.extract_strided_slice %710 {offsets = [32, 0], sizes = [32, 32], strides = [1, 1]} : vector<64x32xf32> to vector<32x32xf32>
    %cst_328 = arith.constant dense<0.000000e+00> : vector<8x32xf32>
    %778 = tpu.matmul %776, %777, %cst_328 {dimension_numbers = #tpu.dot_dimension_numbers<[1], [0], [0], [1], [0, 0, 1, 1], [], []>} : vector<8x32xf32>, vector<32x32xf32>, vector<8x32xf32> -> vector<8x32xf32>
    %779 = arith.addf %758, %778 : vector<8x32xf32>
    %780 = arith.addf %779, %732 : vector<8x32xf32>
    %cst_329 = arith.constant dense<0.000000e+00> : vector<8xf32>
    %781 = vector.multi_reduction <add>, %780, %cst_329 [1] : vector<8x32xf32> to vector<8xf32>
    %782 = vector.shape_cast %781 : vector<8xf32> to vector<8x1xf32>
    %cst_330 = arith.constant 3.200000e+01 : f32
    %783 = vector.broadcast %cst_330 : f32 to vector<8x1xf32>
    %784 = arith.divf %782, %783 : vector<8x1xf32>
    %785 = vector.broadcast %784 : vector<8x1xf32> to vector<8x32xf32>
    %786 = arith.subf %780, %785 : vector<8x32xf32>
    %787 = arith.mulf %786, %786 : vector<8x32xf32>
    %cst_331 = arith.constant dense<0.000000e+00> : vector<8xf32>
    %788 = vector.multi_reduction <add>, %787, %cst_331 [1] : vector<8x32xf32> to vector<8xf32>
    %789 = vector.shape_cast %788 : vector<8xf32> to vector<8x1xf32>
    %cst_332 = arith.constant 3.200000e+01 : f32
    %790 = vector.broadcast %cst_332 : f32 to vector<8x1xf32>
    %791 = arith.divf %789, %790 : vector<8x1xf32>
    %cst_333 = arith.constant 9.99999997E-7 : f32
    %792 = vector.broadcast %cst_333 : f32 to vector<8x1xf32>
    %793 = arith.addf %791, %792 : vector<8x1xf32>
    %794 = math.rsqrt %793 : vector<8x1xf32>
    %795 = vector.broadcast %794 : vector<8x1xf32> to vector<8x32xf32>
    %796 = arith.mulf %786, %795 : vector<8x32xf32>
    %797 = vector.broadcast %711 : vector<1x32xf32> to vector<8x32xf32>
    %798 = arith.mulf %796, %797 : vector<8x32xf32>
    %799 = vector.broadcast %712 : vector<1x32xf32> to vector<8x32xf32>
    %800 = arith.addf %798, %799 : vector<8x32xf32>
    %cst_334 = arith.constant dense<0.000000e+00> : vector<8x64xf32>
    %801 = tpu.matmul %800, %713, %cst_334 {dimension_numbers = #tpu.dot_dimension_numbers<[1], [0], [0], [1], [0, 0, 1, 1], [], []>} : vector<8x32xf32>, vector<32x64xf32>, vector<8x64xf32> -> vector<8x64xf32>
    %cst_335 = arith.constant dense<0.000000e+00> : vector<4x128xf32>
    %802 = tpu.matmul %729, %714, %cst_335 {dimension_numbers = #tpu.dot_dimension_numbers<[1], [0], [0], [1], [0, 0, 1, 1], [], []>} : vector<4x32xf32>, vector<32x128xf32>, vector<4x128xf32> -> vector<4x128xf32>
    %803 = vector.extract_strided_slice %802 {offsets = [0, 0], sizes = [4, 64], strides = [1, 1]} : vector<4x128xf32> to vector<4x64xf32>
    %804 = vector.extract_strided_slice %802 {offsets = [0, 64], sizes = [4, 64], strides = [1, 1]} : vector<4x128xf32> to vector<4x64xf32>
    %805 = vector.extract_strided_slice %801 {offsets = [0, 0], sizes = [8, 32], strides = [1, 1]} : vector<8x64xf32> to vector<8x32xf32>
    %806 = vector.extract_strided_slice %803 {offsets = [0, 0], sizes = [4, 32], strides = [1, 1]} : vector<4x64xf32> to vector<4x32xf32>
    %807 = vector.extract_strided_slice %804 {offsets = [0, 0], sizes = [4, 32], strides = [1, 1]} : vector<4x64xf32> to vector<4x32xf32>
    %cst_336 = arith.constant dense<0.000000e+00> : vector<8x4xf32>
    %808 = tpu.matmul %805, %806, %cst_336 {dimension_numbers = #tpu.dot_dimension_numbers<[1], [1], [0], [0], [0, 0, 1, 0], [], []>} : vector<8x32xf32>, vector<4x32xf32>, vector<8x4xf32> -> vector<8x4xf32>
    %cst_337 = arith.constant 0.176776692 : f32
    %809 = vector.broadcast %cst_337 : f32 to vector<8x4xf32>
    %810 = arith.mulf %808, %809 : vector<8x4xf32>
    %cst_338 = arith.constant dense<0xFF800000> : vector<8xf32>
    %811 = vector.multi_reduction <maximumf>, %810, %cst_338 [1] : vector<8x4xf32> to vector<8xf32>
    %812 = vector.shape_cast %811 : vector<8xf32> to vector<8x1xf32>
    %813 = vector.broadcast %812 : vector<8x1xf32> to vector<8x4xf32>
    %814 = arith.subf %810, %813 : vector<8x4xf32>
    %815 = math.exp %814 : vector<8x4xf32>
    %cst_339 = arith.constant dense<0.000000e+00> : vector<8xf32>
    %816 = vector.multi_reduction <add>, %815, %cst_339 [1] : vector<8x4xf32> to vector<8xf32>
    %817 = vector.shape_cast %816 : vector<8xf32> to vector<8x1xf32>
    %818 = tpu.reciprocal %817 {approx = true} : vector<8x1xf32> -> vector<8x1xf32>
    %819 = vector.broadcast %818 : vector<8x1xf32> to vector<8x4xf32>
    %820 = arith.mulf %815, %819 : vector<8x4xf32>
    %cst_340 = arith.constant dense<0.000000e+00> : vector<8x32xf32>
    %821 = tpu.matmul %820, %807, %cst_340 {dimension_numbers = #tpu.dot_dimension_numbers<[1], [0], [0], [1], [0, 0, 1, 1], [], []>} : vector<8x4xf32>, vector<4x32xf32>, vector<8x32xf32> -> vector<8x32xf32>
    %822 = vector.extract_strided_slice %715 {offsets = [0, 0], sizes = [32, 32], strides = [1, 1]} : vector<64x32xf32> to vector<32x32xf32>
    %cst_341 = arith.constant dense<0.000000e+00> : vector<8x32xf32>
    %823 = tpu.matmul %821, %822, %cst_341 {dimension_numbers = #tpu.dot_dimension_numbers<[1], [0], [0], [1], [0, 0, 1, 1], [], []>} : vector<8x32xf32>, vector<32x32xf32>, vector<8x32xf32> -> vector<8x32xf32>
    %824 = vector.extract_strided_slice %801 {offsets = [0, 32], sizes = [8, 32], strides = [1, 1]} : vector<8x64xf32> to vector<8x32xf32>
    %825 = vector.extract_strided_slice %803 {offsets = [0, 32], sizes = [4, 32], strides = [1, 1]} : vector<4x64xf32> to vector<4x32xf32>
    %826 = vector.extract_strided_slice %804 {offsets = [0, 32], sizes = [4, 32], strides = [1, 1]} : vector<4x64xf32> to vector<4x32xf32>
    %cst_342 = arith.constant dense<0.000000e+00> : vector<8x4xf32>
    %827 = tpu.matmul %824, %825, %cst_342 {dimension_numbers = #tpu.dot_dimension_numbers<[1], [1], [0], [0], [0, 0, 1, 0], [], []>} : vector<8x32xf32>, vector<4x32xf32>, vector<8x4xf32> -> vector<8x4xf32>
    %cst_343 = arith.constant 0.176776692 : f32
    %828 = vector.broadcast %cst_343 : f32 to vector<8x4xf32>
    %829 = arith.mulf %827, %828 : vector<8x4xf32>
    %cst_344 = arith.constant dense<0xFF800000> : vector<8xf32>
    %830 = vector.multi_reduction <maximumf>, %829, %cst_344 [1] : vector<8x4xf32> to vector<8xf32>
    %831 = vector.shape_cast %830 : vector<8xf32> to vector<8x1xf32>
    %832 = vector.broadcast %831 : vector<8x1xf32> to vector<8x4xf32>
    %833 = arith.subf %829, %832 : vector<8x4xf32>
    %834 = math.exp %833 : vector<8x4xf32>
    %cst_345 = arith.constant dense<0.000000e+00> : vector<8xf32>
    %835 = vector.multi_reduction <add>, %834, %cst_345 [1] : vector<8x4xf32> to vector<8xf32>
    %836 = vector.shape_cast %835 : vector<8xf32> to vector<8x1xf32>
    %837 = tpu.reciprocal %836 {approx = true} : vector<8x1xf32> -> vector<8x1xf32>
    %838 = vector.broadcast %837 : vector<8x1xf32> to vector<8x4xf32>
    %839 = arith.mulf %834, %838 : vector<8x4xf32>
    %cst_346 = arith.constant dense<0.000000e+00> : vector<8x32xf32>
    %840 = tpu.matmul %839, %826, %cst_346 {dimension_numbers = #tpu.dot_dimension_numbers<[1], [0], [0], [1], [0, 0, 1, 1], [], []>} : vector<8x4xf32>, vector<4x32xf32>, vector<8x32xf32> -> vector<8x32xf32>
    %841 = vector.extract_strided_slice %715 {offsets = [32, 0], sizes = [32, 32], strides = [1, 1]} : vector<64x32xf32> to vector<32x32xf32>
    %cst_347 = arith.constant dense<0.000000e+00> : vector<8x32xf32>
    %842 = tpu.matmul %840, %841, %cst_347 {dimension_numbers = #tpu.dot_dimension_numbers<[1], [0], [0], [1], [0, 0, 1, 1], [], []>} : vector<8x32xf32>, vector<32x32xf32>, vector<8x32xf32> -> vector<8x32xf32>
    %843 = arith.addf %823, %842 : vector<8x32xf32>
    %844 = arith.addf %843, %800 : vector<8x32xf32>
    %cst_348 = arith.constant dense<0.000000e+00> : vector<8xf32>
    %845 = vector.multi_reduction <add>, %844, %cst_348 [1] : vector<8x32xf32> to vector<8xf32>
    %846 = vector.shape_cast %845 : vector<8xf32> to vector<8x1xf32>
    %cst_349 = arith.constant 3.200000e+01 : f32
    %847 = vector.broadcast %cst_349 : f32 to vector<8x1xf32>
    %848 = arith.divf %846, %847 : vector<8x1xf32>
    %849 = vector.broadcast %848 : vector<8x1xf32> to vector<8x32xf32>
    %850 = arith.subf %844, %849 : vector<8x32xf32>
    %851 = arith.mulf %850, %850 : vector<8x32xf32>
    %cst_350 = arith.constant dense<0.000000e+00> : vector<8xf32>
    %852 = vector.multi_reduction <add>, %851, %cst_350 [1] : vector<8x32xf32> to vector<8xf32>
    %853 = vector.shape_cast %852 : vector<8xf32> to vector<8x1xf32>
    %cst_351 = arith.constant 3.200000e+01 : f32
    %854 = vector.broadcast %cst_351 : f32 to vector<8x1xf32>
    %855 = arith.divf %853, %854 : vector<8x1xf32>
    %cst_352 = arith.constant 9.99999997E-7 : f32
    %856 = vector.broadcast %cst_352 : f32 to vector<8x1xf32>
    %857 = arith.addf %855, %856 : vector<8x1xf32>
    %858 = math.rsqrt %857 : vector<8x1xf32>
    %859 = vector.broadcast %858 : vector<8x1xf32> to vector<8x32xf32>
    %860 = arith.mulf %850, %859 : vector<8x32xf32>
    %861 = vector.broadcast %716 : vector<1x32xf32> to vector<8x32xf32>
    %862 = arith.mulf %860, %861 : vector<8x32xf32>
    %863 = vector.broadcast %717 : vector<1x32xf32> to vector<8x32xf32>
    %864 = arith.addf %862, %863 : vector<8x32xf32>
    %cst_353 = arith.constant dense<0.000000e+00> : vector<8x64xf32>
    %865 = tpu.matmul %864, %718, %cst_353 {dimension_numbers = #tpu.dot_dimension_numbers<[1], [0], [0], [1], [0, 0, 1, 1], [], []>} : vector<8x32xf32>, vector<32x64xf32>, vector<8x64xf32> -> vector<8x64xf32>
    %866 = vector.broadcast %719 : vector<1x64xf32> to vector<8x64xf32>
    %867 = arith.addf %865, %866 : vector<8x64xf32>
    %cst_354 = arith.constant 0.000000e+00 : f32
    %868 = vector.broadcast %cst_354 : f32 to vector<8x64xf32>
    %869 = arith.maximumf %867, %868 : vector<8x64xf32>
    %cst_355 = arith.constant dense<0.000000e+00> : vector<8x32xf32>
    %870 = tpu.matmul %869, %720, %cst_355 {dimension_numbers = #tpu.dot_dimension_numbers<[1], [0], [0], [1], [0, 0, 1, 1], [], []>} : vector<8x64xf32>, vector<64x32xf32>, vector<8x32xf32> -> vector<8x32xf32>
    %871 = vector.broadcast %721 : vector<1x32xf32> to vector<8x32xf32>
    %872 = arith.addf %870, %871 : vector<8x32xf32>
    %873 = arith.addf %872, %864 : vector<8x32xf32>
    %cst_356 = arith.constant dense<0.000000e+00> : vector<8xf32>
    %874 = vector.multi_reduction <add>, %873, %cst_356 [1] : vector<8x32xf32> to vector<8xf32>
    %875 = vector.shape_cast %874 : vector<8xf32> to vector<8x1xf32>
    %cst_357 = arith.constant 3.200000e+01 : f32
    %876 = vector.broadcast %cst_357 : f32 to vector<8x1xf32>
    %877 = arith.divf %875, %876 : vector<8x1xf32>
    %878 = vector.broadcast %877 : vector<8x1xf32> to vector<8x32xf32>
    %879 = arith.subf %873, %878 : vector<8x32xf32>
    %880 = arith.mulf %879, %879 : vector<8x32xf32>
    %cst_358 = arith.constant dense<0.000000e+00> : vector<8xf32>
    %881 = vector.multi_reduction <add>, %880, %cst_358 [1] : vector<8x32xf32> to vector<8xf32>
    %882 = vector.shape_cast %881 : vector<8xf32> to vector<8x1xf32>
    %cst_359 = arith.constant 3.200000e+01 : f32
    %883 = vector.broadcast %cst_359 : f32 to vector<8x1xf32>
    %884 = arith.divf %882, %883 : vector<8x1xf32>
    %cst_360 = arith.constant 9.99999997E-7 : f32
    %885 = vector.broadcast %cst_360 : f32 to vector<8x1xf32>
    %886 = arith.addf %884, %885 : vector<8x1xf32>
    %887 = math.rsqrt %886 : vector<8x1xf32>
    %888 = vector.broadcast %887 : vector<8x1xf32> to vector<8x32xf32>
    %889 = arith.mulf %879, %888 : vector<8x32xf32>
    %890 = vector.broadcast %722 : vector<1x32xf32> to vector<8x32xf32>
    %891 = arith.mulf %889, %890 : vector<8x32xf32>
    %892 = vector.broadcast %723 : vector<1x32xf32> to vector<8x32xf32>
    %893 = arith.addf %891, %892 : vector<8x32xf32>
    %c0_361 = arith.constant 0 : index
    %c0_362 = arith.constant 0 : index
    %c0_363 = arith.constant 0 : index
    %894 = vector.load %arg41[%c0_361, %c0_362, %c0_363] : memref<2x8x32xf32, #tpu.memory_space<vmem>>, vector<1x8x32xf32>
    %895 = vector.shape_cast %894 : vector<1x8x32xf32> to vector<8x32xf32>
    %896 = vector.shape_cast %893 : vector<8x32xf32> to vector<1x8x32xf32>
    tpu.vector_store %arg41[%c0_361, %c0_362, %c0_363], %896 {strides = array<i32>} : memref<2x8x32xf32, #tpu.memory_space<vmem>>, vector<1x8x32xf32>,
    %c1_364 = arith.constant 1 : index
    %c0_365 = arith.constant 0 : index
    %c0_366 = arith.constant 0 : index
    %897 = vector.load %arg20[%c1_364, %c0_365, %c0_366] : memref<2x8x32xf32, #tpu.memory_space<vmem>>, vector<1x8x32xf32>
    %898 = vector.shape_cast %897 : vector<1x8x32xf32> to vector<8x32xf32>
    %c1_367 = arith.constant 1 : index
    %c0_368 = arith.constant 0 : index
    %c0_369 = arith.constant 0 : index
    %899 = vector.load %arg21[%c1_367, %c0_368, %c0_369] : memref<2x8x32xf32, #tpu.memory_space<vmem>>, vector<1x8x32xf32>
    %900 = vector.shape_cast %899 : vector<1x8x32xf32> to vector<8x32xf32>
    %c1_370 = arith.constant 1 : index
    %c0_371 = arith.constant 0 : index
    %c0_372 = arith.constant 0 : index
    %901 = vector.load %arg22[%c1_370, %c0_371, %c0_372] : memref<2x4x32xf32, #tpu.memory_space<vmem>>, vector<1x4x32xf32>
    %902 = vector.shape_cast %901 : vector<1x4x32xf32> to vector<4x32xf32>
    %c1_373 = arith.constant 1 : index
    %c0_374 = arith.constant 0 : index
    %c0_375 = arith.constant 0 : index
    %903 = vector.load %arg23[%c1_373, %c0_374, %c0_375] : memref<2x8x8xf32, #tpu.memory_space<vmem>>, vector<1x8x8xf32>
    %904 = vector.shape_cast %903 : vector<1x8x8xf32> to vector<8x8xf32>
    %905 = arith.addf %898, %900 : vector<8x32xf32>
    %cst_376 = arith.constant dense<0.000000e+00> : vector<8x192xf32>
    %906 = tpu.matmul %898, %708, %cst_376 {dimension_numbers = #tpu.dot_dimension_numbers<[1], [0], [0], [1], [0, 0, 1, 1], [], []>} : vector<8x32xf32>, vector<32x192xf32>, vector<8x192xf32> -> vector<8x192xf32>
    %cst_377 = arith.constant dense<0.000000e+00> : vector<8x192xf32>
    %907 = tpu.matmul %900, %709, %cst_377 {dimension_numbers = #tpu.dot_dimension_numbers<[1], [0], [0], [1], [0, 0, 1, 1], [], []>} : vector<8x32xf32>, vector<32x192xf32>, vector<8x192xf32> -> vector<8x192xf32>
    %908 = arith.addf %906, %907 : vector<8x192xf32>
    %909 = vector.extract_strided_slice %908 {offsets = [0, 0], sizes = [8, 64], strides = [1, 1]} : vector<8x192xf32> to vector<8x64xf32>
    %910 = vector.extract_strided_slice %908 {offsets = [0, 64], sizes = [8, 64], strides = [1, 1]} : vector<8x192xf32> to vector<8x64xf32>
    %911 = vector.extract_strided_slice %908 {offsets = [0, 128], sizes = [8, 64], strides = [1, 1]} : vector<8x192xf32> to vector<8x64xf32>
    %912 = vector.extract_strided_slice %909 {offsets = [0, 0], sizes = [8, 32], strides = [1, 1]} : vector<8x64xf32> to vector<8x32xf32>
    %913 = vector.extract_strided_slice %910 {offsets = [0, 0], sizes = [8, 32], strides = [1, 1]} : vector<8x64xf32> to vector<8x32xf32>
    %914 = vector.extract_strided_slice %911 {offsets = [0, 0], sizes = [8, 32], strides = [1, 1]} : vector<8x64xf32> to vector<8x32xf32>
    %cst_378 = arith.constant dense<0.000000e+00> : vector<8x8xf32>
    %915 = tpu.matmul %912, %913, %cst_378 {dimension_numbers = #tpu.dot_dimension_numbers<[1], [1], [0], [0], [0, 0, 1, 0], [], []>} : vector<8x32xf32>, vector<8x32xf32>, vector<8x8xf32> -> vector<8x8xf32>
    %cst_379 = arith.constant 0.176776692 : f32
    %916 = vector.broadcast %cst_379 : f32 to vector<8x8xf32>
    %917 = arith.mulf %915, %916 : vector<8x8xf32>
    %918 = arith.addf %917, %904 : vector<8x8xf32>
    %cst_380 = arith.constant dense<0xFF800000> : vector<8xf32>
    %919 = vector.multi_reduction <maximumf>, %918, %cst_380 [1] : vector<8x8xf32> to vector<8xf32>
    %920 = vector.shape_cast %919 : vector<8xf32> to vector<8x1xf32>
    %921 = vector.broadcast %920 : vector<8x1xf32> to vector<8x8xf32>
    %922 = arith.subf %918, %921 : vector<8x8xf32>
    %923 = math.exp %922 : vector<8x8xf32>
    %cst_381 = arith.constant dense<0.000000e+00> : vector<8xf32>
    %924 = vector.multi_reduction <add>, %923, %cst_381 [1] : vector<8x8xf32> to vector<8xf32>
    %925 = vector.shape_cast %924 : vector<8xf32> to vector<8x1xf32>
    %926 = tpu.reciprocal %925 {approx = true} : vector<8x1xf32> -> vector<8x1xf32>
    %927 = vector.broadcast %926 : vector<8x1xf32> to vector<8x8xf32>
    %928 = arith.mulf %923, %927 : vector<8x8xf32>
    %cst_382 = arith.constant dense<0.000000e+00> : vector<8x32xf32>
    %929 = tpu.matmul %928, %914, %cst_382 {dimension_numbers = #tpu.dot_dimension_numbers<[1], [0], [0], [1], [0, 0, 1, 1], [], []>} : vector<8x8xf32>, vector<8x32xf32>, vector<8x32xf32> -> vector<8x32xf32>
    %930 = vector.extract_strided_slice %710 {offsets = [0, 0], sizes = [32, 32], strides = [1, 1]} : vector<64x32xf32> to vector<32x32xf32>
    %cst_383 = arith.constant dense<0.000000e+00> : vector<8x32xf32>
    %931 = tpu.matmul %929, %930, %cst_383 {dimension_numbers = #tpu.dot_dimension_numbers<[1], [0], [0], [1], [0, 0, 1, 1], [], []>} : vector<8x32xf32>, vector<32x32xf32>, vector<8x32xf32> -> vector<8x32xf32>
    %932 = vector.extract_strided_slice %909 {offsets = [0, 32], sizes = [8, 32], strides = [1, 1]} : vector<8x64xf32> to vector<8x32xf32>
    %933 = vector.extract_strided_slice %910 {offsets = [0, 32], sizes = [8, 32], strides = [1, 1]} : vector<8x64xf32> to vector<8x32xf32>
    %934 = vector.extract_strided_slice %911 {offsets = [0, 32], sizes = [8, 32], strides = [1, 1]} : vector<8x64xf32> to vector<8x32xf32>
    %cst_384 = arith.constant dense<0.000000e+00> : vector<8x8xf32>
    %935 = tpu.matmul %932, %933, %cst_384 {dimension_numbers = #tpu.dot_dimension_numbers<[1], [1], [0], [0], [0, 0, 1, 0], [], []>} : vector<8x32xf32>, vector<8x32xf32>, vector<8x8xf32> -> vector<8x8xf32>
    %cst_385 = arith.constant 0.176776692 : f32
    %936 = vector.broadcast %cst_385 : f32 to vector<8x8xf32>
    %937 = arith.mulf %935, %936 : vector<8x8xf32>
    %938 = arith.addf %937, %904 : vector<8x8xf32>
    %cst_386 = arith.constant dense<0xFF800000> : vector<8xf32>
    %939 = vector.multi_reduction <maximumf>, %938, %cst_386 [1] : vector<8x8xf32> to vector<8xf32>
    %940 = vector.shape_cast %939 : vector<8xf32> to vector<8x1xf32>
    %941 = vector.broadcast %940 : vector<8x1xf32> to vector<8x8xf32>
    %942 = arith.subf %938, %941 : vector<8x8xf32>
    %943 = math.exp %942 : vector<8x8xf32>
    %cst_387 = arith.constant dense<0.000000e+00> : vector<8xf32>
    %944 = vector.multi_reduction <add>, %943, %cst_387 [1] : vector<8x8xf32> to vector<8xf32>
    %945 = vector.shape_cast %944 : vector<8xf32> to vector<8x1xf32>
    %946 = tpu.reciprocal %945 {approx = true} : vector<8x1xf32> -> vector<8x1xf32>
    %947 = vector.broadcast %946 : vector<8x1xf32> to vector<8x8xf32>
    %948 = arith.mulf %943, %947 : vector<8x8xf32>
    %cst_388 = arith.constant dense<0.000000e+00> : vector<8x32xf32>
    %949 = tpu.matmul %948, %934, %cst_388 {dimension_numbers = #tpu.dot_dimension_numbers<[1], [0], [0], [1], [0, 0, 1, 1], [], []>} : vector<8x8xf32>, vector<8x32xf32>, vector<8x32xf32> -> vector<8x32xf32>
    %950 = vector.extract_strided_slice %710 {offsets = [32, 0], sizes = [32, 32], strides = [1, 1]} : vector<64x32xf32> to vector<32x32xf32>
    %cst_389 = arith.constant dense<0.000000e+00> : vector<8x32xf32>
    %951 = tpu.matmul %949, %950, %cst_389 {dimension_numbers = #tpu.dot_dimension_numbers<[1], [0], [0], [1], [0, 0, 1, 1], [], []>} : vector<8x32xf32>, vector<32x32xf32>, vector<8x32xf32> -> vector<8x32xf32>
    %952 = arith.addf %931, %951 : vector<8x32xf32>
    %953 = arith.addf %952, %905 : vector<8x32xf32>
    %cst_390 = arith.constant dense<0.000000e+00> : vector<8xf32>
    %954 = vector.multi_reduction <add>, %953, %cst_390 [1] : vector<8x32xf32> to vector<8xf32>
    %955 = vector.shape_cast %954 : vector<8xf32> to vector<8x1xf32>
    %cst_391 = arith.constant 3.200000e+01 : f32
    %956 = vector.broadcast %cst_391 : f32 to vector<8x1xf32>
    %957 = arith.divf %955, %956 : vector<8x1xf32>
    %958 = vector.broadcast %957 : vector<8x1xf32> to vector<8x32xf32>
    %959 = arith.subf %953, %958 : vector<8x32xf32>
    %960 = arith.mulf %959, %959 : vector<8x32xf32>
    %cst_392 = arith.constant dense<0.000000e+00> : vector<8xf32>
    %961 = vector.multi_reduction <add>, %960, %cst_392 [1] : vector<8x32xf32> to vector<8xf32>
    %962 = vector.shape_cast %961 : vector<8xf32> to vector<8x1xf32>
    %cst_393 = arith.constant 3.200000e+01 : f32
    %963 = vector.broadcast %cst_393 : f32 to vector<8x1xf32>
    %964 = arith.divf %962, %963 : vector<8x1xf32>
    %cst_394 = arith.constant 9.99999997E-7 : f32
    %965 = vector.broadcast %cst_394 : f32 to vector<8x1xf32>
    %966 = arith.addf %964, %965 : vector<8x1xf32>
    %967 = math.rsqrt %966 : vector<8x1xf32>
    %968 = vector.broadcast %967 : vector<8x1xf32> to vector<8x32xf32>
    %969 = arith.mulf %959, %968 : vector<8x32xf32>
    %970 = vector.broadcast %711 : vector<1x32xf32> to vector<8x32xf32>
    %971 = arith.mulf %969, %970 : vector<8x32xf32>
    %972 = vector.broadcast %712 : vector<1x32xf32> to vector<8x32xf32>
    %973 = arith.addf %971, %972 : vector<8x32xf32>
    %cst_395 = arith.constant dense<0.000000e+00> : vector<8x64xf32>
    %974 = tpu.matmul %973, %713, %cst_395 {dimension_numbers = #tpu.dot_dimension_numbers<[1], [0], [0], [1], [0, 0, 1, 1], [], []>} : vector<8x32xf32>, vector<32x64xf32>, vector<8x64xf32> -> vector<8x64xf32>
    %cst_396 = arith.constant dense<0.000000e+00> : vector<4x128xf32>
    %975 = tpu.matmul %902, %714, %cst_396 {dimension_numbers = #tpu.dot_dimension_numbers<[1], [0], [0], [1], [0, 0, 1, 1], [], []>} : vector<4x32xf32>, vector<32x128xf32>, vector<4x128xf32> -> vector<4x128xf32>
    %976 = vector.extract_strided_slice %975 {offsets = [0, 0], sizes = [4, 64], strides = [1, 1]} : vector<4x128xf32> to vector<4x64xf32>
    %977 = vector.extract_strided_slice %975 {offsets = [0, 64], sizes = [4, 64], strides = [1, 1]} : vector<4x128xf32> to vector<4x64xf32>
    %978 = vector.extract_strided_slice %974 {offsets = [0, 0], sizes = [8, 32], strides = [1, 1]} : vector<8x64xf32> to vector<8x32xf32>
    %979 = vector.extract_strided_slice %976 {offsets = [0, 0], sizes = [4, 32], strides = [1, 1]} : vector<4x64xf32> to vector<4x32xf32>
    %980 = vector.extract_strided_slice %977 {offsets = [0, 0], sizes = [4, 32], strides = [1, 1]} : vector<4x64xf32> to vector<4x32xf32>
    %cst_397 = arith.constant dense<0.000000e+00> : vector<8x4xf32>
    %981 = tpu.matmul %978, %979, %cst_397 {dimension_numbers = #tpu.dot_dimension_numbers<[1], [1], [0], [0], [0, 0, 1, 0], [], []>} : vector<8x32xf32>, vector<4x32xf32>, vector<8x4xf32> -> vector<8x4xf32>
    %cst_398 = arith.constant 0.176776692 : f32
    %982 = vector.broadcast %cst_398 : f32 to vector<8x4xf32>
    %983 = arith.mulf %981, %982 : vector<8x4xf32>
    %cst_399 = arith.constant dense<0xFF800000> : vector<8xf32>
    %984 = vector.multi_reduction <maximumf>, %983, %cst_399 [1] : vector<8x4xf32> to vector<8xf32>
    %985 = vector.shape_cast %984 : vector<8xf32> to vector<8x1xf32>
    %986 = vector.broadcast %985 : vector<8x1xf32> to vector<8x4xf32>
    %987 = arith.subf %983, %986 : vector<8x4xf32>
    %988 = math.exp %987 : vector<8x4xf32>
    %cst_400 = arith.constant dense<0.000000e+00> : vector<8xf32>
    %989 = vector.multi_reduction <add>, %988, %cst_400 [1] : vector<8x4xf32> to vector<8xf32>
    %990 = vector.shape_cast %989 : vector<8xf32> to vector<8x1xf32>
    %991 = tpu.reciprocal %990 {approx = true} : vector<8x1xf32> -> vector<8x1xf32>
    %992 = vector.broadcast %991 : vector<8x1xf32> to vector<8x4xf32>
    %993 = arith.mulf %988, %992 : vector<8x4xf32>
    %cst_401 = arith.constant dense<0.000000e+00> : vector<8x32xf32>
    %994 = tpu.matmul %993, %980, %cst_401 {dimension_numbers = #tpu.dot_dimension_numbers<[1], [0], [0], [1], [0, 0, 1, 1], [], []>} : vector<8x4xf32>, vector<4x32xf32>, vector<8x32xf32> -> vector<8x32xf32>
    %995 = vector.extract_strided_slice %715 {offsets = [0, 0], sizes = [32, 32], strides = [1, 1]} : vector<64x32xf32> to vector<32x32xf32>
    %cst_402 = arith.constant dense<0.000000e+00> : vector<8x32xf32>
    %996 = tpu.matmul %994, %995, %cst_402 {dimension_numbers = #tpu.dot_dimension_numbers<[1], [0], [0], [1], [0, 0, 1, 1], [], []>} : vector<8x32xf32>, vector<32x32xf32>, vector<8x32xf32> -> vector<8x32xf32>
    %997 = vector.extract_strided_slice %974 {offsets = [0, 32], sizes = [8, 32], strides = [1, 1]} : vector<8x64xf32> to vector<8x32xf32>
    %998 = vector.extract_strided_slice %976 {offsets = [0, 32], sizes = [4, 32], strides = [1, 1]} : vector<4x64xf32> to vector<4x32xf32>
    %999 = vector.extract_strided_slice %977 {offsets = [0, 32], sizes = [4, 32], strides = [1, 1]} : vector<4x64xf32> to vector<4x32xf32>
    %cst_403 = arith.constant dense<0.000000e+00> : vector<8x4xf32>
    %1000 = tpu.matmul %997, %998, %cst_403 {dimension_numbers = #tpu.dot_dimension_numbers<[1], [1], [0], [0], [0, 0, 1, 0], [], []>} : vector<8x32xf32>, vector<4x32xf32>, vector<8x4xf32> -> vector<8x4xf32>
    %cst_404 = arith.constant 0.176776692 : f32
    %1001 = vector.broadcast %cst_404 : f32 to vector<8x4xf32>
    %1002 = arith.mulf %1000, %1001 : vector<8x4xf32>
    %cst_405 = arith.constant dense<0xFF800000> : vector<8xf32>
    %1003 = vector.multi_reduction <maximumf>, %1002, %cst_405 [1] : vector<8x4xf32> to vector<8xf32>
    %1004 = vector.shape_cast %1003 : vector<8xf32> to vector<8x1xf32>
    %1005 = vector.broadcast %1004 : vector<8x1xf32> to vector<8x4xf32>
    %1006 = arith.subf %1002, %1005 : vector<8x4xf32>
    %1007 = math.exp %1006 : vector<8x4xf32>
    %cst_406 = arith.constant dense<0.000000e+00> : vector<8xf32>
    %1008 = vector.multi_reduction <add>, %1007, %cst_406 [1] : vector<8x4xf32> to vector<8xf32>
    %1009 = vector.shape_cast %1008 : vector<8xf32> to vector<8x1xf32>
    %1010 = tpu.reciprocal %1009 {approx = true} : vector<8x1xf32> -> vector<8x1xf32>
    %1011 = vector.broadcast %1010 : vector<8x1xf32> to vector<8x4xf32>
    %1012 = arith.mulf %1007, %1011 : vector<8x4xf32>
    %cst_407 = arith.constant dense<0.000000e+00> : vector<8x32xf32>
    %1013 = tpu.matmul %1012, %999, %cst_407 {dimension_numbers = #tpu.dot_dimension_numbers<[1], [0], [0], [1], [0, 0, 1, 1], [], []>} : vector<8x4xf32>, vector<4x32xf32>, vector<8x32xf32> -> vector<8x32xf32>
    %1014 = vector.extract_strided_slice %715 {offsets = [32, 0], sizes = [32, 32], strides = [1, 1]} : vector<64x32xf32> to vector<32x32xf32>
    %cst_408 = arith.constant dense<0.000000e+00> : vector<8x32xf32>
    %1015 = tpu.matmul %1013, %1014, %cst_408 {dimension_numbers = #tpu.dot_dimension_numbers<[1], [0], [0], [1], [0, 0, 1, 1], [], []>} : vector<8x32xf32>, vector<32x32xf32>, vector<8x32xf32> -> vector<8x32xf32>
    %1016 = arith.addf %996, %1015 : vector<8x32xf32>
    %1017 = arith.addf %1016, %973 : vector<8x32xf32>
    %cst_409 = arith.constant dense<0.000000e+00> : vector<8xf32>
    %1018 = vector.multi_reduction <add>, %1017, %cst_409 [1] : vector<8x32xf32> to vector<8xf32>
    %1019 = vector.shape_cast %1018 : vector<8xf32> to vector<8x1xf32>
    %cst_410 = arith.constant 3.200000e+01 : f32
    %1020 = vector.broadcast %cst_410 : f32 to vector<8x1xf32>
    %1021 = arith.divf %1019, %1020 : vector<8x1xf32>
    %1022 = vector.broadcast %1021 : vector<8x1xf32> to vector<8x32xf32>
    %1023 = arith.subf %1017, %1022 : vector<8x32xf32>
    %1024 = arith.mulf %1023, %1023 : vector<8x32xf32>
    %cst_411 = arith.constant dense<0.000000e+00> : vector<8xf32>
    %1025 = vector.multi_reduction <add>, %1024, %cst_411 [1] : vector<8x32xf32> to vector<8xf32>
    %1026 = vector.shape_cast %1025 : vector<8xf32> to vector<8x1xf32>
    %cst_412 = arith.constant 3.200000e+01 : f32
    %1027 = vector.broadcast %cst_412 : f32 to vector<8x1xf32>
    %1028 = arith.divf %1026, %1027 : vector<8x1xf32>
    %cst_413 = arith.constant 9.99999997E-7 : f32
    %1029 = vector.broadcast %cst_413 : f32 to vector<8x1xf32>
    %1030 = arith.addf %1028, %1029 : vector<8x1xf32>
    %1031 = math.rsqrt %1030 : vector<8x1xf32>
    %1032 = vector.broadcast %1031 : vector<8x1xf32> to vector<8x32xf32>
    %1033 = arith.mulf %1023, %1032 : vector<8x32xf32>
    %1034 = vector.broadcast %716 : vector<1x32xf32> to vector<8x32xf32>
    %1035 = arith.mulf %1033, %1034 : vector<8x32xf32>
    %1036 = vector.broadcast %717 : vector<1x32xf32> to vector<8x32xf32>
    %1037 = arith.addf %1035, %1036 : vector<8x32xf32>
    %cst_414 = arith.constant dense<0.000000e+00> : vector<8x64xf32>
    %1038 = tpu.matmul %1037, %718, %cst_414 {dimension_numbers = #tpu.dot_dimension_numbers<[1], [0], [0], [1], [0, 0, 1, 1], [], []>} : vector<8x32xf32>, vector<32x64xf32>, vector<8x64xf32> -> vector<8x64xf32>
    %1039 = vector.broadcast %719 : vector<1x64xf32> to vector<8x64xf32>
    %1040 = arith.addf %1038, %1039 : vector<8x64xf32>
    %cst_415 = arith.constant 0.000000e+00 : f32
    %1041 = vector.broadcast %cst_415 : f32 to vector<8x64xf32>
    %1042 = arith.maximumf %1040, %1041 : vector<8x64xf32>
    %cst_416 = arith.constant dense<0.000000e+00> : vector<8x32xf32>
    %1043 = tpu.matmul %1042, %720, %cst_416 {dimension_numbers = #tpu.dot_dimension_numbers<[1], [0], [0], [1], [0, 0, 1, 1], [], []>} : vector<8x64xf32>, vector<64x32xf32>, vector<8x32xf32> -> vector<8x32xf32>
    %1044 = vector.broadcast %721 : vector<1x32xf32> to vector<8x32xf32>
    %1045 = arith.addf %1043, %1044 : vector<8x32xf32>
    %1046 = arith.addf %1045, %1037 : vector<8x32xf32>
    %cst_417 = arith.constant dense<0.000000e+00> : vector<8xf32>
    %1047 = vector.multi_reduction <add>, %1046, %cst_417 [1] : vector<8x32xf32> to vector<8xf32>
    %1048 = vector.shape_cast %1047 : vector<8xf32> to vector<8x1xf32>
    %cst_418 = arith.constant 3.200000e+01 : f32
    %1049 = vector.broadcast %cst_418 : f32 to vector<8x1xf32>
    %1050 = arith.divf %1048, %1049 : vector<8x1xf32>
    %1051 = vector.broadcast %1050 : vector<8x1xf32> to vector<8x32xf32>
    %1052 = arith.subf %1046, %1051 : vector<8x32xf32>
    %1053 = arith.mulf %1052, %1052 : vector<8x32xf32>
    %cst_419 = arith.constant dense<0.000000e+00> : vector<8xf32>
    %1054 = vector.multi_reduction <add>, %1053, %cst_419 [1] : vector<8x32xf32> to vector<8xf32>
    %1055 = vector.shape_cast %1054 : vector<8xf32> to vector<8x1xf32>
    %cst_420 = arith.constant 3.200000e+01 : f32
    %1056 = vector.broadcast %cst_420 : f32 to vector<8x1xf32>
    %1057 = arith.divf %1055, %1056 : vector<8x1xf32>
    %cst_421 = arith.constant 9.99999997E-7 : f32
    %1058 = vector.broadcast %cst_421 : f32 to vector<8x1xf32>
    %1059 = arith.addf %1057, %1058 : vector<8x1xf32>
    %1060 = math.rsqrt %1059 : vector<8x1xf32>
    %1061 = vector.broadcast %1060 : vector<8x1xf32> to vector<8x32xf32>
    %1062 = arith.mulf %1052, %1061 : vector<8x32xf32>
    %1063 = vector.broadcast %722 : vector<1x32xf32> to vector<8x32xf32>
    %1064 = arith.mulf %1062, %1063 : vector<8x32xf32>
    %1065 = vector.broadcast %723 : vector<1x32xf32> to vector<8x32xf32>
    %1066 = arith.addf %1064, %1065 : vector<8x32xf32>
    %c1_422 = arith.constant 1 : index
    %c0_423 = arith.constant 0 : index
    %c0_424 = arith.constant 0 : index
    %1067 = vector.load %arg41[%c1_422, %c0_423, %c0_424] : memref<2x8x32xf32, #tpu.memory_space<vmem>>, vector<1x8x32xf32>
    %1068 = vector.shape_cast %1067 : vector<1x8x32xf32> to vector<8x32xf32>
    %1069 = vector.shape_cast %1066 : vector<8x32xf32> to vector<1x8x32xf32>
    tpu.vector_store %arg41[%c1_422, %c0_423, %c0_424], %1069 {strides = array<i32>} : memref<2x8x32xf32, #tpu.memory_space<vmem>>, vector<1x8x32xf32>,
    return
  }
}

</mosaic_0001>

<bundles_post_ra>
// kernel: _lambda_.3
= control target key start
LH: loop header
LB: loop body
LE: loop exit
PB: predicated region body
PF: predicated region fallthrough
CT: control target
= control target key end

     0   :  { %vm73_vm0 = vcmask 1041408   ;;  %vm66_vm1 = vcmask 15360   ;;  %vm249_vm2 = vcmask 261120   ;;  %s1217_s25 = smov 32   ;;  %vm959_vm3 = vcmask 523264   ;;  %s1463_s6 = inlined_call_operand.vmem [shape: f32[2,32], index: 6, kind: input, shape index: {}]   ;;  %s1464_s0 = inlined_call_operand.vmem [shape: f32[16,2], index: 0, kind: input, shape index: {}]   ;;  %s1465_s1 = inlined_call_operand.vmem [shape: f32[16,2], index: 1, kind: input, shape index: {}]   ;;  %s1466_s9 = inlined_call_operand.vmem [shape: f32[32,32], index: 9, kind: input, shape index: {}]   ;;  %s1467_s8 = inlined_call_operand.vmem [shape: f32[32,32], index: 8, kind: input, shape index: {}]   ;;  %s1468_s2 = inlined_call_operand.vmem [shape: f32[16,32], index: 2, kind: input, shape index: {}]   ;;  %s1469_s3 = inlined_call_operand.vmem [shape: f32[16,32], index: 3, kind: input, shape index: {}]   ;;  %s1470_s15 = inlined_call_operand.vmem [shape: f32[32,32], index: 15, kind: input, shape index: {}]   ;;  %s1471_s12 = inlined_call_operand.vmem [shape: f32[32,32], index: 12, kind: input, shape index: {}]   ;;  %s1472_s7 = inlined_call_operand.vmem [shape: f32[1,32], index: 7, kind: input, shape index: {}]   ;;  %s1473_s5 = inlined_call_operand.vmem [shape: f32[16,32], index: 5, kind: input, shape index: {}]   ;;  %s1474_s14 = inlined_call_operand.vmem [shape: f32[32,32], index: 14, kind: input, shape index: {}]   ;;  %s1475_s4 = inlined_call_operand.vmem [shape: f32[16,32], index: 4, kind: input, shape index: {}]   ;;  %s1476_s11 = inlined_call_operand.vmem [shape: f32[32,32], index: 11, kind: input, shape index: {}]   ;;  %s1477_s10 = inlined_call_operand.vmem [shape: f32[1,32], index: 10, kind: input, shape index: {}]   ;;  %s1478_s16 = inlined_call_operand.vmem [shape: f32[1,32], index: 16, kind: input, shape index: {}]   ;;  %s1479_s13 = inlined_call_operand.vmem [shape: f32[1,32], index: 13, kind: input, shape index: {}]   ;;  %s1480_s17 = inlined_call_operand.vmem [shape: f32[16,64], index: 17, kind: output, shape index: {}]  }
   0x1   :  { %1482 = sst [smem:[#allocation2_spill]] %s1463_s6  ;;  %v154_v3 = vld [vmem:[%s1465_s1] sm:$0xff]  ;;  %v155_v4 = vld [vmem:[%s1465_s1 + $0x8] sm:$0xff]  ;;  %v247_v7 = vld [vmem:[%s1466_s9 + $0x10] sm:$0xff] }
   0x2   :  { %1483 = sst [smem:[#allocation3_spill]] %s1464_s0  ;;  %s1484_s26 = sld [smem:[#allocation2_spill]]  ;;  %v245_v5 = vld [vmem:[%s1466_s9] sm:$0xff]  ;;  %v246_v6 = vld [vmem:[%s1466_s9 + $0x8] sm:$0xff]  ;;  %v248_v8 = vld [vmem:[%s1466_s9 + $0x18] sm:$0xff]  ;;  %1053 = vmatprep.mubr.msk.f32.mxu1 %vm66_vm1, %v154_v3 }
   0x3   :  { %s1485_s29 = sld [smem:[#allocation3_spill]]  ;;  %v1144_v9 = vpack.c.bf16 %v246_v6, %v245_v5  ;;  %v1148_v10 = vpack.c.bf16 %v248_v8, %v247_v7  ;;  %v239_v11 = vld [vmem:[%s1467_s8] sm:$0xff]  ;;  %v240_v12 = vld [vmem:[%s1467_s8 + $0x8] sm:$0xff]  ;;  %v241_v18 = vld [vmem:[%s1467_s8 + $0x10] sm:$0xff] }
   0x4   :  { %v243_v13 = vld [vmem:[%s1468_s2] sm:$0xff]  ;;  %v1152_v15 = vpack.c.bf16 %v240_v12, %v239_v11  ;;  %v244_v16 = vld [vmem:[%s1468_s2 + $0x8] sm:$0xff]  ;;  %v242_v19 = vld [vmem:[%s1467_s8 + $0x18] sm:$0xff] }
   0x5   :  { %v421_v14 = vld [vmem:[%s1469_s3] sm:$0xff]  ;;  %v422_v17 = vld [vmem:[%s1469_s3 + $0x8] sm:$0xff]  ;;  %v1156_v20 = vpack.c.bf16 %v242_v19, %v241_v18  ;;  %v776_v36 = vld [vmem:[%s1470_s15 + $0x10] sm:$0xff] }
   0x6   :  { %v774_v21 = vld [vmem:[%s1470_s15] sm:$0xff]  ;;  %v775_v22 = vld [vmem:[%s1470_s15 + $0x8] sm:$0xff]  ;;  %v777_v37 = vld [vmem:[%s1470_s15 + $0x18] sm:$0xff] }
   0x7   :  { %v1192_v23 = vpack.c.bf16 %v775_v22, %v774_v21  ;;  %v591_v24 = vld [vmem:[%s1471_s12] sm:$0xff]  ;;  %v592_v25 = vld [vmem:[%s1471_s12 + $0x8] sm:$0xff]  ;;  %v1196_v42 = vpack.c.bf16 %v777_v37, %v776_v36  ;;  %v770_v47 = vld [vmem:[%s1474_s14 + $0x10] sm:$0xff] }
   0x8   :  { %v58_v0 = vld [vmem:[%s1484_s26] sm:$0x3]  ;;  %v1176_v26 = vpack.c.bf16 %v592_v25, %v591_v24  ;;  %v769_v45 = vld [vmem:[%s1474_s14 + $0x8] sm:$0xff]  ;;  %v771_v48 = vld [vmem:[%s1474_s14 + $0x18] sm:$0xff] }
   0x9   :  { %v56_v1 = vld [vmem:[%s1485_s29] sm:$0xff]  ;;  %v57_v2 = vld [vmem:[%s1485_s29 + $0x8] sm:$0xff]  ;;  %1046 = vmatprep.subr.msk.mxu0 %vm73_vm0, %v58_v0  ;;  %1051 = vmatprep.subr.msk.mxu1 %vm73_vm0, %v58_v0  ;;  %v1204_v50 = vpack.c.bf16 %v771_v48, %v770_v47  ;;  %v593_v53 = vld [vmem:[%s1471_s12 + $0x10] sm:$0xff] }
   0xa   :  { %1047 = vmatpush3.msk.msra.mxu0 %vm73_vm0, %v58_v0  ;;  %1048 = vmatprep.mubr.msk.f32.mxu0 %vm66_vm1, %v56_v1  ;;  %v966_v27 = vld [vmem:[%s1472_s7] ss:$0 sm:$0xff]  ;;  %v773_v49 = vld [vmem:[%s1473_s5 + $0x8] sm:$0xff]  ;;  %v594_v54 = vld [vmem:[%s1471_s12 + $0x18] sm:$0xff] }
   0xb   :  { %1052 = vmatpush3.msk.msra.mxu1 %vm73_vm0, %v58_v0  ;;  %1049 = vmatmul.mubr.msk.f32.vlgmr.msra.gmra.mrb[0].mxu0 %vm66_vm1, %v57_v2  ;;  %v772_v43 = vld [vmem:[%s1473_s5] sm:$0xff]  ;;  %v767_v52 = vld [vmem:[%s1475_s4 + $0x8] sm:$0xff]  ;;  %v1180_v55 = vpack.c.bf16 %v594_v54, %v593_v53  ;;  %v589_v62 = vld [vmem:[%s1476_s11 + $0x10] sm:$0xff] }
   0xc   :  { %1054 = vmatmul.mubr.msk.f32.vlgmr.msra.gmra.mrb[0].mxu1 %vm66_vm1, %v155_v4  ;;  %1161 = vmatprep.subr.bf16.mxu1 %v1144_v9  ;;  %v768_v44 = vld [vmem:[%s1474_s14] sm:$0xff]  ;;  %v588_v57 = vld [vmem:[%s1476_s11 + $0x8] sm:$0xff]  ;;  %v590_v63 = vld [vmem:[%s1476_s11 + $0x18] sm:$0xff] }
   0xd   :  { %1145 = vmatprep.subr.bf16.mxu0 %v1144_v9  ;;  %1163 = vmatpush3.bf16.msra.mxu1 %v1144_v9  ;;  %v1200_v46 = vpack.c.bf16 %v769_v45, %v768_v44  ;;  %v766_v51 = vld [vmem:[%s1475_s4] sm:$0xff]  ;;  %v1188_v4 = vpack.c.bf16 %v590_v63, %v589_v62 }
   0xe   :  { %1147 = vmatpush3.bf16.msra.mxu0 %v1144_v9  ;;  %1165 = vmatprep.subr.bf16.mxu1 %v1148_v10  ;;  %v587_v56 = vld [vmem:[%s1476_s11] sm:$0xff] }
   0xf   :  { %1149 = vmatprep.subr.bf16.mxu0 %v1148_v10  ;;  %1064 = vmatprep.mubr.msk.f32.mxu0 %vm249_vm2, %v243_v13  ;;  %v1184_v58 = vpack.c.bf16 %v588_v57, %v587_v56  ;;  %v977_v59 = vld [vmem:[%s1477_s10] ss:$0 sm:$0xff] }
  0x10   :  { %1086 = vmatprep.mubr.msk.f32.mxu1 %vm249_vm2, %v421_v14  ;;  %v991_v7 = vld [vmem:[%s1478_s16] ss:$0 sm:$0xff] }
  0x11   :  { %1167 = vmatpush3.bf16.msra.mxu1 %v1148_v10  ;;  %v986_v13 = vld [vmem:[%s1479_s13] ss:$0 sm:$0xff] }
  0x12   :  { %1151 = vmatpush3.bf16.msra.mxu0 %v1148_v10  ;;  %1169 = vmatprep.subr.bf16.mxu1 %v1152_v15 }
  0x13   :  { %1153 = vmatprep.subr.bf16.mxu0 %v1152_v15 }
  0x14   :  { %1087 = vmatmul.mubr.msk.f32.vlgmr.msra.gmra.mrb[2].mxu1 %vm249_vm2, %v422_v17 }
  0x15   :  { %1065 = vmatmul.mubr.msk.f32.vlgmr.msra.gmra.mrb[2].mxu0 %vm249_vm2, %v244_v16  ;;  %1171 = vmatpush3.bf16.msra.mxu1 %v1152_v15 }
  0x16   :  { %1155 = vmatpush3.bf16.msra.mxu0 %v1152_v15  ;;  %1173 = vmatprep.subr.bf16.mxu1 %v1156_v20 }
  0x17   :  { %1157 = vmatprep.subr.bf16.mxu0 %v1156_v20 }
  0x19   :  { %1175 = vmatpush3.bf16.msra.mxu1 %v1156_v20 }
  0x1a   :  { %1159 = vmatpush3.bf16.msra.mxu0 %v1156_v20  ;;  %1193 = vmatprep.subr.bf16.mxu1 %v1192_v23 }
  0x1b   :  { %1177 = vmatprep.subr.bf16.mxu0 %v1176_v26 }
  0xde   :  { %v1050_v28 = vpop.f32.mrb[0].mxu0 }
  0xdf   :  { %v1055_v29 = vpop.f32.mrb[0].mxu1  ;;  %v149_v30 = vadd.f32 %v1050_v28, %v966_v27  ;;  %v143_v32 = vpop.f32.mrb[1].mxu0 }
  0xe0   :  { %v234_v31 = vadd.f32 %v1055_v29, %v966_v27  ;;  %v228_v33 = vpop.f32.mrb[1].mxu1  ;;  %v144_v34 = vadd.f32 %v966_v27, %v143_v32 }
  0xe1   :  { %v229_v35 = vadd.f32 %v966_v27, %v228_v33  ;;  %v153_v38 = vmax.f32 %v149_v30, 0.0 }
  0xe2   :  { %v152_v39 = vmax.f32 %v144_v34, 0.0  ;;  %v238_v41 = vmax.f32 %v234_v31, 0.0 }
  0xe3   :  { %v237_v40 = vmax.f32 %v229_v35, 0.0 }
  0xe4   :  { %1075 = vmatprep.mubr.msk.f32.mxu0 %vm249_vm2, %v152_v39 }
  0xe5   :  { %1097 = vmatprep.mubr.msk.f32.mxu1 %vm249_vm2, %v237_v40  ;;  %1076 = vmatmul.mubr.msk.f32.vlgmr.msra.gmra.mrb[2].mxu0 %vm249_vm2, %v153_v38 }
  0xe6   :  { %1098 = vmatmul.mubr.msk.f32.vlgmr.msra.gmra.mrb[2].mxu1 %vm249_vm2, %v238_v41  ;;  %1179 = vmatpush3.bf16.msra.mxu0 %v1176_v26 }
  0xe7   :  { %1195 = vmatpush3.bf16.msra.mxu1 %v1192_v23  ;;  %1130 = vmatprep.mubr.msk.f32.mxu1 %vm249_vm2, %v772_v43 }
  0xe8   :  { %1197 = vmatprep.subr.bf16.mxu1 %v1196_v42  ;;  %1181 = vmatprep.subr.bf16.mxu0 %v1180_v55 }
  0xea   :  { %1183 = vmatpush3.bf16.msra.mxu0 %v1180_v55 }
  0xeb   :  { %1199 = vmatpush3.bf16.msra.mxu1 %v1196_v42  ;;  %1185 = vmatprep.subr.bf16.mxu0 %v1184_v58 }
  0xec   :  { %1201 = vmatprep.subr.bf16.mxu1 %v1200_v46 }
  0xee   :  { %1131 = vmatmul.mubr.msk.f32.vlgmr.msra.gmra.mrb[4].mxu1 %vm249_vm2, %v773_v49 }
  0xef   :  { %1203 = vmatpush3.bf16.msra.mxu1 %v1200_v46  ;;  %1141 = vmatprep.mubr.msk.f32.mxu1 %vm249_vm2, %v766_v51 }
  0xf0   :  { %1205 = vmatprep.subr.bf16.mxu1 %v1204_v50 }
  0xf3   :  { %1207 = vmatpush3.bf16.msra.mxu1 %v1204_v50 }
  0xf6   :  { %1142 = vmatmul.mubr.msk.f32.vlgmr.msra.gmra.mrb[4].mxu1 %vm249_vm2, %v767_v52 }
 0x1b8   :  { %v1077_v60 = vpop.f32.mrb[2].mxu0 }
 0x1b9   :  { %v1099_v61 = vpop.f32.mrb[2].mxu1  ;;  %v403_v0 = vpop.f32.mrb[3].mxu0  ;;  %v420_v6 = vadd.f32 %v1077_v60, %v977_v59 }
 0x1ba   :  { %v576_v1 = vpop.f32.mrb[3].mxu1  ;;  %v586_v3 = vadd.f32 %v1099_v61, %v977_v59  ;;  %v419_v5 = vadd.f32 %v977_v59, %v403_v0 }
 0x1bb   :  { %v585_v2 = vadd.f32 %v977_v59, %v576_v1 }
 0x1bd   :  { %1108 = vmatprep.mubr.msk.f32.mxu0 %vm249_vm2, %v585_v2 }
 0x1be   :  { %1109 = vmatmul.mubr.msk.f32.vlgmr.msra.gmra.mrb[4].mxu0 %vm249_vm2, %v586_v3 }
 0x1bf   :  { %1187 = vmatpush3.bf16.msra.mxu0 %v1184_v58  ;;  %1119 = vmatprep.mubr.msk.f32.mxu0 %vm249_vm2, %v419_v5 }
 0x1c0   :  { %1189 = vmatprep.subr.bf16.mxu0 %v1188_v4 }
 0x1c3   :  { %1191 = vmatpush3.bf16.msra.mxu0 %v1188_v4 }
 0x1c6   :  { %1120 = vmatmul.mubr.msk.f32.vlgmr.msra.gmra.mrb[4].mxu0 %vm249_vm2, %v420_v6 }
 0x1c9   :  { %v1143_v8 = vpop.f32.mrb[4].mxu1 }
 0x1ca   :  { %v931_v9 = vpop.f32.mrb[5].mxu1  ;;  %v948_v11 = vadd.f32 %v1143_v8, %v991_v7 }
 0x1cb   :  { %v947_v10 = vadd.f32 %v991_v7, %v931_v9 }
 0x1cd   :  { %951 = vrot.lane.b32.xlu0 %v947_v10, %s1217_s25 }
 0x1d1   :  { %953 = vrot.lane.b32.xlu0 %v948_v11, %s1217_s25 }
 0x23f   :  { %v952_v12 = vpop.permute.xlu0 %951 }
 0x243   :  { %v954_v17 = vpop.permute.xlu0 %953 }
 0x299   :  { %v1121_v14 = vpop.f32.mrb[4].mxu0 }
 0x29a   :  { %v765_v15 = vadd.f32 %v1121_v14, %v986_v13  ;;  %v748_v16 = vpop.f32.mrb[5].mxu0 }
 0x29b   :  { %v764_v18 = vadd.f32 %v986_v13, %v748_v16 }
 0x29c   :  { %v958_v19 = vsel %vm249_vm2, %v765_v15, %v954_v17 }
 0x29d   :  { %961 = vst.msk [vmem:[%s1480_s17 + $0x8] sm:$0xff] %vm959_vm3, %v958_v19  ;;  %v957_v20 = vsel %vm249_vm2, %v764_v18, %v952_v12 }
 0x29e   :  { %960 = vst.msk [vmem:[%s1480_s17] sm:$0xff] %vm959_vm3, %v957_v20 }

// kernel: _lambda_.5
= control target key start
LH: loop header
LB: loop body
LE: loop exit
PB: predicated region body
PF: predicated region fallthrough
CT: control target
= control target key end

     0   :  { %v2699_v0 = vmov 0.0|0.0   ;;  %vm2700_vm0 = vmmov 0   ;;  %v2701_v8 = vmov 0.0   ;;  %vm84_vm1 = vcmask 261120   ;;  %s3199_s3 = inlined_call_operand.vmem [shape: f32[3,32,32], index: 3, kind: input, shape index: {}]   ;;  %s3200_s4 = inlined_call_operand.vmem [shape: f32[3,96,32], index: 4, kind: input, shape index: {}]   ;;  %s3201_s0 = inlined_call_operand.vmem [shape: f32[2,8,32], index: 0, kind: input, shape index: {}]   ;;  %s3202_s1 = inlined_call_operand.vmem [shape: f32[2,8,32], index: 1, kind: input, shape index: {}]   ;;  %s3203_s2 = inlined_call_operand.vmem [shape: f32[2,8,32], index: 2, kind: input, shape index: {}]   ;;  %s3204_s6 = inlined_call_operand.vmem [shape: f32[32,128], index: 6, kind: input, shape index: {}]   ;;  %s3205_s5 = inlined_call_operand.vmem [shape: f32[3,8,32], index: 5, kind: input, shape index: {}]   ;;  %s3206_s7 = inlined_call_operand.vmem [shape: f32[2,8,128], index: 7, kind: output, shape index: {}]  }
   0x1   :  { %2472 = vmatprep.subr.bf16.mxu1 %v2699_v0  ;;  %2496 = vmatprep.subr.bf16.mxu0 %v2699_v0  ;;  %v26_v1 = vld [vmem:[%s3199_s3] sm:$0xff]  ;;  %v27_v2 = vld [vmem:[%s3199_s3 + $0x8] sm:$0xff]  ;;  %v28_v6 = vld [vmem:[%s3199_s3 + $0x10] sm:$0xff] }
   0x2   :  { %v30_v3 = vld [vmem:[%s3199_s3 + $0x20] sm:$0xff]  ;;  %v2753_v4 = vpack.c.bf16 %v27_v2, %v26_v1  ;;  %v31_v5 = vld [vmem:[%s3199_s3 + $0x28] sm:$0xff]  ;;  %v29_v7 = vld [vmem:[%s3199_s3 + $0x18] sm:$0xff]  ;;  %2194 = vmatprep.mubr.msk.f32.mxu1 %vm2700_vm0, %v2701_v8  ;;  %2238 = vmatprep.mubr.msk.f32.mxu0 %vm2700_vm0, %v2701_v8 }
   0x3   :  { %v2768_v9 = vpack.c.bf16 %v31_v5, %v30_v3  ;;  %v32_v10 = vld [vmem:[%s3199_s3 + $0x30] sm:$0xff]  ;;  %v33_v11 = vld [vmem:[%s3199_s3 + $0x38] sm:$0xff]  ;;  %v2777_v12 = vpack.c.bf16 %v29_v7, %v28_v6  ;;  %v42_v14 = vld [vmem:[%s3200_s4 + $0x20] sm:$0xff] }
   0x4   :  { %2474 = vmatpush3.bf16.msra.mxu1 %v2753_v4  ;;  %v2781_v13 = vpack.c.bf16 %v33_v11, %v32_v10  ;;  %v43_v15 = vld [vmem:[%s3200_s4 + $0x28] sm:$0xff]  ;;  %v54_v16 = vld [vmem:[%s3200_s4 + $0x80] sm:$0xff]  ;;  %v44_v22 = vld [vmem:[%s3200_s4 + $0x30] sm:$0xff] }
   0x5   :  { %2498 = vmatpush3.bf16.msra.mxu0 %v2768_v9  ;;  %2475 = vmatprep.subr.bf16.mxu1 %v2699_v0  ;;  %v55_v17 = vld [vmem:[%s3200_s4 + $0x88] sm:$0xff]  ;;  %v2800_v18 = vld [vmem:[%s3201_s0] sm:$0xff]  ;;  %v2802_v19 = vpack.c.bf16 %v43_v15, %v42_v14  ;;  %v45_v23 = vld [vmem:[%s3200_s4 + $0x38] sm:$0xff] }
   0x6   :  { %2499 = vmatprep.subr.bf16.mxu0 %v2699_v0  ;;  %v2809_v20 = vld [vmem:[%s3202_s1] sm:$0xff]  ;;  %v2811_v21 = vpack.c.bf16 %v55_v17, %v54_v16  ;;  %v56_v24 = vld [vmem:[%s3200_s4 + $0x90] sm:$0xff]  ;;  %v57_v25 = vld [vmem:[%s3200_s4 + $0x98] sm:$0xff]  ;;  %v2831_v26 = vpack.c.bf16 %v45_v23, %v44_v22 }
   0x7   :  { %v2835_v27 = vpack.c.bf16 %v57_v25, %v56_v24  ;;  %v38_v28 = vld [vmem:[%s3200_s4] sm:$0xff]  ;;  %v39_v29 = vld [vmem:[%s3200_s4 + $0x8] sm:$0xff]  ;;  %v40_v34 = vld [vmem:[%s3200_s4 + $0x10] sm:$0xff] }
   0x8   :  { %2477 = vmatpush3.bf16.msra.mxu1 %v2777_v12  ;;  %v50_v30 = vld [vmem:[%s3200_s4 + $0x60] sm:$0xff]  ;;  %v51_v31 = vld [vmem:[%s3200_s4 + $0x68] sm:$0xff]  ;;  %v2855_v32 = vpack.c.bf16 %v39_v29, %v38_v28  ;;  %v41_v35 = vld [vmem:[%s3200_s4 + $0x18] sm:$0xff] }
   0x9   :  { %2501 = vmatpush3.bf16.msra.mxu0 %v2781_v13  ;;  %2478 = vmatprep.subr.bf16.mxu1 %v2699_v0  ;;  %v2859_v33 = vpack.c.bf16 %v51_v31, %v50_v30  ;;  %v52_v36 = vld [vmem:[%s3200_s4 + $0x70] sm:$0xff]  ;;  %v53_v37 = vld [vmem:[%s3200_s4 + $0x78] sm:$0xff]  ;;  %v2879_v38 = vpack.c.bf16 %v41_v35, %v40_v34  ;;  %v46_v40 = vld [vmem:[%s3200_s4 + $0x40] sm:$0xff] }
   0xa   :  { %2502 = vmatprep.subr.bf16.mxu0 %v2699_v0  ;;  %v2883_v39 = vpack.c.bf16 %v53_v37, %v52_v36  ;;  %v47_v41 = vld [vmem:[%s3200_s4 + $0x48] sm:$0xff]  ;;  %v58_v42 = vld [vmem:[%s3200_s4 + $0xa0] sm:$0xff]  ;;  %v48_v46 = vld [vmem:[%s3200_s4 + $0x50] sm:$0xff] }
   0xb   :  { %2195 = vmatmul.mubr.msk.f32.vlgmr.msra.gmra.mrb[0].mxu1 %vm84_vm1, %v2800_v18  ;;  %v59_v43 = vld [vmem:[%s3200_s4 + $0xa8] sm:$0xff]  ;;  %v2903_v44 = vpack.c.bf16 %v47_v41, %v46_v40  ;;  %v49_v47 = vld [vmem:[%s3200_s4 + $0x58] sm:$0xff]  ;;  %v60_v48 = vld [vmem:[%s3200_s4 + $0xb0] sm:$0xff] }
   0xc   :  { %2480 = vmatpush3.bf16.msra.mxu1 %v2802_v19  ;;  %2239 = vmatmul.mubr.msk.f32.vlgmr.msra.gmra.mrb[0].mxu0 %vm84_vm1, %v2809_v20  ;;  %v2907_v45 = vpack.c.bf16 %v59_v43, %v58_v42  ;;  %v61_v49 = vld [vmem:[%s3200_s4 + $0xb8] sm:$0xff]  ;;  %v2927_v50 = vpack.c.bf16 %v49_v47, %v48_v46  ;;  %v34_v52 = vld [vmem:[%s3199_s3 + $0x40] sm:$0xff]  ;;  %v35_v53 = vld [vmem:[%s3199_s3 + $0x48] sm:$0xff] }
   0xd   :  { %2504 = vmatpush3.bf16.msra.mxu0 %v2811_v21  ;;  %2481 = vmatprep.subr.bf16.mxu1 %v2699_v0  ;;  %v2931_v51 = vpack.c.bf16 %v61_v49, %v60_v48  ;;  %v83_v54 = vld [vmem:[%s3203_s2] sm:$0xff]  ;;  %v2948_v55 = vpack.c.bf16 %v35_v53, %v34_v52  ;;  %v36_v56 = vld [vmem:[%s3199_s3 + $0x50] sm:$0xff]  ;;  %v37_v57 = vld [vmem:[%s3199_s3 + $0x58] sm:$0xff] }
   0xe   :  { %2505 = vmatprep.subr.bf16.mxu0 %v2699_v0  ;;  %2205 = vmatprep.mubr.msk.f32.mxu1 %vm2700_vm0, %v2701_v8  ;;  %v2962_v58 = vpack.c.bf16 %v37_v57, %v36_v56  ;;  %v66_v59 = vld [vmem:[%s3200_s4 + $0xe0] sm:$0xff]  ;;  %v67_v60 = vld [vmem:[%s3200_s4 + $0xe8] sm:$0xff]  ;;  %v68_v62 = vld [vmem:[%s3200_s4 + $0xf0] sm:$0xff] }
   0xf   :  { %2249 = vmatprep.mubr.msk.f32.mxu0 %vm2700_vm0, %v2701_v8  ;;  %v2976_v61 = vpack.c.bf16 %v67_v60, %v66_v59  ;;  %v69_v63 = vld [vmem:[%s3200_s4 + $0xf8] sm:$0xff]  ;;  %v62_v2 = vld [vmem:[%s3200_s4 + $0xc0] sm:$0xff]  ;;  %v63_v3 = vld [vmem:[%s3200_s4 + $0xc8] sm:$0xff] }
  0x10   :  { %2483 = vmatpush3.bf16.msra.mxu1 %v2831_v26  ;;  %v2987_v1 = vpack.c.bf16 %v69_v63, %v68_v62  ;;  %v2999_v5 = vpack.c.bf16 %v63_v3, %v62_v2  ;;  %v64_v6 = vld [vmem:[%s3200_s4 + $0xd0] sm:$0xff]  ;;  %v65_v7 = vld [vmem:[%s3200_s4 + $0xd8] sm:$0xff]  ;;  %v70_v11 = vld [vmem:[%s3200_s4 + $0x100] sm:$0xff] }
  0x11   :  { %2507 = vmatpush3.bf16.msra.mxu0 %v2835_v27  ;;  %2484 = vmatprep.subr.bf16.mxu1 %v2699_v0  ;;  %v3011_v10 = vpack.c.bf16 %v65_v7, %v64_v6  ;;  %v71_v14 = vld [vmem:[%s3200_s4 + $0x108] sm:$0xff]  ;;  %v72_v16 = vld [vmem:[%s3200_s4 + $0x110] sm:$0xff]  ;;  %v73_v17 = vld [vmem:[%s3200_s4 + $0x118] sm:$0xff] }
  0x12   :  { %2508 = vmatprep.subr.bf16.mxu0 %v2699_v0  ;;  %v3023_v15 = vpack.c.bf16 %v71_v14, %v70_v11  ;;  %v79_v22 = vld [vmem:[%s3204_s6 + $0x10] sm:$0xff]  ;;  %v80_v24 = vld [vmem:[%s3204_s6 + $0x18] sm:$0xff]  ;;  %v3100_v31 = vld [vmem:[%s3203_s2 + $0x8] sm:$0xff] }
  0x13   :  { %2206 = vmatmul.mubr.msk.f32.vlgmr.msra.gmra.mrb[2].mxu1 %vm84_vm1, %v2809_v20  ;;  %v2548_v25 = vpack.c.bf16 %v80_v24, %v79_v22  ;;  %v3110_v47 = vld [vmem:[%s3205_s5] sm:$0xff]  ;;  %v3115_v48 = vld [vmem:[%s3205_s5 + $0x8] sm:$0xff]  ;;  %v3122_v7 = vld [vmem:[%s3205_s5 + $0x10] sm:$0xff] }
  0x14   :  { %2250 = vmatmul.mubr.msk.f32.vlgmr.msra.gmra.mrb[2].mxu0 %vm84_vm1, %v2809_v20  ;;  %2486 = vmatpush3.bf16.msra.mxu1 %v2855_v32 }
  0x15   :  { %2510 = vmatpush3.bf16.msra.mxu0 %v2859_v33  ;;  %2487 = vmatprep.subr.bf16.mxu1 %v2699_v0 }
  0x16   :  { %2511 = vmatprep.subr.bf16.mxu0 %v2699_v0  ;;  %2216 = vmatprep.mubr.msk.f32.mxu1 %vm2700_vm0, %v2701_v8 }
  0x17   :  { %2260 = vmatprep.mubr.msk.f32.mxu0 %vm2700_vm0, %v2701_v8 }
  0x18   :  { %2489 = vmatpush3.bf16.msra.mxu1 %v2879_v38 }
  0x19   :  { %2513 = vmatpush3.bf16.msra.mxu0 %v2883_v39  ;;  %2490 = vmatprep.subr.bf16.mxu1 %v2699_v0 }
  0x1a   :  { %2514 = vmatprep.subr.bf16.mxu0 %v2699_v0 }
  0x1b   :  { %2217 = vmatmul.mubr.msk.f32.vlgmr.msra.gmra.mrb[2].mxu1 %vm84_vm1, %v2800_v18 }
  0x1c   :  { %2261 = vmatmul.mubr.msk.f32.vlgmr.msra.gmra.mrb[2].mxu0 %vm84_vm1, %v2800_v18  ;;  %2492 = vmatpush3.bf16.msra.mxu1 %v2903_v44 }
  0x1d   :  { %2516 = vmatpush3.bf16.msra.mxu0 %v2907_v45  ;;  %2493 = vmatprep.subr.bf16.mxu1 %v2699_v0 }
  0x1e   :  { %2517 = vmatprep.subr.bf16.mxu0 %v2699_v0  ;;  %2227 = vmatprep.mubr.msk.f32.mxu1 %vm2700_vm0, %v2701_v8 }
  0x1f   :  { %2271 = vmatprep.mubr.msk.f32.mxu0 %vm2700_vm0, %v2701_v8 }
  0x20   :  { %2495 = vmatpush3.bf16.msra.mxu1 %v2927_v50 }
  0x21   :  { %2519 = vmatpush3.bf16.msra.mxu0 %v2931_v51  ;;  %2520 = vmatprep.subr.bf16.mxu1 %v2699_v0 }
  0x22   :  { %2544 = vmatprep.subr.bf16.mxu0 %v2699_v0 }
  0x23   :  { %2228 = vmatmul.mubr.msk.f32.vlgmr.msra.gmra.mrb[2].mxu1 %vm84_vm1, %v83_v54 }
  0x24   :  { %2272 = vmatmul.mubr.msk.f32.vlgmr.msra.gmra.mrb[2].mxu0 %vm84_vm1, %v83_v54  ;;  %2522 = vmatpush3.bf16.msra.mxu1 %v2948_v55 }
  0x25   :  { %2523 = vmatprep.subr.bf16.mxu1 %v2699_v0  ;;  %2282 = vmatprep.mubr.msk.f32.mxu1 %vm2700_vm0, %v2701_v8 }
  0x26   :  { %2326 = vmatprep.mubr.msk.f32.mxu0 %vm2700_vm0, %v2701_v8 }
  0x28   :  { %2525 = vmatpush3.bf16.msra.mxu1 %v2962_v58 }
  0x29   :  { %2526 = vmatprep.subr.bf16.mxu1 %v2699_v0 }
  0x2b   :  { %2283 = vmatmul.mubr.msk.f32.vlgmr.msra.gmra.mrb[4].mxu1 %vm84_vm1, %v83_v54 }
  0x2c   :  { %2528 = vmatpush3.bf16.msra.mxu1 %v2976_v61  ;;  %2293 = vmatprep.mubr.msk.f32.mxu1 %vm2700_vm0, %v2701_v8 }
  0x2d   :  { %2529 = vmatprep.subr.bf16.mxu1 %v2699_v0 }
  0x30   :  { %2531 = vmatpush3.bf16.msra.mxu1 %v2987_v1 }
  0x31   :  { %2532 = vmatprep.subr.bf16.mxu1 %v2699_v0 }
  0x33   :  { %2294 = vmatmul.mubr.msk.f32.vlgmr.msra.gmra.mrb[6].mxu1 %vm84_vm1, %v2809_v20  ;;  %v3035_v20 = vpack.c.bf16 %v73_v17, %v72_v16 }
  0x34   :  { %2534 = vmatpush3.bf16.msra.mxu1 %v2999_v5  ;;  %2304 = vmatprep.mubr.msk.f32.mxu1 %vm2700_vm0, %v2701_v8 }
  0x35   :  { %2535 = vmatprep.subr.bf16.mxu1 %v2699_v0 }
  0x38   :  { %2537 = vmatpush3.bf16.msra.mxu1 %v3011_v10 }
  0x39   :  { %2538 = vmatprep.subr.bf16.mxu1 %v2699_v0 }
  0x3b   :  { %2305 = vmatmul.mubr.msk.f32.vlgmr.msra.gmra.mrb[6].mxu1 %vm84_vm1, %v2800_v18  ;;  %v3050_v18 = vld [vmem:[%s3202_s1 + $0x8] sm:$0xff] }
  0x3c   :  { %2540 = vmatpush3.bf16.msra.mxu1 %v3023_v15  ;;  %2315 = vmatprep.mubr.msk.f32.mxu1 %vm2700_vm0, %v2701_v8 }
  0x3d   :  { %2541 = vmatprep.subr.bf16.mxu1 %v2699_v0 }
  0x40   :  { %2543 = vmatpush3.bf16.msra.mxu1 %v3035_v20 }
  0x41   :  { %2574 = vmatprep.subr.bf16.mxu1 %v2699_v0 }
  0x43   :  { %2316 = vmatmul.mubr.msk.f32.vlgmr.msra.gmra.mrb[6].mxu1 %vm84_vm1, %v83_v54 }
  0x44   :  { %2576 = vmatpush3.bf16.msra.mxu1 %v2768_v9  ;;  %2381 = vmatprep.mubr.msk.f32.mxu1 %vm2700_vm0, %v2701_v8  ;;  %v3073_v9 = vld [vmem:[%s3201_s0 + $0x8] sm:$0xff] }
  0x45   :  { %2577 = vmatprep.subr.bf16.mxu1 %v2699_v0 }
  0x48   :  { %2579 = vmatpush3.bf16.msra.mxu1 %v2781_v13  ;;  %v77_v13 = vld [vmem:[%s3204_s6] sm:$0xff] }
  0x49   :  { %2580 = vmatprep.subr.bf16.mxu1 %v2699_v0 }
  0x4b   :  { %2382 = vmatmul.mubr.msk.f32.vlgmr.msra.gmra.mrb[8].mxu1 %vm84_vm1, %v3050_v18 }
  0x4c   :  { %2582 = vmatpush3.bf16.msra.mxu1 %v2811_v21  ;;  %2392 = vmatprep.mubr.msk.f32.mxu1 %vm2700_vm0, %v2701_v8  ;;  %v78_v21 = vld [vmem:[%s3204_s6 + $0x8] sm:$0xff] }
  0x4d   :  { %2583 = vmatprep.subr.bf16.mxu1 %v2699_v0  ;;  %v2545_v23 = vpack.c.bf16 %v78_v21, %v77_v13 }
  0x4f   :  { %2546 = vmatpush3.bf16.msra.mxu0 %v2545_v23 }
  0x50   :  { %2585 = vmatpush3.bf16.msra.mxu1 %v2835_v27  ;;  %2547 = vmatprep.subr.bf16.mxu0 %v2699_v0 }
  0x51   :  { %2586 = vmatprep.subr.bf16.mxu1 %v2699_v0 }
  0x53   :  { %2393 = vmatmul.mubr.msk.f32.vlgmr.msra.gmra.mrb[10].mxu1 %vm84_vm1, %v3050_v18  ;;  %2549 = vmatpush3.bf16.msra.mxu0 %v2548_v25 }
  0x54   :  { %2588 = vmatpush3.bf16.msra.mxu1 %v2859_v33  ;;  %2403 = vmatprep.mubr.msk.f32.mxu1 %vm2700_vm0, %v2701_v8 }
  0x55   :  { %2589 = vmatprep.subr.bf16.mxu1 %v2699_v0  ;;  %2550 = vmatprep.subr.bf16.mxu0 %v2699_v0 }
  0x58   :  { %2591 = vmatpush3.bf16.msra.mxu1 %v2883_v39 }
  0x59   :  { %2592 = vmatprep.subr.bf16.mxu1 %v2699_v0 }
  0x5b   :  { %2404 = vmatmul.mubr.msk.f32.vlgmr.msra.gmra.mrb[10].mxu1 %vm84_vm1, %v3073_v9 }
  0x5c   :  { %2594 = vmatpush3.bf16.msra.mxu1 %v2907_v45  ;;  %2414 = vmatprep.mubr.msk.f32.mxu1 %vm2700_vm0, %v2701_v8 }
  0x5d   :  { %2595 = vmatprep.subr.bf16.mxu1 %v2699_v0 }
  0x60   :  { %2597 = vmatpush3.bf16.msra.mxu1 %v2931_v51 }
  0x61   :  { %2622 = vmatprep.subr.bf16.mxu1 %v2699_v0 }
  0x63   :  { %2415 = vmatmul.mubr.msk.f32.vlgmr.msra.gmra.mrb[10].mxu1 %vm84_vm1, %v3100_v31 }
  0x64   :  { %2624 = vmatpush3.bf16.msra.mxu1 %v2545_v23  ;;  %2469 = vmatprep.mubr.msk.f32.mxu1 %vm2700_vm0, %v2701_v8 }
  0x65   :  { %2625 = vmatprep.subr.bf16.mxu1 %v2699_v0 }
  0x68   :  { %2627 = vmatpush3.bf16.msra.mxu1 %v2548_v25 }
  0xde   :  { %v154_v27 = vpop.f32.mrb[0].mxu1 }
  0xdf   :  { %v2196_v28 = vpop.f32.mrb[1].mxu1  ;;  %v450_v29 = vpop.f32.mrb[0].mxu0 }
  0xe0   :  { %v2240_v30 = vpop.f32.mrb[1].mxu0 }
  0xf6   :  { %v371_v33 = vpop.f32.mrb[2].mxu1 }
  0xf7   :  { %v2022_v34 = vmul.f32 -1.442695, %v371_v33  ;;  %v661_v35 = vpop.f32.mrb[2].mxu0  ;;  %v2229_v36 = vpop.f32.mrb[3].mxu1 }
  0xf8   :  { %v2027_v37 = vmul.f32 -1.442695, %v661_v35  ;;  %v2273_v39 = vpop.f32.mrb[3].mxu0 }
  0xf9   :  { %2655 = vpow2.f32 %v2022_v34 }
  0xfa   :  { %2657 = vpow2.f32 %v2027_v37 }
  0xfe   :  { %v741_v40 = vpop.f32.mrb[4].mxu1 }
  0xff   :  { %v2284_v41 = vpop.f32.mrb[5].mxu1 }
 0x103   :  { %v2656_v42 = vpop.eup %2655 }
 0x104   :  { %v2658_v43 = vpop.eup %2657  ;;  %v379_v45 = vadd.f32 1.0, %v2656_v42 }
 0x105   :  { %v669_v46 = vadd.f32 1.0, %v2658_v43 }
 0x106   :  { %2659 = vrcp.f32 %v379_v45 }
 0x107   :  { %2661 = vrcp.f32 %v669_v46 }
 0x108   :  { %2663 = vtanh.f32 %v154_v27 }
 0x109   :  { %2665 = vtanh.f32 %v450_v29 }
 0x110   :  { %v2660_v49 = vpop.eup %2659 }
 0x111   :  { %v2662_v51 = vpop.eup %2661  ;;  %v382_v52 = vmul.f32 %v2660_v49, %v3110_v47 }
 0x112   :  { %v2664_v53 = vpop.eup %2663  ;;  %v672_v54 = vmul.f32 %v2662_v51, %v3115_v48 }
 0x113   :  { %v2666_v56 = vpop.eup %2665  ;;  %v383_v57 = vmul.f32 %v2664_v53, %v382_v52 }
 0x114   :  { %v673_v59 = vmul.f32 %v2666_v56, %v672_v54 }
 0x116   :  { %v674_v60 = vadd.f32 %v673_v59, %v383_v57  ;;  %v952_v62 = vpop.f32.mrb[6].mxu1 }
 0x117   :  { %v2032_v63 = vmul.f32 -1.442695, %v952_v62  ;;  %v2317_v2 = vpop.f32.mrb[7].mxu1 }
 0x119   :  { %2667 = vpow2.f32 %v2032_v63 }
 0x123   :  { %v2668_v3 = vpop.eup %2667 }
 0x124   :  { %v960_v6 = vadd.f32 1.0, %v2668_v3 }
 0x126   :  { %2669 = vrcp.f32 %v960_v6 }
 0x127   :  { %2671 = vtanh.f32 %v741_v40 }
 0x130   :  { %v2670_v11 = vpop.eup %2669 }
 0x131   :  { %v963_v14 = vmul.f32 %v2670_v11, %v3122_v7  ;;  %v2672_v16 = vpop.eup %2671 }
 0x133   :  { %v964_v17 = vmul.f32 %v2672_v16, %v963_v14 }
 0x135   :  { %v965_v13 = vadd.f32 %v964_v17, %v674_v60 }
 0x137   :  { %v2033_v21 = vmul.f32 -1.442695, %v965_v13 }
 0x139   :  { %2673 = vpow2.f32 %v2033_v21 }
 0x143   :  { %v2674_v22 = vpop.eup %2673 }
 0x144   :  { %v969_v23 = vadd.f32 1.0, %v2674_v22 }
 0x146   :  { %2675 = vrcp.f32 %v969_v23 }
 0x150   :  { %v2676_v24 = vpop.eup %2675 }
 0x151   :  { %2327 = vmatmul.mubr.msk.f32.vlgmr.msra.gmra.mrb[4].mxu0 %vm84_vm1, %v2676_v24 }
 0x152   :  { %2552 = vmatpush3.bf16.msra.mxu0 %v2753_v4  ;;  %2337 = vmatprep.mubr.msk.f32.mxu0 %vm2700_vm0, %v2701_v8  ;;  %v1417_v4 = vpop.f32.mrb[8].mxu1 }
 0x153   :  { %2553 = vmatprep.subr.bf16.mxu0 %v2699_v0 }
 0x156   :  { %2555 = vmatpush3.bf16.msra.mxu0 %v2777_v12  ;;  %v2383_v12 = vpop.f32.mrb[9].mxu1 }
 0x157   :  { %2556 = vmatprep.subr.bf16.mxu0 %v2699_v0 }
 0x159   :  { %2338 = vmatmul.mubr.msk.f32.vlgmr.msra.gmra.mrb[6].mxu0 %vm84_vm1, %v3073_v9 }
 0x15a   :  { %2558 = vmatpush3.bf16.msra.mxu0 %v2802_v19  ;;  %2348 = vmatprep.mubr.msk.f32.mxu0 %vm2700_vm0, %v2701_v8  ;;  %v1628_v19 = vpop.f32.mrb[10].mxu1 }
 0x15b   :  { %2559 = vmatprep.subr.bf16.mxu0 %v2699_v0 }
 0x15e   :  { %2561 = vmatpush3.bf16.msra.mxu0 %v2831_v26  ;;  %v2047_v26 = vmul.f32 -1.442695, %v1628_v19 }
 0x15f   :  { %2562 = vmatprep.subr.bf16.mxu0 %v2699_v0 }
 0x160   :  { %2677 = vpow2.f32 %v2047_v26 }
 0x161   :  { %2349 = vmatmul.mubr.msk.f32.vlgmr.msra.gmra.mrb[8].mxu0 %vm84_vm1, %v3050_v18  ;;  %2679 = vtanh.f32 %v1417_v4 }
 0x162   :  { %2564 = vmatpush3.bf16.msra.mxu0 %v2855_v32  ;;  %2359 = vmatprep.mubr.msk.f32.mxu0 %vm2700_vm0, %v2701_v8  ;;  %v2416_v32 = vpop.f32.mrb[11].mxu1 }
 0x163   :  { %2565 = vmatprep.subr.bf16.mxu0 %v2699_v0 }
 0x166   :  { %2567 = vmatpush3.bf16.msra.mxu0 %v2879_v38 }
 0x167   :  { %2568 = vmatprep.subr.bf16.mxu0 %v2699_v0 }
 0x169   :  { %2360 = vmatmul.mubr.msk.f32.vlgmr.msra.gmra.mrb[8].mxu0 %vm84_vm1, %v3073_v9 }
 0x16a   :  { %2570 = vmatpush3.bf16.msra.mxu0 %v2903_v44  ;;  %2370 = vmatprep.mubr.msk.f32.mxu0 %vm2700_vm0, %v2701_v8  ;;  %v2678_v38 = vpop.eup %2677 }
 0x16b   :  { %2571 = vmatprep.subr.bf16.mxu0 %v2699_v0  ;;  %v1636_v44 = vadd.f32 1.0, %v2678_v38 }
 0x16d   :  { %2681 = vrcp.f32 %v1636_v44 }
 0x16e   :  { %2573 = vmatpush3.bf16.msra.mxu0 %v2927_v50  ;;  %v2680_v50 = vpop.eup %2679 }
 0x16f   :  { %2598 = vmatprep.subr.bf16.mxu0 %v2699_v0 }
 0x171   :  { %2371 = vmatmul.mubr.msk.f32.vlgmr.msra.gmra.mrb[8].mxu0 %vm84_vm1, %v3100_v31 }
 0x172   :  { %2600 = vmatpush3.bf16.msra.mxu0 %v2948_v55  ;;  %2425 = vmatprep.mubr.msk.f32.mxu0 %vm2700_vm0, %v2701_v8 }
 0x173   :  { %2601 = vmatprep.subr.bf16.mxu0 %v2699_v0 }
 0x176   :  { %2603 = vmatpush3.bf16.msra.mxu0 %v2962_v58 }
 0x177   :  { %2604 = vmatprep.subr.bf16.mxu0 %v2699_v0  ;;  %v2682_v55 = vpop.eup %2681 }
 0x179   :  { %2426 = vmatmul.mubr.msk.f32.vlgmr.msra.gmra.mrb[10].mxu0 %vm84_vm1, %v3100_v31 }
 0x17a   :  { %2606 = vmatpush3.bf16.msra.mxu0 %v2976_v61  ;;  %2436 = vmatprep.mubr.msk.f32.mxu0 %vm2700_vm0, %v2701_v8 }
 0x17b   :  { %2607 = vmatprep.subr.bf16.mxu0 %v2699_v0 }
 0x17e   :  { %2609 = vmatpush3.bf16.msra.mxu0 %v2987_v1 }
 0x17f   :  { %2610 = vmatprep.subr.bf16.mxu0 %v2699_v0 }
 0x181   :  { %2437 = vmatmul.mubr.msk.f32.vlgmr.msra.gmra.mrb[12].mxu0 %vm84_vm1, %v3050_v18 }
 0x182   :  { %2612 = vmatpush3.bf16.msra.mxu0 %v2999_v5  ;;  %2447 = vmatprep.mubr.msk.f32.mxu0 %vm2700_vm0, %v2701_v8 }
 0x183   :  { %2613 = vmatprep.subr.bf16.mxu0 %v2699_v0 }
 0x186   :  { %2615 = vmatpush3.bf16.msra.mxu0 %v3011_v10 }
 0x187   :  { %2616 = vmatprep.subr.bf16.mxu0 %v2699_v0 }
 0x189   :  { %2448 = vmatmul.mubr.msk.f32.vlgmr.msra.gmra.mrb[12].mxu0 %vm84_vm1, %v3073_v9 }
 0x18a   :  { %2618 = vmatpush3.bf16.msra.mxu0 %v3023_v15  ;;  %2458 = vmatprep.mubr.msk.f32.mxu0 %vm2700_vm0, %v2701_v8  ;;  %v1639_v8 = vmul.f32 %v2682_v55, %v3115_v48 }
 0x18b   :  { %2619 = vmatprep.subr.bf16.mxu0 %v2699_v0 }
 0x18c   :  { %v1640_v0 = vmul.f32 %v2680_v50, %v1639_v8 }
 0x18e   :  { %2621 = vmatpush3.bf16.msra.mxu0 %v3035_v20 }
 0x191   :  { %2459 = vmatmul.mubr.msk.f32.vlgmr.msra.gmra.mrb[12].mxu0 %vm84_vm1, %v3100_v31 }
 0x224   :  { %v1041_v58 = vpop.f32.mrb[4].mxu0 }
 0x225   :  { %1045 = vst [vmem:[%s3206_s7] sm:$0xff] %v1041_v58  ;;  %v2328_v61 = vpop.f32.mrb[5].mxu0 }
 0x22c   :  { %v1121_v1 = vpop.f32.mrb[6].mxu0 }
 0x22d   :  { %v2339_v5 = vpop.f32.mrb[7].mxu0 }
 0x244   :  { %v1338_v10 = vpop.f32.mrb[8].mxu0 }
 0x245   :  { %v2042_v15 = vmul.f32 -1.442695, %v1338_v10  ;;  %v2372_v20 = vpop.f32.mrb[9].mxu0 }
 0x247   :  { %2683 = vpow2.f32 %v2042_v15 }
 0x24c   :  { %v1708_v18 = vpop.f32.mrb[10].mxu0 }
 0x24d   :  { %v2427_v9 = vpop.f32.mrb[11].mxu0 }
 0x251   :  { %v2684_v25 = vpop.eup %2683 }
 0x252   :  { %v1346_v27 = vadd.f32 1.0, %v2684_v25 }
 0x254   :  { %2685 = vrcp.f32 %v1346_v27 }
 0x255   :  { %2687 = vtanh.f32 %v1121_v1 }
 0x25e   :  { %v2686_v28 = vpop.eup %2685 }
 0x25f   :  { %v1349_v29 = vmul.f32 %v2686_v28, %v3110_v47  ;;  %v2688_v30 = vpop.eup %2687 }
 0x261   :  { %v1350_v31 = vmul.f32 %v2688_v30, %v1349_v29 }
 0x263   :  { %v1641_v33 = vadd.f32 %v1640_v0, %v1350_v31 }
 0x264   :  { %v1919_v34 = vpop.f32.mrb[12].mxu0 }
 0x265   :  { %v2052_v35 = vmul.f32 -1.442695, %v1919_v34  ;;  %v2460_v36 = vpop.f32.mrb[13].mxu0 }
 0x267   :  { %2689 = vpow2.f32 %v2052_v35 }
 0x271   :  { %v2690_v37 = vpop.eup %2689 }
 0x272   :  { %v1927_v39 = vadd.f32 1.0, %v2690_v37 }
 0x274   :  { %2691 = vrcp.f32 %v1927_v39 }
 0x275   :  { %2693 = vtanh.f32 %v1708_v18 }
 0x27e   :  { %v2692_v40 = vpop.eup %2691 }
 0x27f   :  { %v1930_v41 = vmul.f32 %v2692_v40, %v3122_v7  ;;  %v2694_v42 = vpop.eup %2693 }
 0x281   :  { %v1931_v43 = vmul.f32 %v2694_v42, %v1930_v41 }
 0x283   :  { %v1932_v45 = vadd.f32 %v1931_v43, %v1641_v33 }
 0x285   :  { %v2053_v46 = vmul.f32 -1.442695, %v1932_v45 }
 0x287   :  { %2695 = vpow2.f32 %v2053_v46 }
 0x291   :  { %v2696_v47 = vpop.eup %2695 }
 0x292   :  { %v1936_v48 = vadd.f32 1.0, %v2696_v47 }
 0x294   :  { %2697 = vrcp.f32 %v1936_v48 }
 0x29e   :  { %v2698_v49 = vpop.eup %2697 }
 0x29f   :  { %2470 = vmatmul.mubr.msk.f32.vlgmr.msra.gmra.mrb[12].mxu1 %vm84_vm1, %v2698_v49 }
 0x372   :  { %v2008_v51 = vpop.f32.mrb[12].mxu1 }
 0x373   :  { %2055 = vst [vmem:[%s3206_s7 + $0x8] sm:$0xff] %v2008_v51  ;;  %v2471_v52 = vpop.f32.mrb[13].mxu1 }

// kernel: _lambda_.4
= control target key start
LH: loop header
LB: loop body
LE: loop exit
PB: predicated region body
PF: predicated region fallthrough
CT: control target
= control target key end

     0   :  { %s11156_s3 = smov 5   ;;  %v11157_v0 = vmov 0.0   ;;  %s11158_s7 = smov 4   ;;  %vm234_vm0 = vcmask 261120   ;;  %vm11160_vm1 = vmmov 0   ;;  %vm478_vm2 = vcmask 1043456   ;;  %s12556_s0 = inlined_call_operand.smem [shape: u32[42], index: -1, kind: input, shape index: {}] }
   0x1   :  { %s9140_s6 = sld [smem:[%s12556_s0 + %s11156_s3]]   ;;  %302 = vmatprep.mubr.f32.mxu0 %v11157_v0  ;;  %9730 = vmatprep.subr.mxu1 %v11157_v0  ;;  %s11159_s11 = smov 1   ;;  %vm462_vm3 = vcmask 27648   ;;  %vm474_vm4 = vcmask 31744   ;;  %v11165_v58 = vmov 0.0|0.0   ;;  %vm867_vm5 = vcmask 257024  }
   0x2   :  { %s11215_s10 = sld [smem:[%s12556_s0 + %s11158_s7]]   ;;  %9732 = vmatprep.mubr.msk.f32.mxu1 %vm11160_vm1, %v11157_v0  ;;  %s11161_s18 = smov 32   ;;  %vm1119_vm6 = vcmask 11264   ;;  %vm1137_vm7 = vcmask 1041408   ;;  %vm1133_vm8 = vcmask 15360   ;;  %vm1637_vm9 = vcmask 523264  }
   0x3   :  { %s11220_s14 = sld [smem:[%s12556_s0 + %s11159_s11]]   ;;  %s11162_s19 = smov 64   ;;  %vm6406_vm10 = vcmask 64512  }
   0x4   :  { %s11250_s17 = sld [smem:[%s12556_s0]]   ;;  %s11163_s20 = smov 3  }
   0x5   :  { %s11286_s23 = sld [smem:[%s12556_s0 + %s11163_s20]]   ;;  %s11164_s24 = smov 96  }
   0x6   :  { %s11166_s25 = smov 6   ;;  %s11167_s29 = smov 10  }
   0x7   :  { %v178_v1 = vld [vmem:[%s9140_s6 + $0x8] sm:$0xff]  ;;  %v180_v2 = vld [vmem:[%s9140_s6 + $0x18] sm:$0xff]  ;;  %v177_v3 = vld [vmem:[%s9140_s6] sm:$0xff]  ;;  %s9141_s28 = sld [smem:[%s12556_s0 + %s11166_s25]]   ;;  %s11168_s3 = smov 9  }
   0x8   :  { %v11222_v4 = vpack.c.bf16 %v180_v2, %v178_v1  ;;  %v179_v5 = vld [vmem:[%s9140_s6 + $0x10] sm:$0xff]  ;;  %v182_v6 = vld [vmem:[%s9140_s6 + $0x28] sm:$0xff]  ;;  %v184_v7 = vld [vmem:[%s9140_s6 + $0x38] sm:$0xff]  ;;  %s9145_s2 = sld [smem:[%s12556_s0 + %s11167_s29]]   ;;  %s11169_s7 = smov 2  }
   0x9   :  { %v11224_v8 = vpack.c.bf16 %v179_v5, %v177_v3  ;;  %v11226_v9 = vpack.c.bf16 %v184_v7, %v182_v6  ;;  %v181_v10 = vld [vmem:[%s9140_s6 + $0x20] sm:$0xff]  ;;  %v183_v11 = vld [vmem:[%s9140_s6 + $0x30] sm:$0xff]  ;;  %v170_v12 = vld [vmem:[%s11215_s10 + $0x8] sm:$0xff]  ;;  %s9144_s6 = sld [smem:[%s12556_s0 + %s11168_s3]]   ;;  %s11170_s11 = smov 7  }
   0xa   :  { %10542 = vmatprep.subr.bf16.mxu0 %v11222_v4  ;;  %v172_v13 = vld [vmem:[%s11215_s10 + $0x18] sm:$0xff]  ;;  %v11232_v14 = vpack.c.bf16 %v183_v11, %v181_v10  ;;  %v169_v16 = vld [vmem:[%s11215_s10] sm:$0xff]  ;;  %v171_v17 = vld [vmem:[%s11215_s10 + $0x10] sm:$0xff]  ;;  %s11372_s15 = sld [smem:[%s12556_s0 + %s11170_s11]]   ;;  %s11171_s16 = smov 8  }
   0xb   :  { %10544 = vmatpush1.bf16.msra.mxu0 %v11224_v8  ;;  %v11235_v15 = vpack.c.bf16 %v172_v13, %v170_v12  ;;  %v174_v18 = vld [vmem:[%s11215_s10 + $0x28] sm:$0xff]  ;;  %v176_v19 = vld [vmem:[%s11215_s10 + $0x38] sm:$0xff]  ;;  %v11243_v20 = vld [vmem:[%s11220_s14] sm:$0xf]  ;;  %v11245_v21 = vpack.c.bf16 %v171_v17, %v169_v16  ;;  %s11377_s22 = sld [smem:[%s12556_s0 + %s11171_s16]]   ;;  %s11172_s25 = smov 11  }
   0xc   :  { %10546 = vmatprep.subr.bf16.mxu0 %v11226_v9  ;;  %v11253_v22 = vpack.c.bf16 %v176_v19, %v174_v18  ;;  %v173_v23 = vld [vmem:[%s11215_s10 + $0x20] sm:$0xff]  ;;  %v175_v24 = vld [vmem:[%s11215_s10 + $0x30] sm:$0xff]  ;;  %s11350_s10 = sld [smem:[%s12556_s0 + %s11169_s7]]   ;;  %s11173_s29 = smov 14  }
   0xd   :  { %v11260_v25 = vpack.c.bf16 %v175_v24, %v173_v23  ;;  %v11266_v26 = vld [vmem:[%s11250_s17] sm:$0xf]  ;;  %v190_v60 = vld [vmem:[%s9141_s28 + $0x28] sm:$0xff]  ;;  %v191_v61 = vld [vmem:[%s9141_s28 + $0x30] sm:$0xff]  ;;  %s11174_s3 = smov 16   ;;  %s11175_s7 = smov 12  }
   0xe   :  { %v232_v31 = vld [vmem:[%s11286_s23] sm:$0xf]  ;;  %v192_v63 = vld [vmem:[%s9141_s28 + $0x38] sm:$0xff]  ;;  %v186_v6 = vld [vmem:[%s9141_s28 + $0x8] sm:$0xff]  ;;  %v233_v24 = vadd.f32 %v11243_v20, %v11266_v26  ;;  %s11496_s11 = sld [smem:[%s12556_s0 + %s11175_s7]]   ;;  %s11176_s12 = smov 13  }
   0xf   :  { %10548 = vmatpush1.bf16.msra.mxu0 %v11232_v14  ;;  %v189_v59 = vld [vmem:[%s9141_s28 + $0x20] sm:$0xff]  ;;  %v11310_v1 = vpack.c.bf16 %v192_v63, %v191_v61  ;;  %v187_v12 = vld [vmem:[%s9141_s28 + $0x10] sm:$0xff]  ;;  %v188_v13 = vld [vmem:[%s9141_s28 + $0x18] sm:$0xff]  ;;  %s11501_s20 = sld [smem:[%s12556_s0 + %s11176_s12]]   ;;  %s11177_s21 = smov 15  }
  0x10   :  { %10550 = vmatprep.subr.bf16.mxu0 %v11235_v15  ;;  %v11307_v62 = vpack.c.bf16 %v190_v60, %v189_v59  ;;  %v185_v5 = vld [vmem:[%s9141_s28] sm:$0xff]  ;;  %v11321_v16 = vpack.c.bf16 %v188_v13, %v187_v12  ;;  %s11414_s28 = sld [smem:[%s12556_s0 + %s11172_s25]]   ;;  %s11180_s30 = smov 21  }
  0x11   :  { %v11317_v10 = vpack.c.bf16 %v186_v6, %v185_v5  ;;  %s11546_s27 = sld [smem:[%s12556_s0 + %s11177_s21]]   ;;  %s11181_s4 = smov 20  }
  0x12   :  { %9177 = vmatmul.mubr.msk.f32.vlgmr.msra.gmra.mrb[0].mxu0 %vm234_vm0, %v11243_v20  ;;  %v199_v20 = vld [vmem:[%s9145_s2] sm:$0xff]  ;;  %s12050_s7 = sld [smem:[%s12556_s0 + %s11181_s4]]   ;;  %s11182_s8 = smov 23  }
  0x13   :  { %10552 = vmatpush1.bf16.msra.mxu0 %v11245_v21  ;;  %376 = vmatprep.mubr.f32.mxu0 %v11157_v0  ;;  %s12096_s12 = sld [smem:[%s12556_s0 + %s11182_s8]]   ;;  %s11183_s13 = smov 26  }
  0x14   :  { %10554 = vmatprep.subr.bf16.mxu0 %v11253_v22  ;;  %s12107_s21 = sld [smem:[%s12556_s0 + %s11183_s13]]   ;;  %s11184_s25 = smov 30  }
  0x15   :  { %s11187_s1 = smov 27   ;;  %s11189_s13 = smov 31  }
  0x16   :  { %s9162_s5 = sld [smem:[%s12556_s0 + %s11187_s1]]   ;;  %s11192_s1 = smov 33  }
  0x17   :  { %10556 = vmatpush1.bf16.msra.mxu0 %v11260_v25  ;;  %s11196_s16 = smov 18   ;;  %s11197_s26 = smov 19  }
  0x18   :  { %9725 = vmatprep.subr.mxu0 %v11157_v0  ;;  %s11200_s4 = smov 39  }
  0x1a   :  { %9178 = vmatmul.mubr.msk.f32.vlgmr.msra.gmra.mrb[0].mxu0 %vm234_vm0, %v11266_v26  ;;  %v200_v26 = vld [vmem:[%s9145_s2 + $0x8] sm:$0xff] }
  0x1b   :  { %9727 = vmatprep.mubr.msk.f32.mxu0 %vm11160_vm1, %v11157_v0 }
  0xed   :  { %v378_v27 = vpop.f32.mrb[0].mxu0 }
  0xee   :  { %554 = vrot.lane.b32.xlu1 %v378_v27, %s11161_s18  ;;  %384 = vrot.lane.b32.xlu0 %v378_v27, %s11162_s19  ;;  %v380_v28 = vpop.f32.mrb[1].mxu0 }
  0xef   :  { %9731 = vmatpush3.msk.msra.mxu1 %vm478_vm2, %v380_v28 }
  0xf0   :  { %9735 = vmatprep.subr.mxu1 %v11157_v0 }
 0x160   :  { %v385_v29 = vpop.permute.xlu0 %384  ;;  %v555_v41 = vpop.permute.xlu1 %554 }
 0x161   :  { %9726 = vmatpush3.xpose.msk.msra.mxu0 %vm234_vm0, %v385_v29 }
 0x162   :  { %10557 = vmatprep.subr.bf16.mxu0 %v11165_v58 }
 0x164   :  { %9728 = vmatmul.mubr.msk.f32.vlgmr.msra.gmra.mrb[2].mxu0 %vm234_vm0, %v378_v27 }
 0x165   :  { %9753 = vmatprep.mubr.msk.f32.mxu0 %vm11160_vm1, %v11157_v0  ;;  %10559 = vmatpush3.bf16.msra.mxu0 %v11307_v62 }
 0x166   :  { %10560 = vmatprep.subr.bf16.mxu0 %v11165_v58 }
 0x169   :  { %10562 = vmatpush3.bf16.msra.mxu0 %v11310_v1 }
 0x16a   :  { %10569 = vmatprep.subr.bf16.mxu0 %v11165_v58 }
 0x237   :  { %v456_v30 = vpop.f32.mrb[2].mxu0 }
 0x238   :  { %v460_v32 = vmul.f32 0.17677669, %v456_v30  ;;  %v9729_v33 = vpop.f32.mrb[3].mxu0 }
 0x23a   :  { %v461_v34 = vadd.f32 %v460_v32, %v232_v31 }
 0x23c   :  { %v463_v35 = vsel %vm462_vm3, %v461_v34, -inf }
 0x23d   :  { %464 = vmax.xlane.f32.xlu0 %v463_v35 }
 0x2ca   :  { %v465_v36 = vpop.xlane.xlu0 %464 }
 0x2cb   :  { %v466_v37 = vsub.f32 %v461_v34, %v465_v36 }
 0x2cd   :  { %v467_v38 = vmul.f32 1.442695, %v466_v37  ;;  %v11344_v37 = vpack.c.bf16 %v200_v26, %v199_v20 }
 0x2cf   :  { %11019 = vpow2.f32 %v467_v38  ;;  %v201_v38 = vld [vmem:[%s9145_s2 + $0x10] sm:$0xff] }
 0x2d9   :  { %v11020_v39 = vpop.eup %11019 }
 0x2da   :  { %v469_v40 = vsel %vm462_vm3, %v11020_v39, 0.0 }
 0x2db   :  { %470 = vadd.xlane.f32.xlu1 %v469_v40 }
 0x2ec   :  { %552 = vrot.lane.b32.xlu1 %v378_v27, %s11164_s24 }
 0x368   :  { %v471_v42 = vpop.xlane.xlu1 %470 }
 0x369   :  { %11021 = vrcp.f32 %v471_v42  ;;  %v196_v42 = vld [vmem:[%s9144_s6 + $0x8] sm:$0xff] }
 0x36c   :  { %v553_v45 = vpop.permute.xlu1 %552 }
 0x373   :  { %v11022_v43 = vpop.eup %11021 }
 0x374   :  { %v473_v44 = vmul.f32 %v11022_v43, %v11020_v39  ;;  %v202_v39 = vld [vmem:[%s9145_s2 + $0x18] sm:$0xff]  ;;  %s9149_s2 = sld [smem:[%s12556_s0 + %s11173_s29]]  }
 0x375   :  { %v11353_v40 = vpack.c.bf16 %v202_v39, %v201_v38  ;;  %v203_v38 = vld [vmem:[%s11414_s28] sm:$0xff]  ;;  %v204_v39 = vld [vmem:[%s11414_s28 + $0x8] sm:$0xff] }
 0x376   :  { %9733 = vmatmul.mubr.msk.f32.vlgmr.msra.gmra.mrb[0].mxu1 %vm474_vm4, %v473_v44  ;;  %v197_v44 = vld [vmem:[%s9144_s6 + $0x10] sm:$0xff] }
 0x377   :  { %9736 = vmatpush3.xpose.msk.msra.mxu1 %vm234_vm0, %v555_v41  ;;  %9737 = vmatprep.mubr.msk.f32.mxu1 %vm11160_vm1, %v11157_v0  ;;  %v195_v41 = vld [vmem:[%s9144_s6] sm:$0xff] }
 0x378   :  { %9740 = vmatprep.subr.mxu1 %v11157_v0  ;;  %v11355_v43 = vpack.c.bf16 %v196_v42, %v195_v41  ;;  %v11425_v42 = vpack.c.bf16 %v204_v39, %v203_v38 }
 0x37a   :  { %9738 = vmatmul.mubr.msk.f32.vlgmr.msra.gmra.mrb[2].mxu1 %vm234_vm0, %v553_v45  ;;  %v198_v45 = vld [vmem:[%s9144_s6 + $0x18] sm:$0xff]  ;;  %s11473_s6 = sld [smem:[%s12556_s0 + %s11174_s3]]  }
 0x37b   :  { %9742 = vmatprep.mubr.msk.f32.mxu1 %vm11160_vm1, %v11157_v0  ;;  %s12019_s3 = sld [smem:[%s12556_s0 + %s11180_s30]]  }
 0x449   :  { %v548_v46 = vpop.f32.mrb[0].mxu1 }
 0x44a   :  { %v9734_v47 = vpop.f32.mrb[1].mxu1 }
 0x44b   :  { %v11362_v47 = vpack.c.bf16 %v198_v45, %v197_v44  ;;  %v205_v45 = vld [vmem:[%s11414_s28 + $0x10] sm:$0xff] }
 0x44d   :  { %v626_v48 = vpop.f32.mrb[2].mxu1 }
 0x44e   :  { %v630_v49 = vmul.f32 0.17677669, %v626_v48  ;;  %v9739_v50 = vpop.f32.mrb[3].mxu1 }
 0x450   :  { %v631_v51 = vadd.f32 %v630_v49, %v232_v31 }
 0x452   :  { %v632_v52 = vsel %vm462_vm3, %v631_v51, -inf }
 0x453   :  { %633 = vmax.xlane.f32.xlu1 %v632_v52  ;;  %v11380_v52 = vld [vmem:[%s11372_s15] ss:$0 sm:$0xff] }
 0x4e0   :  { %v634_v53 = vpop.xlane.xlu1 %633 }
 0x4e1   :  { %v635_v54 = vsub.f32 %v631_v51, %v634_v53 }
 0x4e3   :  { %v636_v55 = vmul.f32 1.442695, %v635_v54  ;;  %v11383_v54 = vld [vmem:[%s11377_s22] ss:$0 sm:$0xff] }
 0x4e5   :  { %11023 = vpow2.f32 %v636_v55 }
 0x4ef   :  { %v11024_v56 = vpop.eup %11023 }
 0x4f0   :  { %v638_v57 = vsel %vm462_vm3, %v11024_v56, 0.0 }
 0x4f1   :  { %639 = vadd.xlane.f32.xlu0 %v638_v57 }
 0x507   :  { %643 = vrot.lane.b32.xlu0 %v380_v28, %s11164_s24 }
 0x57e   :  { %v640_v2 = vpop.xlane.xlu0 %639 }
 0x57f   :  { %11025 = vrcp.f32 %v640_v2 }
 0x582   :  { %v644_v3 = vpop.permute.xlu0 %643 }
 0x583   :  { %9741 = vmatpush3.msk.msra.mxu1 %vm478_vm2, %v644_v3 }
 0x584   :  { %10563 = vmatprep.subr.bf16.mxu1 %v11165_v58 }
 0x589   :  { %v11026_v7 = vpop.eup %11025 }
 0x58a   :  { %v642_v11 = vmul.f32 %v11026_v7, %v11024_v56 }
 0x58c   :  { %9743 = vmatmul.mubr.msk.f32.vlgmr.msra.gmra.mrb[4].mxu1 %vm474_vm4, %v642_v11 }
 0x58d   :  { %10565 = vmatpush3.bf16.msra.mxu1 %v11317_v10  ;;  %9764 = vmatprep.mubr.msk.f32.mxu1 %vm11160_vm1, %v11157_v0 }
 0x58e   :  { %10566 = vmatprep.subr.bf16.mxu1 %v11165_v58 }
 0x591   :  { %10568 = vmatpush3.bf16.msra.mxu1 %v11321_v16 }
 0x592   :  { %10575 = vmatprep.subr.bf16.mxu1 %v11165_v58 }
 0x594   :  { %9765 = vmatmul.mubr.msk.f32.vlgmr.msra.gmra.mrb[6].mxu1 %vm234_vm0, %v548_v46  ;;  %v231_v46 = vld [vmem:[%s11350_s10] sm:$0x3] }
 0x595   :  { %9786 = vmatprep.mubr.msk.f32.mxu1 %vm11160_vm1, %v11157_v0  ;;  %10577 = vmatpush3.bf16.msra.mxu1 %v11344_v37 }
 0x596   :  { %10578 = vmatprep.subr.bf16.mxu1 %v11165_v58 }
 0x599   :  { %10580 = vmatpush3.bf16.msra.mxu1 %v11353_v40 }
 0x59a   :  { %9794 = vmatprep.subr.mxu1 %v11157_v0 }
 0x59c   :  { %9787 = vmatmul.mubr.msk.f32.vlgmr.msra.gmra.mrb[8].mxu1 %vm234_vm0, %v231_v46  ;;  %v206_v46 = vld [vmem:[%s11414_s28 + $0x18] sm:$0xff] }
 0x59d   :  { %9796 = vmatprep.mubr.msk.f32.mxu1 %vm11160_vm1, %v11157_v0 }
 0x65f   :  { %v716_v17 = vpop.f32.mrb[4].mxu1 }
 0x660   :  { %v9744_v18 = vpop.f32.mrb[5].mxu1  ;;  %9754 = vmatmul.mubr.msk.f32.vlgmr.msra.gmra.mrb[4].mxu0 %vm234_vm0, %v716_v17 }
 0x661   :  { %9775 = vmatprep.mubr.msk.f32.mxu0 %vm11160_vm1, %v11157_v0  ;;  %10571 = vmatpush3.bf16.msra.mxu0 %v11355_v43 }
 0x662   :  { %10572 = vmatprep.subr.bf16.mxu0 %v11165_v58 }
 0x665   :  { %10574 = vmatpush3.bf16.msra.mxu0 %v11362_v47 }
 0x666   :  { %9789 = vmatprep.subr.mxu0 %v11157_v0 }
 0x667   :  { %v862_v19 = vpop.f32.mrb[6].mxu1 }
 0x668   :  { %v9766_v23 = vpop.f32.mrb[7].mxu1 }
 0x66f   :  { %v1038_v57 = vpop.f32.mrb[8].mxu1 }
 0x670   :  { %v9788_v59 = vpop.f32.mrb[9].mxu1 }
 0x733   :  { %v789_v27 = vpop.f32.mrb[4].mxu0 }
 0x734   :  { %v863_v28 = vadd.f32 %v862_v19, %v789_v27  ;;  %v9755_v29 = vpop.f32.mrb[5].mxu0 }
 0x736   :  { %v866_v30 = vadd.f32 %v863_v28, %v233_v24 }
 0x738   :  { %v868_v31 = vsel %vm867_vm5, %v866_v30, 0.0 }
 0x739   :  { %869 = vadd.xlane.f32.xlu0 %v868_v31 }
 0x7c6   :  { %v870_v32 = vpop.xlane.xlu0 %869 }
 0x7c7   :  { %v872_v33 = vmul.f32 0.03125, %v870_v32 }
 0x7c9   :  { %v873_v34 = vsub.f32 %v866_v30, %v872_v33 }
 0x7cb   :  { %v874_v35 = vmul.f32 %v873_v34, %v873_v34 }
 0x7cd   :  { %v875_v36 = vsel %vm867_vm5, %v874_v35, 0.0 }
 0x7ce   :  { %876 = vadd.xlane.f32.xlu1 %v875_v36 }
 0x7df   :  { %1212 = vrot.lane.b32.xlu1 %v1038_v57, %s11164_s24 }
 0x85b   :  { %v877_v48 = vpop.xlane.xlu1 %876 }
 0x85c   :  { %v878_v49 = vmul.f32 0.03125, %v877_v48  ;;  %v11431_v48 = vpack.c.bf16 %v206_v46, %v205_v45  ;;  %v11504_v46 = vld [vmem:[%s11496_s11] ss:$0 sm:$0xff] }
 0x85e   :  { %v879_v50 = vadd.f32 1e-06, %v878_v49  ;;  %v207_v49 = vld [vmem:[%s11414_s28 + $0x20] sm:$0xff] }
 0x85f   :  { %v1213_v60 = vpop.permute.xlu1 %1212 }
 0x860   :  { %11027 = vrsqrt.f32 %v879_v50  ;;  %v208_v50 = vld [vmem:[%s11414_s28 + $0x28] sm:$0xff] }
 0x86a   :  { %v11028_v51 = vpop.eup %11027 }
 0x86b   :  { %v881_v53 = vmul.f32 %v11028_v51, %v873_v34  ;;  %v11440_v51 = vpack.c.bf16 %v208_v50, %v207_v49  ;;  %v11507_v50 = vld [vmem:[%s11501_s20] ss:$0 sm:$0xff] }
 0x86d   :  { %v888_v55 = vmul.f32 %v11380_v52, %v881_v53  ;;  %v209_v53 = vld [vmem:[%s11414_s28 + $0x30] sm:$0xff] }
 0x86f   :  { %v11387_v56 = vadd.f32 %v11383_v54, %v888_v55  ;;  %v210_v55 = vld [vmem:[%s11414_s28 + $0x38] sm:$0xff]  ;;  %s11199_s28 = smov 38  }
 0x871   :  { %9776 = vmatmul.mubr.msk.f32.vlgmr.msra.gmra.mrb[6].mxu0 %vm234_vm0, %v11387_v56 }
 0x872   :  { %9791 = vmatprep.mubr.msk.f32.mxu0 %vm11160_vm1, %v11157_v0  ;;  %9790 = vmatpush3.xpose.msk.msra.mxu0 %vm234_vm0, %v1038_v57 }
 0x873   :  { %9799 = vmatprep.subr.mxu0 %v11157_v0 }
 0x944   :  { %v965_v61 = vpop.f32.mrb[6].mxu0 }
 0x945   :  { %1210 = vrot.lane.b32.xlu1 %v965_v61, %s11164_s24  ;;  %v9777_v63 = vpop.f32.mrb[7].mxu0  ;;  %9792 = vmatmul.mubr.msk.f32.vlgmr.msra.gmra.mrb[8].mxu0 %vm234_vm0, %v965_v61 }
 0x946   :  { %9800 = vmatpush3.xpose.msk.msra.mxu0 %vm234_vm0, %v1213_v60  ;;  %9801 = vmatprep.mubr.msk.f32.mxu0 %vm11160_vm1, %v11157_v0 }
 0x947   :  { %10581 = vmatprep.subr.bf16.mxu0 %v11165_v58 }
 0x9b7   :  { %v1211_v2 = vpop.permute.xlu1 %1210 }
 0x9b8   :  { %9802 = vmatmul.mubr.msk.f32.vlgmr.msra.gmra.mrb[10].mxu0 %vm234_vm0, %v1211_v2 }
 0x9b9   :  { %9817 = vmatprep.mubr.msk.f32.mxu0 %vm11160_vm1, %v11157_v0  ;;  %10583 = vmatpush3.bf16.msra.mxu0 %v11440_v51 }
 0x9ba   :  { %10584 = vmatprep.subr.bf16.mxu0 %v11165_v58 }
 0xa18   :  { %v1114_v3 = vpop.f32.mrb[8].mxu0 }
 0xa19   :  { %v1118_v5 = vmul.f32 0.17677669, %v1114_v3  ;;  %v9793_v6 = vpop.f32.mrb[9].mxu0 }
 0xa1b   :  { %v1120_v7 = vsel %vm1119_vm6, %v1118_v5, -inf }
 0xa1c   :  { %1121 = vmax.xlane.f32.xlu1 %v1120_v7 }
 0xa2d   :  { %1300 = vrot.lane.b32.xlu1 %v1038_v57, %s11161_s18 }
 0xa8b   :  { %v1284_v11 = vpop.f32.mrb[10].mxu0 }
 0xa8c   :  { %v1288_v12 = vmul.f32 0.17677669, %v1284_v11  ;;  %v9803_v13 = vpop.f32.mrb[11].mxu0 }
 0xa8e   :  { %v1289_v17 = vsel %vm1119_vm6, %v1288_v12, -inf }
 0xa8f   :  { %1290 = vmax.xlane.f32.xlu0 %v1289_v17 }
 0xaa9   :  { %v1122_v18 = vpop.xlane.xlu1 %1121 }
 0xaaa   :  { %v1123_v19 = vsub.f32 %v1118_v5, %v1122_v18 }
 0xaac   :  { %v1124_v23 = vmul.f32 1.442695, %v1123_v19 }
 0xaad   :  { %v1301_v26 = vpop.permute.xlu1 %1300 }
 0xaae   :  { %11029 = vpow2.f32 %v1124_v23 }
 0xab8   :  { %v11030_v24 = vpop.eup %11029 }
 0xab9   :  { %v1126_v27 = vsel %vm1119_vm6, %v11030_v24, 0.0 }
 0xaba   :  { %1127 = vadd.xlane.f32.xlu0 %v1126_v27  ;;  %v214_v27 = vld [vmem:[%s9149_s2 + $0x8] sm:$0xff] }
 0xb1c   :  { %v1291_v28 = vpop.xlane.xlu0 %1290 }
 0xb1d   :  { %v1292_v29 = vsub.f32 %v1288_v12, %v1291_v28 }
 0xb1f   :  { %v1293_v30 = vmul.f32 1.442695, %v1292_v29  ;;  %v216_v29 = vld [vmem:[%s9149_s2 + $0x18] sm:$0xff] }
 0xb21   :  { %11031 = vpow2.f32 %v1293_v30 }
 0xb2b   :  { %v11032_v31 = vpop.eup %11031 }
 0xb2c   :  { %v1295_v32 = vsel %vm1119_vm6, %v11032_v31, 0.0 }
 0xb2d   :  { %1296 = vadd.xlane.f32.xlu0 %v1295_v32  ;;  %v219_v32 = vld [vmem:[%s11473_s6 + $0x8] sm:$0xff] }
 0xb43   :  { %1131 = vrot.lane.b32.xlu0 %v1038_v57, %s11162_s19  ;;  %v11445_v57 = vpack.c.bf16 %v210_v55, %v209_v53 }
 0xb45   :  { %10586 = vmatpush3.bf16.msra.mxu0 %v11445_v57 }
 0xb46   :  { %10593 = vmatprep.subr.bf16.mxu0 %v11165_v58 }
 0xb47   :  { %v1128_v33 = vpop.xlane.xlu0 %1127 }
 0xb48   :  { %11033 = vrcp.f32 %v1128_v33  ;;  %v220_v33 = vld [vmem:[%s11473_s6 + $0x10] sm:$0xff] }
 0xb52   :  { %v11034_v35 = vpop.eup %11033 }
 0xb53   :  { %v1130_v20 = vmul.f32 %v11034_v35, %v11030_v24  ;;  %v213_v24 = vld [vmem:[%s9149_s2] sm:$0xff]  ;;  %v221_v35 = vld [vmem:[%s11473_s6 + $0x18] sm:$0xff] }
 0xb54   :  { %v11462_v28 = vpack.c.bf16 %v214_v27, %v213_v24 }
 0xbba   :  { %v1297_v34 = vpop.xlane.xlu0 %1296 }
 0xbbb   :  { %11035 = vrcp.f32 %v1297_v34 }
 0xbbe   :  { %v1132_v36 = vpop.permute.xlu0 %1131 }
 0xbbf   :  { %9795 = vmatpush3.msk.msra.mxu1 %vm1137_vm7, %v1132_v36  ;;  %v11482_v36 = vpack.c.bf16 %v221_v35, %v220_v33 }
 0xbc0   :  { %9797 = vmatmul.mubr.msk.f32.vlgmr.msra.gmra.mrb[10].mxu1 %vm1133_vm8, %v1130_v20  ;;  %9804 = vmatprep.subr.mxu1 %v11157_v0  ;;  %v222_v20 = vld [vmem:[%s11473_s6 + $0x20] sm:$0xff] }
 0xbc1   :  { %9805 = vmatpush3.msk.msra.mxu1 %vm1137_vm7, %v1301_v26  ;;  %9806 = vmatprep.mubr.msk.f32.mxu1 %vm11160_vm1, %v11157_v0  ;;  %v223_v26 = vld [vmem:[%s11473_s6 + $0x28] sm:$0xff] }
 0xbc2   :  { %10587 = vmatprep.subr.bf16.mxu1 %v11165_v58  ;;  %v11488_v38 = vpack.c.bf16 %v223_v26, %v222_v20 }
 0xbc5   :  { %v11036_v41 = vpop.eup %11035 }
 0xbc6   :  { %v1299_v44 = vmul.f32 %v11036_v41, %v11032_v31  ;;  %v218_v31 = vld [vmem:[%s11473_s6] sm:$0xff] }
 0xbc7   :  { %v11478_v34 = vpack.c.bf16 %v219_v32, %v218_v31 }
 0xbc8   :  { %9807 = vmatmul.mubr.msk.f32.vlgmr.msra.gmra.mrb[12].mxu1 %vm1133_vm8, %v1299_v44 }
 0xbc9   :  { %10589 = vmatpush3.bf16.msra.mxu1 %v11425_v42  ;;  %9828 = vmatprep.mubr.msk.f32.mxu1 %vm11160_vm1, %v11157_v0 }
 0xbca   :  { %10590 = vmatprep.subr.bf16.mxu1 %v11165_v58 }
 0xbcd   :  { %10592 = vmatpush3.bf16.msra.mxu1 %v11431_v48 }
 0xbce   :  { %10599 = vmatprep.subr.bf16.mxu1 %v11165_v58 }
 0xc93   :  { %v1206_v59 = vpop.f32.mrb[10].mxu1 }
 0xc94   :  { %v9798_v60 = vpop.f32.mrb[11].mxu1  ;;  %9829 = vmatmul.mubr.msk.f32.vlgmr.msra.gmra.mrb[14].mxu1 %vm234_vm0, %v1206_v59  ;;  %v11520_v59 = vld [vmem:[%s11220_s14 + $0x4] sm:$0xf] }
 0xc95   :  { %9858 = vmatprep.mubr.msk.f32.mxu1 %vm11160_vm1, %v11157_v0  ;;  %10601 = vmatpush3.bf16.msra.mxu1 %v11478_v34  ;;  %v11530_v60 = vld [vmem:[%s11250_s17 + $0x4] sm:$0xf] }
 0xc96   :  { %10602 = vmatprep.subr.bf16.mxu1 %v11165_v58 }
 0xc99   :  { %10604 = vmatpush3.bf16.msra.mxu1 %v11482_v36 }
 0xc9a   :  { %10605 = vmatprep.subr.bf16.mxu1 %v11165_v58 }
 0xc9b   :  { %v1373_v61 = vpop.f32.mrb[12].mxu1 }
 0xc9c   :  { %v9808_v63 = vpop.f32.mrb[13].mxu1  ;;  %9818 = vmatmul.mubr.msk.f32.vlgmr.msra.gmra.mrb[12].mxu0 %vm234_vm0, %v1373_v61  ;;  %v224_v61 = vld [vmem:[%s11473_s6 + $0x30] sm:$0xff] }
 0xc9d   :  { %9839 = vmatprep.mubr.msk.f32.mxu0 %vm11160_vm1, %v11157_v0  ;;  %10595 = vmatpush3.bf16.msra.mxu0 %v11462_v28  ;;  %v225_v63 = vld [vmem:[%s11473_s6 + $0x38] sm:$0xff]  ;;  %s11188_s6 = smov 28  }
 0xc9e   :  { %10596 = vmatprep.subr.bf16.mxu0 %v11165_v58  ;;  %10607 = vmatpush3.bf16.msra.mxu1 %v11488_v38 }
 0xc9f   :  { %10608 = vmatprep.subr.bf16.mxu1 %v11165_v58 }
 0xd67   :  { %v1519_v2 = vpop.f32.mrb[14].mxu1 }
 0xd68   :  { %v9830_v3 = vpop.f32.mrb[15].mxu1 }
 0xd69   :  { %v11549_v3 = vld [vmem:[%s11546_s27] ss:$0 sm:$0xff] }
 0xd6f   :  { %v1446_v5 = vpop.f32.mrb[12].mxu0 }
 0xd70   :  { %v1520_v6 = vadd.f32 %v1519_v2, %v1446_v5  ;;  %v9819_v7 = vpop.f32.mrb[13].mxu0  ;;  %v11539_v2 = vpack.c.bf16 %v225_v63, %v224_v61 }
 0xd72   :  { %v1523_v11 = vadd.f32 %v1520_v6, %v11387_v56  ;;  %v215_v56 = vld [vmem:[%s9149_s2 + $0x10] sm:$0xff]  ;;  %10610 = vmatpush3.bf16.msra.mxu1 %v11539_v2  ;;  %s9173_s2 = sld [smem:[%s12556_s0 + %s11199_s28]]  }
 0xd73   :  { %v11466_v30 = vpack.c.bf16 %v216_v29, %v215_v56  ;;  %9861 = vmatprep.subr.mxu1 %v11157_v0  ;;  %v9214_v56 = vld [vmem:[%s11286_s23 + $0x4] sm:$0xf] }
 0xd74   :  { %v1524_v12 = vsel %vm867_vm5, %v1523_v11, 0.0 }
 0xd75   :  { %1525 = vadd.xlane.f32.xlu0 %v1524_v12  ;;  %10598 = vmatpush3.bf16.msra.mxu0 %v11466_v30 }
 0xd76   :  { %10612 = vmatprep.subr.bf16.mxu0 %v11222_v4 }
 0xe02   :  { %v1526_v13 = vpop.xlane.xlu0 %1525 }
 0xe03   :  { %v1527_v17 = vmul.f32 0.03125, %v1526_v13 }
 0xe05   :  { %v1528_v18 = vsub.f32 %v1523_v11, %v1527_v17 }
 0xe07   :  { %v1529_v19 = vmul.f32 %v1528_v18, %v1528_v18 }
 0xe09   :  { %v1530_v23 = vsel %vm867_vm5, %v1529_v19, 0.0 }
 0xe0a   :  { %1531 = vadd.xlane.f32.xlu1 %v1530_v23 }
 0xe97   :  { %v1532_v39 = vpop.xlane.xlu1 %1531 }
 0xe98   :  { %v1533_v41 = vmul.f32 0.03125, %v1532_v39 }
 0xe9a   :  { %v1534_v44 = vadd.f32 1e-06, %v1533_v41 }
 0xe9c   :  { %11037 = vrsqrt.f32 %v1534_v44 }
 0xea6   :  { %v11038_v45 = vpop.eup %11037 }
 0xea7   :  { %v1536_v49 = vmul.f32 %v11038_v45, %v1528_v18 }
 0xea9   :  { %v1543_v53 = vmul.f32 %v11504_v46, %v1536_v49 }
 0xeab   :  { %v11511_v55 = vadd.f32 %v11507_v50, %v1543_v53 }
 0xead   :  { %9840 = vmatmul.mubr.msk.f32.vlgmr.msra.gmra.mrb[14].mxu0 %vm234_vm0, %v11511_v55 }
 0xeae   :  { %10614 = vmatpush1.bf16.msra.mxu0 %v11224_v8  ;;  %1816 = vmatprep.mubr.f32.mxu0 %v11157_v0 }
 0xeaf   :  { %10616 = vmatprep.subr.bf16.mxu0 %v11226_v9 }
 0xeb2   :  { %10618 = vmatpush1.bf16.msra.mxu0 %v11232_v14 }
 0xeb3   :  { %10620 = vmatprep.subr.bf16.mxu0 %v11235_v15 }
 0xeb5   :  { %9215 = vmatmul.mubr.msk.f32.vlgmr.msra.gmra.mrb[16].mxu0 %vm234_vm0, %v11520_v59 }
 0xeb6   :  { %10622 = vmatpush1.bf16.msra.mxu0 %v11245_v21  ;;  %1890 = vmatprep.mubr.f32.mxu0 %v11157_v0 }
 0xeb7   :  { %10624 = vmatprep.subr.bf16.mxu0 %v11253_v22 }
 0xeba   :  { %10626 = vmatpush1.bf16.msra.mxu0 %v11260_v25 }
 0xebb   :  { %9871 = vmatprep.subr.mxu0 %v11157_v0 }
 0xebd   :  { %9216 = vmatmul.mubr.msk.f32.vlgmr.msra.gmra.mrb[16].mxu0 %vm234_vm0, %v11530_v60 }
 0xebe   :  { %9873 = vmatprep.mubr.msk.f32.mxu0 %vm11160_vm1, %v11157_v0 }
 0xf80   :  { %v1626_v5 = vpop.f32.mrb[14].mxu0 }
 0xf81   :  { %v1627_v6 = vadd.f32 %v11549_v3, %v1626_v5  ;;  %v9841_v7 = vpop.f32.mrb[15].mxu0 }
 0xf83   :  { %v1630_v11 = vmax.f32 %v1627_v6, 0.0 }
 0xf85   :  { %9859 = vmatmul.mubr.msk.f32.vlgmr.msra.gmra.mrb[16].mxu1 %vm1637_vm9, %v1630_v11 }
 0xf86   :  { %9863 = vmatprep.mubr.msk.f32.mxu1 %vm11160_vm1, %v11157_v0 }
 0xf90   :  { %v1892_v12 = vpop.f32.mrb[16].mxu0 }
 0xf91   :  { %2065 = vrot.lane.b32.xlu1 %v1892_v12, %s11161_s18  ;;  %1898 = vrot.lane.b32.xlu0 %v1892_v12, %s11162_s19  ;;  %v1894_v13 = vpop.f32.mrb[17].mxu0 }
 0xf95   :  { %2063 = vrot.lane.b32.xlu0 %v1892_v12, %s11164_s24 }
0x1003   :  { %v2066_v17 = vpop.permute.xlu1 %2065  ;;  %v1899_v18 = vpop.permute.xlu0 %1898 }
0x1004   :  { %9862 = vmatpush3.xpose.msk.msra.mxu1 %vm234_vm0, %v1899_v18  ;;  %9872 = vmatpush3.xpose.msk.msra.mxu0 %vm234_vm0, %v2066_v17 }
0x1005   :  { %9866 = vmatprep.subr.mxu1 %v11157_v0  ;;  %10627 = vmatprep.subr.bf16.mxu0 %v11165_v58 }
0x1007   :  { %9864 = vmatmul.mubr.msk.f32.vlgmr.msra.gmra.mrb[18].mxu1 %vm234_vm0, %v1892_v12  ;;  %v2064_v19 = vpop.permute.xlu0 %2063 }
0x1008   :  { %9867 = vmatpush3.msk.msra.mxu1 %vm478_vm2, %v1894_v13  ;;  %9874 = vmatmul.mubr.msk.f32.vlgmr.msra.gmra.mrb[18].mxu0 %vm234_vm0, %v2064_v19 }
0x1009   :  { %9868 = vmatprep.mubr.msk.f32.mxu1 %vm11160_vm1, %v11157_v0  ;;  %9876 = vmatprep.subr.mxu1 %v11157_v0 }
0x100a   :  { %10629 = vmatpush3.bf16.msra.mxu0 %v11307_v62  ;;  %9889 = vmatprep.mubr.msk.f32.mxu0 %vm11160_vm1, %v11157_v0 }
0x100b   :  { %10630 = vmatprep.subr.bf16.mxu0 %v11165_v58 }
0x100e   :  { %10632 = vmatpush3.bf16.msra.mxu0 %v11310_v1 }
0x100f   :  { %10639 = vmatprep.subr.bf16.mxu0 %v11165_v58 }
0x1058   :  { %v11574_v23 = vpop.f32.mrb[16].mxu1 }
0x1059   :  { %v9860_v24 = vpop.f32.mrb[17].mxu1 }
0x10da   :  { %v1970_v27 = vpop.f32.mrb[18].mxu1 }
0x10db   :  { %v1974_v29 = vmul.f32 0.17677669, %v1970_v27  ;;  %v9865_v31 = vpop.f32.mrb[19].mxu1  ;;  %v2137_v32 = vpop.f32.mrb[18].mxu0 }
0x10dc   :  { %v2141_v33 = vmul.f32 0.17677669, %v2137_v32  ;;  %v9875_v35 = vpop.f32.mrb[19].mxu0 }
0x10dd   :  { %v1975_v20 = vadd.f32 %v9214_v56, %v1974_v29 }
0x10de   :  { %v2142_v26 = vadd.f32 %v9214_v56, %v2141_v33 }
0x10df   :  { %v1976_v39 = vsel %vm462_vm3, %v1975_v20, -inf }
0x10e0   :  { %1977 = vmax.xlane.f32.xlu0 %v1976_v39  ;;  %v2143_v41 = vsel %vm462_vm3, %v2142_v26, -inf }
0x10e1   :  { %2144 = vmax.xlane.f32.xlu1 %v2143_v41 }
0x116d   :  { %v1978_v44 = vpop.xlane.xlu0 %1977 }
0x116e   :  { %v1979_v45 = vsub.f32 %v1975_v20, %v1978_v44  ;;  %v2145_v49 = vpop.xlane.xlu1 %2144  ;;  %v1748_v20 = vadd.f32 %v11520_v59, %v11530_v60 }
0x116f   :  { %v2146_v53 = vsub.f32 %v2142_v26, %v2145_v49 }
0x1170   :  { %v1980_v61 = vmul.f32 1.442695, %v1979_v45 }
0x1171   :  { %v2147_v63 = vmul.f32 1.442695, %v2146_v53 }
0x1172   :  { %11039 = vpow2.f32 %v1980_v61 }
0x1173   :  { %11041 = vpow2.f32 %v2147_v63 }
0x117c   :  { %v11040_v5 = vpop.eup %11039 }
0x117d   :  { %v1982_v6 = vsel %vm462_vm3, %v11040_v5, 0.0  ;;  %v11042_v7 = vpop.eup %11041 }
0x117e   :  { %1983 = vadd.xlane.f32.xlu0 %v1982_v6  ;;  %v2149_v11 = vsel %vm462_vm3, %v11042_v7, 0.0  ;;  %v9213_v6 = vld [vmem:[%s11350_s10 + $0x2] sm:$0x3] }
0x1182   :  { %2150 = vadd.xlane.f32.xlu0 %v2149_v11 }
0x1198   :  { %2154 = vrot.lane.b32.xlu0 %v1894_v13, %s11164_s24 }
0x120b   :  { %v1984_v12 = vpop.xlane.xlu0 %1983 }
0x120c   :  { %11043 = vrcp.f32 %v1984_v12 }
0x120f   :  { %v2151_v17 = vpop.xlane.xlu0 %2150 }
0x1210   :  { %11045 = vrcp.f32 %v2151_v17 }
0x1213   :  { %v2155_v24 = vpop.permute.xlu0 %2154 }
0x1216   :  { %v11044_v18 = vpop.eup %11043 }
0x1217   :  { %v1986_v19 = vmul.f32 %v11044_v18, %v11040_v5 }
0x1219   :  { %9869 = vmatmul.mubr.msk.f32.vlgmr.msra.gmra.mrb[20].mxu1 %vm474_vm4, %v1986_v19 }
0x121a   :  { %v11046_v27 = vpop.eup %11045  ;;  %9877 = vmatpush3.msk.msra.mxu1 %vm478_vm2, %v2155_v24  ;;  %9878 = vmatprep.mubr.msk.f32.mxu1 %vm11160_vm1, %v11157_v0 }
0x121b   :  { %v2153_v56 = vmul.f32 %v11046_v27, %v11042_v7  ;;  %10633 = vmatprep.subr.bf16.mxu1 %v11165_v58 }
0x121d   :  { %9879 = vmatmul.mubr.msk.f32.vlgmr.msra.gmra.mrb[22].mxu1 %vm474_vm4, %v2153_v56 }
0x121e   :  { %10635 = vmatpush3.bf16.msra.mxu1 %v11317_v10  ;;  %9900 = vmatprep.mubr.msk.f32.mxu1 %vm11160_vm1, %v11157_v0 }
0x121f   :  { %10636 = vmatprep.subr.bf16.mxu1 %v11165_v58 }
0x1222   :  { %10638 = vmatpush3.bf16.msra.mxu1 %v11321_v16 }
0x1223   :  { %10645 = vmatprep.subr.bf16.mxu1 %v11165_v58 }
0x12ec   :  { %v2059_v13 = vpop.f32.mrb[20].mxu1 }
0x12ed   :  { %v9870_v29 = vpop.f32.mrb[21].mxu1  ;;  %9901 = vmatmul.mubr.msk.f32.vlgmr.msra.gmra.mrb[24].mxu1 %vm234_vm0, %v2059_v13 }
0x12ee   :  { %10647 = vmatpush3.bf16.msra.mxu1 %v11344_v37  ;;  %9922 = vmatprep.mubr.msk.f32.mxu1 %vm11160_vm1, %v11157_v0 }
0x12ef   :  { %10648 = vmatprep.subr.bf16.mxu1 %v11165_v58 }
0x12f0   :  { %v2227_v31 = vpop.f32.mrb[22].mxu1 }
0x12f1   :  { %v9880_v32 = vpop.f32.mrb[23].mxu1  ;;  %9890 = vmatmul.mubr.msk.f32.vlgmr.msra.gmra.mrb[20].mxu0 %vm234_vm0, %v2227_v31 }
0x12f2   :  { %10641 = vmatpush3.bf16.msra.mxu0 %v11355_v43  ;;  %10650 = vmatpush3.bf16.msra.mxu1 %v11353_v40 }
0x12f3   :  { %10642 = vmatprep.subr.bf16.mxu0 %v11165_v58  ;;  %9911 = vmatprep.mubr.msk.f32.mxu0 %vm11160_vm1, %v11157_v0 }
0x12f4   :  { %9930 = vmatprep.subr.mxu1 %v11157_v0 }
0x12f5   :  { %9923 = vmatmul.mubr.msk.f32.vlgmr.msra.gmra.mrb[26].mxu1 %vm234_vm0, %v9213_v6 }
0x12f6   :  { %10644 = vmatpush3.bf16.msra.mxu0 %v11362_v47  ;;  %9932 = vmatprep.mubr.msk.f32.mxu1 %vm11160_vm1, %v11157_v0 }
0x12f7   :  { %9925 = vmatprep.subr.mxu0 %v11157_v0 }
0x13c0   :  { %v2373_v33 = vpop.f32.mrb[24].mxu1 }
0x13c1   :  { %v9902_v35 = vpop.f32.mrb[25].mxu1 }
0x13c4   :  { %v2300_v26 = vpop.f32.mrb[20].mxu0 }
0x13c5   :  { %v2374_v39 = vadd.f32 %v2373_v33, %v2300_v26  ;;  %v9891_v41 = vpop.f32.mrb[21].mxu0 }
0x13c7   :  { %v2377_v44 = vadd.f32 %v2374_v39, %v1748_v20 }
0x13c8   :  { %v2535_v19 = vpop.f32.mrb[26].mxu1 }
0x13c9   :  { %v2378_v45 = vsel %vm867_vm5, %v2377_v44, 0.0  ;;  %v9924_v24 = vpop.f32.mrb[27].mxu1 }
0x13ca   :  { %2379 = vadd.xlane.f32.xlu1 %v2378_v45 }
0x1457   :  { %v2380_v49 = vpop.xlane.xlu1 %2379 }
0x1458   :  { %v2381_v53 = vmul.f32 0.03125, %v2380_v49 }
0x145a   :  { %v2382_v61 = vsub.f32 %v2377_v44, %v2381_v53 }
0x145c   :  { %v2383_v63 = vmul.f32 %v2382_v61, %v2382_v61 }
0x145e   :  { %v2384_v5 = vsel %vm867_vm5, %v2383_v63, 0.0 }
0x145f   :  { %2385 = vadd.xlane.f32.xlu1 %v2384_v5 }
0x1470   :  { %2706 = vrot.lane.b32.xlu1 %v2535_v19, %s11164_s24 }
0x14ec   :  { %v2386_v59 = vpop.xlane.xlu1 %2385 }
0x14ed   :  { %v2387_v60 = vmul.f32 0.03125, %v2386_v59 }
0x14ef   :  { %v2388_v7 = vadd.f32 1e-06, %v2387_v60 }
0x14f0   :  { %v2707_v27 = vpop.permute.xlu1 %2706 }
0x14f1   :  { %11047 = vrsqrt.f32 %v2388_v7 }
0x14fb   :  { %v11048_v11 = vpop.eup %11047 }
0x14fc   :  { %v2390_v12 = vmul.f32 %v11048_v11, %v2382_v61 }
0x14fe   :  { %v2391_v17 = vmul.f32 %v11380_v52, %v2390_v12 }
0x1500   :  { %v11618_v18 = vadd.f32 %v11383_v54, %v2391_v17 }
0x1502   :  { %9912 = vmatmul.mubr.msk.f32.vlgmr.msra.gmra.mrb[22].mxu0 %vm234_vm0, %v11618_v18 }
0x1503   :  { %9927 = vmatprep.mubr.msk.f32.mxu0 %vm11160_vm1, %v11157_v0  ;;  %9926 = vmatpush3.xpose.msk.msra.mxu0 %vm234_vm0, %v2535_v19 }
0x1504   :  { %9935 = vmatprep.subr.mxu0 %v11157_v0 }
0x15d5   :  { %v2462_v56 = vpop.f32.mrb[22].mxu0 }
0x15d6   :  { %2704 = vrot.lane.b32.xlu0 %v2462_v56, %s11164_s24  ;;  %v9913_v52 = vpop.f32.mrb[23].mxu0  ;;  %9928 = vmatmul.mubr.msk.f32.vlgmr.msra.gmra.mrb[24].mxu0 %vm234_vm0, %v2462_v56 }
0x15d7   :  { %9936 = vmatpush3.xpose.msk.msra.mxu0 %vm234_vm0, %v2707_v27  ;;  %9937 = vmatprep.mubr.msk.f32.mxu0 %vm11160_vm1, %v11157_v0 }
0x15d8   :  { %10651 = vmatprep.subr.bf16.mxu0 %v11165_v58 }
0x1648   :  { %v2705_v54 = vpop.permute.xlu0 %2704 }
0x1649   :  { %9938 = vmatmul.mubr.msk.f32.vlgmr.msra.gmra.mrb[26].mxu0 %vm234_vm0, %v2705_v54 }
0x164a   :  { %10653 = vmatpush3.bf16.msra.mxu0 %v11440_v51  ;;  %9953 = vmatprep.mubr.msk.f32.mxu0 %vm11160_vm1, %v11157_v0 }
0x164b   :  { %10654 = vmatprep.subr.bf16.mxu0 %v11165_v58 }
0x164e   :  { %10656 = vmatpush3.bf16.msra.mxu0 %v11445_v57 }
0x164f   :  { %10663 = vmatprep.subr.bf16.mxu0 %v11165_v58 }
0x16a9   :  { %v2611_v13 = vpop.f32.mrb[24].mxu0 }
0x16aa   :  { %v2615_v29 = vmul.f32 0.17677669, %v2611_v13  ;;  %v9929_v31 = vpop.f32.mrb[25].mxu0 }
0x16ac   :  { %v2616_v32 = vsel %vm1119_vm6, %v2615_v29, -inf }
0x16ad   :  { %2617 = vmax.xlane.f32.xlu0 %v2616_v32 }
0x171c   :  { %v2778_v33 = vpop.f32.mrb[26].mxu0 }
0x171d   :  { %v2782_v35 = vmul.f32 0.17677669, %v2778_v33  ;;  %v9939_v20 = vpop.f32.mrb[27].mxu0 }
0x171f   :  { %v2783_v26 = vsel %vm1119_vm6, %v2782_v35, -inf }
0x1720   :  { %2784 = vmax.xlane.f32.xlu1 %v2783_v26 }
0x1731   :  { %2794 = vrot.lane.b32.xlu1 %v2535_v19, %s11161_s18 }
0x173a   :  { %v2618_v39 = vpop.xlane.xlu0 %2617 }
0x173b   :  { %v2619_v41 = vsub.f32 %v2615_v29, %v2618_v39 }
0x173d   :  { %v2620_v44 = vmul.f32 1.442695, %v2619_v41 }
0x173f   :  { %11049 = vpow2.f32 %v2620_v44 }
0x1749   :  { %v11050_v45 = vpop.eup %11049 }
0x174a   :  { %v2622_v49 = vsel %vm1119_vm6, %v11050_v45, 0.0 }
0x174b   :  { %2623 = vadd.xlane.f32.xlu0 %v2622_v49 }
0x17ad   :  { %v2785_v53 = vpop.xlane.xlu1 %2784 }
0x17ae   :  { %v2786_v61 = vsub.f32 %v2782_v35, %v2785_v53 }
0x17b0   :  { %v2787_v63 = vmul.f32 1.442695, %v2786_v61 }
0x17b1   :  { %v2795_v17 = vpop.permute.xlu1 %2794 }
0x17b2   :  { %11051 = vpow2.f32 %v2787_v63 }
0x17bc   :  { %v11052_v5 = vpop.eup %11051 }
0x17bd   :  { %v2789_v6 = vsel %vm1119_vm6, %v11052_v5, 0.0 }
0x17be   :  { %2790 = vadd.xlane.f32.xlu0 %v2789_v6 }
0x17d4   :  { %2627 = vrot.lane.b32.xlu0 %v2535_v19, %s11162_s19 }
0x17d8   :  { %v2624_v59 = vpop.xlane.xlu0 %2623 }
0x17d9   :  { %11053 = vrcp.f32 %v2624_v59  ;;  %v11692_v59 = vld [vmem:[%s11220_s14 + $0x8] sm:$0xf] }
0x17e3   :  { %v11054_v7 = vpop.eup %11053 }
0x17e4   :  { %v2626_v12 = vmul.f32 %v11054_v7, %v11050_v45 }
0x184b   :  { %v2791_v60 = vpop.xlane.xlu0 %2790 }
0x184c   :  { %11055 = vrcp.f32 %v2791_v60  ;;  %v11702_v60 = vld [vmem:[%s11250_s17 + $0x8] sm:$0xf] }
0x184f   :  { %v2628_v11 = vpop.permute.xlu0 %2627 }
0x1850   :  { %9931 = vmatpush3.msk.msra.mxu1 %vm1137_vm7, %v2628_v11 }
0x1851   :  { %9933 = vmatmul.mubr.msk.f32.vlgmr.msra.gmra.mrb[28].mxu1 %vm1133_vm8, %v2626_v12  ;;  %9940 = vmatprep.subr.mxu1 %v11157_v0 }
0x1852   :  { %9941 = vmatpush3.msk.msra.mxu1 %vm1137_vm7, %v2795_v17  ;;  %9942 = vmatprep.mubr.msk.f32.mxu1 %vm11160_vm1, %v11157_v0 }
0x1853   :  { %10657 = vmatprep.subr.bf16.mxu1 %v11165_v58 }
0x1856   :  { %v11056_v19 = vpop.eup %11055 }
0x1857   :  { %v2793_v24 = vmul.f32 %v11056_v19, %v11052_v5 }
0x1859   :  { %9943 = vmatmul.mubr.msk.f32.vlgmr.msra.gmra.mrb[30].mxu1 %vm1133_vm8, %v2793_v24 }
0x185a   :  { %10659 = vmatpush3.bf16.msra.mxu1 %v11425_v42  ;;  %9964 = vmatprep.mubr.msk.f32.mxu1 %vm11160_vm1, %v11157_v0 }
0x185b   :  { %10660 = vmatprep.subr.bf16.mxu1 %v11165_v58 }
0x185e   :  { %10662 = vmatpush3.bf16.msra.mxu1 %v11431_v48 }
0x185f   :  { %10669 = vmatprep.subr.bf16.mxu1 %v11165_v58 }
0x1924   :  { %v2700_v27 = vpop.f32.mrb[28].mxu1 }
0x1925   :  { %v9934_v56 = vpop.f32.mrb[29].mxu1  ;;  %9965 = vmatmul.mubr.msk.f32.vlgmr.msra.gmra.mrb[32].mxu1 %vm234_vm0, %v2700_v27 }
0x1926   :  { %10671 = vmatpush3.bf16.msra.mxu1 %v11478_v34  ;;  %9994 = vmatprep.mubr.msk.f32.mxu1 %vm11160_vm1, %v11157_v0 }
0x1927   :  { %10672 = vmatprep.subr.bf16.mxu1 %v11165_v58 }
0x192a   :  { %10674 = vmatpush3.bf16.msra.mxu1 %v11482_v36 }
0x192b   :  { %10675 = vmatprep.subr.bf16.mxu1 %v11165_v58 }
0x192c   :  { %v2867_v52 = vpop.f32.mrb[30].mxu1 }
0x192d   :  { %v9944_v54 = vpop.f32.mrb[31].mxu1  ;;  %9954 = vmatmul.mubr.msk.f32.vlgmr.msra.gmra.mrb[28].mxu0 %vm234_vm0, %v2867_v52 }
0x192e   :  { %10665 = vmatpush3.bf16.msra.mxu0 %v11462_v28  ;;  %9975 = vmatprep.mubr.msk.f32.mxu0 %vm11160_vm1, %v11157_v0 }
0x192f   :  { %10666 = vmatprep.subr.bf16.mxu0 %v11165_v58  ;;  %10677 = vmatpush3.bf16.msra.mxu1 %v11488_v38 }
0x1930   :  { %10678 = vmatprep.subr.bf16.mxu1 %v11165_v58 }
0x1932   :  { %10668 = vmatpush3.bf16.msra.mxu0 %v11466_v30 }
0x1933   :  { %10682 = vmatprep.subr.bf16.mxu0 %v11222_v4  ;;  %10680 = vmatpush3.bf16.msra.mxu1 %v11539_v2 }
0x1934   :  { %9997 = vmatprep.subr.mxu1 %v11157_v0 }
0x19f8   :  { %v3013_v13 = vpop.f32.mrb[32].mxu1 }
0x19f9   :  { %v9966_v29 = vpop.f32.mrb[33].mxu1 }
0x1a00   :  { %v2940_v31 = vpop.f32.mrb[28].mxu0 }
0x1a01   :  { %v3014_v32 = vadd.f32 %v3013_v13, %v2940_v31  ;;  %v9955_v33 = vpop.f32.mrb[29].mxu0  ;;  %v9245_v31 = vld [vmem:[%s11286_s23 + $0x8] sm:$0xf] }
0x1a03   :  { %v3017_v35 = vadd.f32 %v3014_v32, %v11618_v18 }
0x1a05   :  { %v3018_v20 = vsel %vm867_vm5, %v3017_v35, 0.0 }
0x1a06   :  { %3019 = vadd.xlane.f32.xlu1 %v3018_v20 }
0x1a93   :  { %v3020_v26 = vpop.xlane.xlu1 %3019 }
0x1a94   :  { %v3021_v39 = vmul.f32 0.03125, %v3020_v26 }
0x1a96   :  { %v3022_v41 = vsub.f32 %v3017_v35, %v3021_v39 }
0x1a98   :  { %v3023_v44 = vmul.f32 %v3022_v41, %v3022_v41 }
0x1a9a   :  { %v3024_v45 = vsel %vm867_vm5, %v3023_v44, 0.0 }
0x1a9b   :  { %3025 = vadd.xlane.f32.xlu0 %v3024_v45 }
0x1b28   :  { %v3026_v49 = vpop.xlane.xlu0 %3025 }
0x1b29   :  { %v3027_v53 = vmul.f32 0.03125, %v3026_v49 }
0x1b2b   :  { %v3028_v61 = vadd.f32 1e-06, %v3027_v53 }
0x1b2d   :  { %11057 = vrsqrt.f32 %v3028_v61 }
0x1b37   :  { %v11058_v63 = vpop.eup %11057 }
0x1b38   :  { %v3030_v5 = vmul.f32 %v11058_v63, %v3022_v41 }
0x1b3a   :  { %v3031_v18 = vmul.f32 %v11504_v46, %v3030_v5 }
0x1b3c   :  { %v11683_v6 = vadd.f32 %v11507_v50, %v3031_v18 }
0x1b3e   :  { %9976 = vmatmul.mubr.msk.f32.vlgmr.msra.gmra.mrb[30].mxu0 %vm234_vm0, %v11683_v6 }
0x1b3f   :  { %10684 = vmatpush1.bf16.msra.mxu0 %v11224_v8  ;;  %3274 = vmatprep.mubr.f32.mxu0 %v11157_v0 }
0x1b40   :  { %10686 = vmatprep.subr.bf16.mxu0 %v11226_v9 }
0x1b43   :  { %10688 = vmatpush1.bf16.msra.mxu0 %v11232_v14 }
0x1b44   :  { %10690 = vmatprep.subr.bf16.mxu0 %v11235_v15 }
0x1b46   :  { %9246 = vmatmul.mubr.msk.f32.vlgmr.msra.gmra.mrb[32].mxu0 %vm234_vm0, %v11692_v59 }
0x1b47   :  { %10692 = vmatpush1.bf16.msra.mxu0 %v11245_v21  ;;  %3348 = vmatprep.mubr.f32.mxu0 %v11157_v0 }
0x1b48   :  { %10694 = vmatprep.subr.bf16.mxu0 %v11253_v22 }
0x1b4b   :  { %10696 = vmatpush1.bf16.msra.mxu0 %v11260_v25 }
0x1b4c   :  { %10007 = vmatprep.subr.mxu0 %v11157_v0 }
0x1b4e   :  { %9247 = vmatmul.mubr.msk.f32.vlgmr.msra.gmra.mrb[32].mxu0 %vm234_vm0, %v11702_v60 }
0x1b4f   :  { %10009 = vmatprep.mubr.msk.f32.mxu0 %vm11160_vm1, %v11157_v0 }
0x1c11   :  { %v3102_v7 = vpop.f32.mrb[30].mxu0 }
0x1c12   :  { %v3103_v11 = vadd.f32 %v11549_v3, %v3102_v7  ;;  %v9977_v12 = vpop.f32.mrb[31].mxu0 }
0x1c14   :  { %v3106_v17 = vmax.f32 %v3103_v11, 0.0 }
0x1c16   :  { %9995 = vmatmul.mubr.msk.f32.vlgmr.msra.gmra.mrb[34].mxu1 %vm1637_vm9, %v3106_v17 }
0x1c17   :  { %9999 = vmatprep.mubr.msk.f32.mxu1 %vm11160_vm1, %v11157_v0 }
0x1c21   :  { %v3350_v19 = vpop.f32.mrb[32].mxu0 }
0x1c22   :  { %3523 = vrot.lane.b32.xlu1 %v3350_v19, %s11161_s18  ;;  %3356 = vrot.lane.b32.xlu0 %v3350_v19, %s11162_s19  ;;  %v3352_v24 = vpop.f32.mrb[33].mxu0 }
0x1c26   :  { %3521 = vrot.lane.b32.xlu1 %v3350_v19, %s11164_s24 }
0x1c94   :  { %v3524_v27 = vpop.permute.xlu1 %3523  ;;  %v3357_v56 = vpop.permute.xlu0 %3356 }
0x1c95   :  { %9998 = vmatpush3.xpose.msk.msra.mxu1 %vm234_vm0, %v3357_v56  ;;  %10008 = vmatpush3.xpose.msk.msra.mxu0 %vm234_vm0, %v3524_v27 }
0x1c96   :  { %10002 = vmatprep.subr.mxu1 %v11157_v0  ;;  %10697 = vmatprep.subr.bf16.mxu0 %v11165_v58 }
0x1c98   :  { %v3522_v52 = vpop.permute.xlu1 %3521  ;;  %10000 = vmatmul.mubr.msk.f32.vlgmr.msra.gmra.mrb[36].mxu1 %vm234_vm0, %v3350_v19 }
0x1c99   :  { %10003 = vmatpush3.msk.msra.mxu1 %vm478_vm2, %v3352_v24  ;;  %10010 = vmatmul.mubr.msk.f32.vlgmr.msra.gmra.mrb[34].mxu0 %vm234_vm0, %v3522_v52 }
0x1c9a   :  { %10004 = vmatprep.mubr.msk.f32.mxu1 %vm11160_vm1, %v11157_v0  ;;  %10012 = vmatprep.subr.mxu1 %v11157_v0 }
0x1c9b   :  { %10699 = vmatpush3.bf16.msra.mxu0 %v11307_v62  ;;  %10025 = vmatprep.mubr.msk.f32.mxu0 %vm11160_vm1, %v11157_v0 }
0x1c9c   :  { %10700 = vmatprep.subr.bf16.mxu0 %v11165_v58 }
0x1c9f   :  { %10702 = vmatpush3.bf16.msra.mxu0 %v11310_v1 }
0x1ca0   :  { %10709 = vmatprep.subr.bf16.mxu0 %v11165_v58 }
0x1ce9   :  { %v11732_v54 = vpop.f32.mrb[34].mxu1 }
0x1cea   :  { %v9996_v13 = vpop.f32.mrb[35].mxu1 }
0x1d6b   :  { %v3428_v29 = vpop.f32.mrb[36].mxu1 }
0x1d6c   :  { %v3432_v32 = vmul.f32 0.17677669, %v3428_v29  ;;  %v10001_v33 = vpop.f32.mrb[37].mxu1  ;;  %v3595_v35 = vpop.f32.mrb[34].mxu0 }
0x1d6d   :  { %v3599_v20 = vmul.f32 0.17677669, %v3595_v35  ;;  %v10011_v26 = vpop.f32.mrb[35].mxu0 }
0x1d6e   :  { %v3433_v39 = vadd.f32 %v9245_v31, %v3432_v32 }
0x1d6f   :  { %v3600_v41 = vadd.f32 %v9245_v31, %v3599_v20 }
0x1d70   :  { %v3434_v44 = vsel %vm462_vm3, %v3433_v39, -inf }
0x1d71   :  { %3435 = vmax.xlane.f32.xlu0 %v3434_v44  ;;  %v3601_v45 = vsel %vm462_vm3, %v3600_v41, -inf }
0x1d72   :  { %3602 = vmax.xlane.f32.xlu1 %v3601_v45 }
0x1d83   :  { %3612 = vrot.lane.b32.xlu1 %v3352_v24, %s11164_s24 }
0x1dfe   :  { %v3436_v49 = vpop.xlane.xlu0 %3435 }
0x1dff   :  { %v3437_v53 = vsub.f32 %v3433_v39, %v3436_v49  ;;  %v3603_v61 = vpop.xlane.xlu1 %3602  ;;  %v3206_v39 = vadd.f32 %v11692_v59, %v11702_v60 }
0x1e00   :  { %v3604_v63 = vsub.f32 %v3600_v41, %v3603_v61 }
0x1e01   :  { %v3438_v5 = vmul.f32 1.442695, %v3437_v53 }
0x1e02   :  { %v3605_v18 = vmul.f32 1.442695, %v3604_v63 }
0x1e03   :  { %11059 = vpow2.f32 %v3438_v5  ;;  %v3613_v52 = vpop.permute.xlu1 %3612 }
0x1e04   :  { %11061 = vpow2.f32 %v3605_v18 }
0x1e0d   :  { %v11060_v7 = vpop.eup %11059 }
0x1e0e   :  { %v3440_v11 = vsel %vm462_vm3, %v11060_v7, 0.0  ;;  %v11062_v12 = vpop.eup %11061 }
0x1e0f   :  { %3441 = vadd.xlane.f32.xlu0 %v3440_v11  ;;  %v3607_v17 = vsel %vm462_vm3, %v11062_v12, 0.0  ;;  %v9244_v11 = vld [vmem:[%s11350_s10 + $0x4] sm:$0x3] }
0x1e13   :  { %3608 = vadd.xlane.f32.xlu0 %v3607_v17 }
0x1e9c   :  { %v3442_v19 = vpop.xlane.xlu0 %3441 }
0x1e9d   :  { %11063 = vrcp.f32 %v3442_v19 }
0x1ea0   :  { %v3609_v27 = vpop.xlane.xlu0 %3608 }
0x1ea1   :  { %11065 = vrcp.f32 %v3609_v27  ;;  %v11775_v27 = vld [vmem:[%s11372_s15] ss:$0 sm:$0xff]  ;;  %s11179_s15 = smov 24  }
0x1ea2   :  { %s12011_s29 = sld [smem:[%s12556_s0 + %s11179_s15]]  }
0x1ea7   :  { %v11064_v24 = vpop.eup %11063 }
0x1ea8   :  { %v3444_v56 = vmul.f32 %v11064_v24, %v11060_v7 }
0x1eaa   :  { %10005 = vmatmul.mubr.msk.f32.vlgmr.msra.gmra.mrb[38].mxu1 %vm474_vm4, %v3444_v56  ;;  %v11779_v56 = vld [vmem:[%s11377_s22] ss:$0 sm:$0xff]  ;;  %s11186_s22 = smov 22  }
0x1eab   :  { %v11066_v13 = vpop.eup %11065  ;;  %10013 = vmatpush3.msk.msra.mxu1 %vm478_vm2, %v3613_v52  ;;  %10014 = vmatprep.mubr.msk.f32.mxu1 %vm11160_vm1, %v11157_v0  ;;  %s12162_s30 = sld [smem:[%s12556_s0 + %s11186_s22]]  }
0x1eac   :  { %v3611_v29 = vmul.f32 %v11066_v13, %v11062_v12  ;;  %10703 = vmatprep.subr.bf16.mxu1 %v11165_v58 }
0x1eae   :  { %10015 = vmatmul.mubr.msk.f32.vlgmr.msra.gmra.mrb[40].mxu1 %vm474_vm4, %v3611_v29 }
0x1eaf   :  { %10705 = vmatpush3.bf16.msra.mxu1 %v11317_v10  ;;  %10036 = vmatprep.mubr.msk.f32.mxu1 %vm11160_vm1, %v11157_v0 }
0x1eb0   :  { %10706 = vmatprep.subr.bf16.mxu1 %v11165_v58 }
0x1eb3   :  { %10708 = vmatpush3.bf16.msra.mxu1 %v11321_v16 }
0x1eb4   :  { %10715 = vmatprep.subr.bf16.mxu1 %v11165_v58 }
0x1f7d   :  { %v3517_v31 = vpop.f32.mrb[38].mxu1 }
0x1f7e   :  { %v10006_v32 = vpop.f32.mrb[39].mxu1  ;;  %10037 = vmatmul.mubr.msk.f32.vlgmr.msra.gmra.mrb[42].mxu1 %vm234_vm0, %v3517_v31 }
0x1f7f   :  { %10717 = vmatpush3.bf16.msra.mxu1 %v11344_v37  ;;  %10058 = vmatprep.mubr.msk.f32.mxu1 %vm11160_vm1, %v11157_v0 }
0x1f80   :  { %10718 = vmatprep.subr.bf16.mxu1 %v11165_v58 }
0x1f81   :  { %v3685_v33 = vpop.f32.mrb[40].mxu1 }
0x1f82   :  { %v10016_v35 = vpop.f32.mrb[41].mxu1  ;;  %10026 = vmatmul.mubr.msk.f32.vlgmr.msra.gmra.mrb[36].mxu0 %vm234_vm0, %v3685_v33 }
0x1f83   :  { %10711 = vmatpush3.bf16.msra.mxu0 %v11355_v43  ;;  %10720 = vmatpush3.bf16.msra.mxu1 %v11353_v40 }
0x1f84   :  { %10712 = vmatprep.subr.bf16.mxu0 %v11165_v58  ;;  %10047 = vmatprep.mubr.msk.f32.mxu0 %vm11160_vm1, %v11157_v0 }
0x1f85   :  { %10066 = vmatprep.subr.mxu1 %v11157_v0 }
0x1f86   :  { %10059 = vmatmul.mubr.msk.f32.vlgmr.msra.gmra.mrb[44].mxu1 %vm234_vm0, %v9244_v11 }
0x1f87   :  { %10714 = vmatpush3.bf16.msra.mxu0 %v11362_v47  ;;  %10068 = vmatprep.mubr.msk.f32.mxu1 %vm11160_vm1, %v11157_v0 }
0x1f88   :  { %10061 = vmatprep.subr.mxu0 %v11157_v0 }
0x2051   :  { %v3831_v20 = vpop.f32.mrb[42].mxu1 }
0x2052   :  { %v10038_v26 = vpop.f32.mrb[43].mxu1 }
0x2055   :  { %v3758_v41 = vpop.f32.mrb[36].mxu0 }
0x2056   :  { %v3832_v44 = vadd.f32 %v3831_v20, %v3758_v41  ;;  %v10027_v45 = vpop.f32.mrb[37].mxu0 }
0x2058   :  { %v3835_v49 = vadd.f32 %v3832_v44, %v3206_v39 }
0x2059   :  { %v3993_v13 = vpop.f32.mrb[44].mxu1 }
0x205a   :  { %v3836_v53 = vsel %vm867_vm5, %v3835_v49, 0.0  ;;  %v10060_v29 = vpop.f32.mrb[45].mxu1 }
0x205b   :  { %3837 = vadd.xlane.f32.xlu0 %v3836_v53 }
0x20e8   :  { %v3838_v61 = vpop.xlane.xlu0 %3837 }
0x20e9   :  { %v3839_v63 = vmul.f32 0.03125, %v3838_v61 }
0x20eb   :  { %v3840_v5 = vsub.f32 %v3835_v49, %v3839_v63 }
0x20ed   :  { %v3841_v18 = vmul.f32 %v3840_v5, %v3840_v5 }
0x20ef   :  { %v3842_v7 = vsel %vm867_vm5, %v3841_v18, 0.0 }
0x20f0   :  { %3843 = vadd.xlane.f32.xlu0 %v3842_v7 }
0x2106   :  { %4164 = vrot.lane.b32.xlu0 %v3993_v13, %s11164_s24 }
0x217d   :  { %v3844_v59 = vpop.xlane.xlu0 %3843 }
0x217e   :  { %v3845_v60 = vmul.f32 0.03125, %v3844_v59 }
0x2180   :  { %v3846_v12 = vadd.f32 1e-06, %v3845_v60 }
0x2181   :  { %v4165_v31 = vpop.permute.xlu0 %4164 }
0x2182   :  { %11067 = vrsqrt.f32 %v3846_v12 }
0x218c   :  { %v11068_v17 = vpop.eup %11067 }
0x218d   :  { %v3848_v19 = vmul.f32 %v11068_v17, %v3840_v5 }
0x218f   :  { %v3849_v24 = vmul.f32 %v11775_v27, %v3848_v19 }
0x2191   :  { %v11782_v52 = vadd.f32 %v11779_v56, %v3849_v24 }
0x2193   :  { %10048 = vmatmul.mubr.msk.f32.vlgmr.msra.gmra.mrb[38].mxu0 %vm234_vm0, %v11782_v52 }
0x2194   :  { %10063 = vmatprep.mubr.msk.f32.mxu0 %vm11160_vm1, %v11157_v0  ;;  %10062 = vmatpush3.xpose.msk.msra.mxu0 %vm234_vm0, %v3993_v13 }
0x2195   :  { %10071 = vmatprep.subr.mxu0 %v11157_v0 }
0x2266   :  { %v3920_v32 = vpop.f32.mrb[38].mxu0 }
0x2267   :  { %4162 = vrot.lane.b32.xlu1 %v3920_v32, %s11164_s24  ;;  %v10049_v33 = vpop.f32.mrb[39].mxu0  ;;  %10064 = vmatmul.mubr.msk.f32.vlgmr.msra.gmra.mrb[40].mxu0 %vm234_vm0, %v3920_v32 }
0x2268   :  { %10072 = vmatpush3.xpose.msk.msra.mxu0 %vm234_vm0, %v4165_v31  ;;  %10073 = vmatprep.mubr.msk.f32.mxu0 %vm11160_vm1, %v11157_v0 }
0x2269   :  { %10721 = vmatprep.subr.bf16.mxu0 %v11165_v58 }
0x22d9   :  { %v4163_v35 = vpop.permute.xlu1 %4162 }
0x22da   :  { %10074 = vmatmul.mubr.msk.f32.vlgmr.msra.gmra.mrb[42].mxu0 %vm234_vm0, %v4163_v35 }
0x22db   :  { %10723 = vmatpush3.bf16.msra.mxu0 %v11440_v51  ;;  %10089 = vmatprep.mubr.msk.f32.mxu0 %vm11160_vm1, %v11157_v0 }
0x22dc   :  { %10724 = vmatprep.subr.bf16.mxu0 %v11165_v58 }
0x22df   :  { %10726 = vmatpush3.bf16.msra.mxu0 %v11445_v57 }
0x22e0   :  { %10733 = vmatprep.subr.bf16.mxu0 %v11165_v58 }
0x233a   :  { %v4069_v20 = vpop.f32.mrb[40].mxu0 }
0x233b   :  { %v4073_v26 = vmul.f32 0.17677669, %v4069_v20  ;;  %v10065_v39 = vpop.f32.mrb[41].mxu0 }
0x233d   :  { %v4074_v41 = vsel %vm1119_vm6, %v4073_v26, -inf }
0x233e   :  { %4075 = vmax.xlane.f32.xlu1 %v4074_v41 }
0x23ad   :  { %v4236_v44 = vpop.f32.mrb[42].mxu0 }
0x23ae   :  { %v4240_v45 = vmul.f32 0.17677669, %v4236_v44  ;;  %v10075_v49 = vpop.f32.mrb[43].mxu0 }
0x23b0   :  { %v4241_v53 = vsel %vm1119_vm6, %v4240_v45, -inf }
0x23b1   :  { %4242 = vmax.xlane.f32.xlu0 %v4241_v53 }
0x23c7   :  { %4085 = vrot.lane.b32.xlu0 %v3993_v13, %s11162_s19 }
0x23cb   :  { %v4076_v61 = vpop.xlane.xlu1 %4075 }
0x23cc   :  { %v4077_v63 = vsub.f32 %v4073_v26, %v4076_v61 }
0x23ce   :  { %v4078_v5 = vmul.f32 1.442695, %v4077_v63 }
0x23d0   :  { %11069 = vpow2.f32 %v4078_v5 }
0x23da   :  { %v11070_v18 = vpop.eup %11069 }
0x23db   :  { %v4080_v7 = vsel %vm1119_vm6, %v11070_v18, 0.0 }
0x23dc   :  { %4081 = vadd.xlane.f32.xlu1 %v4080_v7 }
0x243e   :  { %v4243_v11 = vpop.xlane.xlu0 %4242 }
0x243f   :  { %v4244_v59 = vsub.f32 %v4240_v45, %v4243_v11 }
0x2441   :  { %v4245_v60 = vmul.f32 1.442695, %v4244_v59 }
0x2442   :  { %v4086_v12 = vpop.permute.xlu0 %4085 }
0x2443   :  { %11071 = vpow2.f32 %v4245_v60  ;;  %10067 = vmatpush3.msk.msra.mxu1 %vm1137_vm7, %v4086_v12 }
0x2444   :  { %10076 = vmatprep.subr.mxu1 %v11157_v0 }
0x244d   :  { %v11072_v17 = vpop.eup %11071 }
0x244e   :  { %v4247_v19 = vsel %vm1119_vm6, %v11072_v17, 0.0 }
0x244f   :  { %4248 = vadd.xlane.f32.xlu1 %v4247_v19 }
0x2460   :  { %4252 = vrot.lane.b32.xlu1 %v3993_v13, %s11161_s18 }
0x2469   :  { %v4082_v24 = vpop.xlane.xlu1 %4081 }
0x246a   :  { %11073 = vrcp.f32 %v4082_v24 }
0x2474   :  { %v11074_v29 = vpop.eup %11073 }
0x2475   :  { %v4084_v31 = vmul.f32 %v11074_v29, %v11070_v18 }
0x2477   :  { %10069 = vmatmul.mubr.msk.f32.vlgmr.msra.gmra.mrb[46].mxu1 %vm1133_vm8, %v4084_v31  ;;  %v11856_v31 = vld [vmem:[%s11220_s14 + $0xc] sm:$0xf]  ;;  %s11178_s14 = smov 25  }
0x2478   :  { %10078 = vmatprep.mubr.msk.f32.mxu1 %vm11160_vm1, %v11157_v0 }
0x24dc   :  { %v4249_v32 = vpop.xlane.xlu1 %4248 }
0x24dd   :  { %11075 = vrcp.f32 %v4249_v32 }
0x24e0   :  { %v4253_v33 = vpop.permute.xlu1 %4252 }
0x24e1   :  { %10077 = vmatpush3.msk.msra.mxu1 %vm1137_vm7, %v4253_v33 }
0x24e2   :  { %10727 = vmatprep.subr.bf16.mxu1 %v11165_v58 }
0x24e7   :  { %v11076_v35 = vpop.eup %11075 }
0x24e8   :  { %v4251_v20 = vmul.f32 %v11076_v35, %v11072_v17 }
0x24ea   :  { %10079 = vmatmul.mubr.msk.f32.vlgmr.msra.gmra.mrb[48].mxu1 %vm1133_vm8, %v4251_v20  ;;  %v9276_v20 = vld [vmem:[%s11286_s23 + $0xc] sm:$0xf]  ;;  %s11198_s23 = smov 40  }
0x24eb   :  { %10729 = vmatpush3.bf16.msra.mxu1 %v11425_v42  ;;  %10100 = vmatprep.mubr.msk.f32.mxu1 %vm11160_vm1, %v11157_v0  ;;  %s12510_s22 = sld [smem:[%s12556_s0 + %s11198_s23]]  }
0x24ec   :  { %10730 = vmatprep.subr.bf16.mxu1 %v11165_v58 }
0x24ef   :  { %10732 = vmatpush3.bf16.msra.mxu1 %v11431_v48 }
0x24f0   :  { %10739 = vmatprep.subr.bf16.mxu1 %v11165_v58 }
0x254a   :  { %v4158_v13 = vpop.f32.mrb[46].mxu1 }
0x254b   :  { %v10070_v26 = vpop.f32.mrb[47].mxu1  ;;  %10101 = vmatmul.mubr.msk.f32.vlgmr.msra.gmra.mrb[50].mxu1 %vm234_vm0, %v4158_v13 }
0x254c   :  { %10741 = vmatpush3.bf16.msra.mxu1 %v11478_v34  ;;  %10130 = vmatprep.mubr.msk.f32.mxu1 %vm11160_vm1, %v11157_v0 }
0x254d   :  { %10742 = vmatprep.subr.bf16.mxu1 %v11165_v58 }
0x2550   :  { %10744 = vmatpush3.bf16.msra.mxu1 %v11482_v36 }
0x2551   :  { %10745 = vmatprep.subr.bf16.mxu1 %v11165_v58 }
0x2554   :  { %10747 = vmatpush3.bf16.msra.mxu1 %v11488_v38 }
0x2555   :  { %10748 = vmatprep.subr.bf16.mxu1 %v11165_v58 }
0x2558   :  { %10750 = vmatpush3.bf16.msra.mxu1 %v11539_v2 }
0x2559   :  { %10133 = vmatprep.subr.mxu1 %v11157_v0 }
0x25bd   :  { %v4325_v39 = vpop.f32.mrb[48].mxu1 }
0x25be   :  { %v10080_v41 = vpop.f32.mrb[49].mxu1  ;;  %10090 = vmatmul.mubr.msk.f32.vlgmr.msra.gmra.mrb[44].mxu0 %vm234_vm0, %v4325_v39 }
0x25bf   :  { %10735 = vmatpush3.bf16.msra.mxu0 %v11462_v28  ;;  %10111 = vmatprep.mubr.msk.f32.mxu0 %vm11160_vm1, %v11157_v0 }
0x25c0   :  { %10736 = vmatprep.subr.bf16.mxu0 %v11165_v58 }
0x25c3   :  { %10738 = vmatpush3.bf16.msra.mxu0 %v11466_v30 }
0x25c4   :  { %10752 = vmatprep.subr.bf16.mxu0 %v11222_v4 }
0x261e   :  { %v4471_v44 = vpop.f32.mrb[50].mxu1 }
0x261f   :  { %v10102_v45 = vpop.f32.mrb[51].mxu1 }
0x2691   :  { %v4398_v49 = vpop.f32.mrb[44].mxu0 }
0x2692   :  { %v4472_v53 = vadd.f32 %v4471_v44, %v4398_v49  ;;  %v10091_v61 = vpop.f32.mrb[45].mxu0 }
0x2694   :  { %v4475_v63 = vadd.f32 %v4472_v53, %v11782_v52 }
0x2696   :  { %v4476_v5 = vsel %vm867_vm5, %v4475_v63, 0.0 }
0x2697   :  { %4477 = vadd.xlane.f32.xlu1 %v4476_v5 }
0x2724   :  { %v4478_v18 = vpop.xlane.xlu1 %4477 }
0x2725   :  { %v4479_v7 = vmul.f32 0.03125, %v4478_v18 }
0x2727   :  { %v4480_v11 = vsub.f32 %v4475_v63, %v4479_v7 }
0x2729   :  { %v4481_v59 = vmul.f32 %v4480_v11, %v4480_v11 }
0x272b   :  { %v4482_v60 = vsel %vm867_vm5, %v4481_v59, 0.0 }
0x272c   :  { %4483 = vadd.xlane.f32.xlu0 %v4482_v60 }
0x27b9   :  { %v4484_v12 = vpop.xlane.xlu0 %4483 }
0x27ba   :  { %v4485_v4 = vmul.f32 0.03125, %v4484_v12 }
0x27bc   :  { %v4486_v17 = vadd.f32 1e-06, %v4485_v4 }
0x27be   :  { %11077 = vrsqrt.f32 %v4486_v17 }
0x27c8   :  { %v11078_v19 = vpop.eup %11077 }
0x27c9   :  { %v4488_v24 = vmul.f32 %v11078_v19, %v4480_v11 }
0x27cb   :  { %v4489_v52 = vmul.f32 %v11504_v46, %v4488_v24 }
0x27cd   :  { %v11847_v29 = vadd.f32 %v11507_v50, %v4489_v52 }
0x27cf   :  { %10112 = vmatmul.mubr.msk.f32.vlgmr.msra.gmra.mrb[46].mxu0 %vm234_vm0, %v11847_v29 }
0x27d0   :  { %10754 = vmatpush1.bf16.msra.mxu0 %v11224_v8  ;;  %4732 = vmatprep.mubr.f32.mxu0 %v11157_v0  ;;  %v11866_v8 = vld [vmem:[%s11250_s17 + $0xc] sm:$0xf]  ;;  %s11185_s17 = smov 29  }
0x27d1   :  { %10756 = vmatprep.subr.bf16.mxu0 %v11226_v9  ;;  %s9164_s15 = sld [smem:[%s12556_s0 + %s11185_s17]]   ;;  %s11191_s17 = smov 36  }
0x27d4   :  { %10758 = vmatpush1.bf16.msra.mxu0 %v11232_v14 }
0x27d5   :  { %10760 = vmatprep.subr.bf16.mxu0 %v11235_v15 }
0x27d7   :  { %9277 = vmatmul.mubr.msk.f32.vlgmr.msra.gmra.mrb[48].mxu0 %vm234_vm0, %v11856_v31 }
0x27d8   :  { %10762 = vmatpush1.bf16.msra.mxu0 %v11245_v21  ;;  %4806 = vmatprep.mubr.f32.mxu0 %v11157_v0 }
0x27d9   :  { %10764 = vmatprep.subr.bf16.mxu0 %v11253_v22 }
0x27dc   :  { %10766 = vmatpush1.bf16.msra.mxu0 %v11260_v25 }
0x27dd   :  { %10143 = vmatprep.subr.mxu0 %v11157_v0 }
0x27df   :  { %9278 = vmatmul.mubr.msk.f32.vlgmr.msra.gmra.mrb[48].mxu0 %vm234_vm0, %v11866_v8 }
0x27e0   :  { %10145 = vmatprep.mubr.msk.f32.mxu0 %vm11160_vm1, %v11157_v0 }
0x28a2   :  { %v4560_v9 = vpop.f32.mrb[46].mxu0 }
0x28a3   :  { %v4561_v14 = vadd.f32 %v11549_v3, %v4560_v9  ;;  %v10113_v15 = vpop.f32.mrb[47].mxu0 }
0x28a5   :  { %v4564_v21 = vmax.f32 %v4561_v14, 0.0 }
0x28a7   :  { %10131 = vmatmul.mubr.msk.f32.vlgmr.msra.gmra.mrb[52].mxu1 %vm1637_vm9, %v4564_v21 }
0x28a8   :  { %10135 = vmatprep.mubr.msk.f32.mxu1 %vm11160_vm1, %v11157_v0 }
0x28b2   :  { %v4808_v22 = vpop.f32.mrb[48].mxu0 }
0x28b3   :  { %4981 = vrot.lane.b32.xlu1 %v4808_v22, %s11161_s18  ;;  %4814 = vrot.lane.b32.xlu0 %v4808_v22, %s11162_s19  ;;  %v4810_v25 = vpop.f32.mrb[49].mxu0 }
0x28b7   :  { %4979 = vrot.lane.b32.xlu1 %v4808_v22, %s11164_s24 }
0x2925   :  { %v4982_v46 = vpop.permute.xlu1 %4981  ;;  %v4815_v50 = vpop.permute.xlu0 %4814 }
0x2926   :  { %10134 = vmatpush3.xpose.msk.msra.mxu1 %vm234_vm0, %v4815_v50  ;;  %10144 = vmatpush3.xpose.msk.msra.mxu0 %vm234_vm0, %v4982_v46 }
0x2927   :  { %10138 = vmatprep.subr.mxu1 %v11157_v0  ;;  %10767 = vmatprep.subr.bf16.mxu0 %v11165_v58 }
0x2929   :  { %v4980_v3 = vpop.permute.xlu1 %4979  ;;  %10136 = vmatmul.mubr.msk.f32.vlgmr.msra.gmra.mrb[54].mxu1 %vm234_vm0, %v4808_v22 }
0x292a   :  { %10139 = vmatpush3.msk.msra.mxu1 %vm478_vm2, %v4810_v25  ;;  %10146 = vmatmul.mubr.msk.f32.vlgmr.msra.gmra.mrb[50].mxu0 %vm234_vm0, %v4980_v3 }
0x292b   :  { %10140 = vmatprep.mubr.msk.f32.mxu1 %vm11160_vm1, %v11157_v0  ;;  %10148 = vmatprep.subr.mxu1 %v11157_v0 }
0x292c   :  { %10769 = vmatpush3.bf16.msra.mxu0 %v11307_v62  ;;  %10161 = vmatprep.mubr.msk.f32.mxu0 %vm11160_vm1, %v11157_v0 }
0x292d   :  { %10770 = vmatprep.subr.bf16.mxu0 %v11165_v58 }
0x2930   :  { %10772 = vmatpush3.bf16.msra.mxu0 %v11310_v1 }
0x2931   :  { %10779 = vmatprep.subr.bf16.mxu0 %v11165_v58 }
0x297a   :  { %v11896_v32 = vpop.f32.mrb[52].mxu1 }
0x297b   :  { %v10132_v33 = vpop.f32.mrb[53].mxu1 }
0x29fc   :  { %v4886_v35 = vpop.f32.mrb[54].mxu1 }
0x29fd   :  { %v4890_v13 = vmul.f32 0.17677669, %v4886_v35  ;;  %v10137_v26 = vpop.f32.mrb[55].mxu1  ;;  %v5053_v39 = vpop.f32.mrb[50].mxu0 }
0x29fe   :  { %v5057_v41 = vmul.f32 0.17677669, %v5053_v39  ;;  %v10147_v44 = vpop.f32.mrb[51].mxu0  ;;  %v9275_v26 = vld [vmem:[%s11350_s10 + $0x6] sm:$0x3]  ;;  %s9160_s10 = sld [smem:[%s12556_s0 + %s11178_s14]]  }
0x29ff   :  { %v4891_v62 = vadd.f32 %v9276_v20, %v4890_v13  ;;  %s9165_s14 = sld [smem:[%s12556_s0 + %s11184_s25]]   ;;  %s11190_s25 = smov 34  }
0x2a00   :  { %v5058_v45 = vadd.f32 %v9276_v20, %v5057_v41 }
0x2a01   :  { %v4892_v49 = vsel %vm462_vm3, %v4891_v62, -inf }
0x2a02   :  { %4893 = vmax.xlane.f32.xlu0 %v4892_v49  ;;  %v5059_v53 = vsel %vm462_vm3, %v5058_v45, -inf }
0x2a03   :  { %5060 = vmax.xlane.f32.xlu1 %v5059_v53 }
0x2a14   :  { %5070 = vrot.lane.b32.xlu1 %v4810_v25, %s11164_s24  ;;  %v4664_v25 = vadd.f32 %v11856_v31, %v11866_v8 }
0x2a8f   :  { %v4894_v1 = vpop.xlane.xlu0 %4893 }
0x2a90   :  { %v4895_v61 = vsub.f32 %v4891_v62, %v4894_v1  ;;  %v5061_v63 = vpop.xlane.xlu1 %5060 }
0x2a91   :  { %v5062_v5 = vsub.f32 %v5058_v45, %v5061_v63 }
0x2a92   :  { %v4896_v18 = vmul.f32 1.442695, %v4895_v61 }
0x2a93   :  { %v5063_v7 = vmul.f32 1.442695, %v5062_v5 }
0x2a94   :  { %11079 = vpow2.f32 %v4896_v18  ;;  %v5071_v52 = vpop.permute.xlu1 %5070 }
0x2a95   :  { %11081 = vpow2.f32 %v5063_v7 }
0x2a9e   :  { %v11080_v11 = vpop.eup %11079 }
0x2a9f   :  { %v4898_v59 = vsel %vm462_vm3, %v11080_v11, 0.0  ;;  %v11082_v60 = vpop.eup %11081 }
0x2aa0   :  { %4899 = vadd.xlane.f32.xlu0 %v4898_v59  ;;  %v5065_v12 = vsel %vm462_vm3, %v11082_v60, 0.0 }
0x2aa4   :  { %5066 = vadd.xlane.f32.xlu0 %v5065_v12 }
0x2b2d   :  { %v4900_v4 = vpop.xlane.xlu0 %4899 }
0x2b2e   :  { %11083 = vrcp.f32 %v4900_v4 }
0x2b31   :  { %v5067_v17 = vpop.xlane.xlu0 %5066 }
0x2b32   :  { %11085 = vrcp.f32 %v5067_v17 }
0x2b38   :  { %v11084_v19 = vpop.eup %11083 }
0x2b39   :  { %v4902_v24 = vmul.f32 %v11084_v19, %v11080_v11 }
0x2b3b   :  { %10141 = vmatmul.mubr.msk.f32.vlgmr.msra.gmra.mrb[56].mxu1 %vm474_vm4, %v4902_v24 }
0x2b3c   :  { %v11086_v9 = vpop.eup %11085  ;;  %10149 = vmatpush3.msk.msra.mxu1 %vm478_vm2, %v5071_v52  ;;  %10150 = vmatprep.mubr.msk.f32.mxu1 %vm11160_vm1, %v11157_v0 }
0x2b3d   :  { %v5069_v14 = vmul.f32 %v11086_v9, %v11082_v60  ;;  %10773 = vmatprep.subr.bf16.mxu1 %v11165_v58 }
0x2b3f   :  { %10151 = vmatmul.mubr.msk.f32.vlgmr.msra.gmra.mrb[58].mxu1 %vm474_vm4, %v5069_v14 }
0x2b40   :  { %10775 = vmatpush3.bf16.msra.mxu1 %v11317_v10  ;;  %10172 = vmatprep.mubr.msk.f32.mxu1 %vm11160_vm1, %v11157_v0 }
0x2b41   :  { %10776 = vmatprep.subr.bf16.mxu1 %v11165_v58 }
0x2b44   :  { %10778 = vmatpush3.bf16.msra.mxu1 %v11321_v16 }
0x2b45   :  { %10785 = vmatprep.subr.bf16.mxu1 %v11165_v58 }
0x2c0e   :  { %v4975_v15 = vpop.f32.mrb[56].mxu1 }
0x2c0f   :  { %v10142_v21 = vpop.f32.mrb[57].mxu1  ;;  %10173 = vmatmul.mubr.msk.f32.vlgmr.msra.gmra.mrb[60].mxu1 %vm234_vm0, %v4975_v15 }
0x2c10   :  { %10787 = vmatpush3.bf16.msra.mxu1 %v11344_v37  ;;  %10194 = vmatprep.mubr.msk.f32.mxu1 %vm11160_vm1, %v11157_v0 }
0x2c11   :  { %10788 = vmatprep.subr.bf16.mxu1 %v11165_v58 }
0x2c12   :  { %v5143_v10 = vpop.f32.mrb[58].mxu1 }
0x2c13   :  { %v10152_v22 = vpop.f32.mrb[59].mxu1  ;;  %10162 = vmatmul.mubr.msk.f32.vlgmr.msra.gmra.mrb[52].mxu0 %vm234_vm0, %v5143_v10 }
0x2c14   :  { %10781 = vmatpush3.bf16.msra.mxu0 %v11355_v43  ;;  %10790 = vmatpush3.bf16.msra.mxu1 %v11353_v40 }
0x2c15   :  { %10782 = vmatprep.subr.bf16.mxu0 %v11165_v58  ;;  %10183 = vmatprep.mubr.msk.f32.mxu0 %vm11160_vm1, %v11157_v0 }
0x2c16   :  { %10202 = vmatprep.subr.mxu1 %v11157_v0 }
0x2c17   :  { %10195 = vmatmul.mubr.msk.f32.vlgmr.msra.gmra.mrb[62].mxu1 %vm234_vm0, %v9275_v26 }
0x2c18   :  { %10784 = vmatpush3.bf16.msra.mxu0 %v11362_v47  ;;  %10204 = vmatprep.mubr.msk.f32.mxu1 %vm11160_vm1, %v11157_v0 }
0x2c19   :  { %10197 = vmatprep.subr.mxu0 %v11157_v0 }
0x2ce2   :  { %v5289_v16 = vpop.f32.mrb[60].mxu1 }
0x2ce3   :  { %v10174_v37 = vpop.f32.mrb[61].mxu1 }
0x2ce6   :  { %v5216_v43 = vpop.f32.mrb[52].mxu0 }
0x2ce7   :  { %v5290_v46 = vadd.f32 %v5289_v16, %v5216_v43  ;;  %v10163_v40 = vpop.f32.mrb[53].mxu0 }
0x2ce9   :  { %v5293_v50 = vadd.f32 %v5290_v46, %v4664_v25 }
0x2cea   :  { %v5451_v49 = vpop.f32.mrb[62].mxu1 }
0x2ceb   :  { %v5294_v3 = vsel %vm867_vm5, %v5293_v50, 0.0  ;;  %v10196_v53 = vpop.f32.mrb[63].mxu1 }
0x2cec   :  { %5295 = vadd.xlane.f32.xlu0 %v5294_v3  ;;  %v6124_v53 = vld [vmem:[%s9160_s10 + $0x10] sm:$0xff] }
0x2d79   :  { %v5296_v33 = vpop.xlane.xlu0 %5295 }
0x2d7a   :  { %v5297_v35 = vmul.f32 0.03125, %v5296_v33 }
0x2d7c   :  { %v5298_v20 = vsub.f32 %v5293_v50, %v5297_v35 }
0x2d7e   :  { %v5299_v13 = vmul.f32 %v5298_v20, %v5298_v20 }
0x2d80   :  { %v5300_v47 = vsel %vm867_vm5, %v5299_v13, 0.0 }
0x2d81   :  { %5301 = vadd.xlane.f32.xlu0 %v5300_v47 }
0x2d97   :  { %5622 = vrot.lane.b32.xlu0 %v5451_v49, %s11164_s24 }
0x2e0e   :  { %v5302_v31 = vpop.xlane.xlu0 %5301 }
0x2e0f   :  { %v5303_v8 = vmul.f32 0.03125, %v5302_v31  ;;  %v6125_v31 = vld [vmem:[%s9160_s10 + $0x18] sm:$0xff] }
0x2e11   :  { %v5304_v39 = vadd.f32 1e-06, %v5303_v8 }
0x2e12   :  { %v5623_v1 = vpop.permute.xlu0 %5622 }
0x2e13   :  { %11087 = vrsqrt.f32 %v5304_v39 }
0x2e1d   :  { %v11088_v41 = vpop.eup %11087 }
0x2e1e   :  { %v5306_v44 = vmul.f32 %v11088_v41, %v5298_v20 }
0x2e20   :  { %v5307_v62 = vmul.f32 %v11775_v27, %v5306_v44 }
0x2e22   :  { %v11940_v45 = vadd.f32 %v11779_v56, %v5307_v62 }
0x2e24   :  { %10184 = vmatmul.mubr.msk.f32.vlgmr.msra.gmra.mrb[54].mxu0 %vm234_vm0, %v11940_v45 }
0x2e25   :  { %10199 = vmatprep.mubr.msk.f32.mxu0 %vm11160_vm1, %v11157_v0  ;;  %10198 = vmatpush3.xpose.msk.msra.mxu0 %vm234_vm0, %v5451_v49 }
0x2e26   :  { %10207 = vmatprep.subr.mxu0 %v11157_v0 }
0x2ef7   :  { %v5378_v61 = vpop.f32.mrb[54].mxu0 }
0x2ef8   :  { %5620 = vrot.lane.b32.xlu1 %v5378_v61, %s11164_s24  ;;  %v10185_v27 = vpop.f32.mrb[55].mxu0  ;;  %10200 = vmatmul.mubr.msk.f32.vlgmr.msra.gmra.mrb[56].mxu0 %vm234_vm0, %v5378_v61  ;;  %v6129_v61 = vld [vmem:[%s9160_s10 + $0x38] sm:$0xff] }
0x2ef9   :  { %10208 = vmatpush3.xpose.msk.msra.mxu0 %vm234_vm0, %v5623_v1  ;;  %10209 = vmatprep.mubr.msk.f32.mxu0 %vm11160_vm1, %v11157_v0  ;;  %v6127_v1 = vld [vmem:[%s9160_s10 + $0x28] sm:$0xff]  ;;  %v11153_v27 = vld [vmem:[%s11496_s11] ss:$0 sm:$0xff]  ;;  %s9163_s11 = sld [smem:[%s12556_s0 + %s11188_s6]]  }
0x2efa   :  { %10791 = vmatprep.subr.bf16.mxu0 %v11165_v58  ;;  %s9174_s6 = sld [smem:[%s12556_s0 + %s11200_s4]]  }
0x2f6a   :  { %v5621_v56 = vpop.permute.xlu1 %5620 }
0x2f6b   :  { %10210 = vmatmul.mubr.msk.f32.vlgmr.msra.gmra.mrb[58].mxu0 %vm234_vm0, %v5621_v56 }
0x2f6c   :  { %10793 = vmatpush3.bf16.msra.mxu0 %v11440_v51  ;;  %10225 = vmatprep.mubr.msk.f32.mxu0 %vm11160_vm1, %v11157_v0 }
0x2f6d   :  { %10794 = vmatprep.subr.bf16.mxu0 %v11165_v58 }
0x2f70   :  { %10796 = vmatpush3.bf16.msra.mxu0 %v11445_v57 }
0x2f71   :  { %10803 = vmatprep.subr.bf16.mxu0 %v11165_v58 }
0x2fcb   :  { %v5527_v63 = vpop.f32.mrb[56].mxu0 }
0x2fcc   :  { %v5531_v5 = vmul.f32 0.17677669, %v5527_v63  ;;  %v10201_v18 = vpop.f32.mrb[57].mxu0 }
0x2fce   :  { %v5532_v7 = vsel %vm1119_vm6, %v5531_v5, -inf }
0x2fcf   :  { %5533 = vmax.xlane.f32.xlu1 %v5532_v7  ;;  %v12024_v7 = vpack.c.bf16 %v6129_v61, %v6127_v1 }
0x303e   :  { %v5694_v11 = vpop.f32.mrb[58].mxu0 }
0x303f   :  { %v5698_v59 = vmul.f32 0.17677669, %v5694_v11  ;;  %v10211_v60 = vpop.f32.mrb[59].mxu0  ;;  %v6126_v11 = vld [vmem:[%s9160_s10 + $0x20] sm:$0xff] }
0x3040   :  { %v6115_v60 = vld [vmem:[%s12011_s29 + $0x8] sm:$0xff] }
0x3041   :  { %v5699_v51 = vsel %vm1119_vm6, %v5698_v59, -inf }
0x3042   :  { %5700 = vmax.xlane.f32.xlu0 %v5699_v51  ;;  %v6117_v51 = vld [vmem:[%s12011_s29 + $0x18] sm:$0xff] }
0x3058   :  { %5543 = vrot.lane.b32.xlu0 %v5451_v49, %s11162_s19 }
0x305c   :  { %v5534_v12 = vpop.xlane.xlu1 %5533 }
0x305d   :  { %v5535_v4 = vsub.f32 %v5531_v5, %v5534_v12  ;;  %v11154_v5 = vld [vmem:[%s11501_s20] ss:$0 sm:$0xff] }
0x305f   :  { %v5536_v17 = vmul.f32 1.442695, %v5535_v4  ;;  %v12035_v4 = vpack.c.bf16 %v6117_v51, %v6115_v60 }
0x3061   :  { %11089 = vpow2.f32 %v5536_v17  ;;  %v6114_v17 = vld [vmem:[%s12011_s29] sm:$0xff] }
0x306b   :  { %v11090_v57 = vpop.eup %11089 }
0x306c   :  { %v5538_v19 = vsel %vm1119_vm6, %v11090_v57, 0.0 }
0x306d   :  { %5539 = vadd.xlane.f32.xlu1 %v5538_v19  ;;  %v6119_v19 = vld [vmem:[%s12011_s29 + $0x28] sm:$0xff] }
0x30cf   :  { %v5701_v24 = vpop.xlane.xlu0 %5700 }
0x30d0   :  { %v5702_v52 = vsub.f32 %v5698_v59, %v5701_v24  ;;  %v6128_v59 = vld [vmem:[%s9160_s10 + $0x30] sm:$0xff]  ;;  %v6121_v24 = vld [vmem:[%s12011_s29 + $0x38] sm:$0xff] }
0x30d1   :  { %v12031_v12 = vpack.c.bf16 %v6128_v59, %v6126_v11 }
0x30d2   :  { %v5703_v9 = vmul.f32 1.442695, %v5702_v52  ;;  %v12043_v52 = vld [vmem:[%s12019_s3] sm:$0xff] }
0x30d3   :  { %v5544_v14 = vpop.permute.xlu0 %5543 }
0x30d4   :  { %11091 = vpow2.f32 %v5703_v9  ;;  %10203 = vmatpush3.msk.msra.mxu1 %vm1137_vm7, %v5544_v14  ;;  %v12053_v14 = vpack.c.bf16 %v6121_v24, %v6119_v19  ;;  %v6131_v19 = vld [vmem:[%s12107_s21 + $0x8] sm:$0xff] }
0x30d5   :  { %10212 = vmatprep.subr.mxu1 %v11157_v0 }
0x30de   :  { %v11092_v15 = vpop.eup %11091 }
0x30df   :  { %v5705_v21 = vsel %vm1119_vm6, %v11092_v15, 0.0 }
0x30e0   :  { %5706 = vadd.xlane.f32.xlu1 %v5705_v21  ;;  %v6120_v21 = vld [vmem:[%s12011_s29 + $0x30] sm:$0xff] }
0x30f1   :  { %5710 = vrot.lane.b32.xlu1 %v5451_v49, %s11161_s18  ;;  %v6122_v49 = vld [vmem:[%s9160_s10] sm:$0xff] }
0x30f2   :  { %v12014_v63 = vpack.c.bf16 %v6124_v53, %v6122_v49 }
0x30fa   :  { %v5540_v10 = vpop.xlane.xlu1 %5539 }
0x30fb   :  { %11093 = vrcp.f32 %v5540_v10 }
0x3105   :  { %v11094_v22 = vpop.eup %11093 }
0x3106   :  { %v5542_v16 = vmul.f32 %v11094_v22, %v11090_v57  ;;  %v6116_v57 = vld [vmem:[%s12011_s29 + $0x10] sm:$0xff]  ;;  %v12066_v22 = vld [vmem:[%s12050_s7] sm:$0xff] }
0x3107   :  { %v12045_v9 = vpack.c.bf16 %v6116_v57, %v6114_v17  ;;  %v6130_v57 = vld [vmem:[%s12107_s21] sm:$0xff] }
0x3108   :  { %10205 = vmatmul.mubr.msk.f32.vlgmr.msra.gmra.mrb[64].mxu1 %vm1133_vm8, %v5542_v16 }
0x3109   :  { %10214 = vmatprep.mubr.msk.f32.mxu1 %vm11160_vm1, %v11157_v0 }
0x316d   :  { %v5707_v37 = vpop.xlane.xlu1 %5706 }
0x316e   :  { %11095 = vrcp.f32 %v5707_v37  ;;  %v11155_v37 = vld [vmem:[%s11546_s27] ss:$0 sm:$0xff] }
0x3171   :  { %v5711_v25 = vpop.permute.xlu1 %5710 }
0x3172   :  { %10213 = vmatpush3.msk.msra.mxu1 %vm1137_vm7, %v5711_v25 }
0x3173   :  { %10797 = vmatprep.subr.bf16.mxu1 %v11165_v58 }
0x3178   :  { %v11096_v43 = vpop.eup %11095 }
0x3179   :  { %v5709_v46 = vmul.f32 %v11096_v43, %v11092_v15  ;;  %v6118_v15 = vld [vmem:[%s12011_s29 + $0x20] sm:$0xff]  ;;  %s9167_s29 = sld [smem:[%s12556_s0 + %s11161_s18]]  }
0x317a   :  { %v12060_v10 = vpack.c.bf16 %v6120_v21, %v6118_v15  ;;  %v12120_v21 = vpack.c.bf16 %v6131_v19, %v6130_v57  ;;  %v12187_v19 = vld [vmem:[%s9162_s5] ss:$0 sm:$0xff]  ;;  %s9168_s5 = sld [smem:[%s12556_s0 + %s11192_s1]]  }
0x317b   :  { %10215 = vmatmul.mubr.msk.f32.vlgmr.msra.gmra.mrb[66].mxu1 %vm1133_vm8, %v5709_v46 }
0x317c   :  { %10799 = vmatpush3.bf16.msra.mxu1 %v11425_v42  ;;  %10236 = vmatprep.mubr.msk.f32.mxu1 %vm11160_vm1, %v11157_v0 }
0x317d   :  { %10800 = vmatprep.subr.bf16.mxu1 %v11165_v58 }
0x3180   :  { %10802 = vmatpush3.bf16.msra.mxu1 %v11431_v48 }
0x3181   :  { %10809 = vmatprep.subr.bf16.mxu1 %v11165_v58 }
0x31db   :  { %v5616_v40 = vpop.f32.mrb[64].mxu1 }
0x31dc   :  { %v10206_v50 = vpop.f32.mrb[65].mxu1  ;;  %10237 = vmatmul.mubr.msk.f32.vlgmr.msra.gmra.mrb[68].mxu1 %vm234_vm0, %v5616_v40 }
0x31dd   :  { %10811 = vmatpush3.bf16.msra.mxu1 %v11478_v34  ;;  %10266 = vmatprep.mubr.msk.f32.mxu1 %vm11160_vm1, %v11157_v0 }
0x31de   :  { %10812 = vmatprep.subr.bf16.mxu1 %v11165_v58 }
0x31e1   :  { %10814 = vmatpush3.bf16.msra.mxu1 %v11482_v36 }
0x31e2   :  { %10815 = vmatprep.subr.bf16.mxu1 %v11165_v58 }
0x31e5   :  { %10817 = vmatpush3.bf16.msra.mxu1 %v11488_v38 }
0x31e6   :  { %10818 = vmatprep.subr.bf16.mxu1 %v11165_v58 }
0x31e9   :  { %10820 = vmatpush3.bf16.msra.mxu1 %v11539_v2 }
0x31ea   :  { %10269 = vmatprep.subr.mxu1 %v11157_v0 }
0x324e   :  { %v5783_v42 = vpop.f32.mrb[66].mxu1 }
0x324f   :  { %v10216_v48 = vpop.f32.mrb[67].mxu1  ;;  %10226 = vmatmul.mubr.msk.f32.vlgmr.msra.gmra.mrb[60].mxu0 %vm234_vm0, %v5783_v42 }
0x3250   :  { %10805 = vmatpush3.bf16.msra.mxu0 %v11462_v28  ;;  %10247 = vmatprep.mubr.msk.f32.mxu0 %vm11160_vm1, %v11157_v0 }
0x3251   :  { %10806 = vmatprep.subr.bf16.mxu0 %v11165_v58 }
0x3254   :  { %10808 = vmatpush3.bf16.msra.mxu0 %v11466_v30  ;;  %v6123_v30 = vld [vmem:[%s9160_s10 + $0x8] sm:$0xff] }
0x3255   :  { %v12005_v8 = vpack.c.bf16 %v6125_v31, %v6123_v30 }
0x3257   :  { %10822 = vmatprep.subr.bf16.mxu0 %v12005_v8 }
0x32af   :  { %v5929_v34 = vpop.f32.mrb[68].mxu1 }
0x32b0   :  { %v10238_v36 = vpop.f32.mrb[69].mxu1 }
0x3322   :  { %v5856_v38 = vpop.f32.mrb[60].mxu0 }
0x3323   :  { %v5930_v3 = vadd.f32 %v5929_v34, %v5856_v38  ;;  %v10227_v2 = vpop.f32.mrb[61].mxu0 }
0x3324   :  { %v6177_v2 = vld [vmem:[%s12096_s12] sm:$0xff] }
0x3325   :  { %v5933_v33 = vadd.f32 %v5930_v3, %v11940_v45 }
0x3327   :  { %v5934_v35 = vsel %vm867_vm5, %v5933_v33, 0.0 }
0x3328   :  { %5935 = vadd.xlane.f32.xlu1 %v5934_v35 }
0x33b5   :  { %v5936_v20 = vpop.xlane.xlu1 %5935 }
0x33b6   :  { %v5937_v13 = vmul.f32 0.03125, %v5936_v20 }
0x33b8   :  { %v5938_v28 = vsub.f32 %v5933_v33, %v5937_v13 }
0x33ba   :  { %v5939_v47 = vmul.f32 %v5938_v28, %v5938_v28 }
0x33bc   :  { %v5940_v26 = vsel %vm867_vm5, %v5939_v47, 0.0 }
0x33bd   :  { %5941 = vadd.xlane.f32.xlu0 %v5940_v26 }
0x344a   :  { %v5942_v39 = vpop.xlane.xlu0 %5941 }
0x344b   :  { %v5943_v41 = vmul.f32 0.03125, %v5942_v39 }
0x344d   :  { %v5944_v44 = vadd.f32 1e-06, %v5943_v41 }
0x344f   :  { %11097 = vrsqrt.f32 %v5944_v44 }
0x3459   :  { %v11098_v62 = vpop.eup %11097 }
0x345a   :  { %v5946_v45 = vmul.f32 %v11098_v62, %v5938_v28 }
0x345c   :  { %v5947_v56 = vmul.f32 %v11153_v27, %v5946_v45 }
0x345e   :  { %v12022_v18 = vadd.f32 %v11154_v5, %v5947_v56  ;;  %v6134_v56 = vld [vmem:[%s12107_s21 + $0x20] sm:$0xff]  ;;  %v6135_v5 = vld [vmem:[%s12107_s21 + $0x28] sm:$0xff] }
0x345f   :  { %v12111_v11 = vpack.c.bf16 %v6135_v5, %v6134_v56  ;;  %v6143_v56 = vld [vmem:[%s9164_s15 + $0x18] sm:$0xff] }
0x3460   :  { %10248 = vmatmul.mubr.msk.f32.vlgmr.msra.gmra.mrb[62].mxu0 %vm234_vm0, %v12022_v18 }
0x3461   :  { %10824 = vmatpush1.bf16.msra.mxu0 %v12014_v63  ;;  %6246 = vmatprep.mubr.f32.mxu0 %v11157_v0 }
0x3462   :  { %10826 = vmatprep.subr.bf16.mxu0 %v12024_v7 }
0x3465   :  { %10828 = vmatpush1.bf16.msra.mxu0 %v12031_v12 }
0x3466   :  { %10830 = vmatprep.subr.bf16.mxu0 %v12035_v4 }
0x3468   :  { %9304 = vmatmul.mubr.msk.f32.vlgmr.msra.gmra.mrb[64].mxu0 %vm234_vm0, %v12043_v52 }
0x3469   :  { %10832 = vmatpush1.bf16.msra.mxu0 %v12045_v9  ;;  %6320 = vmatprep.mubr.f32.mxu0 %v11157_v0 }
0x346a   :  { %10834 = vmatprep.subr.bf16.mxu0 %v12053_v14 }
0x346d   :  { %10836 = vmatpush1.bf16.msra.mxu0 %v12060_v10 }
0x346e   :  { %10279 = vmatprep.subr.mxu0 %v11157_v0 }
0x3470   :  { %9305 = vmatmul.mubr.msk.f32.vlgmr.msra.gmra.mrb[64].mxu0 %vm234_vm0, %v12066_v22 }
0x3471   :  { %10281 = vmatprep.mubr.msk.f32.mxu0 %vm11160_vm1, %v11157_v0 }
0x3533   :  { %v6018_v16 = vpop.f32.mrb[62].mxu0 }
0x3534   :  { %v6019_v25 = vadd.f32 %v11155_v37, %v6018_v16  ;;  %v10249_v43 = vpop.f32.mrb[63].mxu0  ;;  %v6132_v37 = vld [vmem:[%s12107_s21 + $0x10] sm:$0xff] }
0x3536   :  { %v6022_v46 = vmax.f32 %v6019_v25, 0.0  ;;  %v6133_v25 = vld [vmem:[%s12107_s21 + $0x18] sm:$0xff] }
0x3537   :  { %v12127_v43 = vpack.c.bf16 %v6133_v25, %v6132_v37 }
0x3538   :  { %10267 = vmatmul.mubr.msk.f32.vlgmr.msra.gmra.mrb[70].mxu1 %vm1637_vm9, %v6022_v46  ;;  %v6136_v46 = vld [vmem:[%s12107_s21 + $0x30] sm:$0xff] }
0x3539   :  { %10271 = vmatprep.mubr.msk.f32.mxu1 %vm11160_vm1, %v11157_v0 }
0x3543   :  { %v6322_v40 = vpop.f32.mrb[64].mxu0 }
0x3544   :  { %6493 = vrot.lane.b32.xlu1 %v6322_v40, %s11161_s18  ;;  %6328 = vrot.lane.b32.xlu0 %v6322_v40, %s11162_s19  ;;  %v6324_v50 = vpop.f32.mrb[65].mxu0 }
0x3548   :  { %6491 = vrot.lane.b32.xlu1 %v6322_v40, %s11164_s24 }
0x35b6   :  { %v6494_v42 = vpop.permute.xlu1 %6493  ;;  %v6329_v48 = vpop.permute.xlu0 %6328 }
0x35b7   :  { %10270 = vmatpush3.xpose.msk.msra.mxu1 %vm234_vm0, %v6329_v48  ;;  %10280 = vmatpush3.xpose.msk.msra.mxu0 %vm234_vm0, %v6494_v42 }
0x35b8   :  { %10274 = vmatprep.subr.mxu1 %v11157_v0  ;;  %10837 = vmatprep.subr.bf16.mxu0 %v11165_v58 }
0x35ba   :  { %v6492_v34 = vpop.permute.xlu1 %6491  ;;  %10272 = vmatmul.mubr.msk.f32.vlgmr.msra.gmra.mrb[72].mxu1 %vm234_vm0, %v6322_v40  ;;  %v6137_v40 = vld [vmem:[%s12107_s21 + $0x38] sm:$0xff]  ;;  %s9166_s21 = sld [smem:[%s12556_s0 + %s11189_s13]]  }
0x35bb   :  { %10275 = vmatpush3.msra.mxu1 %v6324_v50  ;;  %10282 = vmatmul.mubr.msk.f32.vlgmr.msra.gmra.mrb[66].mxu0 %vm234_vm0, %v6492_v34 }
0x35bc   :  { %10276 = vmatprep.mubr.msk.f32.mxu1 %vm11160_vm1, %v11157_v0  ;;  %10284 = vmatprep.subr.mxu1 %v11157_v0 }
0x35bd   :  { %10297 = vmatprep.mubr.msk.f32.mxu0 %vm11160_vm1, %v11157_v0  ;;  %10839 = vmatpush3.bf16.msra.mxu0 %v12111_v11 }
0x35be   :  { %10840 = vmatprep.subr.bf16.mxu0 %v11165_v58 }
0x360b   :  { %v12091_v36 = vpop.f32.mrb[70].mxu1 }
0x360c   :  { %v10268_v38 = vpop.f32.mrb[71].mxu1 }
0x368d   :  { %v6400_v3 = vpop.f32.mrb[72].mxu1 }
0x368e   :  { %v6404_v33 = vmul.f32 0.17677669, %v6400_v3  ;;  %v10273_v35 = vpop.f32.mrb[73].mxu1  ;;  %v6565_v20 = vpop.f32.mrb[66].mxu0 }
0x368f   :  { %v6569_v13 = vmul.f32 0.17677669, %v6565_v20  ;;  %v10283_v28 = vpop.f32.mrb[67].mxu0 }
0x3690   :  { %v6405_v47 = vadd.f32 %v6404_v33, %v6177_v2  ;;  %v6178_v33 = vadd.f32 %v12043_v52, %v12066_v22  ;;  %v6144_v52 = vld [vmem:[%s9165_s14] sm:$0xff]  ;;  %v6145_v22 = vld [vmem:[%s9165_s14 + $0x8] sm:$0xff] }
0x3691   :  { %v6570_v26 = vadd.f32 %v6569_v13, %v6177_v2 }
0x3692   :  { %v6407_v30 = vsel %vm6406_vm10, %v6405_v47, -inf }
0x3693   :  { %6408 = vmax.xlane.f32.xlu0 %v6407_v30  ;;  %v6571_v31 = vsel %vm6406_vm10, %v6570_v26, -inf }
0x3694   :  { %6572 = vmax.xlane.f32.xlu1 %v6571_v31 }
0x36a5   :  { %6583 = vrot.lane.b32.xlu1 %v6324_v50, %s11164_s24  ;;  %v12136_v50 = vpack.c.bf16 %v6137_v40, %v6136_v46 }
0x36a7   :  { %10842 = vmatpush3.bf16.msra.mxu0 %v12136_v50 }
0x36a8   :  { %10849 = vmatprep.subr.bf16.mxu0 %v11165_v58 }
0x3720   :  { %v6409_v39 = vpop.xlane.xlu0 %6408 }
0x3721   :  { %v6410_v41 = vsub.f32 %v6405_v47, %v6409_v39  ;;  %v6573_v44 = vpop.xlane.xlu1 %6572 }
0x3722   :  { %v6574_v62 = vsub.f32 %v6570_v26, %v6573_v44  ;;  %v12156_v44 = vpack.c.bf16 %v6145_v22, %v6144_v52 }
0x3723   :  { %v6411_v45 = vmul.f32 1.442695, %v6410_v41 }
0x3724   :  { %v6575_v49 = vmul.f32 1.442695, %v6574_v62  ;;  %v6140_v62 = vld [vmem:[%s9164_s15] sm:$0xff] }
0x3725   :  { %11099 = vpow2.f32 %v6411_v45  ;;  %v6584_v24 = vpop.permute.xlu1 %6583  ;;  %v6141_v45 = vld [vmem:[%s9164_s15 + $0x8] sm:$0xff] }
0x3726   :  { %11101 = vpow2.f32 %v6575_v49  ;;  %v6146_v49 = vld [vmem:[%s9165_s14 + $0x10] sm:$0xff] }
0x372f   :  { %v11100_v53 = vpop.eup %11099 }
0x3730   :  { %v6413_v1 = vsel %vm6406_vm10, %v11100_v53, 0.0  ;;  %v11102_v61 = vpop.eup %11101 }
0x3731   :  { %6414 = vadd.xlane.f32.xlu0 %v6413_v1  ;;  %v6577_v27 = vsel %vm6406_vm10, %v11102_v61, 0.0  ;;  %v6147_v1 = vld [vmem:[%s9165_s14 + $0x18] sm:$0xff]  ;;  %s9169_s14 = sld [smem:[%s12556_s0 + %s11190_s25]]  }
0x3732   :  { %s9153_s25 = sld [smem:[%s12556_s0 + %s11196_s16]]  }
0x3735   :  { %6578 = vadd.xlane.f32.xlu0 %v6577_v27  ;;  %v6142_v27 = vld [vmem:[%s9164_s15 + $0x10] sm:$0xff]  ;;  %s12269_s15 = sld [smem:[%s12556_s0 + %s11191_s17]]  }
0x3736   :  { %v12172_v5 = vpack.c.bf16 %v6143_v56, %v6142_v27  ;;  %s9154_s17 = sld [smem:[%s12556_s0 + %s11197_s26]]  }
0x37be   :  { %v6415_v59 = vpop.xlane.xlu0 %6414 }
0x37bf   :  { %11103 = vrcp.f32 %v6415_v59  ;;  %v6176_v59 = vld [vmem:[%s12162_s30] sm:$0xf] }
0x37c2   :  { %v6579_v60 = vpop.xlane.xlu0 %6578 }
0x37c3   :  { %11105 = vrcp.f32 %v6579_v60 }
0x37c9   :  { %v11104_v51 = vpop.eup %11103 }
0x37ca   :  { %v6417_v17 = vmul.f32 %v11104_v51, %v11100_v53  ;;  %v12165_v53 = vpack.c.bf16 %v6141_v45, %v6140_v62 }
0x37cc   :  { %10277 = vmatmul.mubr.msk.f32.vlgmr.msra.gmra.mrb[74].mxu1 %vm6406_vm10, %v6417_v17 }
0x37cd   :  { %v11106_v15 = vpop.eup %11105  ;;  %10285 = vmatpush3.msra.mxu1 %v6584_v24  ;;  %10286 = vmatprep.mubr.msk.f32.mxu1 %vm11160_vm1, %v11157_v0 }
0x37ce   :  { %v6581_v16 = vmul.f32 %v11106_v15, %v11102_v61  ;;  %10843 = vmatprep.subr.bf16.mxu1 %v11165_v58  ;;  %v12167_v61 = vpack.c.bf16 %v6147_v1, %v6146_v49  ;;  %v12189_v15 = vld [vmem:[%s9163_s11] ss:$0 sm:$0xff] }
0x37d0   :  { %10287 = vmatmul.mubr.msk.f32.vlgmr.msra.gmra.mrb[76].mxu1 %vm6406_vm10, %v6581_v16 }
0x37d1   :  { %10845 = vmatpush3.bf16.msra.mxu1 %v12120_v21  ;;  %10308 = vmatprep.mubr.msk.f32.mxu1 %vm11160_vm1, %v11157_v0 }
0x37d2   :  { %10846 = vmatprep.subr.bf16.mxu1 %v11165_v58 }
0x37d5   :  { %10848 = vmatpush3.bf16.msra.mxu1 %v12127_v43 }
0x37d6   :  { %10855 = vmatprep.subr.bf16.mxu1 %v11165_v58 }
0x389f   :  { %v6487_v42 = vpop.f32.mrb[74].mxu1 }
0x38a0   :  { %v10278_v48 = vpop.f32.mrb[75].mxu1  ;;  %10309 = vmatmul.mubr.msk.f32.vlgmr.msra.gmra.mrb[78].mxu1 %vm234_vm0, %v6487_v42 }
0x38a1   :  { %10330 = vmatprep.mubr.msk.f32.mxu1 %vm11160_vm1, %v11157_v0  ;;  %10857 = vmatpush3.bf16.msra.mxu1 %v12156_v44 }
0x38a2   :  { %10858 = vmatprep.subr.bf16.mxu1 %v11165_v58 }
0x38a3   :  { %v6655_v34 = vpop.f32.mrb[76].mxu1 }
0x38a4   :  { %v10288_v38 = vpop.f32.mrb[77].mxu1  ;;  %10298 = vmatmul.mubr.msk.f32.vlgmr.msra.gmra.mrb[68].mxu0 %vm234_vm0, %v6655_v34 }
0x38a5   :  { %10319 = vmatprep.mubr.msk.f32.mxu0 %vm11160_vm1, %v11157_v0  ;;  %10851 = vmatpush3.bf16.msra.mxu0 %v12165_v53 }
0x38a6   :  { %10860 = vmatpush3.bf16.msra.mxu1 %v12167_v61  ;;  %10852 = vmatprep.subr.bf16.mxu0 %v11165_v58 }
0x38a7   :  { %10338 = vmatprep.subr.mxu1 %v11157_v0 }
0x38a9   :  { %10331 = vmatmul.mubr.msk.f32.vlgmr.msra.gmra.mrb[80].mxu1 %vm234_vm0, %v6176_v59  ;;  %10854 = vmatpush3.bf16.msra.mxu0 %v12172_v5  ;;  %v6152_v59 = vld [vmem:[%s9166_s21 + $0x20] sm:$0xff] }
0x38aa   :  { %10333 = vmatprep.subr.mxu0 %v11157_v0  ;;  %10340 = vmatprep.mubr.msk.f32.mxu1 %vm11160_vm1, %v11157_v0 }
0x3973   :  { %v6801_v3 = vpop.f32.mrb[78].mxu1 }
0x3974   :  { %v10310_v2 = vpop.f32.mrb[79].mxu1 }
0x3977   :  { %v6728_v35 = vpop.f32.mrb[68].mxu0 }
0x3978   :  { %v6802_v20 = vadd.f32 %v6801_v3, %v6728_v35  ;;  %v10299_v13 = vpop.f32.mrb[69].mxu0 }
0x397a   :  { %v6805_v28 = vadd.f32 %v6802_v20, %v6178_v33 }
0x397c   :  { %v6806_v47 = vsel %vm234_vm0, %v6805_v28, 0.0  ;;  %v6975_v25 = vpop.f32.mrb[80].mxu1 }
0x397d   :  { %6807 = vadd.xlane.f32.xlu0 %v6806_v47  ;;  %v10332_v46 = vpop.f32.mrb[81].mxu1 }
0x397e   :  { %v6148_v46 = vld [vmem:[%s9166_s21] sm:$0xff] }
0x3a0a   :  { %v6808_v26 = vpop.xlane.xlu0 %6807 }
0x3a0b   :  { %v6809_v30 = vmul.f32 0.03125, %v6808_v26 }
0x3a0d   :  { %v6810_v31 = vsub.f32 %v6805_v28, %v6809_v30 }
0x3a0f   :  { %v6811_v39 = vmul.f32 %v6810_v31, %v6810_v31 }
0x3a11   :  { %v6812_v41 = vsel %vm234_vm0, %v6811_v39, 0.0 }
0x3a12   :  { %6813 = vadd.xlane.f32.xlu0 %v6812_v41 }
0x3a28   :  { %7146 = vrot.lane.b32.xlu0 %v6975_v25, %s11164_s24 }
0x3a9f   :  { %v6814_v60 = vpop.xlane.xlu0 %6813 }
0x3aa0   :  { %v6815_v51 = vmul.f32 0.03125, %v6814_v60  ;;  %v6153_v60 = vld [vmem:[%s9166_s21 + $0x28] sm:$0xff] }
0x3aa2   :  { %v6816_v17 = vadd.f32 1e-06, %v6815_v51  ;;  %v6154_v51 = vld [vmem:[%s9166_s21 + $0x30] sm:$0xff] }
0x3aa3   :  { %v7147_v40 = vpop.permute.xlu0 %7146 }
0x3aa4   :  { %11107 = vrsqrt.f32 %v6816_v17  ;;  %v12225_v17 = vpack.c.bf16 %v6153_v60, %v6152_v59  ;;  %v6161_v59 = vld [vmem:[%s9169_s14 + $0x18] sm:$0xff] }
0x3aae   :  { %v11108_v57 = vpop.eup %11107 }
0x3aaf   :  { %v6818_v24 = vmul.f32 %v11108_v57, %v6810_v31  ;;  %v6155_v57 = vld [vmem:[%s9166_s21 + $0x38] sm:$0xff] }
0x3ab1   :  { %v6825_v16 = vmul.f32 %v12187_v19, %v6818_v24  ;;  %v12228_v24 = vpack.c.bf16 %v6155_v57, %v6154_v51  ;;  %v6163_v51 = vld [vmem:[%s12269_s15] sm:$0xff]  ;;  %v6164_v57 = vld [vmem:[%s12269_s15 + $0x8] sm:$0xff] }
0x3ab3   :  { %v12193_v37 = vadd.f32 %v12189_v15, %v6825_v16 }
0x3ab5   :  { %10320 = vmatmul.mubr.msk.f32.vlgmr.msra.gmra.mrb[70].mxu0 %vm234_vm0, %v12193_v37 }
0x3ab6   :  { %10335 = vmatprep.mubr.msk.f32.mxu0 %vm11160_vm1, %v11157_v0  ;;  %10334 = vmatpush3.xpose.msk.msra.mxu0 %vm234_vm0, %v6975_v25 }
0x3ab7   :  { %10343 = vmatprep.subr.mxu0 %v11157_v0 }
0x3b88   :  { %v6902_v42 = vpop.f32.mrb[70].mxu0 }
0x3b89   :  { %7144 = vrot.lane.b32.xlu1 %v6902_v42, %s11164_s24  ;;  %v10321_v48 = vpop.f32.mrb[71].mxu0  ;;  %10336 = vmatmul.mubr.msk.f32.vlgmr.msra.gmra.mrb[72].mxu0 %vm234_vm0, %v6902_v42 }
0x3b8a   :  { %10344 = vmatpush3.xpose.msk.msra.mxu0 %vm234_vm0, %v7147_v40  ;;  %10345 = vmatprep.mubr.msk.f32.mxu0 %vm11160_vm1, %v11157_v0  ;;  %v6149_v40 = vld [vmem:[%s9166_s21 + $0x8] sm:$0xff] }
0x3b8b   :  { %10861 = vmatprep.subr.bf16.mxu0 %v11165_v58  ;;  %v12235_v48 = vpack.c.bf16 %v6149_v40, %v6148_v46  ;;  %v6166_v46 = vld [vmem:[%s12269_s15 + $0x18] sm:$0xff]  ;;  %v6167_v40 = vld [vmem:[%s12269_s15 + $0x20] sm:$0xff] }
0x3bfb   :  { %v7145_v34 = vpop.permute.xlu1 %7144 }
0x3bfc   :  { %10346 = vmatmul.mubr.msk.f32.vlgmr.msra.gmra.mrb[74].mxu0 %vm234_vm0, %v7145_v34 }
0x3bfd   :  { %10361 = vmatprep.mubr.msk.f32.mxu0 %vm11160_vm1, %v11157_v0  ;;  %10863 = vmatpush3.bf16.msra.mxu0 %v12225_v17 }
0x3bfe   :  { %10864 = vmatprep.subr.bf16.mxu0 %v11165_v58 }
0x3c01   :  { %10866 = vmatpush3.bf16.msra.mxu0 %v12228_v24 }
0x3c02   :  { %10873 = vmatprep.subr.bf16.mxu0 %v11165_v58 }
0x3c5c   :  { %v7051_v38 = vpop.f32.mrb[72].mxu0 }
0x3c5d   :  { %v7055_v3 = vmul.f32 0.17677669, %v7051_v38  ;;  %v10337_v2 = vpop.f32.mrb[73].mxu0  ;;  %v6150_v38 = vld [vmem:[%s9166_s21 + $0x10] sm:$0xff] }
0x3c5f   :  { %v7056_v33 = vsel %vm474_vm4, %v7055_v3, -inf }
0x3c60   :  { %7057 = vmax.xlane.f32.xlu1 %v7056_v33 }
0x3ccf   :  { %v7218_v35 = vpop.f32.mrb[74].mxu0 }
0x3cd0   :  { %v7222_v20 = vmul.f32 0.17677669, %v7218_v35  ;;  %v10347_v13 = vpop.f32.mrb[75].mxu0 }
0x3cd2   :  { %v7223_v28 = vsel %vm474_vm4, %v7222_v20, -inf }
0x3cd3   :  { %7224 = vmax.xlane.f32.xlu0 %v7223_v28 }
0x3ce9   :  { %7067 = vrot.lane.b32.xlu0 %v6975_v25, %s11162_s19 }
0x3ced   :  { %v7058_v47 = vpop.xlane.xlu1 %7057 }
0x3cee   :  { %v7059_v26 = vsub.f32 %v7055_v3, %v7058_v47  ;;  %v6151_v3 = vld [vmem:[%s9166_s21 + $0x18] sm:$0xff] }
0x3cef   :  { %v12239_v2 = vpack.c.bf16 %v6151_v3, %v6150_v38 }
0x3cf0   :  { %v7060_v30 = vmul.f32 1.442695, %v7059_v26 }
0x3cf2   :  { %11109 = vpow2.f32 %v7060_v30 }
0x3cfc   :  { %v11110_v31 = vpop.eup %11109 }
0x3cfd   :  { %v7062_v39 = vsel %vm474_vm4, %v11110_v31, 0.0 }
0x3cfe   :  { %7063 = vadd.xlane.f32.xlu1 %v7062_v39 }
0x3d60   :  { %v7225_v41 = vpop.xlane.xlu0 %7224 }
0x3d61   :  { %v7226_v52 = vsub.f32 %v7222_v20, %v7225_v41 }
0x3d63   :  { %v7227_v22 = vmul.f32 1.442695, %v7226_v52 }
0x3d64   :  { %v7068_v62 = vpop.permute.xlu0 %7067 }
0x3d65   :  { %11111 = vpow2.f32 %v7227_v22  ;;  %10339 = vmatpush3.msk.msra.mxu1 %vm478_vm2, %v7068_v62 }
0x3d66   :  { %10348 = vmatprep.subr.mxu1 %v11157_v0 }
0x3d6f   :  { %v11112_v45 = vpop.eup %11111 }
0x3d70   :  { %v7229_v49 = vsel %vm474_vm4, %v11112_v45, 0.0 }
0x3d71   :  { %7230 = vadd.xlane.f32.xlu1 %v7229_v49 }
0x3d82   :  { %7234 = vrot.lane.b32.xlu1 %v6975_v25, %s11161_s18 }
0x3d8b   :  { %v7064_v1 = vpop.xlane.xlu1 %7063 }
0x3d8c   :  { %11113 = vrcp.f32 %v7064_v1  ;;  %v6158_v1 = vld [vmem:[%s9169_s14] sm:$0xff] }
0x3d96   :  { %v11114_v27 = vpop.eup %11113 }
0x3d97   :  { %v7066_v56 = vmul.f32 %v11114_v27, %v11110_v31  ;;  %v6159_v27 = vld [vmem:[%s9169_s14 + $0x8] sm:$0xff] }
0x3d99   :  { %10341 = vmatmul.mubr.msk.f32.vlgmr.msra.gmra.mrb[82].mxu1 %vm474_vm4, %v7066_v56  ;;  %v12258_v56 = vpack.c.bf16 %v6159_v27, %v6158_v1  ;;  %v9339_v27 = vld [vmem:[%s12096_s12 + $0x8] sm:$0xff] }
0x3d9a   :  { %10350 = vmatprep.mubr.msk.f32.mxu1 %vm11160_vm1, %v11157_v0 }
0x3dfe   :  { %v7231_v16 = vpop.xlane.xlu1 %7230 }
0x3dff   :  { %11115 = vrcp.f32 %v7231_v16  ;;  %v6165_v16 = vld [vmem:[%s12269_s15 + $0x10] sm:$0xff] }
0x3e02   :  { %v7235_v25 = vpop.permute.xlu1 %7234 }
0x3e03   :  { %10349 = vmatpush3.msk.msra.mxu1 %vm478_vm2, %v7235_v25  ;;  %v12274_v25 = vpack.c.bf16 %v6164_v57, %v6163_v51 }
0x3e04   :  { %10867 = vmatprep.subr.bf16.mxu1 %v11165_v58 }
0x3e09   :  { %v11116_v42 = vpop.eup %11115 }
0x3e0a   :  { %v7233_v34 = vmul.f32 %v11116_v42, %v11112_v45  ;;  %v6168_v42 = vld [vmem:[%s12269_s15 + $0x28] sm:$0xff] }
0x3e0c   :  { %10351 = vmatmul.mubr.msk.f32.vlgmr.msra.gmra.mrb[84].mxu1 %vm474_vm4, %v7233_v34  ;;  %v12284_v34 = vpack.c.bf16 %v6168_v42, %v6167_v40 }
0x3e0d   :  { %10869 = vmatpush3.bf16.msra.mxu1 %v12235_v48  ;;  %10372 = vmatprep.mubr.msk.f32.mxu1 %vm11160_vm1, %v11157_v0 }
0x3e0e   :  { %10870 = vmatprep.subr.bf16.mxu1 %v11165_v58 }
0x3e11   :  { %10872 = vmatpush3.bf16.msra.mxu1 %v12239_v2 }
0x3e12   :  { %10879 = vmatprep.subr.bf16.mxu1 %v11165_v58 }
0x3e6c   :  { %v7140_v33 = vpop.f32.mrb[82].mxu1 }
0x3e6d   :  { %v10342_v35 = vpop.f32.mrb[83].mxu1  ;;  %10373 = vmatmul.mubr.msk.f32.vlgmr.msra.gmra.mrb[86].mxu1 %vm234_vm0, %v7140_v33 }
0x3e6e   :  { %10402 = vmatprep.mubr.msk.f32.mxu1 %vm11160_vm1, %v11157_v0  ;;  %10881 = vmatpush3.bf16.msra.mxu1 %v12274_v25 }
0x3e6f   :  { %10882 = vmatprep.subr.bf16.mxu1 %v11165_v58 }
0x3edf   :  { %v7307_v20 = vpop.f32.mrb[84].mxu1 }
0x3ee0   :  { %v10352_v13 = vpop.f32.mrb[85].mxu1  ;;  %10362 = vmatmul.mubr.msk.f32.vlgmr.msra.gmra.mrb[76].mxu0 %vm234_vm0, %v7307_v20  ;;  %v12296_v20 = vld [vmem:[%s9167_s29] ss:$0 sm:$0xff] }
0x3ee1   :  { %10383 = vmatprep.mubr.msk.f32.mxu0 %vm11160_vm1, %v11157_v0  ;;  %10875 = vmatpush3.bf16.msra.mxu0 %v12258_v56 }
0x3ee2   :  { %10876 = vmatprep.subr.bf16.mxu0 %v11165_v58 }
0x3f40   :  { %v7453_v28 = vpop.f32.mrb[86].mxu1 }
0x3f41   :  { %v10374_v47 = vpop.f32.mrb[87].mxu1 }
0x3fb3   :  { %v7380_v26 = vpop.f32.mrb[76].mxu0 }
0x3fb4   :  { %v7454_v30 = vadd.f32 %v7453_v28, %v7380_v26  ;;  %v10363_v31 = vpop.f32.mrb[77].mxu0  ;;  %v12298_v28 = vld [vmem:[%s9168_s5] ss:$0 sm:$0xff] }
0x3fb6   :  { %v7457_v39 = vadd.f32 %v7454_v30, %v12193_v37  ;;  %v6160_v37 = vld [vmem:[%s9169_s14 + $0x10] sm:$0xff]  ;;  %v12311_v30 = vld [vmem:[%s12019_s3 + $0x8] sm:$0xff]  ;;  %s11193_s3 = smov 35  }
0x3fb7   :  { %v12262_v60 = vpack.c.bf16 %v6161_v59, %v6160_v37  ;;  %s9170_s8 = sld [smem:[%s12556_s0 + %s11193_s3]]  }
0x3fb8   :  { %v7458_v41 = vsel %vm234_vm0, %v7457_v39, 0.0 }
0x3fb9   :  { %7459 = vadd.xlane.f32.xlu1 %v7458_v41  ;;  %10878 = vmatpush3.bf16.msra.mxu0 %v12262_v60 }
0x3fba   :  { %10892 = vmatprep.subr.bf16.mxu0 %v12005_v8  ;;  %v12278_v8 = vpack.c.bf16 %v6166_v46, %v6165_v16 }
0x3fbc   :  { %10884 = vmatpush3.bf16.msra.mxu1 %v12278_v8 }
0x3fbd   :  { %10885 = vmatprep.subr.bf16.mxu1 %v11165_v58 }
0x3fc0   :  { %10887 = vmatpush3.bf16.msra.mxu1 %v12284_v34 }
0x3fc1   :  { %10888 = vmatprep.subr.bf16.mxu1 %v11165_v58 }
0x4046   :  { %v7460_v52 = vpop.xlane.xlu1 %7459 }
0x4047   :  { %v7461_v22 = vmul.f32 0.03125, %v7460_v52 }
0x4049   :  { %v7462_v62 = vsub.f32 %v7457_v39, %v7461_v22 }
0x404b   :  { %v7463_v45 = vmul.f32 %v7462_v62, %v7462_v62 }
0x404d   :  { %v7464_v49 = vsel %vm234_vm0, %v7463_v45, 0.0 }
0x404e   :  { %7465 = vadd.xlane.f32.xlu0 %v7464_v49 }
0x40db   :  { %v7466_v38 = vpop.xlane.xlu0 %7465 }
0x40dc   :  { %v7467_v3 = vmul.f32 0.03125, %v7466_v38 }
0x40de   :  { %v7468_v33 = vadd.f32 1e-06, %v7467_v3 }
0x40e0   :  { %11117 = vrsqrt.f32 %v7468_v33 }
0x40ea   :  { %v11118_v35 = vpop.eup %11117 }
0x40eb   :  { %v7470_v13 = vmul.f32 %v11118_v35, %v7462_v62 }
0x40ed   :  { %v7477_v47 = vmul.f32 %v12296_v20, %v7470_v13 }
0x40ef   :  { %v12302_v26 = vadd.f32 %v12298_v28, %v7477_v47 }
0x40f1   :  { %10384 = vmatmul.mubr.msk.f32.vlgmr.msra.gmra.mrb[78].mxu0 %vm234_vm0, %v12302_v26 }
0x40f2   :  { %10894 = vmatpush1.bf16.msra.mxu0 %v12014_v63  ;;  %7749 = vmatprep.mubr.f32.mxu0 %v11157_v0  ;;  %v12321_v63 = vld [vmem:[%s12050_s7 + $0x8] sm:$0xff]  ;;  %s11201_s7 = smov 41  }
0x40f3   :  { %10896 = vmatprep.subr.bf16.mxu0 %v12024_v7  ;;  %v6169_v7 = vld [vmem:[%s12269_s15 + $0x30] sm:$0xff] }
0x40f6   :  { %10898 = vmatpush1.bf16.msra.mxu0 %v12031_v12  ;;  %v6170_v12 = vld [vmem:[%s12269_s15 + $0x38] sm:$0xff] }
0x40f7   :  { %10900 = vmatprep.subr.bf16.mxu0 %v12035_v4  ;;  %v12330_v4 = vpack.c.bf16 %v6170_v12, %v6169_v7 }
0x40f9   :  { %9340 = vmatmul.mubr.msk.f32.vlgmr.msra.gmra.mrb[80].mxu0 %vm234_vm0, %v12311_v30  ;;  %10890 = vmatpush3.bf16.msra.mxu1 %v12330_v4 }
0x40fa   :  { %10902 = vmatpush1.bf16.msra.mxu0 %v12045_v9  ;;  %7823 = vmatprep.mubr.f32.mxu0 %v11157_v0  ;;  %v12337_v9 = vld [vmem:[%s9170_s8] ss:$0 sm:$0xff] }
0x40fb   :  { %10904 = vmatprep.subr.bf16.mxu0 %v12053_v14  ;;  %10405 = vmatprep.subr.mxu1 %v11157_v0 }
0x40fe   :  { %10906 = vmatpush1.bf16.msra.mxu0 %v12060_v10 }
0x40ff   :  { %10415 = vmatprep.subr.mxu0 %v11157_v0 }
0x4101   :  { %9341 = vmatmul.mubr.msk.f32.vlgmr.msra.gmra.mrb[80].mxu0 %vm234_vm0, %v12321_v63 }
0x4102   :  { %10417 = vmatprep.mubr.msk.f32.mxu0 %vm11160_vm1, %v11157_v0 }
0x41c4   :  { %v7560_v14 = vpop.f32.mrb[78].mxu0 }
0x41c5   :  { %v7561_v10 = vadd.f32 %v12337_v9, %v7560_v14  ;;  %v10385_v31 = vpop.f32.mrb[79].mxu0 }
0x41c7   :  { %v7564_v39 = vmax.f32 %v7561_v10, 0.0 }
0x41c9   :  { %10403 = vmatmul.mubr.msk.f32.vlgmr.msra.gmra.mrb[88].mxu1 %vm1637_vm9, %v7564_v39 }
0x41ca   :  { %10407 = vmatprep.mubr.msk.f32.mxu1 %vm11160_vm1, %v11157_v0 }
0x41d4   :  { %v7825_v41 = vpop.f32.mrb[80].mxu0 }
0x41d5   :  { %7995 = vrot.lane.b32.xlu1 %v7825_v41, %s11161_s18  ;;  %7831 = vrot.lane.b32.xlu0 %v7825_v41, %s11162_s19  ;;  %v7827_v52 = vpop.f32.mrb[81].mxu0 }
0x41d9   :  { %7993 = vrot.lane.b32.xlu1 %v7825_v41, %s11164_s24 }
0x4247   :  { %v7996_v22 = vpop.permute.xlu1 %7995  ;;  %v7832_v62 = vpop.permute.xlu0 %7831 }
0x4248   :  { %10406 = vmatpush3.xpose.msk.msra.mxu1 %vm234_vm0, %v7832_v62  ;;  %10416 = vmatpush3.xpose.msk.msra.mxu0 %vm234_vm0, %v7996_v22 }
0x4249   :  { %10410 = vmatprep.subr.mxu1 %v11157_v0  ;;  %10907 = vmatprep.subr.bf16.mxu0 %v11165_v58 }
0x424b   :  { %v7994_v45 = vpop.permute.xlu1 %7993  ;;  %10408 = vmatmul.mubr.msk.f32.vlgmr.msra.gmra.mrb[90].mxu1 %vm234_vm0, %v7825_v41 }
0x424c   :  { %10411 = vmatpush3.msra.mxu1 %v7827_v52  ;;  %10418 = vmatmul.mubr.msk.f32.vlgmr.msra.gmra.mrb[82].mxu0 %vm234_vm0, %v7994_v45 }
0x424d   :  { %10412 = vmatprep.mubr.msk.f32.mxu1 %vm11160_vm1, %v11157_v0  ;;  %10420 = vmatprep.subr.mxu1 %v11157_v0 }
0x424e   :  { %10909 = vmatpush3.bf16.msra.mxu0 %v12111_v11  ;;  %10433 = vmatprep.mubr.msk.f32.mxu0 %vm11160_vm1, %v11157_v0 }
0x424f   :  { %10910 = vmatprep.subr.bf16.mxu0 %v11165_v58 }
0x4252   :  { %10912 = vmatpush3.bf16.msra.mxu0 %v12136_v50 }
0x4253   :  { %10919 = vmatprep.subr.bf16.mxu0 %v11165_v58 }
0x429c   :  { %v12361_v49 = vpop.f32.mrb[88].mxu1 }
0x429d   :  { %v10404_v1 = vpop.f32.mrb[89].mxu1 }
0x431e   :  { %v7903_v37 = vpop.f32.mrb[90].mxu1 }
0x431f   :  { %v7907_v59 = vmul.f32 0.17677669, %v7903_v37  ;;  %v10409_v51 = vpop.f32.mrb[91].mxu1  ;;  %v8067_v57 = vpop.f32.mrb[82].mxu0 }
0x4320   :  { %v8071_v16 = vmul.f32 0.17677669, %v8067_v57  ;;  %v10419_v46 = vpop.f32.mrb[83].mxu0 }
0x4321   :  { %v7908_v11 = vadd.f32 %v9339_v27, %v7907_v59  ;;  %v7681_v59 = vadd.f32 %v12311_v30, %v12321_v63 }
0x4322   :  { %v8072_v40 = vadd.f32 %v9339_v27, %v8071_v16 }
0x4323   :  { %v7909_v42 = vsel %vm6406_vm10, %v7908_v11, -inf }
0x4324   :  { %7910 = vmax.xlane.f32.xlu0 %v7909_v42  ;;  %v8073_v38 = vsel %vm6406_vm10, %v8072_v40, -inf }
0x4325   :  { %8074 = vmax.xlane.f32.xlu1 %v8073_v38  ;;  %v9338_v38 = vld [vmem:[%s12162_s30 + $0x4] sm:$0xf]  ;;  %s11195_s30 = smov 37  }
0x4326   :  { %s9172_s13 = sld [smem:[%s12556_s0 + %s11195_s30]]  }
0x4336   :  { %8085 = vrot.lane.b32.xlu1 %v7827_v52, %s11164_s24 }
0x43b1   :  { %v7911_v50 = vpop.xlane.xlu0 %7910 }
0x43b2   :  { %v7912_v3 = vsub.f32 %v7908_v11, %v7911_v50  ;;  %v8075_v33 = vpop.xlane.xlu1 %8074 }
0x43b3   :  { %v8076_v35 = vsub.f32 %v8072_v40, %v8075_v33 }
0x43b4   :  { %v7913_v13 = vmul.f32 1.442695, %v7912_v3 }
0x43b5   :  { %v8077_v47 = vmul.f32 1.442695, %v8076_v35 }
0x43b6   :  { %11119 = vpow2.f32 %v7913_v13  ;;  %v8086_v22 = vpop.permute.xlu1 %8085 }
0x43b7   :  { %11121 = vpow2.f32 %v8077_v47 }
0x43c0   :  { %v11120_v7 = vpop.eup %11119 }
0x43c1   :  { %v7915_v12 = vsel %vm6406_vm10, %v11120_v7, 0.0  ;;  %v11122_v14 = vpop.eup %11121 }
0x43c2   :  { %7916 = vadd.xlane.f32.xlu0 %v7915_v12  ;;  %v8079_v10 = vsel %vm6406_vm10, %v11122_v14, 0.0 }
0x43c6   :  { %8080 = vadd.xlane.f32.xlu0 %v8079_v10 }
0x444f   :  { %v7917_v31 = vpop.xlane.xlu0 %7916 }
0x4450   :  { %11123 = vrcp.f32 %v7917_v31 }
0x4453   :  { %v8081_v39 = vpop.xlane.xlu0 %8080 }
0x4454   :  { %11125 = vrcp.f32 %v8081_v39 }
0x445a   :  { %v11124_v41 = vpop.eup %11123 }
0x445b   :  { %v7919_v52 = vmul.f32 %v11124_v41, %v11120_v7 }
0x445d   :  { %10413 = vmatmul.mubr.msk.f32.vlgmr.msra.gmra.mrb[92].mxu1 %vm6406_vm10, %v7919_v52 }
0x445e   :  { %v11126_v62 = vpop.eup %11125  ;;  %10421 = vmatpush3.msra.mxu1 %v8086_v22  ;;  %10422 = vmatprep.mubr.msk.f32.mxu1 %vm11160_vm1, %v11157_v0 }
0x445f   :  { %v8083_v45 = vmul.f32 %v11126_v62, %v11122_v14  ;;  %10913 = vmatprep.subr.bf16.mxu1 %v11165_v58 }
0x4461   :  { %10423 = vmatmul.mubr.msk.f32.vlgmr.msra.gmra.mrb[94].mxu1 %vm6406_vm10, %v8083_v45 }
0x4462   :  { %10915 = vmatpush3.bf16.msra.mxu1 %v12120_v21  ;;  %10444 = vmatprep.mubr.msk.f32.mxu1 %vm11160_vm1, %v11157_v0 }
0x4463   :  { %10916 = vmatprep.subr.bf16.mxu1 %v11165_v58 }
0x4466   :  { %10918 = vmatpush3.bf16.msra.mxu1 %v12127_v43 }
0x4467   :  { %10925 = vmatprep.subr.bf16.mxu1 %v11165_v58 }
0x4530   :  { %v7989_v1 = vpop.f32.mrb[92].mxu1 }
0x4531   :  { %v10414_v27 = vpop.f32.mrb[93].mxu1  ;;  %10445 = vmatmul.mubr.msk.f32.vlgmr.msra.gmra.mrb[96].mxu1 %vm234_vm0, %v7989_v1 }
0x4532   :  { %10927 = vmatpush3.bf16.msra.mxu1 %v12156_v44  ;;  %10466 = vmatprep.mubr.msk.f32.mxu1 %vm11160_vm1, %v11157_v0 }
0x4533   :  { %10928 = vmatprep.subr.bf16.mxu1 %v11165_v58 }
0x4534   :  { %v8157_v21 = vpop.f32.mrb[94].mxu1 }
0x4535   :  { %v10424_v37 = vpop.f32.mrb[95].mxu1  ;;  %10434 = vmatmul.mubr.msk.f32.vlgmr.msra.gmra.mrb[84].mxu0 %vm234_vm0, %v8157_v21 }
0x4536   :  { %10921 = vmatpush3.bf16.msra.mxu0 %v12165_v53  ;;  %10930 = vmatpush3.bf16.msra.mxu1 %v12167_v61 }
0x4537   :  { %10922 = vmatprep.subr.bf16.mxu0 %v11165_v58  ;;  %10455 = vmatprep.mubr.msk.f32.mxu0 %vm11160_vm1, %v11157_v0 }
0x4538   :  { %10474 = vmatprep.subr.mxu1 %v11157_v0 }
0x4539   :  { %10467 = vmatmul.mubr.msk.f32.vlgmr.msra.gmra.mrb[98].mxu1 %vm234_vm0, %v9338_v38 }
0x453a   :  { %10924 = vmatpush3.bf16.msra.mxu0 %v12172_v5  ;;  %10476 = vmatprep.mubr.msk.f32.mxu1 %vm11160_vm1, %v11157_v0 }
0x453b   :  { %10469 = vmatprep.subr.mxu0 %v11157_v0 }
0x4604   :  { %v8303_v43 = vpop.f32.mrb[96].mxu1 }
0x4605   :  { %v10446_v44 = vpop.f32.mrb[97].mxu1 }
0x4608   :  { %v8230_v53 = vpop.f32.mrb[84].mxu0 }
0x4609   :  { %v8304_v51 = vadd.f32 %v8303_v43, %v8230_v53  ;;  %v10435_v61 = vpop.f32.mrb[85].mxu0 }
0x460b   :  { %v8307_v57 = vadd.f32 %v8304_v51, %v7681_v59 }
0x460c   :  { %v8465_v47 = vpop.f32.mrb[98].mxu1 }
0x460d   :  { %v8308_v16 = vsel %vm234_vm0, %v8307_v57, 0.0  ;;  %v10468_v7 = vpop.f32.mrb[99].mxu1 }
0x460e   :  { %8309 = vadd.xlane.f32.xlu0 %v8308_v16 }
0x469b   :  { %v8310_v46 = vpop.xlane.xlu0 %8309 }
0x469c   :  { %v8311_v11 = vmul.f32 0.03125, %v8310_v46 }
0x469e   :  { %v8312_v40 = vsub.f32 %v8307_v57, %v8311_v11 }
0x46a0   :  { %v8313_v42 = vmul.f32 %v8312_v40, %v8312_v40 }
0x46a2   :  { %v8314_v5 = vsel %vm234_vm0, %v8313_v42, 0.0 }
0x46a3   :  { %8315 = vadd.xlane.f32.xlu0 %v8314_v5 }
0x46b9   :  { %8636 = vrot.lane.b32.xlu0 %v8465_v47, %s11164_s24 }
0x4730   :  { %v8316_v30 = vpop.xlane.xlu0 %8315 }
0x4731   :  { %v8317_v63 = vmul.f32 0.03125, %v8316_v30 }
0x4733   :  { %v8318_v50 = vadd.f32 1e-06, %v8317_v63 }
0x4734   :  { %v8637_v12 = vpop.permute.xlu0 %8636 }
0x4735   :  { %11127 = vrsqrt.f32 %v8318_v50 }
0x473f   :  { %v11128_v3 = vpop.eup %11127 }
0x4740   :  { %v8320_v33 = vmul.f32 %v11128_v3, %v8312_v40 }
0x4742   :  { %v8321_v35 = vmul.f32 %v12187_v19, %v8320_v33 }
0x4744   :  { %v12404_v13 = vadd.f32 %v12189_v15, %v8321_v35 }
0x4746   :  { %10456 = vmatmul.mubr.msk.f32.vlgmr.msra.gmra.mrb[86].mxu0 %vm234_vm0, %v12404_v13 }
0x4747   :  { %10471 = vmatprep.mubr.msk.f32.mxu0 %vm11160_vm1, %v11157_v0  ;;  %10470 = vmatpush3.xpose.msk.msra.mxu0 %vm234_vm0, %v8465_v47 }
0x4748   :  { %10479 = vmatprep.subr.mxu0 %v11157_v0 }
0x4819   :  { %v8392_v14 = vpop.f32.mrb[86].mxu0 }
0x481a   :  { %8634 = vrot.lane.b32.xlu1 %v8392_v14, %s11164_s24  ;;  %v10457_v19 = vpop.f32.mrb[87].mxu0  ;;  %10472 = vmatmul.mubr.msk.f32.vlgmr.msra.gmra.mrb[88].mxu0 %vm234_vm0, %v8392_v14  ;;  %v12486_v14 = vld [vmem:[%s9172_s13] ss:$0 sm:$0xff] }
0x481b   :  { %10480 = vmatpush3.xpose.msk.msra.mxu0 %vm234_vm0, %v8637_v12  ;;  %10481 = vmatprep.mubr.msk.f32.mxu0 %vm11160_vm1, %v11157_v0 }
0x481c   :  { %10931 = vmatprep.subr.bf16.mxu0 %v11165_v58 }
0x488c   :  { %v8635_v15 = vpop.permute.xlu1 %8634 }
0x488d   :  { %10482 = vmatmul.mubr.msk.f32.vlgmr.msra.gmra.mrb[90].mxu0 %vm234_vm0, %v8635_v15  ;;  %v7641_v15 = vadd.f32 %v12486_v14, %v12361_v49 }
0x488e   :  { %10933 = vmatpush3.bf16.msra.mxu0 %v12225_v17  ;;  %10497 = vmatprep.mubr.msk.f32.mxu0 %vm11160_vm1, %v11157_v0 }
0x488f   :  { %10934 = vmatprep.subr.bf16.mxu0 %v11165_v58 }
0x4892   :  { %10936 = vmatpush3.bf16.msra.mxu0 %v12228_v24 }
0x4893   :  { %10943 = vmatprep.subr.bf16.mxu0 %v11165_v58 }
0x48ed   :  { %v8541_v10 = vpop.f32.mrb[88].mxu0 }
0x48ee   :  { %v8545_v31 = vmul.f32 0.17677669, %v8541_v10  ;;  %v10473_v39 = vpop.f32.mrb[89].mxu0 }
0x48f0   :  { %v8546_v41 = vsel %vm474_vm4, %v8545_v31, -inf }
0x48f1   :  { %8547 = vmax.xlane.f32.xlu1 %v8546_v41 }
0x4960   :  { %v8708_v52 = vpop.f32.mrb[90].mxu0 }
0x4961   :  { %v8712_v22 = vmul.f32 0.17677669, %v8708_v52  ;;  %v10483_v62 = vpop.f32.mrb[91].mxu0 }
0x4963   :  { %v8713_v17 = vsel %vm474_vm4, %v8712_v22, -inf }
0x4964   :  { %8714 = vmax.xlane.f32.xlu0 %v8713_v17 }
0x497a   :  { %8557 = vrot.lane.b32.xlu0 %v8465_v47, %s11162_s19  ;;  %s12530_s19 = sld [smem:[%s12556_s0 + %s11201_s7]]  }
0x497e   :  { %v8548_v45 = vpop.xlane.xlu1 %8547 }
0x497f   :  { %v8549_v1 = vsub.f32 %v8545_v31, %v8548_v45 }
0x4981   :  { %v8550_v27 = vmul.f32 1.442695, %v8549_v1 }
0x4983   :  { %11129 = vpow2.f32 %v8550_v27 }
0x498d   :  { %v11130_v24 = vpop.eup %11129 }
0x498e   :  { %v8552_v21 = vsel %vm474_vm4, %v11130_v24, 0.0 }
0x498f   :  { %8553 = vadd.xlane.f32.xlu1 %v8552_v21 }
0x49f1   :  { %v8715_v37 = vpop.xlane.xlu0 %8714 }
0x49f2   :  { %v8716_v43 = vsub.f32 %v8712_v22, %v8715_v37 }
0x49f4   :  { %v8717_v44 = vmul.f32 1.442695, %v8716_v43 }
0x49f5   :  { %v8558_v59 = vpop.permute.xlu0 %8557 }
0x49f6   :  { %11131 = vpow2.f32 %v8717_v44  ;;  %10475 = vmatpush3.msk.msra.mxu1 %vm478_vm2, %v8558_v59 }
0x49f7   :  { %10484 = vmatprep.subr.mxu1 %v11157_v0 }
0x4a00   :  { %v11132_v53 = vpop.eup %11131 }
0x4a01   :  { %v8719_v51 = vsel %vm474_vm4, %v11132_v53, 0.0 }
0x4a02   :  { %8720 = vadd.xlane.f32.xlu1 %v8719_v51 }
0x4a13   :  { %8724 = vrot.lane.b32.xlu1 %v8465_v47, %s11161_s18  ;;  %s11194_s18 = smov 17  }
0x4a14   :  { %s9152_s12 = sld [smem:[%s12556_s0 + %s11194_s18]]  }
0x4a1c   :  { %v8554_v61 = vpop.xlane.xlu1 %8553 }
0x4a1d   :  { %11133 = vrcp.f32 %v8554_v61 }
0x4a27   :  { %v11134_v57 = vpop.eup %11133 }
0x4a28   :  { %v8556_v16 = vmul.f32 %v11134_v57, %v11130_v24 }
0x4a2a   :  { %10477 = vmatmul.mubr.msk.f32.vlgmr.msra.gmra.mrb[100].mxu1 %vm474_vm4, %v8556_v16 }
0x4a2b   :  { %10486 = vmatprep.mubr.msk.f32.mxu1 %vm11160_vm1, %v11157_v0 }
0x4a8f   :  { %v8721_v46 = vpop.xlane.xlu1 %8720 }
0x4a90   :  { %11135 = vrcp.f32 %v8721_v46 }
0x4a93   :  { %v8725_v11 = vpop.permute.xlu1 %8724 }
0x4a94   :  { %10485 = vmatpush3.msk.msra.mxu1 %vm478_vm2, %v8725_v11 }
0x4a95   :  { %10937 = vmatprep.subr.bf16.mxu1 %v11165_v58 }
0x4a9a   :  { %v11136_v40 = vpop.eup %11135 }
0x4a9b   :  { %v8723_v42 = vmul.f32 %v11136_v40, %v11132_v53 }
0x4a9d   :  { %10487 = vmatmul.mubr.msk.f32.vlgmr.msra.gmra.mrb[102].mxu1 %vm474_vm4, %v8723_v42 }
0x4a9e   :  { %10939 = vmatpush3.bf16.msra.mxu1 %v12235_v48  ;;  %10508 = vmatprep.mubr.msk.f32.mxu1 %vm11160_vm1, %v11157_v0 }
0x4a9f   :  { %10940 = vmatprep.subr.bf16.mxu1 %v11165_v58 }
0x4aa2   :  { %10942 = vmatpush3.bf16.msra.mxu1 %v12239_v2 }
0x4aa3   :  { %10949 = vmatprep.subr.bf16.mxu1 %v11165_v58 }
0x4afd   :  { %v8630_v5 = vpop.f32.mrb[100].mxu1 }
0x4afe   :  { %v10478_v38 = vpop.f32.mrb[101].mxu1  ;;  %10509 = vmatmul.mubr.msk.f32.vlgmr.msra.gmra.mrb[104].mxu1 %vm234_vm0, %v8630_v5 }
0x4aff   :  { %10951 = vmatpush3.bf16.msra.mxu1 %v12274_v25  ;;  %10538 = vmatprep.mubr.msk.f32.mxu1 %vm11160_vm1, %v11157_v0 }
0x4b00   :  { %10952 = vmatprep.subr.bf16.mxu1 %v11165_v58 }
0x4b03   :  { %10954 = vmatpush3.bf16.msra.mxu1 %v12278_v8 }
0x4b04   :  { %10955 = vmatprep.subr.bf16.mxu1 %v11165_v58 }
0x4b07   :  { %10957 = vmatpush3.bf16.msra.mxu1 %v12284_v34  ;;  %v9207_v34 = vld [vmem:[%s9152_s12] ss:$0 sm:$0xff] }
0x4b08   :  { %10958 = vmatprep.subr.bf16.mxu1 %v11165_v58  ;;  %v3177_v30 = vadd.f32 %v9207_v34, %v11732_v54  ;;  %v1708_v35 = vadd.f32 %v9207_v34, %v11574_v23  ;;  %v4635_v7 = vadd.f32 %v9207_v34, %v11896_v32  ;;  %v7644_v23 = vadd.f32 %v7641_v15, %v12302_v26 }
0x4b0a   :  { %v1711_v47 = vadd.f32 %v1708_v35, %v11511_v55  ;;  %v4638_v19 = vadd.f32 %v4635_v7, %v11847_v29  ;;  %v7645_v55 = vsel %vm234_vm0, %v7644_v23, 0.0 }
0x4b0b   :  { %10960 = vmatpush3.bf16.msra.mxu1 %v12330_v4 }
0x4b0c   :  { %v1712_v10 = vsel %vm867_vm5, %v1711_v47, 0.0  ;;  %v4639_v31 = vsel %vm867_vm5, %v4638_v19, 0.0 }
0x4b70   :  { %v8797_v48 = vpop.f32.mrb[102].mxu1 }
0x4b71   :  { %v10488_v2 = vpop.f32.mrb[103].mxu1  ;;  %10498 = vmatmul.mubr.msk.f32.vlgmr.msra.gmra.mrb[92].mxu0 %vm234_vm0, %v8797_v48  ;;  %v12512_v48 = vld [vmem:[%s9153_s25] ss:$0 sm:$0xff] }
0x4b72   :  { %10945 = vmatpush3.bf16.msra.mxu0 %v12258_v56  ;;  %10519 = vmatprep.mubr.msk.f32.mxu0 %vm11160_vm1, %v11157_v0  ;;  %v12468_v0 = vadd.f32 %v3177_v30, %v11683_v6 }
0x4b73   :  { %10946 = vmatprep.subr.bf16.mxu0 %v11165_v58  ;;  %v6093_v58 = vadd.f32 %v9207_v34, %v12091_v36 }
0x4b74   :  { %v3181_v33 = vsel %vm867_vm5, %v12468_v0, 0.0 }
0x4b75   :  { %v12473_v3 = vadd.f32 %v6093_v58, %v12022_v18 }
0x4b76   :  { %10948 = vmatpush3.bf16.msra.mxu0 %v12262_v60 }
0x4b77   :  { %v6097_v54 = vsel %vm867_vm5, %v12473_v3, 0.0 }
0x4bd1   :  { %v8943_v25 = vpop.f32.mrb[104].mxu1 }
0x4bd2   :  { %v10510_v8 = vpop.f32.mrb[105].mxu1 }
0x4c44   :  { %v8870_v4 = vpop.f32.mrb[92].mxu0 }
0x4c45   :  { %v8944_v63 = vadd.f32 %v8943_v25, %v8870_v4  ;;  %v10499_v56 = vpop.f32.mrb[93].mxu0  ;;  %v12517_v25 = vld [vmem:[%s9154_s17] ss:$0 sm:$0xff] }
0x4c47   :  { %v8947_v50 = vadd.f32 %v8944_v63, %v12404_v13 }
0x4c49   :  { %v8948_v60 = vsel %vm234_vm0, %v8947_v50, 0.0 }
0x4c4a   :  { %8949 = vadd.xlane.f32.xlu1 %v8948_v60 }
0x4c4e   :  { %3182 = vadd.xlane.f32.xlu1 %v3181_v33  ;;  %v9335_v33 = vld [vmem:[%s9174_s6] ss:$0 sm:$0xff] }
0x4c52   :  { %6098 = vadd.xlane.f32.xlu1 %v6097_v54 }
0x4cd7   :  { %v8950_v6 = vpop.xlane.xlu1 %8949 }
0x4cd8   :  { %v8951_v36 = vmul.f32 0.03125, %v8950_v6 }
0x4cda   :  { %v8952_v13 = vsub.f32 %v8947_v50, %v8951_v36  ;;  %v9334_v50 = vld [vmem:[%s9173_s2] ss:$0 sm:$0xff] }
0x4cdc   :  { %v8953_v18 = vmul.f32 %v8952_v13, %v8952_v13 }
0x4cde   :  { %v8954_v12 = vsel %vm234_vm0, %v8953_v18, 0.0 }
0x4cdf   :  { %8955 = vadd.xlane.f32.xlu0 %v8954_v12 }
0x4ce3   :  { %1713 = vadd.xlane.f32.xlu0 %v1712_v10 }
0x4ce7   :  { %4640 = vadd.xlane.f32.xlu0 %v4639_v31 }
0x4ceb   :  { %7646 = vadd.xlane.f32.xlu0 %v7645_v55 }
0x4d6c   :  { %v8956_v32 = vpop.xlane.xlu0 %8955 }
0x4d6d   :  { %v8957_v39 = vmul.f32 0.03125, %v8956_v32 }
0x4d6f   :  { %v8958_v41 = vadd.f32 1e-06, %v8957_v39 }
0x4d70   :  { %v1714_v52 = vpop.xlane.xlu0 %1713 }
0x4d71   :  { %11137 = vrsqrt.f32 %v8958_v41  ;;  %v1715_v29 = vmul.f32 0.03125, %v1714_v52 }
0x4d73   :  { %v1716_v22 = vsub.f32 %v1711_v47, %v1715_v29  ;;  %v3183_v47 = vpop.xlane.xlu1 %3182 }
0x4d74   :  { %v4641_v62 = vpop.xlane.xlu0 %4640  ;;  %v3184_v7 = vmul.f32 0.03125, %v3183_v47 }
0x4d75   :  { %v4642_v49 = vmul.f32 0.03125, %v4641_v62  ;;  %v1717_v17 = vmul.f32 %v1716_v22, %v1716_v22 }
0x4d76   :  { %v3185_v15 = vsub.f32 %v12468_v0, %v3184_v7 }
0x4d77   :  { %v4643_v45 = vsub.f32 %v4638_v19, %v4642_v49  ;;  %v1718_v1 = vsel %vm867_vm5, %v1717_v17, 0.0  ;;  %v6099_v12 = vpop.xlane.xlu1 %6098 }
0x4d78   :  { %1719 = vadd.xlane.f32.xlu0 %v1718_v1  ;;  %v7647_v26 = vpop.xlane.xlu0 %7646  ;;  %v6100_v10 = vmul.f32 0.03125, %v6099_v12 }
0x4d79   :  { %v7648_v27 = vmul.f32 0.03125, %v7647_v26  ;;  %v4644_v24 = vmul.f32 %v4643_v45, %v4643_v45 }
0x4d7a   :  { %v6101_v32 = vsub.f32 %v12473_v3, %v6100_v10 }
0x4d7b   :  { %v11138_v21 = vpop.eup %11137  ;;  %v7649_v37 = vsub.f32 %v7644_v23, %v7648_v27  ;;  %v4645_v43 = vsel %vm867_vm5, %v4644_v24, 0.0 }
0x4d7c   :  { %v8960_v44 = vmul.f32 %v11138_v21, %v8952_v13  ;;  %4646 = vadd.xlane.f32.xlu0 %v4645_v43  ;;  %v6102_v52 = vmul.f32 %v6101_v32, %v6101_v32 }
0x4d7d   :  { %v7650_v59 = vmul.f32 %v7649_v37, %v7649_v37 }
0x4d7e   :  { %v8961_v53 = vmul.f32 %v12296_v20, %v8960_v44  ;;  %v6103_v29 = vsel %vm867_vm5, %v6102_v52, 0.0 }
0x4d7f   :  { %v7651_v51 = vsel %vm234_vm0, %v7650_v59, 0.0 }
0x4d80   :  { %7652 = vadd.xlane.f32.xlu0 %v7651_v51  ;;  %v8962_v61 = vadd.f32 %v12298_v28, %v8961_v53 }
0x4d82   :  { %10520 = vmatmul.mubr.msk.f32.vlgmr.msra.gmra.mrb[94].mxu0 %vm234_vm0, %v8962_v61 }
0x4e05   :  { %v1720_v57 = vpop.xlane.xlu0 %1719 }
0x4e06   :  { %v1721_v16 = vmul.f32 0.03125, %v1720_v57 }
0x4e08   :  { %v1722_v46 = vadd.f32 1e-06, %v1721_v16 }
0x4e09   :  { %v4647_v11 = vpop.xlane.xlu0 %4646 }
0x4e0a   :  { %11139 = vrsqrt.f32 %v1722_v46  ;;  %v4648_v40 = vmul.f32 0.03125, %v4647_v11 }
0x4e0c   :  { %v4649_v42 = vadd.f32 1e-06, %v4648_v40 }
0x4e0d   :  { %v7653_v20 = vpop.xlane.xlu0 %7652 }
0x4e0e   :  { %11141 = vrsqrt.f32 %v4649_v42  ;;  %v7654_v28 = vmul.f32 0.03125, %v7653_v20 }
0x4e10   :  { %v7655_v5 = vadd.f32 1e-06, %v7654_v28 }
0x4e12   :  { %11143 = vrsqrt.f32 %v7655_v5 }
0x4e14   :  { %v11140_v38 = vpop.eup %11139 }
0x4e15   :  { %v1724_v2 = vmul.f32 %v11140_v38, %v1716_v22 }
0x4e17   :  { %v1731_v8 = vmul.f32 %v12512_v48, %v1724_v2 }
0x4e18   :  { %v11142_v34 = vpop.eup %11141 }
0x4e19   :  { %v1738_v4 = vadd.f32 %v12517_v25, %v1731_v8  ;;  %v4651_v30 = vmul.f32 %v11142_v34, %v4643_v45 }
0x4e1b   :  { %1739 = vst.msk [vmem:[%s12510_s22] sm:$0xf] %vm867_vm5, %v1738_v4  ;;  %v4652_v63 = vmul.f32 %v12512_v48, %v4651_v30 }
0x4e1c   :  { %v11144_v56 = vpop.eup %11143 }
0x4e1d   :  { %v4653_v58 = vadd.f32 %v12517_v25, %v4652_v63  ;;  %v7657_v60 = vmul.f32 %v11144_v56, %v7649_v37 }
0x4e1f   :  { %9272 = vst.msk [vmem:[%s12510_s22 + $0x8] sm:$0xf] %vm867_vm5, %v4653_v58  ;;  %v7664_v54 = vmul.f32 %v9334_v50, %v7657_v60 }
0x4e21   :  { %v7671_v6 = vadd.f32 %v9335_v33, %v7664_v54 }
0x4e23   :  { %7672 = vst.msk [vmem:[%s12530_s19] sm:$0xff] %vm234_vm0, %v7671_v6 }
0x4e55   :  { %v9032_v36 = vpop.f32.mrb[94].mxu0 }
0x4e56   :  { %v9033_v35 = vadd.f32 %v12337_v9, %v9032_v36  ;;  %v10521_v13 = vpop.f32.mrb[95].mxu0  ;;  %v3186_v9 = vmul.f32 %v3185_v15, %v3185_v15 }
0x4e58   :  { %v9036_v18 = vmax.f32 %v9033_v35, 0.0  ;;  %v3187_v41 = vsel %vm867_vm5, %v3186_v9, 0.0 }
0x4e5a   :  { %10539 = vmatmul.mubr.msk.f32.vlgmr.msra.gmra.mrb[106].mxu1 %vm1637_vm9, %v9036_v18 }
0x4f2d   :  { %v9106_v19 = vpop.f32.mrb[106].mxu1 }
0x4f2e   :  { %v9107_v23 = vadd.f32 %v12486_v14, %v9106_v19  ;;  %v10540_v31 = vpop.f32.mrb[107].mxu1 }
0x4f30   :  { %v9110_v55 = vadd.f32 %v9107_v23, %v8962_v61 }
0x4f32   :  { %v9111_v39 = vsel %vm234_vm0, %v9110_v55, 0.0 }
0x4f33   :  { %9112 = vadd.xlane.f32.xlu1 %v9111_v39 }
0x4f37   :  { %3188 = vadd.xlane.f32.xlu1 %v3187_v41 }
0x4f3b   :  { %6104 = vadd.xlane.f32.xlu1 %v6103_v29 }
0x4fc0   :  { %v9113_v22 = vpop.xlane.xlu1 %9112 }
0x4fc1   :  { %v9114_v0 = vmul.f32 0.03125, %v9113_v22 }
0x4fc3   :  { %v9115_v62 = vsub.f32 %v9110_v55, %v9114_v0 }
0x4fc4   :  { %v3189_v49 = vpop.xlane.xlu1 %3188 }
0x4fc5   :  { %v3190_v14 = vmul.f32 0.03125, %v3189_v49  ;;  %v9116_v17 = vmul.f32 %v9115_v62, %v9115_v62 }
0x4fc7   :  { %v3191_v45 = vadd.f32 1e-06, %v3190_v14  ;;  %v9117_v3 = vsel %vm234_vm0, %v9116_v17, 0.0 }
0x4fc8   :  { %9118 = vadd.xlane.f32.xlu1 %v9117_v3  ;;  %v6105_v1 = vpop.xlane.xlu1 %6104 }
0x4fc9   :  { %11145 = vrsqrt.f32 %v3191_v45  ;;  %v6106_v26 = vmul.f32 0.03125, %v6105_v1 }
0x4fcb   :  { %v6107_v27 = vadd.f32 1e-06, %v6106_v26 }
0x4fcd   :  { %11147 = vrsqrt.f32 %v6107_v27 }
0x4fd3   :  { %v11146_v24 = vpop.eup %11145 }
0x4fd4   :  { %v3193_v21 = vmul.f32 %v11146_v24, %v3185_v15 }
0x4fd6   :  { %v3194_v37 = vmul.f32 %v12512_v48, %v3193_v21 }
0x4fd7   :  { %v11148_v43 = vpop.eup %11147 }
0x4fd8   :  { %v3195_v44 = vadd.f32 %v12517_v25, %v3194_v37  ;;  %v6109_v59 = vmul.f32 %v11148_v43, %v6101_v32 }
0x4fda   :  { %9241 = vst.msk [vmem:[%s12510_s22 + $0x4] sm:$0xf] %vm867_vm5, %v3195_v44  ;;  %v6110_v53 = vmul.f32 %v12512_v48, %v6109_v59 }
0x4fdc   :  { %v6111_v51 = vadd.f32 %v12517_v25, %v6110_v53 }
0x4fde   :  { %9303 = vst.msk [vmem:[%s12510_s22 + $0xc] sm:$0xf] %vm867_vm5, %v6111_v51 }
0x5055   :  { %v9119_v61 = vpop.xlane.xlu1 %9118 }
0x5056   :  { %v9120_v57 = vmul.f32 0.03125, %v9119_v61 }
0x5058   :  { %v9121_v16 = vadd.f32 1e-06, %v9120_v57 }
0x505a   :  { %11149 = vrsqrt.f32 %v9121_v16 }
0x5064   :  { %v11150_v46 = vpop.eup %11149 }
0x5065   :  { %v9123_v11 = vmul.f32 %v11150_v46, %v9115_v62 }
0x5067   :  { %v9124_v40 = vmul.f32 %v9334_v50, %v9123_v11 }
0x5069   :  { %v9125_v42 = vadd.f32 %v9335_v33, %v9124_v40 }
0x506b   :  { %9364 = vst.msk [vmem:[%s12530_s19 + $0x8] sm:$0xff] %vm234_vm0, %v9125_v42 }

</bundles_post_ra>
